<compile_context>
chip_gen: v6e
topology: v6e:2x2x1
jax: 0.10.0
libtpu: 0.0.40
codegen_flags: <defaults>
</compile_context>

<pallas_src>
import jax
import jax.numpy as jnp
from jax.experimental import pallas as pl
from jax.experimental.pallas import tpu as pltpu


HID = 1200        # logical hidden width of the PyTorch module
HID_PAD = 1280    # padded to a multiple of 128 lanes
OUT_DIM = 4096
TN2 = 640         # layer-2 weight column tile  -> 2 grid steps (~1.6 MB bf16)
TN3 = 640         # layer-3 weight column tile  -> 2 grid steps (~1.6 MB bf16)
TN4 = 2048        # layer-4 weight column tile  -> 2 grid steps (~5.2 MB bf16)
N2_STEPS = HID_PAD // TN2
N3_STEPS = HID_PAD // TN3
N4_STEPS = OUT_DIM // TN4


def _fused_mlp_kernel(x_ref, w1_ref, b1_ref, w2_ref, b2_ref, w3_ref, b3_ref,
                      w4_ref, b4_ref, o_ref, h1_ref, h2_ref, h3_ref):
    """Grid step t (grid = N2+N3+N4 = 6):
         t == 0                      : layer 1 (full)  + layer 2 tile 0
         t <  N2                     : layer 2 tile t
         N2 <= t < N2+N3             : layer 3 tile t-N2
         t >= N2+N3                  : layer 4 tile t-N2-N3 -> output block
       Activations h1/h2/h3 persist in VMEM scratch (bf16); accumulate f32.
    """
    t = pl.program_id(0)

    @pl.when(t == 0)
    def _layer1():
        # Layer 1 is tiny (D x 1280); keep it in f32 for accuracy.
        y = jnp.dot(x_ref[...], w1_ref[...],
                    preferred_element_type=jnp.float32) + b1_ref[...]
        h1_ref[...] = jnp.tanh(y).astype(h1_ref.dtype)

    @pl.when(t < N2_STEPS)
    def _layer2():
        y = jnp.dot(h1_ref[...], w2_ref[...],
                    preferred_element_type=jnp.float32) + b2_ref[...]
        h_new = jnp.tanh(y).astype(h2_ref.dtype)
        for j in range(N2_STEPS):           # static slices -> aligned stores
            @pl.when(t == j)
            def _store(j=j):
                h2_ref[:, j * TN2:(j + 1) * TN2] = h_new

    @pl.when((t >= N2_STEPS) & (t < N2_STEPS + N3_STEPS))
    def _layer3():
        y = jnp.dot(h2_ref[...], w3_ref[...],
                    preferred_element_type=jnp.float32) + b3_ref[...]
        h_new = jnp.tanh(y).astype(h3_ref.dtype)
        for j in range(N3_STEPS):
            @pl.when(t == N2_STEPS + j)
            def _store(j=j):
                h3_ref[:, j * TN3:(j + 1) * TN3] = h_new

    @pl.when(t >= N2_STEPS + N3_STEPS)
    def _layer4():
        y = jnp.dot(h3_ref[...], w4_ref[...],
                    preferred_element_type=jnp.float32) + b4_ref[...]
        o_ref[...] = y.astype(o_ref.dtype)


def mlp_decoder_pallas(x, packed_params):
    """x: (B, D) f32 flattened latent.  Returns (B, 4096) f32."""
    B, D = x.shape
    (w1, b1), (w2, b2), (w3, b3), (w4, b4) = packed_params
    n23 = N2_STEPS + N3_STEPS
    grid = (n23 + N4_STEPS,)

    # Block-index maps: constant indices are DMA'd once and stay resident;
    # clamped indices stream each layer's column tiles exactly once.
    l1_idx = lambda t: (0, 0)
    l2_idx = lambda t: (0, jnp.minimum(t, N2_STEPS - 1))
    l3_idx = lambda t: (0, jnp.minimum(jnp.maximum(t - N2_STEPS, 0),
                                       N3_STEPS - 1))
    l4_idx = lambda t: (0, jnp.maximum(t - n23, 0))

    return pl.pallas_call(
        _fused_mlp_kernel,
        out_shape=jax.ShapeDtypeStruct((B, OUT_DIM), jnp.float32),
        grid_spec=pltpu.PrefetchScalarGridSpec(
            num_scalar_prefetch=0,
            grid=grid,
            in_specs=[
                pl.BlockSpec((B, D), l1_idx),            # x   f32  (resident)
                pl.BlockSpec((D, HID_PAD), l1_idx),      # w1  f32  (resident)
                pl.BlockSpec((1, HID_PAD), l1_idx),      # b1  f32
                pl.BlockSpec((HID_PAD, TN2), l2_idx),    # w2 bf16 column tile
                pl.BlockSpec((1, TN2), l2_idx),          # b2 tile
                pl.BlockSpec((HID_PAD, TN3), l3_idx),    # w3 bf16 column tile
                pl.BlockSpec((1, TN3), l3_idx),          # b3 tile
                pl.BlockSpec((HID_PAD, TN4), l4_idx),    # w4 bf16 column tile
                pl.BlockSpec((1, TN4), l4_idx),          # b4 tile
            ],
            out_specs=pl.BlockSpec((B, TN4), l4_idx),
            scratch_shapes=[
                pltpu.VMEM((B, HID_PAD), jnp.bfloat16),  # h1
                pltpu.VMEM((B, HID_PAD), jnp.bfloat16),  # h2
                pltpu.VMEM((B, HID_PAD), jnp.bfloat16),  # h3
            ],
        ),
        compiler_params=pltpu.CompilerParams(
            # Steps carry deps through VMEM scratch -> must run sequentially.
            dimension_semantics=("arbitrary",),
            vmem_limit_bytes=32 * 1024 * 1024,  # ~18 MB used; safe on v5e/v6e/v7x
        ),
    )(x, w1, b1, w2, b2, w3, b3, w4, b4)


def init_mlp_decoder_params(key, input_dim):
    """f32 params mirroring nn.Linear default init (U[-1/sqrt(fan_in), +])."""
    dims = [(input_dim, HID), (HID, HID), (HID, HID), (HID, OUT_DIM)]
    params = []
    for fan_in, fan_out in dims:
        key, kw, kb = jax.random.split(key, 3)
        bound = 1.0 / jnp.sqrt(jnp.float32(fan_in))
        w = jax.random.uniform(kw, (fan_in, fan_out), jnp.float32, -bound, bound)
        b = jax.random.uniform(kb, (1, fan_out), jnp.float32, -bound, bound)
        params.append((w, b))
    return params


def _pad_to(a, shape):
    return jnp.pad(a, [(0, s - d) for d, s in zip(a.shape, shape)])


def pack_params_for_kernel(raw_params):
    """Zero-pad the 1200-wide axes to 1280; w1 stays f32, w2/w3/w4 -> bf16."""
    (w1, b1), (w2, b2), (w3, b3), (w4, b4) = raw_params
    D = w1.shape[0]
    w1p = _pad_to(w1, (D, HID_PAD)).astype(jnp.float32)
    b1p = _pad_to(b1, (1, HID_PAD)).astype(jnp.float32)
    w2p = _pad_to(w2, (HID_PAD, HID_PAD)).astype(jnp.bfloat16)
    b2p = _pad_to(b2, (1, HID_PAD)).astype(jnp.float32)
    w3p = _pad_to(w3, (HID_PAD, HID_PAD)).astype(jnp.bfloat16)
    b3p = _pad_to(b3, (1, HID_PAD)).astype(jnp.float32)
    w4p = _pad_to(w4, (HID_PAD, OUT_DIM)).astype(jnp.bfloat16)
    b4p = b4.astype(jnp.float32)
    return ((w1p, b1p), (w2p, b2p), (w3p, b3p), (w4p, b4p))


@jax.jit
def mlp_decoder_forward(z, packed_params):
    B = z.shape[0]
    x = z.reshape(B, -1).astype(jnp.float32)   # z.view(B, -1)
    h = mlp_decoder_pallas(x, packed_params)   # (B, 4096)
    return h.reshape(B, 1, 64, 64)             # h.view(B, 1, 64, 64), NCHW


if __name__ == "__main__":
    key = jax.random.PRNGKey(0)
    k_param, k_z = jax.random.split(key)

    input_dim = 32
    batch = 2
    z = jax.random.normal(k_z, (batch, input_dim), jnp.float32)

    raw_params = init_mlp_decoder_params(k_param, input_dim)
    params = pack_params_for_kernel(raw_params)

    mu_img = mlp_decoder_forward(z, params)
    jax.block_until_ready(mu_img)
    assert mu_img.shape == (batch, 1, 64, 64), mu_img.shape

    # Pure-JAX reference using the same (bf16-rounded, zero-padded) weights.
    def ref_forward(z, packed):
        (w1, b1), (w2, b2), (w3, b3), (w4, b4) = packed
        h = z.reshape(z.shape[0], -1)
        h = jnp.tanh(h @ w1.astype(jnp.float32) + b1)
        h = jnp.tanh(h @ w2.astype(jnp.float32) + b2)
        h = jnp.tanh(h @ w3.astype(jnp.float32) + b3)
        h = h @ w4.astype(jnp.float32) + b4
        return h.reshape(z.shape[0], 1, 64, 64)

    ref = ref_forward(z, params)
    # bf16 activations/weights in the kernel vs f32-activation reference.
    assert jnp.allclose(mu_img, ref, atol=3e-2, rtol=3e-2), float(
        jnp.max(jnp.abs(mu_img - ref)))

    print("KERNEL_OK")
</pallas_src>

<mosaic_0001>
module attributes {stable_mosaic.version = 11 : i64} {
  func.func @_fused_mlp_kernel(%arg0: i32, %arg1: memref<2x32xf32, #tpu.memory_space<vmem>>, %arg2: memref<32x1280xf32, #tpu.memory_space<vmem>>, %arg3: memref<1x1280xf32, #tpu.memory_space<vmem>>, %arg4: memref<1280x640xbf16, #tpu.memory_space<vmem>>, %arg5: memref<1x640xf32, #tpu.memory_space<vmem>>, %arg6: memref<1280x640xbf16, #tpu.memory_space<vmem>>, %arg7: memref<1x640xf32, #tpu.memory_space<vmem>>, %arg8: memref<1280x2048xbf16, #tpu.memory_space<vmem>>, %arg9: memref<1x2048xf32, #tpu.memory_space<vmem>>, %arg10: memref<2x2048xf32, #tpu.memory_space<vmem>>, %arg11: memref<2x1280xbf16, #tpu.memory_space<vmem>>, %arg12: memref<2x1280xbf16, #tpu.memory_space<vmem>>, %arg13: memref<2x1280xbf16, #tpu.memory_space<vmem>>) attributes {dimension_semantics = [#tpu.dimension_semantics<arbitrary>], iteration_bounds = array<i64: 6>, scalar_prefetch = 0 : i64, scratch_operands = 3 : i64, tpu.core_type = #tpu.core_type<tc>, window_params = [{pipeline_mode = #tpu.pipeline_mode<synchronous>, transform_indices = @transform_0, window_bounds = array<i64: 2, 32>}, {pipeline_mode = #tpu.pipeline_mode<synchronous>, transform_indices = @transform_1, window_bounds = array<i64: 32, 1280>}, {pipeline_mode = #tpu.pipeline_mode<synchronous>, transform_indices = @transform_2, window_bounds = array<i64: 1, 1280>}, {transform_indices = @transform_3, window_bounds = array<i64: 1280, 640>}, {transform_indices = @transform_4, window_bounds = array<i64: 1, 640>}, {transform_indices = @transform_5, window_bounds = array<i64: 1280, 640>}, {transform_indices = @transform_6, window_bounds = array<i64: 1, 640>}, {transform_indices = @transform_7, window_bounds = array<i64: 1280, 2048>}, {transform_indices = @transform_8, window_bounds = array<i64: 1, 2048>}, {transform_indices = @transform_9, window_bounds = array<i64: 2, 2048>}]} {
    %c0_i32 = arith.constant 0 : i32
    %0 = arith.cmpi eq, %arg0, %c0_i32 : i32
    %1 = arith.extui %0 : i1 to i32
    %c0_i32_0 = arith.constant 0 : i32
    %2 = arith.cmpi ne, %1, %c0_i32_0 : i32
    scf.if %2 {
      %c0 = arith.constant 0 : index
      %c0_6 = arith.constant 0 : index
      %14 = vector.load %arg1[%c0, %c0_6] : memref<2x32xf32, #tpu.memory_space<vmem>>, vector<2x32xf32>
      %c0_7 = arith.constant 0 : index
      %c0_8 = arith.constant 0 : index
      %15 = vector.load %arg2[%c0_7, %c0_8] : memref<32x1280xf32, #tpu.memory_space<vmem>>, vector<32x1280xf32>
      %cst = arith.constant dense<0.000000e+00> : vector<2x1280xf32>
      %16 = tpu.matmul %14, %15, %cst {dimension_numbers = #tpu.dot_dimension_numbers<[1], [0], [0], [1], [0, 0, 1, 1], [], []>} : vector<2x32xf32>, vector<32x1280xf32>, vector<2x1280xf32> -> vector<2x1280xf32>
      %c0_9 = arith.constant 0 : index
      %c0_10 = arith.constant 0 : index
      %17 = vector.load %arg3[%c0_9, %c0_10] : memref<1x1280xf32, #tpu.memory_space<vmem>>, vector<1x1280xf32>
      %18 = vector.broadcast %17 : vector<1x1280xf32> to vector<2x1280xf32>
      %19 = arith.addf %16, %18 : vector<2x1280xf32>
      %20 = math.tanh %19 : vector<2x1280xf32>
      %21 = arith.truncf %20 : vector<2x1280xf32> to vector<2x1280xbf16>
      %c0_11 = arith.constant 0 : index
      %c0_12 = arith.constant 0 : index
      %22 = vector.load %arg11[%c0_11, %c0_12] : memref<2x1280xbf16, #tpu.memory_space<vmem>>, vector<2x1280xbf16>
      tpu.vector_store %arg11[%c0_11, %c0_12], %21 {strides = array<i32>} : memref<2x1280xbf16, #tpu.memory_space<vmem>>, vector<2x1280xbf16>,
    } else {
    }
    %c2_i32 = arith.constant 2 : i32
    %3 = arith.cmpi slt, %arg0, %c2_i32 : i32
    %4 = arith.extui %3 : i1 to i32
    %c0_i32_1 = arith.constant 0 : i32
    %5 = arith.cmpi ne, %4, %c0_i32_1 : i32
    scf.if %5 {
      %c0 = arith.constant 0 : index
      %c0_6 = arith.constant 0 : index
      %14 = vector.load %arg11[%c0, %c0_6] : memref<2x1280xbf16, #tpu.memory_space<vmem>>, vector<2x1280xbf16>
      %c0_7 = arith.constant 0 : index
      %c0_8 = arith.constant 0 : index
      %15 = vector.load %arg4[%c0_7, %c0_8] : memref<1280x640xbf16, #tpu.memory_space<vmem>>, vector<1280x640xbf16>
      %cst = arith.constant dense<0.000000e+00> : vector<2x640xf32>
      %16 = tpu.matmul %14, %15, %cst {dimension_numbers = #tpu.dot_dimension_numbers<[1], [0], [0], [1], [0, 0, 1, 1], [], []>} : vector<2x1280xbf16>, vector<1280x640xbf16>, vector<2x640xf32> -> vector<2x640xf32>
      %c0_9 = arith.constant 0 : index
      %c0_10 = arith.constant 0 : index
      %17 = vector.load %arg5[%c0_9, %c0_10] : memref<1x640xf32, #tpu.memory_space<vmem>>, vector<1x640xf32>
      %18 = vector.broadcast %17 : vector<1x640xf32> to vector<2x640xf32>
      %19 = arith.addf %16, %18 : vector<2x640xf32>
      %20 = math.tanh %19 : vector<2x640xf32>
      %21 = arith.truncf %20 : vector<2x640xf32> to vector<2x640xbf16>
      %c0_i32_11 = arith.constant 0 : i32
      %22 = arith.cmpi eq, %arg0, %c0_i32_11 : i32
      %23 = arith.extui %22 : i1 to i32
      %c0_i32_12 = arith.constant 0 : i32
      %24 = arith.cmpi ne, %23, %c0_i32_12 : i32
      scf.if %24 {
        %c0_14 = arith.constant 0 : index
        %c0_15 = arith.constant 0 : index
        %28 = vector.load %arg12[%c0_14, %c0_15] : memref<2x1280xbf16, #tpu.memory_space<vmem>>, vector<2x640xbf16>
        tpu.vector_store %arg12[%c0_14, %c0_15], %21 {strides = array<i32>} : memref<2x1280xbf16, #tpu.memory_space<vmem>>, vector<2x640xbf16>,
      } else {
      }
      %c1_i32 = arith.constant 1 : i32
      %25 = arith.cmpi eq, %arg0, %c1_i32 : i32
      %26 = arith.extui %25 : i1 to i32
      %c0_i32_13 = arith.constant 0 : i32
      %27 = arith.cmpi ne, %26, %c0_i32_13 : i32
      scf.if %27 {
        %c0_14 = arith.constant 0 : index
        %c640 = arith.constant 640 : index
        %28 = vector.load %arg12[%c0_14, %c640] : memref<2x1280xbf16, #tpu.memory_space<vmem>>, vector<2x640xbf16>
        tpu.vector_store %arg12[%c0_14, %c640], %21 {strides = array<i32>} : memref<2x1280xbf16, #tpu.memory_space<vmem>>, vector<2x640xbf16>,
      } else {
      }
    } else {
    }
    %c2_i32_2 = arith.constant 2 : i32
    %6 = arith.cmpi sge, %arg0, %c2_i32_2 : i32
    %c4_i32 = arith.constant 4 : i32
    %7 = arith.cmpi slt, %arg0, %c4_i32 : i32
    %8 = arith.andi %6, %7 : i1
    %9 = arith.extui %8 : i1 to i32
    %c0_i32_3 = arith.constant 0 : i32
    %10 = arith.cmpi ne, %9, %c0_i32_3 : i32
    scf.if %10 {
      %c0 = arith.constant 0 : index
      %c0_6 = arith.constant 0 : index
      %14 = vector.load %arg12[%c0, %c0_6] : memref<2x1280xbf16, #tpu.memory_space<vmem>>, vector<2x1280xbf16>
      %c0_7 = arith.constant 0 : index
      %c0_8 = arith.constant 0 : index
      %15 = vector.load %arg6[%c0_7, %c0_8] : memref<1280x640xbf16, #tpu.memory_space<vmem>>, vector<1280x640xbf16>
      %cst = arith.constant dense<0.000000e+00> : vector<2x640xf32>
      %16 = tpu.matmul %14, %15, %cst {dimension_numbers = #tpu.dot_dimension_numbers<[1], [0], [0], [1], [0, 0, 1, 1], [], []>} : vector<2x1280xbf16>, vector<1280x640xbf16>, vector<2x640xf32> -> vector<2x640xf32>
      %c0_9 = arith.constant 0 : index
      %c0_10 = arith.constant 0 : index
      %17 = vector.load %arg7[%c0_9, %c0_10] : memref<1x640xf32, #tpu.memory_space<vmem>>, vector<1x640xf32>
      %18 = vector.broadcast %17 : vector<1x640xf32> to vector<2x640xf32>
      %19 = arith.addf %16, %18 : vector<2x640xf32>
      %20 = math.tanh %19 : vector<2x640xf32>
      %21 = arith.truncf %20 : vector<2x640xf32> to vector<2x640xbf16>
      %c2_i32_11 = arith.constant 2 : i32
      %22 = arith.cmpi eq, %arg0, %c2_i32_11 : i32
      %23 = arith.extui %22 : i1 to i32
      %c0_i32_12 = arith.constant 0 : i32
      %24 = arith.cmpi ne, %23, %c0_i32_12 : i32
      scf.if %24 {
        %c0_14 = arith.constant 0 : index
        %c0_15 = arith.constant 0 : index
        %28 = vector.load %arg13[%c0_14, %c0_15] : memref<2x1280xbf16, #tpu.memory_space<vmem>>, vector<2x640xbf16>
        tpu.vector_store %arg13[%c0_14, %c0_15], %21 {strides = array<i32>} : memref<2x1280xbf16, #tpu.memory_space<vmem>>, vector<2x640xbf16>,
      } else {
      }
      %c3_i32 = arith.constant 3 : i32
      %25 = arith.cmpi eq, %arg0, %c3_i32 : i32
      %26 = arith.extui %25 : i1 to i32
      %c0_i32_13 = arith.constant 0 : i32
      %27 = arith.cmpi ne, %26, %c0_i32_13 : i32
      scf.if %27 {
        %c0_14 = arith.constant 0 : index
        %c640 = arith.constant 640 : index
        %28 = vector.load %arg13[%c0_14, %c640] : memref<2x1280xbf16, #tpu.memory_space<vmem>>, vector<2x640xbf16>
        tpu.vector_store %arg13[%c0_14, %c640], %21 {strides = array<i32>} : memref<2x1280xbf16, #tpu.memory_space<vmem>>, vector<2x640xbf16>,
      } else {
      }
    } else {
    }
    %c4_i32_4 = arith.constant 4 : i32
    %11 = arith.cmpi sge, %arg0, %c4_i32_4 : i32
    %12 = arith.extui %11 : i1 to i32
    %c0_i32_5 = arith.constant 0 : i32
    %13 = arith.cmpi ne, %12, %c0_i32_5 : i32
    scf.if %13 {
      %c0 = arith.constant 0 : index
      %c0_6 = arith.constant 0 : index
      %14 = vector.load %arg13[%c0, %c0_6] : memref<2x1280xbf16, #tpu.memory_space<vmem>>, vector<2x1280xbf16>
      %c0_7 = arith.constant 0 : index
      %c0_8 = arith.constant 0 : index
      %15 = vector.load %arg8[%c0_7, %c0_8] : memref<1280x2048xbf16, #tpu.memory_space<vmem>>, vector<1280x2048xbf16>
      %cst = arith.constant dense<0.000000e+00> : vector<2x2048xf32>
      %16 = tpu.matmul %14, %15, %cst {dimension_numbers = #tpu.dot_dimension_numbers<[1], [0], [0], [1], [0, 0, 1, 1], [], []>} : vector<2x1280xbf16>, vector<1280x2048xbf16>, vector<2x2048xf32> -> vector<2x2048xf32>
      %c0_9 = arith.constant 0 : index
      %c0_10 = arith.constant 0 : index
      %17 = vector.load %arg9[%c0_9, %c0_10] : memref<1x2048xf32, #tpu.memory_space<vmem>>, vector<1x2048xf32>
      %18 = vector.broadcast %17 : vector<1x2048xf32> to vector<2x2048xf32>
      %19 = arith.addf %16, %18 : vector<2x2048xf32>
      %c0_11 = arith.constant 0 : index
      %c0_12 = arith.constant 0 : index
      %20 = vector.load %arg10[%c0_11, %c0_12] : memref<2x2048xf32, #tpu.memory_space<vmem>>, vector<2x2048xf32>
      tpu.vector_store %arg10[%c0_11, %c0_12], %19 {strides = array<i32>} : memref<2x2048xf32, #tpu.memory_space<vmem>>, vector<2x2048xf32>,
    } else {
    }
    return
  }
  func.func @transform_0(%arg0: i32) -> (i32, i32) {
    %c0_i32 = arith.constant 0 : i32
    %c0_i32_0 = arith.constant 0 : i32
    %c0_i32_1 = arith.constant 0 : i32
    return %c0_i32, %c0_i32_0 : i32, i32
  }
  func.func @transform_1(%arg0: i32) -> (i32, i32) {
    %c0_i32 = arith.constant 0 : i32
    %c0_i32_0 = arith.constant 0 : i32
    %c0_i32_1 = arith.constant 0 : i32
    return %c0_i32, %c0_i32_0 : i32, i32
  }
  func.func @transform_2(%arg0: i32) -> (i32, i32) {
    %c0_i32 = arith.constant 0 : i32
    %c0_i32_0 = arith.constant 0 : i32
    %c0_i32_1 = arith.constant 0 : i32
    return %c0_i32, %c0_i32_0 : i32, i32
  }
  func.func @transform_3(%arg0: i32) -> (i32, i32) {
    %c1_i32 = arith.constant 1 : i32
    %0 = arith.minsi %arg0, %c1_i32 : i32
    %c0_i32 = arith.constant 0 : i32
    %c0_i32_0 = arith.constant 0 : i32
    return %c0_i32, %0 : i32, i32
  }
  func.func @transform_4(%arg0: i32) -> (i32, i32) {
    %c1_i32 = arith.constant 1 : i32
    %0 = arith.minsi %arg0, %c1_i32 : i32
    %c0_i32 = arith.constant 0 : i32
    %c0_i32_0 = arith.constant 0 : i32
    return %c0_i32, %0 : i32, i32
  }
  func.func @transform_5(%arg0: i32) -> (i32, i32) {
    %c2_i32 = arith.constant 2 : i32
    %0 = arith.subi %arg0, %c2_i32 : i32
    %c0_i32 = arith.constant 0 : i32
    %1 = arith.maxsi %0, %c0_i32 : i32
    %c1_i32 = arith.constant 1 : i32
    %2 = arith.minsi %1, %c1_i32 : i32
    %c0_i32_0 = arith.constant 0 : i32
    %c0_i32_1 = arith.constant 0 : i32
    return %c0_i32_0, %2 : i32, i32
  }
  func.func @transform_6(%arg0: i32) -> (i32, i32) {
    %c2_i32 = arith.constant 2 : i32
    %0 = arith.subi %arg0, %c2_i32 : i32
    %c0_i32 = arith.constant 0 : i32
    %1 = arith.maxsi %0, %c0_i32 : i32
    %c1_i32 = arith.constant 1 : i32
    %2 = arith.minsi %1, %c1_i32 : i32
    %c0_i32_0 = arith.constant 0 : i32
    %c0_i32_1 = arith.constant 0 : i32
    return %c0_i32_0, %2 : i32, i32
  }
  func.func @transform_7(%arg0: i32) -> (i32, i32) {
    %c4_i32 = arith.constant 4 : i32
    %0 = arith.subi %arg0, %c4_i32 : i32
    %c0_i32 = arith.constant 0 : i32
    %1 = arith.maxsi %0, %c0_i32 : i32
    %c0_i32_0 = arith.constant 0 : i32
    %c0_i32_1 = arith.constant 0 : i32
    return %c0_i32_0, %1 : i32, i32
  }
  func.func @transform_8(%arg0: i32) -> (i32, i32) {
    %c4_i32 = arith.constant 4 : i32
    %0 = arith.subi %arg0, %c4_i32 : i32
    %c0_i32 = arith.constant 0 : i32
    %1 = arith.maxsi %0, %c0_i32 : i32
    %c0_i32_0 = arith.constant 0 : i32
    %c0_i32_1 = arith.constant 0 : i32
    return %c0_i32_0, %1 : i32, i32
  }
  func.func @transform_9(%arg0: i32) -> (i32, i32) {
    %c4_i32 = arith.constant 4 : i32
    %0 = arith.subi %arg0, %c4_i32 : i32
    %c0_i32 = arith.constant 0 : i32
    %1 = arith.maxsi %0, %c0_i32 : i32
    %c0_i32_0 = arith.constant 0 : i32
    %c0_i32_1 = arith.constant 0 : i32
    return %c0_i32_0, %1 : i32, i32
  }
}

</mosaic_0001>

<bundles_post_ra>
// kernel: mlp_decoder_forward.1
= control target key start
LH: loop header
LB: loop body
LE: loop exit
PB: predicated region body
PF: predicated region fallthrough
CT: control target
= control target key end

     0   :  { %s25151_s0 = inlined_call_operand.hbm [shape: f32[2,32], index: 0, kind: input, shape index: {}]   ;;  %s25152_s1 = inlined_call_operand.hbm [shape: f32[32,1280], index: 1, kind: input, shape index: {}]   ;;  %s25153_s2 = inlined_call_operand.hbm [shape: f32[1,1280], index: 2, kind: input, shape index: {}]   ;;  %s25154_s3 = inlined_call_operand.hbm [shape: bf16[1280,1280], index: 3, kind: input, shape index: {}]   ;;  %s25155_s4 = inlined_call_operand.hbm [shape: f32[1,1280], index: 4, kind: input, shape index: {}]   ;;  %s25156_s5 = inlined_call_operand.hbm [shape: bf16[1280,1280], index: 5, kind: input, shape index: {}]   ;;  %s25157_s6 = inlined_call_operand.hbm [shape: f32[1,1280], index: 6, kind: input, shape index: {}]   ;;  %s25158_s7 = inlined_call_operand.hbm [shape: bf16[1280,4096], index: 7, kind: input, shape index: {}]   ;;  %s25159_s8 = inlined_call_operand.hbm [shape: f32[1,4096], index: 8, kind: input, shape index: {}]   ;;  %s25160_s9 = inlined_call_operand.vmem [shape: f32[2,4096], index: 9, kind: output, shape index: {}]  }
   0x1   :  { %25195 = sst [smem:[#allocation32_spill]] %s25151_s0 }
   0x2   :  { %25196 = sst [smem:[#allocation33_spill]] %s25152_s1 }
   0x3   :  { %25197 = sst [smem:[#allocation34_spill]] %s25153_s2 }
   0x4   :  { %25198 = sst [smem:[#allocation35_spill]] %s25154_s3 }
   0x5   :  { %25199 = sst [smem:[#allocation36_spill]] %s25156_s5 }
   0x6   :  { %25200 = sst [smem:[#allocation37_spill]] %s25157_s6 }
   0x7   :  { %25201 = sst [smem:[#allocation38_spill]] %s25158_s7 }
   0x8   :  { %25202 = sst [smem:[#allocation39_spill]] %s25159_s8 }
   0x9   :  { %25203 = sst [smem:[#allocation40_spill]] %s25160_s9 }
   0xa   :  { %14 = vsyncpa [#allocation6], 0 }
   0xb   :  { %15 = vsyncpa [#allocation8], 0 }
   0xc   :  { %16 = vsyncpa [#allocation11], 0 }
   0xd   :  { %18 = vsyncpa [#allocation11 + $0x1], 0 }
   0xe   :  { %19 = vsyncpa [#allocation14], 0 }
   0xf   :  { %21 = vsyncpa [#allocation14 + $0x1], 0 }
  0x10   :  { %22 = vsyncpa [#allocation17], 0 }
  0x11   :  { %24 = vsyncpa [#allocation17 + $0x1], 0  ;;  %s21997_s30 = smov 0   ;;  %s21999_s10 = smov 0  }
  0x12   :  { %s22001_s11 = smov 0   ;;  %s22003_s12 = smov 0  }
  0x13   :  { %s22005_s13 = smov 0   ;;  %s22007_s14 = smov 0  }
  0x14   :  { %s22009_s15 = smov 0   ;;  %s22011_s16 = smov 0  }
  0x15   :  { %s22013_s17 = smov 0   ;;  %s22015_s18 = smov 0  }
  0x16 LB: > { %25204 = sst [smem:[#allocation24_spill]] %s21902_s13  ;;  %s21924_s19 = smov [#allocation7]   ;;  %s21922_s18 = sphi %s22015_s18, %s25270_s18   ;;  %s21918_s17 = sphi %s22013_s17, %s25283_s17   ;;  %s21914_s16 = sphi %s22011_s16, %s25282_s16   ;;  %s21910_s15 = sphi %s22009_s15, %s25281_s15   ;;  %s21906_s14 = sphi %s22007_s14, %s25280_s14   ;;  %s21902_s13 = sphi %s22005_s13, %s25279_s13   ;;  %s21898_s12 = sphi %s22003_s12, %s25272_s12   ;;  %s21894_s11 = sphi %s22001_s11, %s25278_s11   ;;  %s21890_s10 = sphi %s21999_s10, %s25277_s10   ;;  %s21886_s30 = sphi %s21997_s30, %s25276_s30  }
  0x17   : > { %25205 = sst [smem:[#allocation25_spill]] %s21914_s16  ;;  %s349_s20 = sshll.u32 %s21924_s19, 4  ;;  %s350_s20 = int_to_ptr.vmem [resolvable:$true] %s349_s20 }
  0x18   : > { %s22048_s21 = sadd.s32 4294967295, %s21922_s18   ;;  %p17860_p0 = scmp.ge.s32.totalorder %s21922_s18, 1 }
  0x19   : > { %p25170_p1 = scmp.eq.s32.totalorder %s22048_s21, 0  ;;  %p326_p2 = scmp.lt.s32.totalorder %s21922_s18, 7 }
  0x1a   : > { %s22067_s24 = sadd.s32 1, %s21922_s18   ;;  %s21589_s25 = scalar_lea.vmem %s350_s20, 5120 }
  0x1b   : > { %p22054_p4 = pnand %p17860_p0, %p326_p2  ;;  %25209 = sst [smem:[#allocation27_spill]] %s22067_s24 }
  0x1c   : > { %p21590_p8 = scmp.ne.s32.totalorder %s350_s20, %s21589_s25  ;;  %p21597_p11 = scmp.lt.s32.totalorder %s350_s20, %s350_s20 }
  0x1d   : > { %s25206_s22 = scalar_select %p22054_p4, 1, 0 }
  0x1e   : > { %p20279_p5 = pneg %p22054_p4  ;;  %p21598_p12 = scmp.lt.s32.totalorder %s21589_s25, %s21589_s25 }
  0x1f   : > { %25207 = sst [smem:[#allocation26_spill]] %s25206_s22 }
  0x20   : > { %p22062_p6 = pnand %p20279_p5, %p25170_p1  ;;  %p21599_p13 = por %p21598_p12, %p21597_p11 }
  0x22   : > { %p25168_p7 = pneg %p22062_p6 }
  0x24   : > { %p21592_p9 = pnand %p21590_p8, %p25168_p7 }
  0x26   : > { %p21593_p10 = pneg %p21592_p9 }
  0x28   : > { %p21600_p0 = pnand %p21599_p13, %p21593_p10 }
  0x2a   : > { %21603 = shalt.err (!%p21600_p0)
}
  0x2b   : > { %s21925_s26 = smov 1280   ;;  %s21926_s27 = smov 80  }
  0x2c   : > { %s25210_s1 = sld [smem:[#allocation33_spill]]  ;;  %p97_p2 = scmp.lt.s32.totalorder %s21922_s18, 1 }
  0x2d   : > { %p99_p5 = scmp.lt.s32.totalorder %s22067_s24, 1  ;;  %s104_s19 = sadd.s32 1, %s21918_s17 }
  0x2e   : > { %p111_p8 = scmp.ne.s32.totalorder %s21918_s17, %s21914_s16  ;;  %p25171_p9 = scmp.eq.s32.totalorder %s21922_s18, 0 }
  0x2f   : > { %s22085_s25 = scalar_select %p97_p2, %s21922_s18, 1 }
  0x30   : > { %s100_s9 = scalar_select %p99_p5, %s22067_s24, 1 }
  0x31   : > { %p117_p10 = scmp.ne.s32.totalorder %s21914_s16, %s21910_s15  ;;  %p25169_p11 = scmp.lt.s32.totalorder %s21922_s18, 6 }
  0x32   : > { %20285 = dma.hbm_to_vmem [thread:$0]  (!%p22062_p6), %s25210_s1, 5120, %s350_s20, [#allocation8], %s21925_s26, %s21925_s26, %s21926_s27  }
  0x33   : > { %s101_s22 = ssub.s32 %s22085_s25, %s100_s9  ;;  %p113_p13 = por %p25171_p9, %p111_p8 }
  0x34   : > { %p102_p12 = scmp.eq.s32.totalorder %s101_s22, 0  ;;  %p22097_p0 = por %p25170_p1, %p117_p10 }
  0x35   : > { %s22102_s26 = sand.u32 1, %s21922_s18   ;;  %s25164_s28 = sand.u32 1, %s21918_s17  }
  0x36   : > { %s25211_s20 = scalar_select %p22097_p0, 1, 0 }
  0x37   : > { %s22105_s27 = scalar_select %p102_p12, %s21918_s17, %s104_s19  }
  0x38   : > { %25212 = sst [smem:[#allocation28_spill]] %s25211_s20  ;;  %s20245_s29 = smul.u32 3200, %s25164_s28 }
  0x39   : > { %25213 = sst [smem:[#allocation29_spill]] %s22105_s27  ;;  %p22112_p2 = pnand %p25169_p11, %p113_p13 }
  0x3a   : > { %s20015_s15 = smul.u32 320, %s22085_s25  ;;  %s25215_s3 = sld [smem:[#allocation35_spill]] }
  0x3b   : > { %s25214_s9 = scalar_select %p22112_p2, 1, 0 }
  0x3c   : > { %s378_s19 = scalar_lea.vmem [#allocation10], %s20245_s29  ;;  %s25174_s28 = scalar_lea.sflag [#allocation11], %s22102_s26 }
  0x3d   : > { %s387_s27 = sshll.u32 %s378_s19, 4  ;;  %p25180_p8 = pneg %p22112_p2  ;;  %s22122_s27 = int_to_ptr.vmem [resolvable:$true] %s387_s27 }
  0x40   : > { %s22120_s20 = scalar_lea.hbm %s25215_s3, %s20015_s15  ;;  %s21609_s15 = scalar_lea.hbm %s25215_s3, 102400 }
  0x41   : > { %s21604_s16 = scalar_lea.hbm %s22120_s20, 51200  ;;  %p21610_p13 = scmp.lt.s32.totalorder %s22120_s20, %s25215_s3 }
  0x42   : > { %p21605_p5 = scmp.ne.s32.totalorder %s22120_s20, %s21604_s16  ;;  %p21611_p3 = scmp.lt.s32.totalorder %s21609_s15, %s21604_s16 }
  0x44   : > { %p21607_p10 = pnand %p25180_p8, %p21605_p5  ;;  %p21612_p7 = por %p21611_p3, %p21610_p13 }
  0x46   : > { %p21608_p12 = pneg %p21607_p10 }
  0x48   : > { %p21613_p11 = pnand %p21612_p7, %p21608_p12 }
  0x4a   : > { %21616 = shalt.err (!%p21613_p11)
}
  0x4b   : > { %s21617_s29 = scalar_lea.vmem %s22122_s27, 51200  ;;  %s21927_s8 = smov [#allocation10]  }
  0x4c   : > { %p21618_p1 = scmp.ne.s32.totalorder %s22122_s27, %s21617_s29  ;;  %s21622_s19 = sshll.u32 %s21927_s8, 4  ;;  %s21623_s19 = int_to_ptr.vmem [resolvable:$false] %s21622_s19 }
  0x4d   : > { %s21624_s1 = scalar_lea.vmem %s21623_s19, 102400  ;;  %p21625_p9 = scmp.lt.s32.totalorder %s22122_s27, %s21623_s19 }
  0x4e   : > { %p21620_p5 = pnand %p21618_p1, %p25180_p8  ;;  %p21626_p0 = scmp.lt.s32.totalorder %s21624_s1, %s21617_s29 }
  0x50   : > { %p21621_p10 = pneg %p21620_p5  ;;  %p21627_p4 = por %p21626_p0, %p21625_p9 }
  0x52   : > { %p21628_p3 = pnand %p21627_p4, %p21621_p10 }
  0x54   : > { %21631 = shalt.err (!%p21628_p3)
}
  0x55   : > { %s25175_s6 = smov 640   ;;  %s25176_s16 = smov 320  }
  0x56   : > { %s25177_s15 = smov 20   ;;  %s17830_s22 = sadd.s32 4294967294, %s21922_s18 }
  0x57   : > { %20292 = dma.hbm_to_vmem [thread:$0]  (!%p22112_p2), %s22120_s20, 51200, %s22122_s27, %s25174_s28, %s25175_s6, %s25176_s16, %s25177_s15  }
  0x58   : > { %p158_p1 = scmp.gt.s32.totalorder %s17830_s22, 0  ;;  %p17831_p4 = scmp.lt.s32.totalorder %s17830_s22, 1 }
  0x59   : > { %s17836_s29 = sadd.s32 4294967294, %s22067_s24  ;;  %s170_s8 = sadd.s32 1, %s21906_s14 }
  0x5a   : > { %s25285_s22 = smov (!%p158_p1, %s17830_s22), 0  ;;  %p163_p7 = scmp.gt.s32.totalorder %s17836_s29, 0 }
  0x5b   : > { %p17837_p9 = scmp.lt.s32.totalorder %s17836_s29, 1  ;;  %s25287_s22 = smov (!%p17831_p4, %s25285_s22), 1 }
  0x5c   : > { %s25289_s29 = smov (!%p163_p7, %s17836_s29), 0  ;;  %p177_p11 = scmp.ne.s32.totalorder %s21906_s14, %s21902_s13 }
  0x5d   : > { %p183_p0 = scmp.ne.s32.totalorder %s21902_s13, %s21898_s12  ;;  %s25291_s29 = smov (!%p17837_p9, %s25289_s29), 1 }
  0x5e   : > { %p25216_p12 = scmp.eq.s32.totalorder %s21922_s18, 0  ;;  %p25217_p5 = scmp.eq.s32.totalorder %s22048_s21, 0 }
  0x5f   : > { %s167_s27 = ssub.s32 %s25287_s22, %s25291_s29  ;;  %s25179_s19 = sand.u32 1, %s21906_s14  }
  0x60   : > { %p179_p13 = por %p177_p11, %p25216_p12  ;;  %p22167_p10 = por %p183_p0, %p25217_p5 }
  0x61   : > { %p168_p3 = scmp.eq.s32.totalorder %s167_s27, 0  ;;  %s20247_s1 = smul.u32 3200, %s25179_s19 }
  0x62   : > { %s25218_s20 = scalar_select %p22167_p10, 1, 0 }
  0x63   : > { %p25219_p1 = scmp.lt.s32.totalorder %s21922_s18, 6  ;;  %s20019_s6 = smul.u32 320, %s25287_s22 }
  0x64   : > { %s22182_s12 = scalar_select %p168_p3, %s21906_s14, %s170_s8  }
  0x65   : > { %p22177_p4 = pnand %p25219_p1, %p179_p13  ;;  %s422_s16 = scalar_lea.vmem [#allocation13], %s20247_s1 }
  0x66   : > { %25221 = sst [smem:[#allocation30_spill]] %s22182_s12  ;;  %s434_s15 = sshll.u32 %s422_s16, 4  ;;  %s22190_s15 = int_to_ptr.vmem [resolvable:$true] %s434_s15 }
  0x67   : > { %s25220_s28 = scalar_select %p22177_p4, 1, 0 }
  0x68   : > { %s25222_s5 = sld [smem:[#allocation36_spill]]  ;;  %p25185_p9 = pneg %p22177_p4 }
  0x6e   : > { %s22188_s29 = scalar_lea.hbm %s25222_s5, %s20019_s6  ;;  %s21637_s3 = scalar_lea.hbm %s25222_s5, 102400 }
  0x6f   : > { %s21632_s19 = scalar_lea.hbm %s22188_s29, 51200  ;;  %p21638_p12 = scmp.lt.s32.totalorder %s22188_s29, %s25222_s5 }
  0x70   : > { %p21633_p7 = scmp.ne.s32.totalorder %s22188_s29, %s21632_s19  ;;  %p21639_p13 = scmp.lt.s32.totalorder %s21637_s3, %s21632_s19 }
  0x72   : > { %p21635_p11 = pnand %p25185_p9, %p21633_p7  ;;  %p21640_p5 = por %p21639_p13, %p21638_p12 }
  0x74   : > { %p21636_p0 = pneg %p21635_p11 }
  0x76   : > { %p21641_p3 = pnand %p21640_p5, %p21636_p0 }
  0x78   : > { %21644 = shalt.err (!%p21641_p3)
}
  0x79   : > { %s21645_s1 = scalar_lea.vmem %s22190_s15, 51200  ;;  %s21931_s16 = smov [#allocation13]  }
  0x7a   : > { %p21646_p1 = scmp.ne.s32.totalorder %s22190_s15, %s21645_s1  ;;  %s21650_s8 = sshll.u32 %s21931_s16, 4  ;;  %s21651_s8 = int_to_ptr.vmem [resolvable:$false] %s21650_s8 }
  0x7b   : > { %s21652_s27 = scalar_lea.vmem %s21651_s8, 102400  ;;  %p21653_p8 = scmp.lt.s32.totalorder %s22190_s15, %s21651_s8 }
  0x7c   : > { %p21648_p7 = pnand %p21646_p1, %p25185_p9  ;;  %p21654_p10 = scmp.lt.s32.totalorder %s21652_s27, %s21645_s1 }
  0x7e   : > { %p21649_p11 = pneg %p21648_p7  ;;  %p21655_p2 = por %p21654_p10, %p21653_p8 }
  0x80   : > { %p21656_p12 = pnand %p21655_p2, %p21649_p11 }
  0x82   : > { %21659 = shalt.err (!%p21656_p12)
}
  0x83   : > { %s25223_s19 = smov 20   ;;  %s25224_s3 = smov 320  }
  0x84   : > { %s25225_s13 = smov 640   ;;  %s25226_s6 = scalar_lea.sflag [#allocation14], %s22102_s26 }
  0x85   : > { %20298 = dma.hbm_to_vmem [thread:$0]  (!%p22177_p4), %s22188_s29, 51200, %s22190_s15, %s25226_s6, %s25225_s13, %s25224_s3, %s25223_s19  }
  0x86   : > { %s17854_s27 = sadd.s32 4294967292, %s21922_s18  ;;  %s17855_s1 = sadd.s32 4294967292, %s22067_s24 }
  0x87   : > { %p230_p2 = scmp.gt.s32.totalorder %s17854_s27, 0  ;;  %p233_p8 = scmp.gt.s32.totalorder %s17855_s1, 0 }
  0x88   : > { %s238_s16 = sadd.s32 1, %s21894_s11  ;;  %p245_p10 = scmp.ne.s32.totalorder %s21894_s11, %s21890_s10 }
  0x89   : > { %s25293_s27 = smov (!%p230_p2, %s17854_s27), 0  ;;  %s25295_s1 = smov (!%p233_p8, %s17855_s1), 0 }
  0x8a   : > { %p25227_p0 = scmp.eq.s32.totalorder %s21922_s18, 0  ;;  %p251_p5 = scmp.ne.s32.totalorder %s21890_s10, %s21886_s30 }
  0x8b   : > { %s235_s8 = ssub.s32 %s25293_s27, %s25295_s1  ;;  %p25228_p1 = scmp.eq.s32.totalorder %s22048_s21, 0 }
  0x8c   : > { %p247_p13 = por %p245_p10, %p25227_p0  ;;  %p236_p3 = scmp.eq.s32.totalorder %s235_s8, 0 }
  0x8d   : > { %p22236_p7 = por %p251_p5, %p25228_p1  ;;  %s25184_s29 = sand.u32 1, %s21894_s11  }
  0x8e   : > { %s20023_s19 = sshll.u32 %s25293_s27, 10  ;;  %s20249_s13 = smul.u32 10240, %s25184_s29 }
  0x8f   : > { %s25229_s15 = scalar_select %p22236_p7, 1, 0 }
  0x90   : > { %s22243_s3 = scalar_select %p236_p3, %s21894_s11, %s238_s16  }
  0x91   : > { %s25231_s7 = sld [smem:[#allocation38_spill]]  ;;  %p25232_p11 = scmp.lt.s32.totalorder %s21922_s18, 6 }
  0x92   : > { %25230 = sst [smem:[#allocation31_spill]] %s22243_s3  ;;  %s472_s1 = scalar_lea.vmem [#allocation16], %s20249_s13 }
  0x93   : > { %p22254_p12 = pnand %p25232_p11, %p247_p13  ;;  %s482_s16 = sshll.u32 %s472_s1, 4  ;;  %s22258_s16 = int_to_ptr.vmem [resolvable:$true] %s482_s16 }
  0x94   : > { %s25194_s8 = scalar_lea.sflag [#allocation17], %s22102_s26 }
  0x95   : > { %s25233_s30 = scalar_select %p22254_p12, 1, 0 }
  0x96   : > { %p25191_p8 = pneg %p22254_p12 }
  0x97   : > { %s22250_s12 = scalar_lea.hbm %s25231_s7, %s20023_s19  ;;  %s21665_s19 = scalar_lea.hbm %s25231_s7, 327680 }
  0x98   : > { %s21660_s29 = scalar_lea.hbm %s22250_s12, 163840  ;;  %p21666_p13 = scmp.lt.s32.totalorder %s22250_s12, %s25231_s7 }
  0x99   : > { %p21661_p2 = scmp.ne.s32.totalorder %s22250_s12, %s21660_s29  ;;  %p21667_p5 = scmp.lt.s32.totalorder %s21665_s19, %s21660_s29 }
  0x9b   : > { %p21663_p10 = pnand %p25191_p8, %p21661_p2  ;;  %p21668_p3 = por %p21667_p5, %p21666_p13 }
  0x9d   : > { %p21664_p0 = pneg %p21663_p10 }
  0x9f   : > { %p21669_p1 = pnand %p21668_p3, %p21664_p0 }
  0xa1   : > { %21672 = shalt.err (!%p21669_p1)
}
  0xa2   : > { %s21673_s13 = scalar_lea.vmem %s22258_s16, 163840  ;;  %s21932_s1 = smov [#allocation16]  }
  0xa3   : > { %p21674_p11 = scmp.ne.s32.totalorder %s22258_s16, %s21673_s13  ;;  %s21678_s5 = sshll.u32 %s21932_s1, 4  ;;  %s21679_s5 = int_to_ptr.vmem [resolvable:$false] %s21678_s5 }
  0xa4   : > { %s21680_s18 = scalar_lea.vmem %s21679_s5, 327680  ;;  %p21681_p9 = scmp.lt.s32.totalorder %s22258_s16, %s21679_s5 }
  0xa5   : > { %p21676_p2 = pnand %p21674_p11, %p25191_p8  ;;  %p21682_p7 = scmp.lt.s32.totalorder %s21680_s18, %s21673_s13 }
  0xa7   : > { %p21677_p10 = pneg %p21676_p2  ;;  %p21683_p4 = por %p21682_p7, %p21681_p9 }
  0xa9   : > { %p21684_p13 = pnand %p21683_p4, %p21677_p10 }
  0xab   : > { %21687 = shalt.err (!%p21684_p13)
}
  0xac   : > { %s21933_s29 = smov 2048   ;;  %s21934_s3 = smov 1024  }
  0xad   : > { %s21935_s19 = smov 64   ;;  %s21936_s6 = smov [#allocation5]  }
  0xae   : > { %20304 = dma.hbm_to_vmem [thread:$0]  (!%p22254_p12), %s22250_s12, 163840, %s22258_s16, %s25194_s8, %s21933_s29, %s21934_s3, %s21935_s19  }
  0xaf   : > { %s339_s1 = sshll.u32 %s21936_s6, 4  ;;  %s21937_s7 = smov [#allocation9]   ;;  %s340_s1 = int_to_ptr.vmem [resolvable:$true] %s339_s1 }
  0xb0   : > { %s363_s24 = sshll.u32 %s21937_s7, 4  ;;  %s21699_s13 = scalar_lea.vmem %s340_s1, 32  ;;  %s364_s24 = int_to_ptr.vmem [resolvable:$true] %s363_s24 }
  0xb1   : > { %p21700_p4 = scmp.ne.s32.totalorder %s340_s1, %s21699_s13  ;;  %p25234_p9 = pneg %p22062_p6 }
  0xb2   : > { %p21707_p5 = scmp.lt.s32.totalorder %s340_s1, %s340_s1  ;;  %p21708_p3 = scmp.lt.s32.totalorder %s21699_s13, %s21699_s13 }
  0xb3   : > { %p21702_p7 = pnand %p21700_p4, %p25234_p9 }
  0xb4   : > { %p21709_p1 = por %p21708_p3, %p21707_p5 }
  0xb5   : > { %p21703_p0 = pneg %p21702_p7 }
  0xb7   : > { %p21710_p11 = pnand %p21709_p1, %p21703_p0 }
  0xb9   : > { %21713 = shalt.err (!%p21710_p11)
}
  0xba   : > { %s25235_s0 = sld [smem:[#allocation32_spill]]  ;;  %s21725_s7 = scalar_lea.vmem %s364_s24, 160 }
  0xbb   : > { %p21726_p2 = scmp.ne.s32.totalorder %s364_s24, %s21725_s7  ;;  %p25236_p10 = pmov %p25234_p9 }
  0xbc   : > { %p21733_p4 = scmp.lt.s32.totalorder %s364_s24, %s364_s24  ;;  %p21734_p9 = scmp.lt.s32.totalorder %s21725_s7, %s21725_s7 }
  0xbd   : > { %p21728_p13 = pnand %p21726_p2, %p25236_p10 }
  0xbe   : > { %p21735_p7 = por %p21734_p9, %p21733_p4 }
  0xbf   : > { %p21729_p8 = pneg %p21728_p13 }
  0xc0   : > { %20282 = dma.hbm_to_vmem [thread:$0]  (!%p22062_p6), %s25235_s0, 32, %s340_s1, [#allocation6]  }
  0xc1   : > { %p21736_p12 = pnand %p21735_p7, %p21729_p8 }
  0xc3   : > { %21739 = shalt.err (!%p21736_p12)
}
  0xc4   : > { %s25237_s2 = sld [smem:[#allocation34_spill]]  ;;  %s25238_s29 = sand.u32 1, %s21918_s17  }
  0xc5   : > { %s20246_s3 = smul.u32 5, %s25238_s29  ;;  %s25239_s19 = sand.u32 1, %s21894_s11  }
  0xc6   : > { %s22307_s6 = sshll.u32 %s25239_s19, 4  ;;  %s20016_s1 = smul.u32 80, %s22085_s25 }
  0xc7   : > { %s25240_s13 = sand.u32 1, %s21906_s14   ;;  %s401_s5 = scalar_lea.vmem [#allocation12], %s20246_s3 }
  0xc8   : > { %s22312_s12 = smul.u32 5, %s25240_s13  ;;  %s409_s7 = scalar_lea.hbm %s25155_s4, %s20016_s1 }
  0xc9   : > { %s411_s18 = sshll.u32 %s401_s5, 4  ;;  %s21740_s8 = scalar_lea.hbm %s409_s7, 80  ;;  %s412_s18 = int_to_ptr.vmem [resolvable:$true] %s411_s18 }
  0xca   : > { %20288 = dma.hbm_to_vmem [thread:$0]  (!%p22062_p6), %s25237_s2, 160, %s364_s24, [#allocation8]  }
  0xcb   : > { %p21741_p12 = scmp.ne.s32.totalorder %s409_s7, %s21740_s8  ;;  %p25241_p8 = scmp.ne.s32.totalorder %s25214_s9, 0 }
  0xcc   : > { %s21745_s25 = scalar_lea.hbm %s25155_s4, 160  ;;  %p21746_p3 = scmp.lt.s32.totalorder %s409_s7, %s25155_s4 }
  0xcd   : > { %p25242_p6 = pneg %p25241_p8  ;;  %p21747_p1 = scmp.lt.s32.totalorder %s21745_s25, %s21740_s8 }
  0xcf   : > { %p21743_p0 = pnand %p21741_p12, %p25242_p6  ;;  %p21748_p11 = por %p21747_p1, %p21746_p3 }
  0xd1   : > { %p21744_p5 = pneg %p21743_p0 }
  0xd3   : > { %p21749_p2 = pnand %p21748_p11, %p21744_p5 }
  0xd5   : > { %21752 = shalt.err (!%p21749_p2)
}
  0xd6   : > { %s21753_s3 = scalar_lea.vmem %s412_s18, 80  ;;  %p25243_p13 = pmov %p25242_p6 }
  0xd7   : > { %p21754_p10 = scmp.ne.s32.totalorder %s412_s18, %s21753_s3  ;;  %s21938_s1 = smov [#allocation12]  }
  0xd8   : > { %s21758_s16 = sshll.u32 %s21938_s1, 4  ;;  %s21759_s16 = int_to_ptr.vmem [resolvable:$false] %s21758_s16 }
  0xd9   : > { %p21756_p4 = pnand %p21754_p10, %p25243_p13  ;;  %s21760_s23 = scalar_lea.vmem %s21759_s16, 160 }
  0xda   : > { %p21761_p7 = scmp.lt.s32.totalorder %s412_s18, %s21759_s16  ;;  %p21762_p12 = scmp.lt.s32.totalorder %s21760_s23, %s21753_s3 }
  0xdb   : > { %p21757_p9 = pneg %p21756_p4 }
  0xdc   : > { %p21763_p6 = por %p21762_p12, %p21761_p7 }
  0xde   : > { %p21764_p0 = pnand %p21763_p6, %p21757_p9 }
  0xe0   : > { %21767 = shalt.err (!%p21764_p0)
}
  0xe1   : > { %s25244_s8 = scalar_lea.sflag [#allocation11], %s22102_s26  ;;  %s20022_s5 = smul.u32 80, %s25287_s22 }
  0xe2   : > { %20295 = dma.hbm_to_vmem [thread:$0]  (!%p25241_p8), %s409_s7, 80, %s412_s18, %s25244_s8  }
  0xe3   : > { %s448_s24 = scalar_lea.vmem [#allocation15], %s22312_s12  ;;  %s20024_s25 = sshll.u32 %s25293_s27, 8 }
  0xe4   : > { %s461_s29 = sshll.u32 %s448_s24, 4  ;;  %s25245_s3 = sld [smem:[#allocation37_spill]]  ;;  %s462_s29 = int_to_ptr.vmem [resolvable:$true] %s461_s29 }
  0xe5   : > { %s25246_s0 = sld [smem:[#allocation39_spill]]  ;;  %p25247_p3 = scmp.ne.s32.totalorder %s25220_s28, 0 }
  0xe7   : > { %p25248_p1 = pneg %p25247_p3 }
  0xea   : > { %s459_s1 = scalar_lea.hbm %s25245_s3, %s20022_s5  ;;  %s21773_s7 = scalar_lea.hbm %s25245_s3, 160 }
  0xeb   : > { %s22342_s9 = scalar_lea.hbm %s25246_s0, %s20024_s25  ;;  %s21768_s2 = scalar_lea.hbm %s459_s1, 80 }
  0xec   : > { %p21769_p5 = scmp.ne.s32.totalorder %s459_s1, %s21768_s2  ;;  %p21774_p2 = scmp.lt.s32.totalorder %s459_s1, %s25245_s3 }
  0xed   : > { %p21775_p10 = scmp.lt.s32.totalorder %s21773_s7, %s21768_s2 }
  0xee   : > { %p21771_p11 = pnand %p21769_p5, %p25248_p1 }
  0xef   : > { %p21776_p13 = por %p21775_p10, %p21774_p2 }
  0xf0   : > { %p21772_p8 = pneg %p21771_p11 }
  0xf2   : > { %p21777_p4 = pnand %p21776_p13, %p21772_p8 }
  0xf4   : > { %21780 = shalt.err (!%p21777_p4)
}
  0xf5   : > { %s21781_s8 = scalar_lea.vmem %s462_s29, 80  ;;  %p25249_p7 = pmov %p25248_p1 }
  0xf6   : > { %p21782_p9 = scmp.ne.s32.totalorder %s462_s29, %s21781_s8  ;;  %s21939_s5 = smov [#allocation15]  }
  0xf7   : > { %s21786_s24 = sshll.u32 %s21939_s5, 4  ;;  %s21787_s24 = int_to_ptr.vmem [resolvable:$false] %s21786_s24 }
  0xf8   : > { %p21784_p12 = pnand %p21782_p9, %p25249_p7  ;;  %s21788_s25 = scalar_lea.vmem %s21787_s24, 160 }
  0xf9   : > { %p21789_p0 = scmp.lt.s32.totalorder %s462_s29, %s21787_s24  ;;  %p21790_p5 = scmp.lt.s32.totalorder %s21788_s25, %s21781_s8 }
  0xfa   : > { %p21785_p6 = pneg %p21784_p12 }
  0xfb   : > { %p21791_p1 = por %p21790_p5, %p21789_p0 }
  0xfd   : > { %p21792_p11 = pnand %p21791_p1, %p21785_p6 }
  0xff   : > { %21795 = shalt.err (!%p21792_p11)
}
 0x100   : > { %s25250_s2 = scalar_lea.sflag [#allocation14], %s22102_s26  ;;  %s496_s19 = scalar_lea.vmem [#allocation18], %s22307_s6 }
 0x101   : > { %20301 = dma.hbm_to_vmem [thread:$0]  (!%p25247_p3), %s459_s1, 80, %s462_s29, %s25250_s2  }
 0x102   : > { %s507_s13 = sshll.u32 %s496_s19, 4  ;;  %s21796_s16 = scalar_lea.hbm %s22342_s9, 256  ;;  %s508_s13 = int_to_ptr.vmem [resolvable:$true] %s507_s13 }
 0x103   : > { %p21797_p8 = scmp.ne.s32.totalorder %s22342_s9, %s21796_s16  ;;  %p25251_p2 = scmp.ne.s32.totalorder %s25233_s30, 0 }
 0x104   : > { %s21801_s28 = scalar_lea.hbm %s25246_s0, 512  ;;  %p21802_p9 = scmp.lt.s32.totalorder %s22342_s9, %s25246_s0 }
 0x105   : > { %p25252_p10 = pneg %p25251_p2  ;;  %p21803_p7 = scmp.lt.s32.totalorder %s21801_s28, %s21796_s16 }
 0x107   : > { %p21799_p13 = pnand %p21797_p8, %p25252_p10  ;;  %p21804_p12 = por %p21803_p7, %p21802_p9 }
 0x109   : > { %p21800_p4 = pneg %p21799_p13 }
 0x10b   : > { %p21805_p3 = pnand %p21804_p12, %p21800_p4 }
 0x10d   : > { %21808 = shalt.err (!%p21805_p3)
}
 0x10e   : > { %s21809_s6 = scalar_lea.vmem %s508_s13, 256  ;;  %p25253_p0 = pmov %p25252_p10 }
 0x10f   : > { %p21810_p6 = scmp.ne.s32.totalorder %s508_s13, %s21809_s6  ;;  %s21940_s29 = smov [#allocation18]  }
 0x110   : > { %s21814_s1 = sshll.u32 %s21940_s29, 4  ;;  %s21815_s1 = int_to_ptr.vmem [resolvable:$false] %s21814_s1 }
 0x111   : > { %p21812_p5 = pnand %p21810_p6, %p25253_p0  ;;  %s21816_s27 = scalar_lea.vmem %s21815_s1, 512 }
 0x112   : > { %p21817_p11 = scmp.lt.s32.totalorder %s508_s13, %s21815_s1  ;;  %p21818_p8 = scmp.lt.s32.totalorder %s21816_s27, %s21809_s6 }
 0x113   : > { %p21813_p1 = pneg %p21812_p5 }
 0x114   : > { %p21819_p10 = por %p21818_p8, %p21817_p11 }
 0x116   : > { %p21820_p13 = pnand %p21819_p10, %p21813_p1 }
 0x118   : > { %21823 = shalt.err (!%p21820_p13)
}
 0x119   : > { %s25254_s18 = scalar_lea.sflag [#allocation17], %s22102_s26  ;;  %s25255_s8 = sld [smem:[#allocation26_spill]] }
 0x11a   : > { %20307 = dma.hbm_to_vmem [thread:$0]  (!%p25251_p2), %s22342_s9, 256, %s508_s13, %s25254_s18  }
 0x11f   : > { %p25256_p4 = scmp.ne.s32.totalorder %s25255_s8, 0 }
 0x120   : > { %p25257_p9 = scmp.eq.s32.totalorder (!%p25256_p4), %s22048_s21, 0 }
 0x121   : > { %516 = sbr.rel (%p25256_p4) target bundleno = 3413 (0xd55), region = 56 }
 0x126   : > { %21865 = dma.done.wait (%p25257_p9), [#allocation6], 32   ;;  %p25258_p7 = pmov %p25257_p9 }
 0x128   : > { %21867 = vsyncadd (%p25258_p7), [#allocation6], 4294967264  ;;  %p25259_p12 = pmov %p25258_p7 }
 0x129   : > { %p25260_p3 = pmov %p25258_p7 }
 0x12a   : > { %21869 = dma.done.wait (%p25259_p12), [#allocation8], 5280  }
 0x12b   : > { %21871 = vsyncadd (%p25260_p3), [#allocation8], 4294962016  ;;  %s25261_s30 = sld [smem:[#allocation25_spill]]  ;;  %s530_s5 = sand.u32 1, %s22048_s21  }
 0x12c   : > { %s25262_s26 = sld [smem:[#allocation28_spill]]  ;;  %s531_s25 = scalar_lea.sflag [#allocation11], %s530_s5 }
 0x131   : > { %s532_s9 = sand.u32 1, %s25261_s30  }
 0x132   : > { %s20250_s24 = smul.u32 3200, %s532_s9  ;;  %p25263_p2 = scmp.ne.s32.totalorder %s25262_s26, 0 }
 0x134   : > { %s22393_s2 = scalar_lea.vmem [#allocation10], %s20250_s24 }
 0x135   : > { %21873 = dma.done.wait (%p25263_p2), %s531_s25, 51280  }
 0x136   : > { %21875 = vsyncadd (%p25263_p2), %s531_s25, 4294916016  ;;  %s25264_s19 = sld [smem:[#allocation24_spill]]  ;;  %s22399_s13 = smul.u32 5, %s532_s9 }
 0x137   : > { %s549_s28 = scalar_lea.sflag [#allocation14], %s530_s5  ;;  %p25265_p6 = scmp.ne.s32.totalorder %s25218_s20, 0 }
 0x138   : > { %s543_s22 = scalar_lea.vmem [#allocation12], %s22399_s13 }
 0x13c   : > { %s550_s16 = sand.u32 1, %s25264_s19  }
 0x13d   : > { %s20252_s23 = smul.u32 3200, %s550_s16 }
 0x13f   : > { %s22403_s12 = scalar_lea.vmem [#allocation13], %s20252_s23 }
 0x140   : > { %21877 = dma.done.wait (%p25265_p6), %s549_s28, 51280  }
 0x141   : > { %21879 = vsyncadd (%p25265_p6), %s549_s28, 4294916016  ;;  %s22409_s7 = smul.u32 5, %s550_s16  ;;  %s568_s6 = sand.u32 1, %s21890_s10  }
 0x142   : > { %s20254_s29 = smul.u32 10240, %s568_s6  ;;  %s567_s27 = scalar_lea.sflag [#allocation17], %s530_s5 }
 0x143   : > { %s561_s1 = scalar_lea.vmem [#allocation15], %s22409_s7  ;;  %p25266_p0 = scmp.ne.s32.totalorder %s25229_s15, 0 }
 0x144   : > { %s22413_s18 = scalar_lea.vmem [#allocation16], %s20254_s29 }
 0x145   : > { %21881 = dma.done.wait (%p25266_p0), %s567_s27, 164096  }
 0x146   : > { %21883 = vsyncadd (%p25266_p0), %s567_s27, 4294803200  ;;  %s17892_s8 = sshll.u32 %s568_s6, 4  ;;  %s17893_s20 = sadd.s32 4294967292, %s22048_s21 }
 0x147   : > { %p669_p5 = scmp.gt.s32.totalorder %s17893_s20, 0  ;;  %s25267_s25 = sld [smem:[#allocation40_spill]] }
 0x148   : > { %s22425_s19 = scalar_lea.vmem [#allocation18], %s17892_s8  ;;  %p25268_p11 = scmp.ne.s32.totalorder %s22048_s21, 0 }
 0x149   : > { %s25297_s20 = smov (!%p669_p5, %s17893_s20), 0 }
 0x14a   : > { %s17894_s30 = sshll.u32 %s25297_s20, 4 }
 0x14b   : > { %p672_p1 = scmp.lt.s32.totalorder %s17894_s30, 31  ;;  %684 = sbr.rel (%p25268_p11) target bundleno = 581 (0x245), region = 96 }
 0x14d   : > { %s25299_s30 = smov (!%p672_p1, %s17894_s30), 31 }
 0x14e   : > { %s17895_s26 = sshll.u32 %s25299_s30, 1 }
 0x14f   : > { %s22423_s5 = scalar_lea.vmem %s25267_s25, %s17895_s26 }
 0x150   : > { %v717_v0 = vld [vmem:[#allocation7 + $0xf8] sm:$0xff]  ;;  %v719_v1 = vld [vmem:[#allocation7 + $0x108] sm:$0xff]  ;;  %v716_v2 = vld [vmem:[#allocation7 + $0xf0] sm:$0xff]  ;;  %vm780_vm0 = vcmask 261120   ;;  %v21941_v17 = vmov 0.0   ;;  %v730_v42 = vlaneseq }
 0x151   : > { %808 = vmatprep.subr.mxu0 %v717_v0  ;;  %879 = vmatprep.subr.mxu1 %v719_v1  ;;  %v718_v3 = vld [vmem:[#allocation7 + $0x100] sm:$0xff]  ;;  %v707_v4 = vld [vmem:[#allocation7 + $0xa8] sm:$0xff]  ;;  %v709_v5 = vld [vmem:[#allocation7 + $0xb8] sm:$0xff] }
 0x152   : > { %809 = vmatpush1.msra.mxu0 %v716_v2  ;;  %880 = vmatpush1.msra.mxu1 %v718_v3  ;;  %v706_v6 = vld [vmem:[#allocation7 + $0xa0] sm:$0xff]  ;;  %v708_v7 = vld [vmem:[#allocation7 + $0xb0] sm:$0xff]  ;;  %v697_v8 = vld [vmem:[#allocation7 + $0x58] sm:$0xff]  ;;  %v731_v43 = vshrl.u32 %v730_v42, 7 }
 0x153   : > { %810 = vmatprep.subr.mxu0 %v707_v4  ;;  %881 = vmatprep.subr.mxu1 %v709_v5  ;;  %v699_v9 = vld [vmem:[#allocation7 + $0x68] sm:$0xff]  ;;  %v696_v10 = vld [vmem:[#allocation7 + $0x50] sm:$0xff]  ;;  %v698_v11 = vld [vmem:[#allocation7 + $0x60] sm:$0xff] }
 0x154   : > { %811 = vmatpush1.msra.mxu0 %v706_v6  ;;  %882 = vmatpush1.msra.mxu1 %v708_v7  ;;  %v687_v12 = vld [vmem:[#allocation7 + $0x8] sm:$0xff]  ;;  %v689_v13 = vld [vmem:[#allocation7 + $0x18] sm:$0xff]  ;;  %v686_v14 = vld [vmem:[#allocation7] sm:$0xff]  ;;  %v732_v44 = vsub.s32 0, %v731_v43  ;;  %v740_v46 = vsub.s32 2, %v731_v43  ;;  %v736_v47 = vsub.s32 1, %v731_v43 }
 0x155   : > { %812 = vmatprep.subr.mxu0 %v697_v8  ;;  %883 = vmatprep.subr.mxu1 %v699_v9  ;;  %v688_v15 = vld [vmem:[#allocation7 + $0x10] sm:$0xff]  ;;  %v685_v16 = vld [vmem:[#allocation5] sm:$0x3]  ;;  %v723_v19 = vld [vmem:[#allocation7 + $0x128] sm:$0xff]  ;;  %v744_v48 = vsub.s32 3, %v731_v43  ;;  %v748_v60 = vsub.s32 4, %v731_v43 }
 0x156   : > { %813 = vmatpush1.msra.mxu0 %v696_v10  ;;  %884 = vmatpush1.msra.mxu1 %v698_v11  ;;  %v721_v18 = vld [vmem:[#allocation7 + $0x118] sm:$0xff]  ;;  %v720_v20 = vld [vmem:[#allocation7 + $0x110] sm:$0xff]  ;;  %v722_v21 = vld [vmem:[#allocation7 + $0x120] sm:$0xff]  ;;  %v756_v61 = vsub.s32 6, %v731_v43  ;;  %v752_v63 = vsub.s32 5, %v731_v43  ;;  %v760_v0 = vsub.s32 7, %v731_v43 }
 0x157   : > { %814 = vmatprep.subr.mxu0 %v687_v12  ;;  %885 = vmatprep.subr.mxu1 %v689_v13  ;;  %v711_v22 = vld [vmem:[#allocation7 + $0xc8] sm:$0xff]  ;;  %v713_v23 = vld [vmem:[#allocation7 + $0xd8] sm:$0xff]  ;;  %v710_v24 = vld [vmem:[#allocation7 + $0xc0] sm:$0xff] }
 0x158   : > { %815 = vmatpush1.msra.mxu0 %v686_v14  ;;  %848 = vmatprep.mubr.f32.mxu0 %v21941_v17  ;;  %v712_v25 = vld [vmem:[#allocation7 + $0xd0] sm:$0xff]  ;;  %v701_v26 = vld [vmem:[#allocation7 + $0x78] sm:$0xff]  ;;  %v703_v27 = vld [vmem:[#allocation7 + $0x88] sm:$0xff]  ;;  %v21942_v14 = vmov 1966171168  }
 0x159   : > { %886 = vmatpush1.msra.mxu1 %v688_v15  ;;  %919 = vmatprep.mubr.f32.mxu1 %v21941_v17  ;;  %v700_v28 = vld [vmem:[#allocation7 + $0x70] sm:$0xff]  ;;  %v702_v29 = vld [vmem:[#allocation7 + $0x80] sm:$0xff]  ;;  %v691_v30 = vld [vmem:[#allocation7 + $0x28] sm:$0xff]  ;;  %v1174_v15 = vunpack.c.l.s4 %v21942_v14 }
 0x15a   : > { %17897 = vmatmul.mubr.msk.f32.vlgmr.msra.gmra.mxu0 %vm780_vm0, %v685_v16  ;;  %17898 = vmatmul.mubr.msk.f32.vlgmr.msra.gmra.mxu1 %vm780_vm0, %v685_v16  ;;  %v693_v31 = vld [vmem:[#allocation7 + $0x38] sm:$0xff]  ;;  %v690_v32 = vld [vmem:[#allocation7 + $0x20] sm:$0xff]  ;;  %v692_v33 = vld [vmem:[#allocation7 + $0x30] sm:$0xff] }
 0x15b   : > { %950 = vmatprep.subr.mxu0 %v721_v18  ;;  %1021 = vmatprep.subr.mxu1 %v723_v19  ;;  %v725_v34 = vld [vmem:[#allocation7 + $0x138] sm:$0xff]  ;;  %v724_v35 = vld [vmem:[#allocation7 + $0x130] sm:$0xff]  ;;  %v715_v36 = vld [vmem:[#allocation7 + $0xe8] sm:$0xff] }
 0x15c   : > { %951 = vmatpush1.msra.mxu0 %v720_v20  ;;  %1022 = vmatpush1.msra.mxu1 %v722_v21  ;;  %v714_v37 = vld [vmem:[#allocation7 + $0xe0] sm:$0xff]  ;;  %v705_v38 = vld [vmem:[#allocation7 + $0x98] sm:$0xff]  ;;  %v704_v39 = vld [vmem:[#allocation7 + $0x90] sm:$0xff] }
 0x15d   : > { %952 = vmatprep.subr.mxu0 %v711_v22  ;;  %1023 = vmatprep.subr.mxu1 %v713_v23  ;;  %v695_v40 = vld [vmem:[#allocation7 + $0x48] sm:$0xff]  ;;  %v694_v41 = vld [vmem:[#allocation7 + $0x40] sm:$0xff]  ;;  %v1175_v22 = vunpack.c.0.s8 %v1174_v15 }
 0x15e   : > { %953 = vmatpush1.msra.mxu0 %v710_v24  ;;  %1024 = vmatpush1.msra.mxu1 %v712_v25  ;;  %v726_v45 = vld [vmem:[#allocation9] sm:$0xff]  ;;  %v727_v13 = vld [vmem:[#allocation9 + $0x8] sm:$0x3] }
 0x15f   : > { %954 = vmatprep.subr.mxu0 %v701_v26  ;;  %1025 = vmatprep.subr.mxu1 %v703_v27  ;;  %v733_v49 = vrot.slane %v726_v45, %v732_v44  ;;  %v741_v50 = vrot.slane %v726_v45, %v740_v46  ;;  %v737_v51 = vrot.slane %v726_v45, %v736_v47 }
 0x160   : > { %955 = vmatpush1.msra.mxu0 %v700_v28  ;;  %1026 = vmatpush1.msra.mxu1 %v702_v29  ;;  %v745_v54 = vrot.slane %v726_v45, %v744_v48  ;;  %v749_v1 = vrot.slane %v726_v45, %v748_v60  ;;  %v757_v2 = vrot.slane %v726_v45, %v756_v61 }
 0x161   : > { %956 = vmatprep.subr.mxu0 %v691_v30  ;;  %1027 = vmatprep.subr.mxu1 %v693_v31  ;;  %v753_v3 = vrot.slane %v726_v45, %v752_v63  ;;  %v761_v4 = vrot.slane %v726_v45, %v760_v0  ;;  %v769_v18 = vrot.slane %v727_v13, %v736_v47 }
 0x162   : > { %957 = vmatpush1.msra.mxu0 %v690_v32  ;;  %990 = vmatprep.mubr.f32.mxu0 %v21941_v17  ;;  %v1178_v28 = vsub.s32 %v1175_v22, %v731_v43 }
 0x163   : > { %1028 = vmatpush1.msra.mxu1 %v692_v33  ;;  %1061 = vmatprep.mubr.f32.mxu1 %v21941_v17 }
 0x164   : > { %17899 = vmatmul.mubr.msk.f32.vlgmr.msra.gmra.mxu0 %vm780_vm0, %v685_v16  ;;  %17900 = vmatmul.mubr.msk.f32.vlgmr.msra.gmra.mxu1 %vm780_vm0, %v685_v16 }
 0x165   : > { %1092 = vmatprep.subr.mxu0 %v725_v34  ;;  %1132 = vmatprep.mubr.f32.mxu0 %v21941_v17 }
 0x166   : > { %1093 = vmatpush1.msra.mxu0 %v724_v35 }
 0x167   : > { %1094 = vmatprep.subr.mxu0 %v715_v36 }
 0x168   : > { %1095 = vmatpush1.msra.mxu0 %v714_v37 }
 0x169   : > { %1096 = vmatprep.subr.mxu0 %v705_v38 }
 0x16a   : > { %1097 = vmatpush1.msra.mxu0 %v704_v39 }
 0x16b   : > { %1098 = vmatprep.subr.mxu0 %v695_v40 }
 0x16c   : > { %1099 = vmatpush1.msra.mxu0 %v694_v41 }
 0x16d   : > { %17901 = vmatmul.mubr.msk.f32.vlgmr.msra.gmra.mxu0 %vm780_vm0, %v685_v16  ;;  %v765_v16 = vrot.slane %v727_v13, %v732_v44 }
 0x21a   : > { %v850_v52 = vpop.f32.mrf.mxu0  ;;  %v921_v53 = vpop.f32.mrf.mxu1 }
 0x21b   : > { %v851_v55 = vadd.f32 %v850_v52, %v733_v49  ;;  %v922_v56 = vadd.f32 %v921_v53, %v741_v50 }
 0x21c   : > { %v852_v57 = vpop.f32.mrf.mxu0  ;;  %v923_v58 = vpop.f32.mrf.mxu1 }
 0x21d   : > { %v853_v59 = vadd.f32 %v852_v57, %v737_v51  ;;  %v924_v62 = vadd.f32 %v923_v58, %v745_v54  ;;  %20412 = vtanh.f32 %v851_v55 }
 0x21e   : > { %20414 = vtanh.f32 %v922_v56 }
 0x21f   : > { %20416 = vtanh.f32 %v853_v59 }
 0x220   : > { %20418 = vtanh.f32 %v924_v62 }
 0x224   : > { %v992_v5 = vpop.f32.mrf.mxu0  ;;  %v1063_v6 = vpop.f32.mrf.mxu1 }
 0x225   : > { %v993_v7 = vadd.f32 %v992_v5, %v749_v1  ;;  %v1064_v8 = vadd.f32 %v1063_v6, %v757_v2 }
 0x226   : > { %v994_v9 = vpop.f32.mrf.mxu0  ;;  %v1065_v10 = vpop.f32.mrf.mxu1 }
 0x227   : > { %20420 = vtanh.f32 %v993_v7  ;;  %v995_v11 = vadd.f32 %v994_v9, %v753_v3  ;;  %v1066_v12 = vadd.f32 %v1065_v10, %v761_v4 }
 0x228   : > { %20422 = vtanh.f32 %v1064_v8 }
 0x229   : > { %20424 = vtanh.f32 %v995_v11 }
 0x22a   : > { %20426 = vtanh.f32 %v1066_v12  ;;  %v20413_v17 = vpop.eup %20412 }
 0x22b   : > { %v20415_v19 = vpop.eup %20414 }
 0x22c   : > { %v20417_v21 = vpop.eup %20416 }
 0x22d   : > { %v1134_v20 = vpop.f32.mrf.mxu0  ;;  %v20419_v24 = vpop.eup %20418  ;;  %v17902_v27 = vpack.c.bf16 %v20417_v21, %v20413_v17 }
 0x22e   : > { %v1135_v23 = vadd.f32 %v1134_v20, %v765_v16  ;;  %v17903_v29 = vpack.c.bf16 %v20419_v24, %v20415_v19 }
 0x22f   : > { %v1136_v25 = vpop.f32.mrf.mxu0  ;;  %v1179_v33 = vrot.slane %v17902_v27, %v1178_v28 }
 0x230   : > { %v1137_v26 = vadd.f32 %v1136_v25, %v769_v18  ;;  %20428 = vtanh.f32 %v1135_v23  ;;  %v1186_v34 = vrot.slane %v17903_v29, %v1178_v28 }
 0x232   : > { %20430 = vtanh.f32 %v1137_v26  ;;  %v1201_v39 = vcombine.low %v1179_v33, %v1186_v34 }
 0x234   : > { %v20421_v30 = vpop.eup %20420  ;;  %v1209_v44 = vrot.slane %v1201_v39, %v1178_v28 }
 0x235   : > { %v20423_v31 = vpop.eup %20422 }
 0x236   : > { %v20425_v32 = vpop.eup %20424 }
 0x237   : > { %v20427_v35 = vpop.eup %20426  ;;  %v17904_v36 = vpack.c.bf16 %v20425_v32, %v20421_v30 }
 0x238   : > { %v17905_v37 = vpack.c.bf16 %v20427_v35, %v20423_v31 }
 0x239   : > { %v1193_v38 = vrot.slane %v17904_v36, %v1178_v28 }
 0x23a   : > { %v1200_v40 = vrot.slane %v17905_v37, %v1178_v28 }
 0x23c   : > { %v1202_v41 = vcombine.low %v1193_v38, %v1200_v40 }
 0x23d   : > { %v20429_v42 = vpop.eup %20428 }
 0x23e   : > { %v1216_v45 = vrot.slane %v1202_v41, %v1178_v28 }
 0x23f   : > { %v20431_v46 = vpop.eup %20430 }
 0x240   : > { %v1217_v47 = vcombine.low %v1209_v44, %v1216_v45  ;;  %v17906_v43 = vpack.c.bf16 %v20431_v46, %v20429_v42 }
 0x242   : > { %1235 = vst [vmem:[#allocation2] sm:$0xff] %v1217_v47  ;;  %v1225_v48 = vrot.slane %v17906_v43, %v1178_v28 }
 0x244   : > { %17907 = vst.sshfl [vmem:[#allocation2 + $0x8] sm:$0x5 pattern:$0x73625140] %v1225_v48 }
 0x245 PF: > { %p17908_p8 = scmp.ge.s32.totalorder %s22048_s21, 2 }
 0x246   : > { %p25269_p10 = scmp.ne.s32.totalorder (!%p17908_p8), %s22048_s21, 0 }
 0x247   : > { %1240 = sbr.rel (%p17908_p8) target bundleno = 1248 (0x4e0), region = 100 }
 0x24c   : > { %v20432_v49 = vld [vmem:[%s22393_s2 + $0x11c] ss:$20 sps:$4 sm:$0xff]   ;;  %v20434_v50 = vld [vmem:[%s22393_s2 + $0x118] ss:$20 sps:$4 sm:$0xff]   ;;  %v20438_v53 = vld [vmem:[%s22393_s2 + $0xf4] ss:$20 sps:$4 sm:$0xff]   ;;  %v1725_v20 = vlaneseq }
 0x24d   : > { %3913 = vmatprep.subr.bf16.mxu0 %v20432_v49  ;;  %v20435_v51 = vld [vmem:[%s22393_s2 + $0x39c] ss:$20 sps:$4 sm:$0xff]   ;;  %v20437_v52 = vld [vmem:[%s22393_s2 + $0x398] ss:$20 sps:$4 sm:$0xff]   ;;  %v20441_v55 = vld [vmem:[%s22393_s2 + $0x374] ss:$20 sps:$4 sm:$0xff]  }
 0x24e   : > { %3914 = vmatpush1.bf16.msra.mxu0 %v20434_v50  ;;  %v20440_v54 = vld [vmem:[%s22393_s2 + $0xf0] ss:$20 sps:$4 sm:$0xff]   ;;  %3954 = vmatprep.subr.bf16.mxu1 %v20435_v51  ;;  %v20444_v57 = vld [vmem:[%s22393_s2 + $0xcc] ss:$20 sps:$4 sm:$0xff]   ;;  %v20446_v58 = vld [vmem:[%s22393_s2 + $0xc8] ss:$20 sps:$4 sm:$0xff]  }
 0x24f   : > { %3955 = vmatpush1.bf16.msra.mxu1 %v20437_v52  ;;  %3915 = vmatprep.subr.bf16.mxu0 %v20438_v53  ;;  %v20443_v56 = vld [vmem:[%s22393_s2 + $0x370] ss:$20 sps:$4 sm:$0xff]   ;;  %v20447_v59 = vld [vmem:[%s22393_s2 + $0x34c] ss:$20 sps:$4 sm:$0xff]   ;;  %v20449_v61 = vld [vmem:[%s22393_s2 + $0x348] ss:$20 sps:$4 sm:$0xff]  }
 0x250   : > { %3956 = vmatprep.subr.bf16.mxu1 %v20441_v55  ;;  %v20450_v60 = vld [vmem:[%s22393_s2 + $0xa4] ss:$20 sps:$4 sm:$0xff]   ;;  %v20452_v63 = vld [vmem:[%s22393_s2 + $0xa0] ss:$20 sps:$4 sm:$0xff]   ;;  %v20456_v0 = vld [vmem:[%s22393_s2 + $0x7c] ss:$20 sps:$4 sm:$0xff]  }
 0x251   : > { %v20453_v62 = vld [vmem:[%s22393_s2 + $0x324] ss:$20 sps:$4 sm:$0xff]   ;;  %v20455_v1 = vld [vmem:[%s22393_s2 + $0x320] ss:$20 sps:$4 sm:$0xff]   ;;  %v20459_v2 = vld [vmem:[%s22393_s2 + $0x2fc] ss:$20 sps:$4 sm:$0xff]  }
 0x252   : > { %3916 = vmatpush1.bf16.msra.mxu0 %v20440_v54  ;;  %v20458_v3 = vld [vmem:[%s22393_s2 + $0x78] ss:$20 sps:$4 sm:$0xff]   ;;  %v20462_v4 = vld [vmem:[%s22393_s2 + $0x54] ss:$20 sps:$4 sm:$0xff]   ;;  %v20464_v7 = vld [vmem:[%s22393_s2 + $0x50] ss:$20 sps:$4 sm:$0xff]  }
 0x253   : > { %3917 = vmatprep.subr.bf16.mxu0 %v20444_v57  ;;  %3957 = vmatpush1.bf16.msra.mxu1 %v20443_v56  ;;  %v20461_v5 = vld [vmem:[%s22393_s2 + $0x2f8] ss:$20 sps:$4 sm:$0xff]   ;;  %v20465_v6 = vld [vmem:[%s22393_s2 + $0x2d4] ss:$20 sps:$4 sm:$0xff]   ;;  %v20467_v9 = vld [vmem:[%s22393_s2 + $0x2d0] ss:$20 sps:$4 sm:$0xff]  }
 0x254   : > { %3958 = vmatprep.subr.bf16.mxu1 %v20447_v59  ;;  %v20468_v8 = vld [vmem:[%s22393_s2 + $0x2c] ss:$20 sps:$4 sm:$0xff]   ;;  %v20470_v11 = vld [vmem:[%s22393_s2 + $0x28] ss:$20 sps:$4 sm:$0xff]   ;;  %v20474_v12 = vld [vmem:[%s22393_s2 + $0x4] ss:$20 sps:$4 sm:$0xff]  }
 0x255   : > { %v20471_v10 = vld [vmem:[%s22393_s2 + $0x2ac] ss:$20 sps:$4 sm:$0xff]   ;;  %v20473_v13 = vld [vmem:[%s22393_s2 + $0x2a8] ss:$20 sps:$4 sm:$0xff]   ;;  %v20477_v14 = vld [vmem:[%s22393_s2 + $0x284] ss:$20 sps:$4 sm:$0xff]  }
 0x256   : > { %3918 = vmatpush1.bf16.msra.mxu0 %v20446_v58  ;;  %v20476_v15 = vld [vmem:[%s22393_s2] ss:$20 sps:$4 sm:$0xff]   ;;  %v20480_v16 = vld [vmem:[%s22393_s2 + $0x25c] ss:$20 sps:$4 sm:$0xff]   ;;  %v20482_v19 = vld [vmem:[%s22393_s2 + $0x258] ss:$20 sps:$4 sm:$0xff]  }
 0x257   : > { %3919 = vmatprep.subr.bf16.mxu0 %v20450_v60  ;;  %3959 = vmatpush1.bf16.msra.mxu1 %v20449_v61  ;;  %v20479_v17 = vld [vmem:[%s22393_s2 + $0x280] ss:$20 sps:$4 sm:$0xff]   ;;  %v20483_v18 = vld [vmem:[%s22393_s2 + $0x4dc] ss:$20 sps:$4 sm:$0xff]   ;;  %v21943_v21 = vmov 1966171168  }
 0x258   : > { %3960 = vmatprep.subr.bf16.mxu1 %v20453_v62  ;;  %v1754_v22 = vunpack.c.l.s4 %v21943_v21  ;;  %v20486_v23 = vld [vmem:[%s22393_s2 + $0x234] ss:$20 sps:$4 sm:$0xff]   ;;  %v20485_v24 = vld [vmem:[%s22393_s2 + $0x4d8] ss:$20 sps:$4 sm:$0xff]   ;;  %v20488_v26 = vld [vmem:[%s22393_s2 + $0x230] ss:$20 sps:$4 sm:$0xff]  }
 0x259   : > { %v20489_v25 = vld [vmem:[%s22393_s2 + $0x4b4] ss:$20 sps:$4 sm:$0xff]   ;;  %v22476_v27 = vshrl.u32 %v1725_v20, 7  ;;  %v20492_v29 = vld [vmem:[%s22393_s2 + $0x20c] ss:$20 sps:$4 sm:$0xff]  }
 0x25a   : > { %3920 = vmatpush1.bf16.msra.mxu0 %v20452_v63  ;;  %v1755_v28 = vunpack.c.0.s8 %v1754_v22  ;;  %v20491_v30 = vld [vmem:[%s22393_s2 + $0x4b0] ss:$20 sps:$4 sm:$0xff]   ;;  %v20495_v31 = vld [vmem:[%s22393_s2 + $0x48c] ss:$20 sps:$4 sm:$0xff]   ;;  %v20494_v32 = vld [vmem:[%s22393_s2 + $0x208] ss:$20 sps:$4 sm:$0xff]  }
 0x25b   : > { %3921 = vmatprep.subr.bf16.mxu0 %v20456_v0  ;;  %3961 = vmatpush1.bf16.msra.mxu1 %v20455_v1  ;;  %v20498_v34 = vld [vmem:[%s22393_s2 + $0x1e4] ss:$20 sps:$4 sm:$0xff]   ;;  %v20497_v35 = vld [vmem:[%s22393_s2 + $0x488] ss:$20 sps:$4 sm:$0xff]   ;;  %v20500_v38 = vld [vmem:[%s22393_s2 + $0x1e0] ss:$20 sps:$4 sm:$0xff]  }
 0x25c   : > { %3962 = vmatprep.subr.bf16.mxu1 %v20459_v2  ;;  %v22483_v33 = vsub.s32 %v1755_v28, %v22476_v27  ;;  %v20501_v36 = vld [vmem:[%s22393_s2 + $0x464] ss:$20 sps:$4 sm:$0xff]   ;;  %v20504_v40 = vld [vmem:[%s22393_s2 + $0x1bc] ss:$20 sps:$4 sm:$0xff]   ;;  %v20503_v41 = vld [vmem:[%s22393_s2 + $0x460] ss:$20 sps:$4 sm:$0xff]  }
 0x25d   : > { %v1241_v37 = vld [vmem:[#allocation2] sm:$0xff]  ;;  %v20512_v51 = vld [vmem:[%s22393_s2 + $0x190] ss:$20 sps:$4 sm:$0xff]   ;;  %v20516_v52 = vld [vmem:[%s22393_s2 + $0x16c] ss:$20 sps:$4 sm:$0xff]  }
 0x25e   : > { %3922 = vmatpush1.bf16.msra.mxu0 %v20458_v3  ;;  %v1759_v39 = vrot.slane %v1241_v37, %v22483_v33  ;;  %v20507_v44 = vld [vmem:[%s22393_s2 + $0x43c] ss:$20 sps:$4 sm:$0xff]   ;;  %v20506_v45 = vld [vmem:[%s22393_s2 + $0x1b8] ss:$20 sps:$4 sm:$0xff]   ;;  %v20510_v47 = vld [vmem:[%s22393_s2 + $0x194] ss:$20 sps:$4 sm:$0xff]   ;;  %v1752_v49 = vcombine.high %v1241_v37, %v1241_v37 }
 0x25f   : > { %3923 = vmatprep.subr.bf16.mxu0 %v20462_v4  ;;  %3963 = vmatpush1.bf16.msra.mxu1 %v20461_v5  ;;  %v20509_v43 = vld [vmem:[%s22393_s2 + $0x438] ss:$20 sps:$4 sm:$0xff]   ;;  %v20513_v50 = vld [vmem:[%s22393_s2 + $0x414] ss:$20 sps:$4 sm:$0xff]   ;;  %v20515_v53 = vld [vmem:[%s22393_s2 + $0x410] ss:$20 sps:$4 sm:$0xff]  }
 0x260   : > { %3964 = vmatprep.subr.bf16.mxu1 %v20465_v6  ;;  %v1767_v42 = vcombine.high %v1759_v39, %v1759_v39  ;;  %v22510_v54 = vrot.slane %v1752_v49, %v22483_v33  ;;  %v20519_v55 = vld [vmem:[%s22393_s2 + $0x3ec] ss:$20 sps:$4 sm:$0xff]   ;;  %v20518_v56 = vld [vmem:[%s22393_s2 + $0x168] ss:$20 sps:$4 sm:$0xff]   ;;  %v20522_v57 = vld [vmem:[%s22393_s2 + $0x144] ss:$20 sps:$4 sm:$0xff]   ;;  %v22521_v62 = vrot.slane %v1759_v39, %v22483_v33 }
 0x261   : > { %v20521_v58 = vld [vmem:[%s22393_s2 + $0x3e8] ss:$20 sps:$4 sm:$0xff]   ;;  %v20525_v60 = vld [vmem:[%s22393_s2 + $0x3c4] ss:$20 sps:$4 sm:$0xff]   ;;  %v20524_v61 = vld [vmem:[%s22393_s2 + $0x140] ss:$20 sps:$4 sm:$0xff]  }
 0x262   : > { %3924 = vmatpush1.bf16.msra.mxu0 %v20464_v7  ;;  %v22495_v46 = vrot.slane %v1767_v42, %v22483_v33  ;;  %v1768_v59 = vcombine.high %v22510_v54, %v22510_v54  ;;  %v20530_v63 = vld [vmem:[%s22393_s2 + $0x61c] ss:$20 sps:$4 sm:$0xff]   ;;  %v20527_v0 = vld [vmem:[%s22393_s2 + $0x3c0] ss:$20 sps:$4 sm:$0xff]   ;;  %v20528_v3 = vld [vmem:[%s22393_s2 + $0x618] ss:$20 sps:$4 sm:$0xff]   ;;  %v22532_v4 = vcombine.high %v22521_v62, %v22521_v62 }
 0x263   : > { %3925 = vmatprep.subr.bf16.mxu0 %v20468_v8  ;;  %3965 = vmatpush1.bf16.msra.mxu1 %v20467_v9  ;;  %v20533_v2 = vld [vmem:[%s22393_s2 + $0x89c] ss:$20 sps:$4 sm:$0xff]   ;;  %v20536_v5 = vld [vmem:[%s22393_s2 + $0x5f4] ss:$20 sps:$4 sm:$0xff]   ;;  %v20531_v6 = vld [vmem:[%s22393_s2 + $0x898] ss:$20 sps:$4 sm:$0xff]  }
 0x264   : > { %3966 = vmatprep.subr.bf16.mxu1 %v20471_v10  ;;  %3945 = vmatprep.mubr.bf16.mxu0 %v22495_v46  ;;  %v22502_v48 = vcombine.high %v22495_v46, %v22495_v46  ;;  %v22526_v1 = vrot.slane %v1768_v59, %v22483_v33  ;;  %v20539_v8 = vld [vmem:[%s22393_s2 + $0x874] ss:$20 sps:$4 sm:$0xff]   ;;  %v20534_v9 = vld [vmem:[%s22393_s2 + $0x5f0] ss:$20 sps:$4 sm:$0xff]   ;;  %v20542_v10 = vld [vmem:[%s22393_s2 + $0x5cc] ss:$20 sps:$4 sm:$0xff]  }
 0x265   : > { %v20557_v20 = vld [vmem:[%s22393_s2 + $0x7fc] ss:$20 sps:$4 sm:$0xff]   ;;  %v20552_v21 = vld [vmem:[%s22393_s2 + $0x578] ss:$20 sps:$4 sm:$0xff]   ;;  %v20560_v22 = vld [vmem:[%s22393_s2 + $0x554] ss:$20 sps:$4 sm:$0xff]  }
 0x266   : > { %3926 = vmatpush1.bf16.msra.mxu0 %v20470_v11  ;;  %3986 = vmatprep.mubr.bf16.mxu1 %v22502_v48  ;;  %v22538_v7 = vcombine.high %v22526_v1, %v22526_v1  ;;  %v20537_v11 = vld [vmem:[%s22393_s2 + $0x870] ss:$20 sps:$4 sm:$0xff]   ;;  %v20573_v37 = vld [vmem:[%s22393_s2 + $0x780] ss:$20 sps:$4 sm:$0xff]   ;;  %v20576_v39 = vld [vmem:[%s22393_s2 + $0x758] ss:$20 sps:$4 sm:$0xff]  }
 0x267   : > { %3927 = vmatprep.subr.bf16.mxu0 %v20474_v12  ;;  %3967 = vmatpush1.bf16.msra.mxu1 %v20473_v13  ;;  %v20545_v12 = vld [vmem:[%s22393_s2 + $0x84c] ss:$20 sps:$4 sm:$0xff]   ;;  %v20540_v13 = vld [vmem:[%s22393_s2 + $0x5c8] ss:$20 sps:$4 sm:$0xff]   ;;  %v20561_v28 = vld [vmem:[%s22393_s2 + $0x7d0] ss:$20 sps:$4 sm:$0xff]  }
 0x268   : > { %3968 = vmatprep.subr.bf16.mxu1 %v20477_v14  ;;  %v20548_v14 = vld [vmem:[%s22393_s2 + $0x5a4] ss:$20 sps:$4 sm:$0xff]   ;;  %v20587_v42 = vld [vmem:[%s22393_s2 + $0x9b4] ss:$20 sps:$4 sm:$0xff]  }
 0x269   : > { %v20588_v49 = vld [vmem:[%s22393_s2 + $0x708] ss:$20 sps:$4 sm:$0xff]  }
 0x26a   : > { %3928 = vmatpush1.bf16.msra.mxu0 %v20476_v15  ;;  %v20543_v15 = vld [vmem:[%s22393_s2 + $0x848] ss:$20 sps:$4 sm:$0xff]  }
 0x26b   : > { %3929 = vmatprep.subr.bf16.mxu0 %v20480_v16  ;;  %3969 = vmatpush1.bf16.msra.mxu1 %v20479_v17  ;;  %v20551_v16 = vld [vmem:[%s22393_s2 + $0x824] ss:$20 sps:$4 sm:$0xff]   ;;  %v20546_v17 = vld [vmem:[%s22393_s2 + $0x5a0] ss:$20 sps:$4 sm:$0xff]  }
 0x26c   : > { %3970 = vmatprep.subr.bf16.mxu1 %v20483_v18  ;;  %v20554_v18 = vld [vmem:[%s22393_s2 + $0x57c] ss:$20 sps:$4 sm:$0xff]   ;;  %v20608_v59 = vld [vmem:[%s22393_s2 + $0x694] ss:$20 sps:$4 sm:$0xff]  }
 0x26e   : > { %3930 = vmatpush2.bf16.msra.mxu0 %v20482_v19  ;;  %v20549_v19 = vld [vmem:[%s22393_s2 + $0x820] ss:$20 sps:$4 sm:$0xff]  }
 0x26f   : > { %3931 = vmatprep.subr.bf16.mxu0 %v20486_v23  ;;  %3971 = vmatpush2.bf16.msra.mxu1 %v20485_v24  ;;  %v20555_v23 = vld [vmem:[%s22393_s2 + $0x7f8] ss:$20 sps:$4 sm:$0xff]   ;;  %v20563_v24 = vld [vmem:[%s22393_s2 + $0x7d4] ss:$20 sps:$4 sm:$0xff]  }
 0x270   : > { %3972 = vmatprep.subr.bf16.mxu1 %v20489_v25  ;;  %v20558_v25 = vld [vmem:[%s22393_s2 + $0x550] ss:$20 sps:$4 sm:$0xff]  }
 0x272   : > { %3932 = vmatpush2.bf16.msra.mxu0 %v20488_v26  ;;  %v20566_v26 = vld [vmem:[%s22393_s2 + $0x52c] ss:$20 sps:$4 sm:$0xff]  }
 0x273   : > { %3933 = vmatprep.subr.bf16.mxu0 %v20492_v29  ;;  %3973 = vmatpush2.bf16.msra.mxu1 %v20491_v30  ;;  %v20569_v29 = vld [vmem:[%s22393_s2 + $0x7ac] ss:$20 sps:$4 sm:$0xff]   ;;  %v20564_v30 = vld [vmem:[%s22393_s2 + $0x528] ss:$20 sps:$4 sm:$0xff]  }
 0x274   : > { %3974 = vmatprep.subr.bf16.mxu1 %v20495_v31  ;;  %v20572_v31 = vld [vmem:[%s22393_s2 + $0x504] ss:$20 sps:$4 sm:$0xff]  }
 0x276   : > { %3934 = vmatpush2.bf16.msra.mxu0 %v20494_v32  ;;  %v20567_v32 = vld [vmem:[%s22393_s2 + $0x7a8] ss:$20 sps:$4 sm:$0xff]  }
 0x277   : > { %3935 = vmatprep.subr.bf16.mxu0 %v20498_v34  ;;  %3975 = vmatpush2.bf16.msra.mxu1 %v20497_v35  ;;  %v20575_v34 = vld [vmem:[%s22393_s2 + $0x784] ss:$20 sps:$4 sm:$0xff]   ;;  %v20570_v35 = vld [vmem:[%s22393_s2 + $0x500] ss:$20 sps:$4 sm:$0xff]  }
 0x278   : > { %3976 = vmatprep.subr.bf16.mxu1 %v20501_v36  ;;  %v20578_v36 = vld [vmem:[%s22393_s2 + $0x75c] ss:$20 sps:$4 sm:$0xff]  }
 0x27a   : > { %3936 = vmatpush2.bf16.msra.mxu0 %v20500_v38  ;;  %v20581_v38 = vld [vmem:[%s22393_s2 + $0x9dc] ss:$20 sps:$4 sm:$0xff]  }
 0x27b   : > { %3937 = vmatprep.subr.bf16.mxu0 %v20504_v40  ;;  %3977 = vmatpush2.bf16.msra.mxu1 %v20503_v41  ;;  %v20584_v40 = vld [vmem:[%s22393_s2 + $0x734] ss:$20 sps:$4 sm:$0xff]   ;;  %v20579_v41 = vld [vmem:[%s22393_s2 + $0x9d8] ss:$20 sps:$4 sm:$0xff]  }
 0x27c   : > { %3978 = vmatprep.subr.bf16.mxu1 %v20507_v44  ;;  %v20582_v44 = vld [vmem:[%s22393_s2 + $0x730] ss:$20 sps:$4 sm:$0xff]  }
 0x27e   : > { %3938 = vmatpush2.bf16.msra.mxu0 %v20506_v45  ;;  %v20590_v45 = vld [vmem:[%s22393_s2 + $0x70c] ss:$20 sps:$4 sm:$0xff]  }
 0x27f   : > { %3939 = vmatprep.subr.bf16.mxu0 %v20510_v47  ;;  %3979 = vmatpush2.bf16.msra.mxu1 %v20509_v43  ;;  %v20585_v47 = vld [vmem:[%s22393_s2 + $0x9b0] ss:$20 sps:$4 sm:$0xff]   ;;  %v20593_v43 = vld [vmem:[%s22393_s2 + $0x98c] ss:$20 sps:$4 sm:$0xff]  }
 0x280   : > { %3980 = vmatprep.subr.bf16.mxu1 %v20513_v50  ;;  %v20596_v50 = vld [vmem:[%s22393_s2 + $0x6e4] ss:$20 sps:$4 sm:$0xff]  }
 0x282   : > { %3940 = vmatpush2.bf16.msra.mxu0 %v20512_v51  ;;  %v20591_v51 = vld [vmem:[%s22393_s2 + $0x988] ss:$20 sps:$4 sm:$0xff]  }
 0x283   : > { %3941 = vmatprep.subr.bf16.mxu0 %v20516_v52  ;;  %3981 = vmatpush2.bf16.msra.mxu1 %v20515_v53  ;;  %v20599_v52 = vld [vmem:[%s22393_s2 + $0x964] ss:$20 sps:$4 sm:$0xff]   ;;  %v20594_v53 = vld [vmem:[%s22393_s2 + $0x6e0] ss:$20 sps:$4 sm:$0xff]  }
 0x284   : > { %3982 = vmatprep.subr.bf16.mxu1 %v20519_v55  ;;  %v20602_v55 = vld [vmem:[%s22393_s2 + $0x6bc] ss:$20 sps:$4 sm:$0xff]  }
 0x286   : > { %3942 = vmatpush2.bf16.msra.mxu0 %v20518_v56  ;;  %v20597_v56 = vld [vmem:[%s22393_s2 + $0x960] ss:$20 sps:$4 sm:$0xff]  }
 0x287   : > { %3943 = vmatprep.subr.bf16.mxu0 %v20522_v57  ;;  %3983 = vmatpush2.bf16.msra.mxu1 %v20521_v58  ;;  %v20605_v57 = vld [vmem:[%s22393_s2 + $0x93c] ss:$20 sps:$4 sm:$0xff]   ;;  %v20600_v58 = vld [vmem:[%s22393_s2 + $0x6b8] ss:$20 sps:$4 sm:$0xff]  }
 0x288   : > { %3984 = vmatprep.subr.bf16.mxu1 %v20525_v60  ;;  %v20603_v60 = vld [vmem:[%s22393_s2 + $0x938] ss:$20 sps:$4 sm:$0xff]  }
 0x28a   : > { %3944 = vmatpush2.bf16.msra.mxu0 %v20524_v61  ;;  %v20611_v61 = vld [vmem:[%s22393_s2 + $0x914] ss:$20 sps:$4 sm:$0xff]  }
 0x28b   : > { %3995 = vmatprep.subr.bf16.mxu0 %v20530_v63  ;;  %3985 = vmatpush2.bf16.msra.mxu1 %v20527_v0  ;;  %v20606_v63 = vld [vmem:[%s22393_s2 + $0x690] ss:$20 sps:$4 sm:$0xff]   ;;  %v20614_v0 = vld [vmem:[%s22393_s2 + $0x66c] ss:$20 sps:$4 sm:$0xff]  }
 0x28c   : > { %4036 = vmatprep.subr.bf16.mxu1 %v20533_v2  ;;  %v20609_v2 = vld [vmem:[%s22393_s2 + $0x910] ss:$20 sps:$4 sm:$0xff]  }
 0x28d   : > { %3946 = vmatmul.mubr.bf16.vlgmr.msra.gmra.mxu0 %v22521_v62 }
 0x28e   : > { %3996 = vmatpush1.bf16.msra.mxu0 %v20528_v3  ;;  %4027 = vmatprep.mubr.bf16.mxu0 %v22526_v1  ;;  %v20617_v3 = vld [vmem:[%s22393_s2 + $0x8ec] ss:$20 sps:$4 sm:$0xff]  }
 0x28f   : > { %3987 = vmatmul.mubr.bf16.vlgmr.msra.gmra.mxu1 %v22532_v4  ;;  %3997 = vmatprep.subr.bf16.mxu0 %v20536_v5  ;;  %v20612_v5 = vld [vmem:[%s22393_s2 + $0x668] ss:$20 sps:$4 sm:$0xff]  }
 0x290   : > { %4037 = vmatpush1.bf16.msra.mxu1 %v20531_v6  ;;  %4068 = vmatprep.mubr.bf16.mxu1 %v22538_v7  ;;  %v20620_v6 = vld [vmem:[%s22393_s2 + $0x644] ss:$20 sps:$4 sm:$0xff]  }
 0x291   : > { %4038 = vmatprep.subr.bf16.mxu1 %v20539_v8  ;;  %v20615_v8 = vld [vmem:[%s22393_s2 + $0x8e8] ss:$20 sps:$4 sm:$0xff]  }
 0x292   : > { %3998 = vmatpush1.bf16.msra.mxu0 %v20534_v9  ;;  %v20623_v9 = vld [vmem:[%s22393_s2 + $0x8c4] ss:$20 sps:$4 sm:$0xff]  }
 0x293   : > { %3999 = vmatprep.subr.bf16.mxu0 %v20542_v10  ;;  %v20618_v10 = vld [vmem:[%s22393_s2 + $0x640] ss:$20 sps:$4 sm:$0xff]  }
 0x294   : > { %4039 = vmatpush1.bf16.msra.mxu1 %v20537_v11  ;;  %v22604_v11 = vrot.slane %v22510_v54, %v22483_v33  ;;  %v20628_v54 = vld [vmem:[%s22393_s2 + $0x120] ss:$20 sps:$4 sm:$0xff]  }
 0x295   : > { %4040 = vmatprep.subr.bf16.mxu1 %v20545_v12  ;;  %v20627_v12 = vld [vmem:[%s22393_s2 + $0xb1c] ss:$20 sps:$4 sm:$0xff]  }
 0x296   : > { %4000 = vmatpush1.bf16.msra.mxu0 %v20540_v13  ;;  %v20621_v13 = vld [vmem:[%s22393_s2 + $0x8c0] ss:$20 sps:$4 sm:$0xff]  }
 0x297   : > { %4001 = vmatprep.subr.bf16.mxu0 %v20548_v14  ;;  %v20630_v14 = vld [vmem:[%s22393_s2 + $0x124] ss:$20 sps:$4 sm:$0xff]  }
 0x298   : > { %4041 = vmatpush1.bf16.msra.mxu1 %v20543_v15  ;;  %v20625_v15 = vld [vmem:[%s22393_s2 + $0xb18] ss:$20 sps:$4 sm:$0xff]  }
 0x299   : > { %4042 = vmatprep.subr.bf16.mxu1 %v20551_v16  ;;  %v22612_v16 = vcombine.high %v22604_v11, %v22604_v11 }
 0x29a   : > { %4002 = vmatpush1.bf16.msra.mxu0 %v20546_v17  ;;  %v20633_v17 = vld [vmem:[%s22393_s2 + $0xaf4] ss:$20 sps:$4 sm:$0xff]  }
 0x29b   : > { %4003 = vmatprep.subr.bf16.mxu0 %v20554_v18  ;;  %v22615_v18 = vld.sshfl [vmem:[#allocation2 + $0x8] sm:$0x11 pattern:$0x75316420] }
 0x29c   : > { %4043 = vmatpush1.bf16.msra.mxu1 %v20549_v19  ;;  %v1808_v19 = vcombine.high %v22615_v18, %v22615_v18 }
 0x29d   : > { %4044 = vmatprep.subr.bf16.mxu1 %v20557_v20  ;;  %v20636_v20 = vld [vmem:[%s22393_s2 + $0xfc] ss:$20 sps:$4 sm:$0xff]  }
 0x29e   : > { %4004 = vmatpush1.bf16.msra.mxu0 %v20552_v21  ;;  %v20631_v21 = vld [vmem:[%s22393_s2 + $0xaf0] ss:$20 sps:$4 sm:$0xff]  }
 0x29f   : > { %4005 = vmatprep.subr.bf16.mxu0 %v20560_v22  ;;  %v22624_v22 = vrot.slane %v1808_v19, %v22483_v33  ;;  %v20706_v19 = vld [vmem:[%s22393_s2 + $0x198] ss:$20 sps:$4 sm:$0xff]  }
 0x2a0   : > { %4045 = vmatpush1.bf16.msra.mxu1 %v20555_v23  ;;  %v20639_v23 = vld [vmem:[%s22393_s2 + $0xacc] ss:$20 sps:$4 sm:$0xff]  }
 0x2a1   : > { %4046 = vmatprep.subr.bf16.mxu1 %v20563_v24  ;;  %v20634_v24 = vld [vmem:[%s22393_s2 + $0xf8] ss:$20 sps:$4 sm:$0xff]  }
 0x2a2   : > { %4006 = vmatpush1.bf16.msra.mxu0 %v20558_v25  ;;  %v20642_v25 = vld [vmem:[%s22393_s2 + $0xd4] ss:$20 sps:$4 sm:$0xff]  }
 0x2a3   : > { %4007 = vmatprep.subr.bf16.mxu0 %v20566_v26  ;;  %v20637_v26 = vld [vmem:[%s22393_s2 + $0xac8] ss:$20 sps:$4 sm:$0xff]  }
 0x2a4   : > { %4047 = vmatpush1.bf16.msra.mxu1 %v20561_v28  ;;  %v20645_v28 = vld [vmem:[%s22393_s2 + $0xaa4] ss:$20 sps:$4 sm:$0xff]  }
 0x2a5   : > { %4048 = vmatprep.subr.bf16.mxu1 %v20569_v29  ;;  %v20640_v29 = vld [vmem:[%s22393_s2 + $0xd0] ss:$20 sps:$4 sm:$0xff]  }
 0x2a6   : > { %4008 = vmatpush1.bf16.msra.mxu0 %v20564_v30  ;;  %v20648_v30 = vld [vmem:[%s22393_s2 + $0xac] ss:$20 sps:$4 sm:$0xff]  }
 0x2a7   : > { %4009 = vmatprep.subr.bf16.mxu0 %v20572_v31  ;;  %v20643_v31 = vld [vmem:[%s22393_s2 + $0xaa0] ss:$20 sps:$4 sm:$0xff]  }
 0x2a8   : > { %4049 = vmatpush1.bf16.msra.mxu1 %v20567_v32  ;;  %v20651_v32 = vld [vmem:[%s22393_s2 + $0xa7c] ss:$20 sps:$4 sm:$0xff]  }
 0x2a9   : > { %4050 = vmatprep.subr.bf16.mxu1 %v20575_v34  ;;  %v20646_v34 = vld [vmem:[%s22393_s2 + $0xa8] ss:$20 sps:$4 sm:$0xff]  }
 0x2aa   : > { %4010 = vmatpush1.bf16.msra.mxu0 %v20570_v35  ;;  %v20654_v35 = vld [vmem:[%s22393_s2 + $0x84] ss:$20 sps:$4 sm:$0xff]  }
 0x2ab   : > { %4011 = vmatprep.subr.bf16.mxu0 %v20578_v36  ;;  %v20649_v36 = vld [vmem:[%s22393_s2 + $0xa78] ss:$20 sps:$4 sm:$0xff]  }
 0x2ac   : > { %4051 = vmatpush1.bf16.msra.mxu1 %v20573_v37  ;;  %v20657_v37 = vld [vmem:[%s22393_s2 + $0xa54] ss:$20 sps:$4 sm:$0xff]  }
 0x2ad   : > { %4052 = vmatprep.subr.bf16.mxu1 %v20581_v38  ;;  %v20652_v38 = vld [vmem:[%s22393_s2 + $0x80] ss:$20 sps:$4 sm:$0xff]  }
 0x2ae   : > { %4012 = vmatpush2.bf16.msra.mxu0 %v20576_v39  ;;  %v20660_v39 = vld [vmem:[%s22393_s2 + $0x5c] ss:$20 sps:$4 sm:$0xff]  }
 0x2af   : > { %4013 = vmatprep.subr.bf16.mxu0 %v20584_v40  ;;  %v20655_v40 = vld [vmem:[%s22393_s2 + $0xa50] ss:$20 sps:$4 sm:$0xff]  }
 0x2b0   : > { %4053 = vmatpush2.bf16.msra.mxu1 %v20579_v41  ;;  %v20663_v41 = vld [vmem:[%s22393_s2 + $0xa2c] ss:$20 sps:$4 sm:$0xff]  }
 0x2b1   : > { %4054 = vmatprep.subr.bf16.mxu1 %v20587_v42  ;;  %v20658_v42 = vld [vmem:[%s22393_s2 + $0x58] ss:$20 sps:$4 sm:$0xff]  }
 0x2b2   : > { %4014 = vmatpush2.bf16.msra.mxu0 %v20582_v44  ;;  %v20666_v44 = vld [vmem:[%s22393_s2 + $0x34] ss:$20 sps:$4 sm:$0xff]  }
 0x2b3   : > { %4015 = vmatprep.subr.bf16.mxu0 %v20590_v45  ;;  %v20661_v45 = vld [vmem:[%s22393_s2 + $0xa28] ss:$20 sps:$4 sm:$0xff]  }
 0x2b4   : > { %4055 = vmatpush2.bf16.msra.mxu1 %v20585_v47  ;;  %v20669_v47 = vld [vmem:[%s22393_s2 + $0xa04] ss:$20 sps:$4 sm:$0xff]  }
 0x2b5   : > { %4056 = vmatprep.subr.bf16.mxu1 %v20593_v43  ;;  %v20664_v43 = vld [vmem:[%s22393_s2 + $0x30] ss:$20 sps:$4 sm:$0xff]  }
 0x2b6   : > { %4016 = vmatpush2.bf16.msra.mxu0 %v20588_v49  ;;  %v20672_v49 = vld [vmem:[%s22393_s2 + $0xc] ss:$20 sps:$4 sm:$0xff]  }
 0x2b7   : > { %4017 = vmatprep.subr.bf16.mxu0 %v20596_v50  ;;  %v20667_v50 = vld [vmem:[%s22393_s2 + $0xa00] ss:$20 sps:$4 sm:$0xff]  }
 0x2b8   : > { %4057 = vmatpush2.bf16.msra.mxu1 %v20591_v51  ;;  %v20675_v51 = vld [vmem:[%s22393_s2 + $0xc5c] ss:$20 sps:$4 sm:$0xff]  }
 0x2b9   : > { %4058 = vmatprep.subr.bf16.mxu1 %v20599_v52  ;;  %v20670_v52 = vld [vmem:[%s22393_s2 + $0x8] ss:$20 sps:$4 sm:$0xff]  }
 0x2ba   : > { %4018 = vmatpush2.bf16.msra.mxu0 %v20594_v53  ;;  %v20678_v53 = vld [vmem:[%s22393_s2 + $0x264] ss:$20 sps:$4 sm:$0xff]  }
 0x2bb   : > { %4019 = vmatprep.subr.bf16.mxu0 %v20602_v55  ;;  %v20673_v55 = vld [vmem:[%s22393_s2 + $0xc58] ss:$20 sps:$4 sm:$0xff]  }
 0x2bc   : > { %4059 = vmatpush2.bf16.msra.mxu1 %v20597_v56  ;;  %v20681_v56 = vld [vmem:[%s22393_s2 + $0xc34] ss:$20 sps:$4 sm:$0xff]  }
 0x2bd   : > { %4060 = vmatprep.subr.bf16.mxu1 %v20605_v57  ;;  %v20676_v57 = vld [vmem:[%s22393_s2 + $0x260] ss:$20 sps:$4 sm:$0xff]  }
 0x2be   : > { %4020 = vmatpush2.bf16.msra.mxu0 %v20600_v58  ;;  %v20684_v58 = vld [vmem:[%s22393_s2 + $0x23c] ss:$20 sps:$4 sm:$0xff]  }
 0x2bf   : > { %4021 = vmatprep.subr.bf16.mxu0 %v20608_v59  ;;  %v20679_v59 = vld [vmem:[%s22393_s2 + $0xc30] ss:$20 sps:$4 sm:$0xff]  }
 0x2c0   : > { %4061 = vmatpush2.bf16.msra.mxu1 %v20603_v60  ;;  %v20687_v60 = vld [vmem:[%s22393_s2 + $0xc0c] ss:$20 sps:$4 sm:$0xff]  }
 0x2c1   : > { %4062 = vmatprep.subr.bf16.mxu1 %v20611_v61  ;;  %v20682_v61 = vld [vmem:[%s22393_s2 + $0x238] ss:$20 sps:$4 sm:$0xff]  }
 0x2c2   : > { %4022 = vmatpush2.bf16.msra.mxu0 %v20606_v63  ;;  %v20690_v63 = vld [vmem:[%s22393_s2 + $0x214] ss:$20 sps:$4 sm:$0xff]  }
 0x2c3   : > { %4023 = vmatprep.subr.bf16.mxu0 %v20614_v0  ;;  %v20685_v0 = vld [vmem:[%s22393_s2 + $0xc08] ss:$20 sps:$4 sm:$0xff]  }
 0x2c4   : > { %4063 = vmatpush2.bf16.msra.mxu1 %v20609_v2  ;;  %v20693_v2 = vld [vmem:[%s22393_s2 + $0xbe4] ss:$20 sps:$4 sm:$0xff]  }
 0x2c5   : > { %4064 = vmatprep.subr.bf16.mxu1 %v20617_v3  ;;  %v20688_v3 = vld [vmem:[%s22393_s2 + $0x210] ss:$20 sps:$4 sm:$0xff]  }
 0x2c6   : > { %4024 = vmatpush2.bf16.msra.mxu0 %v20612_v5  ;;  %v20696_v5 = vld [vmem:[%s22393_s2 + $0x1ec] ss:$20 sps:$4 sm:$0xff]  }
 0x2c7   : > { %4025 = vmatprep.subr.bf16.mxu0 %v20620_v6  ;;  %v20691_v6 = vld [vmem:[%s22393_s2 + $0xbe0] ss:$20 sps:$4 sm:$0xff]  }
 0x2c8   : > { %4065 = vmatpush2.bf16.msra.mxu1 %v20615_v8  ;;  %v20699_v8 = vld [vmem:[%s22393_s2 + $0xbbc] ss:$20 sps:$4 sm:$0xff]  }
 0x2c9   : > { %4066 = vmatprep.subr.bf16.mxu1 %v20623_v9  ;;  %v20694_v9 = vld [vmem:[%s22393_s2 + $0x1e8] ss:$20 sps:$4 sm:$0xff]  }
 0x2ca   : > { %4026 = vmatpush2.bf16.msra.mxu0 %v20618_v10  ;;  %v20702_v10 = vld [vmem:[%s22393_s2 + $0x1c4] ss:$20 sps:$4 sm:$0xff]  }
 0x2cb   : > { %4077 = vmatprep.subr.bf16.mxu0 %v20627_v12  ;;  %v20697_v12 = vld [vmem:[%s22393_s2 + $0xbb8] ss:$20 sps:$4 sm:$0xff]  }
 0x2cc   : > { %4067 = vmatpush2.bf16.msra.mxu1 %v20621_v13  ;;  %v20705_v13 = vld [vmem:[%s22393_s2 + $0xb94] ss:$20 sps:$4 sm:$0xff]  }
 0x2cd   : > { %4028 = vmatmul.mubr.bf16.vlgmr.msra.gmra.mxu0 %v22604_v11  ;;  %4118 = vmatprep.subr.bf16.mxu1 %v20630_v14  ;;  %v20700_v14 = vld [vmem:[%s22393_s2 + $0x1c0] ss:$20 sps:$4 sm:$0xff]  }
 0x2ce   : > { %4078 = vmatpush1.bf16.msra.mxu0 %v20625_v15  ;;  %4109 = vmatprep.mubr.bf16.mxu0 %v22624_v22  ;;  %v20708_v15 = vld [vmem:[%s22393_s2 + $0x19c] ss:$20 sps:$4 sm:$0xff]  }
 0x2cf   : > { %4069 = vmatmul.mubr.bf16.vlgmr.msra.gmra.mxu1 %v22612_v16  ;;  %4079 = vmatprep.subr.bf16.mxu0 %v20633_v17  ;;  %v20703_v17 = vld [vmem:[%s22393_s2 + $0xb90] ss:$20 sps:$4 sm:$0xff]  }
 0x2d0   : > { %4119 = vmatpush1.bf16.msra.mxu1 %v20628_v54  ;;  %4150 = vmatprep.mubr.bf16.mxu1 %v22495_v46  ;;  %v20711_v54 = vld [vmem:[%s22393_s2 + $0xb6c] ss:$20 sps:$4 sm:$0xff]  }
 0x2d1   : > { %4120 = vmatprep.subr.bf16.mxu1 %v20636_v20  ;;  %v20714_v20 = vld [vmem:[%s22393_s2 + $0x174] ss:$20 sps:$4 sm:$0xff]  }
 0x2d2   : > { %4080 = vmatpush1.bf16.msra.mxu0 %v20631_v21  ;;  %v20709_v21 = vld [vmem:[%s22393_s2 + $0xb68] ss:$20 sps:$4 sm:$0xff]  }
 0x2d3   : > { %4081 = vmatprep.subr.bf16.mxu0 %v20639_v23  ;;  %v20717_v23 = vld [vmem:[%s22393_s2 + $0xb44] ss:$20 sps:$4 sm:$0xff]  }
 0x2d4   : > { %4121 = vmatpush1.bf16.msra.mxu1 %v20634_v24  ;;  %v20712_v24 = vld [vmem:[%s22393_s2 + $0x170] ss:$20 sps:$4 sm:$0xff]  }
 0x2d5   : > { %4122 = vmatprep.subr.bf16.mxu1 %v20642_v25  ;;  %v20720_v25 = vld [vmem:[%s22393_s2 + $0x14c] ss:$20 sps:$4 sm:$0xff]  }
 0x2d6   : > { %4082 = vmatpush1.bf16.msra.mxu0 %v20637_v26  ;;  %v20715_v26 = vld [vmem:[%s22393_s2 + $0xb40] ss:$20 sps:$4 sm:$0xff]  }
 0x2d7   : > { %4083 = vmatprep.subr.bf16.mxu0 %v20645_v28  ;;  %v20723_v28 = vld [vmem:[%s22393_s2 + $0x3a4] ss:$20 sps:$4 sm:$0xff]  }
 0x2d8   : > { %4123 = vmatpush1.bf16.msra.mxu1 %v20640_v29  ;;  %v20718_v29 = vld [vmem:[%s22393_s2 + $0x148] ss:$20 sps:$4 sm:$0xff]  }
 0x2d9   : > { %4124 = vmatprep.subr.bf16.mxu1 %v20648_v30  ;;  %v22689_v30 = vrot.slane %v22615_v18, %v22483_v33  ;;  %v20727_v18 = vld [vmem:[%s22393_s2 + $0x378] ss:$20 sps:$4 sm:$0xff]  }
 0x2da   : > { %4084 = vmatpush1.bf16.msra.mxu0 %v20643_v31  ;;  %v20726_v31 = vld [vmem:[%s22393_s2 + $0x624] ss:$20 sps:$4 sm:$0xff]  }
 0x2db   : > { %4085 = vmatprep.subr.bf16.mxu0 %v20651_v32  ;;  %v20721_v32 = vld [vmem:[%s22393_s2 + $0x3a0] ss:$20 sps:$4 sm:$0xff]  }
 0x2dc   : > { %4125 = vmatpush1.bf16.msra.mxu1 %v20646_v34  ;;  %v20729_v34 = vld [vmem:[%s22393_s2 + $0x37c] ss:$20 sps:$4 sm:$0xff]  }
 0x2dd   : > { %4126 = vmatprep.subr.bf16.mxu1 %v20654_v35  ;;  %v20724_v35 = vld [vmem:[%s22393_s2 + $0x620] ss:$20 sps:$4 sm:$0xff]  }
 0x2de   : > { %4086 = vmatpush1.bf16.msra.mxu0 %v20649_v36  ;;  %v20732_v36 = vld [vmem:[%s22393_s2 + $0x5fc] ss:$20 sps:$4 sm:$0xff]  }
 0x2df   : > { %4087 = vmatprep.subr.bf16.mxu0 %v20657_v37  ;;  %v20735_v37 = vld [vmem:[%s22393_s2 + $0x354] ss:$20 sps:$4 sm:$0xff]  }
 0x2e0   : > { %4127 = vmatpush1.bf16.msra.mxu1 %v20652_v38  ;;  %v20730_v38 = vld [vmem:[%s22393_s2 + $0x5f8] ss:$20 sps:$4 sm:$0xff]  }
 0x2e1   : > { %4128 = vmatprep.subr.bf16.mxu1 %v20660_v39  ;;  %v20738_v39 = vld [vmem:[%s22393_s2 + $0x5d4] ss:$20 sps:$4 sm:$0xff]  }
 0x2e2   : > { %4088 = vmatpush1.bf16.msra.mxu0 %v20655_v40  ;;  %v20733_v40 = vld [vmem:[%s22393_s2 + $0x350] ss:$20 sps:$4 sm:$0xff]  }
 0x2e3   : > { %4089 = vmatprep.subr.bf16.mxu0 %v20663_v41  ;;  %v20741_v41 = vld [vmem:[%s22393_s2 + $0x32c] ss:$20 sps:$4 sm:$0xff]  }
 0x2e4   : > { %4129 = vmatpush1.bf16.msra.mxu1 %v20658_v42  ;;  %v20736_v42 = vld [vmem:[%s22393_s2 + $0x5d0] ss:$20 sps:$4 sm:$0xff]  }
 0x2e5   : > { %4130 = vmatprep.subr.bf16.mxu1 %v20666_v44  ;;  %v20744_v44 = vld [vmem:[%s22393_s2 + $0x5ac] ss:$20 sps:$4 sm:$0xff]  }
 0x2e6   : > { %4090 = vmatpush1.bf16.msra.mxu0 %v20661_v45  ;;  %v20739_v45 = vld [vmem:[%s22393_s2 + $0x328] ss:$20 sps:$4 sm:$0xff]  }
 0x2e7   : > { %4091 = vmatprep.subr.bf16.mxu0 %v20669_v47  ;;  %v20747_v47 = vld [vmem:[%s22393_s2 + $0x304] ss:$20 sps:$4 sm:$0xff]  }
 0x2e8   : > { %4131 = vmatpush1.bf16.msra.mxu1 %v20664_v43  ;;  %v20742_v43 = vld [vmem:[%s22393_s2 + $0x5a8] ss:$20 sps:$4 sm:$0xff]  }
 0x2e9   : > { %4132 = vmatprep.subr.bf16.mxu1 %v20672_v49  ;;  %v20750_v49 = vld [vmem:[%s22393_s2 + $0x584] ss:$20 sps:$4 sm:$0xff]  }
 0x2ea   : > { %4092 = vmatpush1.bf16.msra.mxu0 %v20667_v50  ;;  %v20745_v50 = vld [vmem:[%s22393_s2 + $0x300] ss:$20 sps:$4 sm:$0xff]  }
 0x2eb   : > { %4093 = vmatprep.subr.bf16.mxu0 %v20675_v51  ;;  %v20753_v51 = vld [vmem:[%s22393_s2 + $0x2dc] ss:$20 sps:$4 sm:$0xff]  }
 0x2ec   : > { %4133 = vmatpush1.bf16.msra.mxu1 %v20670_v52  ;;  %v20748_v52 = vld [vmem:[%s22393_s2 + $0x580] ss:$20 sps:$4 sm:$0xff]  }
 0x2ed   : > { %4134 = vmatprep.subr.bf16.mxu1 %v20678_v53  ;;  %v20756_v53 = vld [vmem:[%s22393_s2 + $0x55c] ss:$20 sps:$4 sm:$0xff]  }
 0x2ee   : > { %4094 = vmatpush2.bf16.msra.mxu0 %v20673_v55  ;;  %v20751_v55 = vld [vmem:[%s22393_s2 + $0x2d8] ss:$20 sps:$4 sm:$0xff]  }
 0x2ef   : > { %4095 = vmatprep.subr.bf16.mxu0 %v20681_v56  ;;  %v20759_v56 = vld [vmem:[%s22393_s2 + $0x2b4] ss:$20 sps:$4 sm:$0xff]  }
 0x2f0   : > { %4135 = vmatpush2.bf16.msra.mxu1 %v20676_v57  ;;  %v20754_v57 = vld [vmem:[%s22393_s2 + $0x558] ss:$20 sps:$4 sm:$0xff]  }
 0x2f1   : > { %4136 = vmatprep.subr.bf16.mxu1 %v20684_v58  ;;  %v1727_v58 = vsub.s32 0, %v22476_v27 }
 0x2f2   : > { %4096 = vmatpush2.bf16.msra.mxu0 %v20679_v59  ;;  %v1731_v59 = vsub.s32 1, %v22476_v27 }
 0x2f3   : > { %4097 = vmatprep.subr.bf16.mxu0 %v20687_v60  ;;  %v20757_v60 = vld [vmem:[%s22393_s2 + $0x2b0] ss:$20 sps:$4 sm:$0xff]  }
 0x2f4   : > { %4137 = vmatpush2.bf16.msra.mxu1 %v20682_v61  ;;  %v20762_v61 = vld [vmem:[%s22393_s2 + $0x534] ss:$20 sps:$4 sm:$0xff]  }
 0x2f5   : > { %4138 = vmatprep.subr.bf16.mxu1 %v20690_v63  ;;  %v20760_v63 = vld [vmem:[%s22393_s2 + $0x530] ss:$20 sps:$4 sm:$0xff]  }
 0x2f6   : > { %4098 = vmatpush2.bf16.msra.mxu0 %v20685_v0  ;;  %v20765_v0 = vld [vmem:[%s22393_s2 + $0x28c] ss:$20 sps:$4 sm:$0xff]  }
 0x2f7   : > { %4099 = vmatprep.subr.bf16.mxu0 %v20693_v2  ;;  %v20763_v2 = vld [vmem:[%s22393_s2 + $0x288] ss:$20 sps:$4 sm:$0xff]  }
 0x2f8   : > { %4139 = vmatpush2.bf16.msra.mxu1 %v20688_v3  ;;  %v20768_v3 = vld [vmem:[%s22393_s2 + $0x50c] ss:$20 sps:$4 sm:$0xff]  }
 0x2f9   : > { %4140 = vmatprep.subr.bf16.mxu1 %v20696_v5  ;;  %v20766_v5 = vld [vmem:[%s22393_s2 + $0x508] ss:$20 sps:$4 sm:$0xff]  }
 0x2fa   : > { %4100 = vmatpush2.bf16.msra.mxu0 %v20691_v6  ;;  %v20771_v6 = vld [vmem:[%s22393_s2 + $0x4e4] ss:$20 sps:$4 sm:$0xff]  }
 0x2fb   : > { %4101 = vmatprep.subr.bf16.mxu0 %v20699_v8  ;;  %v20769_v8 = vld [vmem:[%s22393_s2 + $0x4e0] ss:$20 sps:$4 sm:$0xff]  }
 0x2fc   : > { %4141 = vmatpush2.bf16.msra.mxu1 %v20694_v9  ;;  %v20774_v9 = vld [vmem:[%s22393_s2 + $0x764] ss:$20 sps:$4 sm:$0xff]  }
 0x2fd   : > { %4142 = vmatprep.subr.bf16.mxu1 %v20702_v10  ;;  %v20772_v10 = vld [vmem:[%s22393_s2 + $0x760] ss:$20 sps:$4 sm:$0xff]  }
 0x2fe   : > { %4102 = vmatpush2.bf16.msra.mxu0 %v20697_v12  ;;  %v20777_v12 = vld [vmem:[%s22393_s2 + $0x4bc] ss:$20 sps:$4 sm:$0xff]  }
 0x2ff   : > { %4103 = vmatprep.subr.bf16.mxu0 %v20705_v13  ;;  %v20775_v13 = vld [vmem:[%s22393_s2 + $0x4b8] ss:$20 sps:$4 sm:$0xff]  }
 0x300   : > { %4143 = vmatpush2.bf16.msra.mxu1 %v20700_v14  ;;  %v20780_v14 = vld [vmem:[%s22393_s2 + $0x73c] ss:$20 sps:$4 sm:$0xff]  }
 0x301   : > { %4144 = vmatprep.subr.bf16.mxu1 %v20708_v15  ;;  %v20778_v15 = vld [vmem:[%s22393_s2 + $0x738] ss:$20 sps:$4 sm:$0xff]  }
 0x302   : > { %4104 = vmatpush2.bf16.msra.mxu0 %v20703_v17  ;;  %v20783_v17 = vld [vmem:[%s22393_s2 + $0x494] ss:$20 sps:$4 sm:$0xff]  }
 0x303   : > { %4105 = vmatprep.subr.bf16.mxu0 %v20711_v54  ;;  %v20781_v54 = vld [vmem:[%s22393_s2 + $0x490] ss:$20 sps:$4 sm:$0xff]  }
 0x304   : > { %4145 = vmatpush2.bf16.msra.mxu1 %v20706_v19  ;;  %v20786_v19 = vld [vmem:[%s22393_s2 + $0x714] ss:$20 sps:$4 sm:$0xff]  }
 0x305   : > { %4146 = vmatprep.subr.bf16.mxu1 %v20714_v20  ;;  %v20784_v20 = vld [vmem:[%s22393_s2 + $0x710] ss:$20 sps:$4 sm:$0xff]  }
 0x306   : > { %4106 = vmatpush2.bf16.msra.mxu0 %v20709_v21  ;;  %v20789_v21 = vld [vmem:[%s22393_s2 + $0x46c] ss:$20 sps:$4 sm:$0xff]  }
 0x307   : > { %4107 = vmatprep.subr.bf16.mxu0 %v20717_v23  ;;  %v20787_v23 = vld [vmem:[%s22393_s2 + $0x468] ss:$20 sps:$4 sm:$0xff]  }
 0x308   : > { %4147 = vmatpush2.bf16.msra.mxu1 %v20712_v24  ;;  %v20792_v24 = vld [vmem:[%s22393_s2 + $0x6ec] ss:$20 sps:$4 sm:$0xff]  }
 0x309   : > { %4148 = vmatprep.subr.bf16.mxu1 %v20720_v25  ;;  %v20790_v25 = vld [vmem:[%s22393_s2 + $0x6e8] ss:$20 sps:$4 sm:$0xff]  }
 0x30a   : > { %4108 = vmatpush2.bf16.msra.mxu0 %v20715_v26  ;;  %v20795_v26 = vld [vmem:[%s22393_s2 + $0x444] ss:$20 sps:$4 sm:$0xff]  }
 0x30b   : > { %4159 = vmatprep.subr.bf16.mxu0 %v20723_v28  ;;  %v20793_v28 = vld [vmem:[%s22393_s2 + $0x440] ss:$20 sps:$4 sm:$0xff]  }
 0x30c   : > { %4149 = vmatpush2.bf16.msra.mxu1 %v20718_v29  ;;  %v20798_v29 = vld [vmem:[%s22393_s2 + $0x6c4] ss:$20 sps:$4 sm:$0xff]  }
 0x30d   : > { %4110 = vmatmul.mubr.bf16.vlgmr.msra.gmra.mxu0 %v22689_v30  ;;  %4200 = vmatprep.subr.bf16.mxu1 %v20726_v31  ;;  %v20796_v31 = vld [vmem:[%s22393_s2 + $0x6c0] ss:$20 sps:$4 sm:$0xff]  }
 0x30e   : > { %4160 = vmatpush1.bf16.msra.mxu0 %v20721_v32  ;;  %4191 = vmatprep.mubr.bf16.mxu0 %v22502_v48  ;;  %v20801_v32 = vld [vmem:[%s22393_s2 + $0x41c] ss:$20 sps:$4 sm:$0xff]  }
 0x30f   : > { %4151 = vmatmul.mubr.bf16.vlgmr.msra.gmra.mxu1 %v22521_v62  ;;  %4161 = vmatprep.subr.bf16.mxu0 %v20729_v34  ;;  %v20799_v34 = vld [vmem:[%s22393_s2 + $0x418] ss:$20 sps:$4 sm:$0xff]  }
 0x310   : > { %4201 = vmatpush1.bf16.msra.mxu1 %v20724_v35  ;;  %4232 = vmatprep.mubr.bf16.mxu1 %v22526_v1  ;;  %v20804_v35 = vld [vmem:[%s22393_s2 + $0x69c] ss:$20 sps:$4 sm:$0xff]  }
 0x311   : > { %4202 = vmatprep.subr.bf16.mxu1 %v20732_v36  ;;  %v20802_v36 = vld [vmem:[%s22393_s2 + $0x698] ss:$20 sps:$4 sm:$0xff]  }
 0x312   : > { %4162 = vmatpush1.bf16.msra.mxu0 %v20727_v18  ;;  %v20807_v18 = vld [vmem:[%s22393_s2 + $0x3f4] ss:$20 sps:$4 sm:$0xff]  }
 0x313   : > { %4163 = vmatprep.subr.bf16.mxu0 %v20735_v37  ;;  %v20805_v37 = vld [vmem:[%s22393_s2 + $0x3f0] ss:$20 sps:$4 sm:$0xff]  }
 0x314   : > { %4203 = vmatpush1.bf16.msra.mxu1 %v20730_v38  ;;  %v20810_v38 = vld [vmem:[%s22393_s2 + $0x674] ss:$20 sps:$4 sm:$0xff]  }
 0x315   : > { %4204 = vmatprep.subr.bf16.mxu1 %v20738_v39  ;;  %v20808_v39 = vld [vmem:[%s22393_s2 + $0x670] ss:$20 sps:$4 sm:$0xff]  }
 0x316   : > { %4164 = vmatpush1.bf16.msra.mxu0 %v20733_v40  ;;  %v20813_v40 = vld [vmem:[%s22393_s2 + $0x3cc] ss:$20 sps:$4 sm:$0xff]  }
 0x317   : > { %4165 = vmatprep.subr.bf16.mxu0 %v20741_v41  ;;  %v20811_v41 = vld [vmem:[%s22393_s2 + $0x3c8] ss:$20 sps:$4 sm:$0xff]  }
 0x318   : > { %4205 = vmatpush1.bf16.msra.mxu1 %v20736_v42  ;;  %v20816_v42 = vld [vmem:[%s22393_s2 + $0x64c] ss:$20 sps:$4 sm:$0xff]  }
 0x319   : > { %4206 = vmatprep.subr.bf16.mxu1 %v20744_v44  ;;  %v22761_v44 = vld [vmem:[%s543_s22] sm:$0x1f] }
 0x31a   : > { %4166 = vmatpush1.bf16.msra.mxu0 %v20739_v45  ;;  %v20819_v45 = vld [vmem:[%s22393_s2 + $0x8a4] ss:$20 sps:$4 sm:$0xff]  }
 0x31b   : > { %4167 = vmatprep.subr.bf16.mxu0 %v20747_v47  ;;  %v20814_v47 = vld [vmem:[%s22393_s2 + $0x648] ss:$20 sps:$4 sm:$0xff]  }
 0x31c   : > { %4207 = vmatpush1.bf16.msra.mxu1 %v20742_v43  ;;  %v20822_v43 = vld [vmem:[%s22393_s2 + $0xb24] ss:$20 sps:$4 sm:$0xff]  }
 0x31d   : > { %4208 = vmatprep.subr.bf16.mxu1 %v20750_v49  ;;  %v1728_v49 = vrot.slane %v22761_v44, %v1727_v58  ;;  %v20823_v58 = vld [vmem:[%s22393_s2 + $0x878] ss:$20 sps:$4 sm:$0xff]  }
 0x31e   : > { %4168 = vmatpush1.bf16.msra.mxu0 %v20745_v50  ;;  %v20817_v50 = vld [vmem:[%s22393_s2 + $0x8a0] ss:$20 sps:$4 sm:$0xff]  }
 0x31f   : > { %4169 = vmatprep.subr.bf16.mxu0 %v20753_v51  ;;  %v20825_v51 = vld [vmem:[%s22393_s2 + $0x87c] ss:$20 sps:$4 sm:$0xff]  }
 0x320   : > { %4209 = vmatpush1.bf16.msra.mxu1 %v20748_v52  ;;  %v1732_v52 = vrot.slane %v22761_v44, %v1731_v59  ;;  %v20831_v59 = vld [vmem:[%s22393_s2 + $0x854] ss:$20 sps:$4 sm:$0xff]  }
 0x321   : > { %4210 = vmatprep.subr.bf16.mxu1 %v20756_v53  ;;  %v20820_v53 = vld [vmem:[%s22393_s2 + $0xb20] ss:$20 sps:$4 sm:$0xff]  }
 0x322   : > { %4170 = vmatpush1.bf16.msra.mxu0 %v20751_v55 }
 0x323   : > { %4171 = vmatprep.subr.bf16.mxu0 %v20759_v56  ;;  %v20828_v56 = vld [vmem:[%s22393_s2 + $0xafc] ss:$20 sps:$4 sm:$0xff]  }
 0x324   : > { %4211 = vmatpush1.bf16.msra.mxu1 %v20754_v57 }
 0x325   : > { %4212 = vmatprep.subr.bf16.mxu1 %v20762_v61 }
 0x326   : > { %4172 = vmatpush1.bf16.msra.mxu0 %v20757_v60 }
 0x327   : > { %4173 = vmatprep.subr.bf16.mxu0 %v20765_v0 }
 0x328   : > { %4213 = vmatpush1.bf16.msra.mxu1 %v20760_v63 }
 0x329   : > { %4214 = vmatprep.subr.bf16.mxu1 %v20768_v3 }
 0x32a   : > { %4174 = vmatpush1.bf16.msra.mxu0 %v20763_v2  ;;  %v20826_v2 = vld [vmem:[%s22393_s2 + $0xaf8] ss:$20 sps:$4 sm:$0xff]  }
 0x32b   : > { %4175 = vmatprep.subr.bf16.mxu0 %v20771_v6  ;;  %v20834_v6 = vld [vmem:[%s22393_s2 + $0xad4] ss:$20 sps:$4 sm:$0xff]  }
 0x32c   : > { %4215 = vmatpush1.bf16.msra.mxu1 %v20766_v5 }
 0x32d   : > { %4216 = vmatprep.subr.bf16.mxu1 %v20774_v9  ;;  %v20829_v9 = vld [vmem:[%s22393_s2 + $0x850] ss:$20 sps:$4 sm:$0xff]  }
 0x32e   : > { %4176 = vmatpush2.bf16.msra.mxu0 %v20769_v8 }
 0x32f   : > { %4177 = vmatprep.subr.bf16.mxu0 %v20777_v12  ;;  %v20837_v12 = vld [vmem:[%s22393_s2 + $0x82c] ss:$20 sps:$4 sm:$0xff]  }
 0x330   : > { %4217 = vmatpush2.bf16.msra.mxu1 %v20772_v10 }
 0x331   : > { %4218 = vmatprep.subr.bf16.mxu1 %v20780_v14  ;;  %v20832_v14 = vld [vmem:[%s22393_s2 + $0xad0] ss:$20 sps:$4 sm:$0xff]  }
 0x332   : > { %4178 = vmatpush2.bf16.msra.mxu0 %v20775_v13 }
 0x333   : > { %4179 = vmatprep.subr.bf16.mxu0 %v20783_v17 }
 0x334   : > { %4219 = vmatpush2.bf16.msra.mxu1 %v20778_v15  ;;  %v20840_v15 = vld [vmem:[%s22393_s2 + $0xaac] ss:$20 sps:$4 sm:$0xff]  }
 0x335   : > { %4220 = vmatprep.subr.bf16.mxu1 %v20786_v19  ;;  %v20843_v19 = vld [vmem:[%s22393_s2 + $0x804] ss:$20 sps:$4 sm:$0xff]  }
 0x336   : > { %4180 = vmatpush2.bf16.msra.mxu0 %v20781_v54  ;;  %v20835_v54 = vld [vmem:[%s22393_s2 + $0x828] ss:$20 sps:$4 sm:$0xff]  }
 0x337   : > { %4181 = vmatprep.subr.bf16.mxu0 %v20789_v21  ;;  %v20846_v21 = vld [vmem:[%s22393_s2 + $0xa84] ss:$20 sps:$4 sm:$0xff]  }
 0x338   : > { %4221 = vmatpush2.bf16.msra.mxu1 %v20784_v20  ;;  %v20838_v20 = vld [vmem:[%s22393_s2 + $0xaa8] ss:$20 sps:$4 sm:$0xff]  }
 0x339   : > { %4222 = vmatprep.subr.bf16.mxu1 %v20792_v24  ;;  %v20849_v24 = vld [vmem:[%s22393_s2 + $0x7dc] ss:$20 sps:$4 sm:$0xff]  }
 0x33a   : > { %4182 = vmatpush2.bf16.msra.mxu0 %v20787_v23  ;;  %v20841_v23 = vld [vmem:[%s22393_s2 + $0x800] ss:$20 sps:$4 sm:$0xff]  }
 0x33b   : > { %4183 = vmatprep.subr.bf16.mxu0 %v20795_v26  ;;  %v20852_v26 = vld [vmem:[%s22393_s2 + $0xa5c] ss:$20 sps:$4 sm:$0xff]  }
 0x33c   : > { %4223 = vmatpush2.bf16.msra.mxu1 %v20790_v25  ;;  %v20844_v25 = vld [vmem:[%s22393_s2 + $0xa80] ss:$20 sps:$4 sm:$0xff]  }
 0x33d   : > { %4224 = vmatprep.subr.bf16.mxu1 %v20798_v29  ;;  %v20855_v29 = vld [vmem:[%s22393_s2 + $0x7b4] ss:$20 sps:$4 sm:$0xff]  }
 0x33e   : > { %4184 = vmatpush2.bf16.msra.mxu0 %v20793_v28  ;;  %v20847_v28 = vld [vmem:[%s22393_s2 + $0x7d8] ss:$20 sps:$4 sm:$0xff]  }
 0x33f   : > { %4185 = vmatprep.subr.bf16.mxu0 %v20801_v32  ;;  %v20858_v32 = vld [vmem:[%s22393_s2 + $0xa34] ss:$20 sps:$4 sm:$0xff]  }
 0x340   : > { %4225 = vmatpush2.bf16.msra.mxu1 %v20796_v31  ;;  %v20850_v31 = vld [vmem:[%s22393_s2 + $0xa58] ss:$20 sps:$4 sm:$0xff]  }
 0x341   : > { %4226 = vmatprep.subr.bf16.mxu1 %v20804_v35  ;;  %v20861_v35 = vld [vmem:[%s22393_s2 + $0x78c] ss:$20 sps:$4 sm:$0xff]  }
 0x342   : > { %4186 = vmatpush2.bf16.msra.mxu0 %v20799_v34  ;;  %v20853_v34 = vld [vmem:[%s22393_s2 + $0x7b0] ss:$20 sps:$4 sm:$0xff]  }
 0x343   : > { %4187 = vmatprep.subr.bf16.mxu0 %v20807_v18  ;;  %v20864_v18 = vld [vmem:[%s22393_s2 + $0xa0c] ss:$20 sps:$4 sm:$0xff]  }
 0x344   : > { %4227 = vmatpush2.bf16.msra.mxu1 %v20802_v36  ;;  %v20856_v36 = vld [vmem:[%s22393_s2 + $0xa30] ss:$20 sps:$4 sm:$0xff]  }
 0x345   : > { %4228 = vmatprep.subr.bf16.mxu1 %v20810_v38  ;;  %v20867_v38 = vld [vmem:[%s22393_s2 + $0x9e4] ss:$20 sps:$4 sm:$0xff]  }
 0x346   : > { %4188 = vmatpush2.bf16.msra.mxu0 %v20805_v37  ;;  %v20859_v37 = vld [vmem:[%s22393_s2 + $0x788] ss:$20 sps:$4 sm:$0xff]  }
 0x347   : > { %4189 = vmatprep.subr.bf16.mxu0 %v20813_v40  ;;  %v20870_v40 = vld [vmem:[%s22393_s2 + $0xc64] ss:$20 sps:$4 sm:$0xff]  }
 0x348   : > { %4229 = vmatpush2.bf16.msra.mxu1 %v20808_v39  ;;  %v20862_v39 = vld [vmem:[%s22393_s2 + $0xa08] ss:$20 sps:$4 sm:$0xff]  }
 0x349   : > { %4230 = vmatprep.subr.bf16.mxu1 %v20816_v42  ;;  %v20873_v42 = vld [vmem:[%s22393_s2 + $0x9bc] ss:$20 sps:$4 sm:$0xff]  }
 0x34a   : > { %4190 = vmatpush2.bf16.msra.mxu0 %v20811_v41  ;;  %v20865_v41 = vld [vmem:[%s22393_s2 + $0x9e0] ss:$20 sps:$4 sm:$0xff]  }
 0x34b   : > { %4241 = vmatprep.subr.bf16.mxu0 %v20819_v45  ;;  %v20868_v45 = vld [vmem:[%s22393_s2 + $0xc60] ss:$20 sps:$4 sm:$0xff]  }
 0x34c   : > { %4231 = vmatpush2.bf16.msra.mxu1 %v20814_v47  ;;  %v20876_v47 = vld [vmem:[%s22393_s2 + $0xc3c] ss:$20 sps:$4 sm:$0xff]  }
 0x34d   : > { %v3947_v55 = vpop.f32.mrf.mxu0  ;;  %4192 = vmatmul.mubr.bf16.vlgmr.msra.gmra.mxu0 %v22532_v4  ;;  %4282 = vmatprep.subr.bf16.mxu1 %v20822_v43  ;;  %v20871_v43 = vld [vmem:[%s22393_s2 + $0x9b8] ss:$20 sps:$4 sm:$0xff]  }
 0x34e   : > { %v3948_v57 = vadd.f32 %v3947_v55, %v1728_v49  ;;  %4242 = vmatpush1.bf16.msra.mxu0 %v20817_v50  ;;  %4273 = vmatprep.mubr.bf16.mxu0 %v22538_v7  ;;  %v20879_v49 = vld [vmem:[%s22393_s2 + $0x994] ss:$20 sps:$4 sm:$0xff]   ;;  %v20874_v50 = vld [vmem:[%s22393_s2 + $0xc38] ss:$20 sps:$4 sm:$0xff]   ;;  %v20880_v55 = vld [vmem:[%s22393_s2 + $0xc10] ss:$20 sps:$4 sm:$0xff]  }
 0x34f   : > { %v3949_v60 = vpop.f32.mrf.mxu0  ;;  %v3988_v61 = vpop.f32.mrf.mxu1  ;;  %4233 = vmatmul.mubr.bf16.vlgmr.msra.gmra.mxu1 %v22604_v11  ;;  %4243 = vmatprep.subr.bf16.mxu0 %v20825_v51  ;;  %v20882_v51 = vld [vmem:[%s22393_s2 + $0xc14] ss:$20 sps:$4 sm:$0xff]  }
 0x350   : > { %v3950_v63 = vadd.f32 %v3949_v60, %v1732_v52  ;;  %v22781_v0 = vadd.f32 %v3988_v61, %v3948_v57  ;;  %4283 = vmatpush1.bf16.msra.mxu1 %v20820_v53  ;;  %4314 = vmatprep.mubr.bf16.mxu1 %v22624_v22  ;;  %v20877_v52 = vld [vmem:[%s22393_s2 + $0x990] ss:$20 sps:$4 sm:$0xff]   ;;  %v20885_v53 = vld [vmem:[%s22393_s2 + $0x96c] ss:$20 sps:$4 sm:$0xff]   ;;  %v20883_v57 = vld [vmem:[%s22393_s2 + $0x968] ss:$20 sps:$4 sm:$0xff]  }
 0x351   : > { %v3951_v3 = vpop.f32.mrf.mxu0  ;;  %v3990_v5 = vpop.f32.mrf.mxu1  ;;  %4284 = vmatprep.subr.bf16.mxu1 %v20828_v56  ;;  %v20888_v56 = vld [vmem:[%s22393_s2 + $0xbec] ss:$20 sps:$4 sm:$0xff]   ;;  %v20886_v60 = vld [vmem:[%s22393_s2 + $0xbe8] ss:$20 sps:$4 sm:$0xff]   ;;  %v20894_v61 = vld [vmem:[%s22393_s2 + $0xbc4] ss:$20 sps:$4 sm:$0xff]  }
 0x352   : > { %v22786_v8 = vadd.f32 %v3990_v5, %v3950_v63  ;;  %4244 = vmatpush1.bf16.msra.mxu0 %v20823_v58  ;;  %v20891_v58 = vld [vmem:[%s22393_s2 + $0x944] ss:$20 sps:$4 sm:$0xff]   ;;  %v20897_v63 = vld [vmem:[%s22393_s2 + $0x91c] ss:$20 sps:$4 sm:$0xff]  }
 0x353   : > { %v3952_v10 = vpop.f32.mrf.mxu0  ;;  %4245 = vmatprep.subr.bf16.mxu0 %v20831_v59  ;;  %v3992_v13 = vpop.f32.mrf.mxu1  ;;  %v20889_v59 = vld [vmem:[%s22393_s2 + $0x940] ss:$20 sps:$4 sm:$0xff]   ;;  %v20900_v3 = vld [vmem:[%s22393_s2 + $0xb9c] ss:$20 sps:$4 sm:$0xff]   ;;  %v20895_v5 = vld [vmem:[%s22393_s2 + $0x918] ss:$20 sps:$4 sm:$0xff]  }
 0x354   : > { %4285 = vmatpush1.bf16.msra.mxu1 %v20826_v2  ;;  %v20892_v2 = vld [vmem:[%s22393_s2 + $0xbc0] ss:$20 sps:$4 sm:$0xff]  }
 0x355   : > { %4286 = vmatprep.subr.bf16.mxu1 %v20834_v6  ;;  %v3993_v17 = vpop.f32.mrf.mxu1  ;;  %v20903_v6 = vld [vmem:[%s22393_s2 + $0x8f4] ss:$20 sps:$4 sm:$0xff]   ;;  %v20909_v13 = vld [vmem:[%s22393_s2 + $0x8cc] ss:$20 sps:$4 sm:$0xff]  }
 0x356   : > { %4246 = vmatpush1.bf16.msra.mxu0 %v20829_v9  ;;  %v20898_v9 = vld [vmem:[%s22393_s2 + $0xb98] ss:$20 sps:$4 sm:$0xff]   ;;  %v20906_v10 = vld [vmem:[%s22393_s2 + $0xb74] ss:$20 sps:$4 sm:$0xff]  }
 0x357   : > { %4247 = vmatprep.subr.bf16.mxu0 %v20837_v12  ;;  %v20901_v12 = vld [vmem:[%s22393_s2 + $0x8f0] ss:$20 sps:$4 sm:$0xff]   ;;  %v20907_v17 = vld [vmem:[%s22393_s2 + $0x8c8] ss:$20 sps:$4 sm:$0xff]  }
 0x358   : > { %4287 = vmatpush1.bf16.msra.mxu1 %v20832_v14  ;;  %v20904_v14 = vld [vmem:[%s22393_s2 + $0xb70] ss:$20 sps:$4 sm:$0xff]  }
 0x359   : > { %4288 = vmatprep.subr.bf16.mxu1 %v20840_v15  ;;  %v20912_v15 = vld [vmem:[%s22393_s2 + $0xb4c] ss:$20 sps:$4 sm:$0xff]  }
 0x35a   : > { %4248 = vmatpush1.bf16.msra.mxu0 %v20835_v54  ;;  %v20913_v54 = vld [vmem:[%s22393_s2 + $0x268] ss:$20 sps:$4 sm:$0xff]  }
 0x35b   : > { %4249 = vmatprep.subr.bf16.mxu0 %v20843_v19  ;;  %v20910_v19 = vld [vmem:[%s22393_s2 + $0xb48] ss:$20 sps:$4 sm:$0xff]  }
 0x35c   : > { %4289 = vmatpush1.bf16.msra.mxu1 %v20838_v20  ;;  %v20915_v20 = vld [vmem:[%s22393_s2 + $0x4e8] ss:$20 sps:$4 sm:$0xff]  }
 0x35d   : > { %4290 = vmatprep.subr.bf16.mxu1 %v20846_v21  ;;  %v20914_v21 = vld [vmem:[%s22393_s2 + $0x128] ss:$20 sps:$4 sm:$0xff]  }
 0x35e   : > { %4250 = vmatpush1.bf16.msra.mxu0 %v20841_v23  ;;  %v20917_v23 = vld [vmem:[%s22393_s2 + $0x240] ss:$20 sps:$4 sm:$0xff]  }
 0x35f   : > { %4251 = vmatprep.subr.bf16.mxu0 %v20849_v24  ;;  %v20916_v24 = vld [vmem:[%s22393_s2 + $0x3a8] ss:$20 sps:$4 sm:$0xff]  }
 0x360   : > { %4291 = vmatpush1.bf16.msra.mxu1 %v20844_v25 }
 0x361   : > { %4292 = vmatprep.subr.bf16.mxu1 %v20852_v26  ;;  %v20919_v26 = vld [vmem:[%s22393_s2 + $0x4c0] ss:$20 sps:$4 sm:$0xff]  }
 0x362   : > { %4252 = vmatpush1.bf16.msra.mxu0 %v20847_v28 }
 0x363   : > { %4253 = vmatprep.subr.bf16.mxu0 %v20855_v29  ;;  %v20918_v29 = vld [vmem:[%s22393_s2 + $0x100] ss:$20 sps:$4 sm:$0xff]  }
 0x364   : > { %4293 = vmatpush1.bf16.msra.mxu1 %v20850_v31 }
 0x365   : > { %4294 = vmatprep.subr.bf16.mxu1 %v20858_v32 }
 0x366   : > { %4254 = vmatpush1.bf16.msra.mxu0 %v20853_v34  ;;  %v20921_v34 = vld [vmem:[%s22393_s2 + $0x218] ss:$20 sps:$4 sm:$0xff]  }
 0x367   : > { %4255 = vmatprep.subr.bf16.mxu0 %v20861_v35 }
 0x368   : > { %4295 = vmatpush1.bf16.msra.mxu1 %v20856_v36 }
 0x369   : > { %4296 = vmatprep.subr.bf16.mxu1 %v20864_v18 }
 0x36a   : > { %4256 = vmatpush1.bf16.msra.mxu0 %v20859_v37  ;;  %v20923_v37 = vld [vmem:[%s22393_s2 + $0x498] ss:$20 sps:$4 sm:$0xff]  }
 0x36b   : > { %4257 = vmatprep.subr.bf16.mxu0 %v20867_v38 }
 0x36c   : > { %4297 = vmatpush1.bf16.msra.mxu1 %v20862_v39  ;;  %v20922_v39 = vld [vmem:[%s22393_s2 + $0xd8] ss:$20 sps:$4 sm:$0xff]  }
 0x36d   : > { %4298 = vmatprep.subr.bf16.mxu1 %v20870_v40  ;;  %v20925_v40 = vld [vmem:[%s22393_s2 + $0x1f0] ss:$20 sps:$4 sm:$0xff]  }
 0x36e   : > { %4258 = vmatpush2.bf16.msra.mxu0 %v20865_v41 }
 0x36f   : > { %4259 = vmatprep.subr.bf16.mxu0 %v20873_v42  ;;  %v20927_v42 = vld [vmem:[%s22393_s2 + $0x470] ss:$20 sps:$4 sm:$0xff]  }
 0x370   : > { %4299 = vmatpush2.bf16.msra.mxu1 %v20868_v45 }
 0x371   : > { %4300 = vmatprep.subr.bf16.mxu1 %v20876_v47  ;;  %v20926_v47 = vld [vmem:[%s22393_s2 + $0xb0] ss:$20 sps:$4 sm:$0xff]  }
 0x372   : > { %4260 = vmatpush2.bf16.msra.mxu0 %v20871_v43  ;;  %v20929_v43 = vld [vmem:[%s22393_s2 + $0x1c8] ss:$20 sps:$4 sm:$0xff]  }
 0x373   : > { %4261 = vmatprep.subr.bf16.mxu0 %v20879_v49  ;;  %v20928_v49 = vld [vmem:[%s22393_s2 + $0x330] ss:$20 sps:$4 sm:$0xff]  }
 0x374   : > { %4301 = vmatpush2.bf16.msra.mxu1 %v20874_v50  ;;  %v20931_v50 = vld [vmem:[%s22393_s2 + $0x448] ss:$20 sps:$4 sm:$0xff]  }
 0x375   : > { %4302 = vmatprep.subr.bf16.mxu1 %v20882_v51  ;;  %v20930_v51 = vld [vmem:[%s22393_s2 + $0x88] ss:$20 sps:$4 sm:$0xff]  }
 0x376   : > { %4262 = vmatpush2.bf16.msra.mxu0 %v20877_v52  ;;  %v20933_v52 = vld [vmem:[%s22393_s2 + $0x1a0] ss:$20 sps:$4 sm:$0xff]  }
 0x377   : > { %4263 = vmatprep.subr.bf16.mxu0 %v20885_v53  ;;  %v20932_v53 = vld [vmem:[%s22393_s2 + $0x308] ss:$20 sps:$4 sm:$0xff]  }
 0x378   : > { %4303 = vmatpush2.bf16.msra.mxu1 %v20880_v55  ;;  %v20935_v55 = vld [vmem:[%s22393_s2 + $0x420] ss:$20 sps:$4 sm:$0xff]  }
 0x379   : > { %4304 = vmatprep.subr.bf16.mxu1 %v20888_v56  ;;  %v20934_v56 = vld [vmem:[%s22393_s2 + $0x60] ss:$20 sps:$4 sm:$0xff]  }
 0x37a   : > { %4264 = vmatpush2.bf16.msra.mxu0 %v20883_v57  ;;  %v20937_v57 = vld [vmem:[%s22393_s2 + $0x178] ss:$20 sps:$4 sm:$0xff]  }
 0x37b   : > { %4265 = vmatprep.subr.bf16.mxu0 %v20891_v58  ;;  %v20936_v58 = vld [vmem:[%s22393_s2 + $0x2e0] ss:$20 sps:$4 sm:$0xff]  }
 0x37c   : > { %4305 = vmatpush2.bf16.msra.mxu1 %v20886_v60  ;;  %v20939_v60 = vld [vmem:[%s22393_s2 + $0x3f8] ss:$20 sps:$4 sm:$0xff]  }
 0x37d   : > { %4306 = vmatprep.subr.bf16.mxu1 %v20894_v61  ;;  %v20938_v61 = vld [vmem:[%s22393_s2 + $0x38] ss:$20 sps:$4 sm:$0xff]  }
 0x37e   : > { %4266 = vmatpush2.bf16.msra.mxu0 %v20889_v59  ;;  %v20941_v59 = vld [vmem:[%s22393_s2 + $0x150] ss:$20 sps:$4 sm:$0xff]  }
 0x37f   : > { %4267 = vmatprep.subr.bf16.mxu0 %v20897_v63  ;;  %v20940_v63 = vld [vmem:[%s22393_s2 + $0x2b8] ss:$20 sps:$4 sm:$0xff]  }
 0x380   : > { %4307 = vmatpush2.bf16.msra.mxu1 %v20892_v2  ;;  %v20943_v2 = vld [vmem:[%s22393_s2 + $0x3d0] ss:$20 sps:$4 sm:$0xff]  }
 0x381   : > { %4308 = vmatprep.subr.bf16.mxu1 %v20900_v3  ;;  %v20942_v3 = vld [vmem:[%s22393_s2 + $0x10] ss:$20 sps:$4 sm:$0xff]  }
 0x382   : > { %4268 = vmatpush2.bf16.msra.mxu0 %v20895_v5  ;;  %v20945_v5 = vld [vmem:[%s22393_s2 + $0x768] ss:$20 sps:$4 sm:$0xff]  }
 0x383   : > { %4269 = vmatprep.subr.bf16.mxu0 %v20903_v6  ;;  %v20944_v6 = vld [vmem:[%s22393_s2 + $0x290] ss:$20 sps:$4 sm:$0xff]  }
 0x384   : > { %4309 = vmatpush2.bf16.msra.mxu1 %v20898_v9  ;;  %v20947_v9 = vld [vmem:[%s22393_s2 + $0x9e8] ss:$20 sps:$4 sm:$0xff]  }
 0x385   : > { %4310 = vmatprep.subr.bf16.mxu1 %v20906_v10  ;;  %v20946_v10 = vld [vmem:[%s22393_s2 + $0x628] ss:$20 sps:$4 sm:$0xff]  }
 0x386   : > { %4270 = vmatpush2.bf16.msra.mxu0 %v20901_v12  ;;  %v20949_v12 = vld [vmem:[%s22393_s2 + $0x740] ss:$20 sps:$4 sm:$0xff]  }
 0x387   : > { %4271 = vmatprep.subr.bf16.mxu0 %v20909_v13  ;;  %v20948_v13 = vld [vmem:[%s22393_s2 + $0x8a8] ss:$20 sps:$4 sm:$0xff]  }
 0x388   : > { %4311 = vmatpush2.bf16.msra.mxu1 %v20904_v14  ;;  %v20951_v14 = vld [vmem:[%s22393_s2 + $0x9c0] ss:$20 sps:$4 sm:$0xff]  }
 0x389   : > { %4312 = vmatprep.subr.bf16.mxu1 %v20912_v15  ;;  %v20950_v15 = vld [vmem:[%s22393_s2 + $0x600] ss:$20 sps:$4 sm:$0xff]  }
 0x38a   : > { %4272 = vmatpush2.bf16.msra.mxu0 %v20907_v17  ;;  %v20953_v17 = vld [vmem:[%s22393_s2 + $0x718] ss:$20 sps:$4 sm:$0xff]  }
 0x38b   : > { %20025 = vmatprep.subr.bf16.mxu0 %v20913_v54  ;;  %v20952_v54 = vld [vmem:[%s22393_s2 + $0x880] ss:$20 sps:$4 sm:$0xff]  }
 0x38c   : > { %4313 = vmatpush2.bf16.msra.mxu1 %v20910_v19  ;;  %v20954_v19 = vld [vmem:[%s22393_s2 + $0x5d8] ss:$20 sps:$4 sm:$0xff]  }
 0x38d   : > { %v4029_v25 = vpop.f32.mrf.mxu0  ;;  %4274 = vmatmul.mubr.bf16.vlgmr.msra.gmra.mxu0 %v22612_v16  ;;  %20047 = vmatprep.subr.bf16.mxu1 %v20915_v20  ;;  %v20959_v20 = vld [vmem:[%s22393_s2 + $0x970] ss:$20 sps:$4 sm:$0xff]  }
 0x38e   : > { %v4030_v28 = vadd.f32 %v4029_v25, %v22781_v0  ;;  %20026 = vmatpush3.bf16.msra.mxu0 %v20914_v21  ;;  %4355 = vmatprep.mubr.bf16.mxu0 %v22495_v46  ;;  %v20920_v0 = vld [vmem:[%s22393_s2 + $0x380] ss:$20 sps:$4 sm:$0xff]   ;;  %v20958_v21 = vld [vmem:[%s22393_s2 + $0x5b0] ss:$20 sps:$4 sm:$0xff]   ;;  %v20962_v25 = vld [vmem:[%s22393_s2 + $0x588] ss:$20 sps:$4 sm:$0xff]  }
 0x38f   : > { %v4031_v31 = vpop.f32.mrf.mxu0  ;;  %v4070_v32 = vpop.f32.mrf.mxu1  ;;  %4315 = vmatmul.mubr.bf16.vlgmr.msra.gmra.mxu1 %v22689_v30  ;;  %20027 = vmatprep.subr.bf16.mxu0 %v20917_v23  ;;  %v20960_v23 = vld [vmem:[%s22393_s2 + $0x830] ss:$20 sps:$4 sm:$0xff]  }
 0x390   : > { %v4032_v35 = vadd.f32 %v4031_v31, %v22786_v8  ;;  %v22855_v36 = vadd.f32 %v4070_v32, %v4030_v28  ;;  %20048 = vmatpush3.bf16.msra.mxu1 %v20916_v24  ;;  %4395 = vmatprep.mubr.bf16.mxu1 %v22502_v48  ;;  %v20924_v48 = vld [vmem:[%s22393_s2 + $0x358] ss:$20 sps:$4 sm:$0xff]   ;;  %v20963_v24 = vld [vmem:[%s22393_s2 + $0x948] ss:$20 sps:$4 sm:$0xff]   ;;  %v20966_v31 = vld [vmem:[%s22393_s2 + $0x560] ss:$20 sps:$4 sm:$0xff]  }
 0x391   : > { %v4033_v18 = vpop.f32.mrf.mxu0  ;;  %v4072_v46 = vpop.f32.mrf.mxu1  ;;  %20049 = vmatprep.subr.bf16.mxu1 %v20919_v26  ;;  %v20965_v26 = vld [vmem:[%s22393_s2 + $0x6a0] ss:$20 sps:$4 sm:$0xff]   ;;  %v20964_v28 = vld [vmem:[%s22393_s2 + $0x808] ss:$20 sps:$4 sm:$0xff]   ;;  %v20969_v32 = vld [vmem:[%s22393_s2 + $0x678] ss:$20 sps:$4 sm:$0xff]  }
 0x392   : > { %v22860_v38 = vadd.f32 %v4072_v46, %v4032_v35  ;;  %20028 = vmatpush3.bf16.msra.mxu0 %v20918_v29  ;;  %v20967_v29 = vld [vmem:[%s22393_s2 + $0x920] ss:$20 sps:$4 sm:$0xff]   ;;  %v20971_v35 = vld [vmem:[%s22393_s2 + $0x8f8] ss:$20 sps:$4 sm:$0xff]   ;;  %v20973_v18 = vld [vmem:[%s22393_s2 + $0x650] ss:$20 sps:$4 sm:$0xff]  }
 0x393   : > { %v4034_v8 = vpop.f32.mrf.mxu0  ;;  %20029 = vmatprep.subr.bf16.mxu0 %v20921_v34  ;;  %v4074_v41 = vpop.f32.mrf.mxu1  ;;  %v20968_v34 = vld [vmem:[%s22393_s2 + $0x7e0] ss:$20 sps:$4 sm:$0xff]   ;;  %v20972_v46 = vld [vmem:[%s22393_s2 + $0x7b8] ss:$20 sps:$4 sm:$0xff]  }
 0x394   : > { %20050 = vmatpush3.bf16.msra.mxu1 %v20920_v0  ;;  %v20970_v0 = vld [vmem:[%s22393_s2 + $0x538] ss:$20 sps:$4 sm:$0xff]   ;;  %v20977_v8 = vld [vmem:[%s22393_s2 + $0xc68] ss:$20 sps:$4 sm:$0xff]  }
 0x395   : > { %20051 = vmatprep.subr.bf16.mxu1 %v20923_v37  ;;  %v4075_v45 = vpop.f32.mrf.mxu1  ;;  %v20975_v37 = vld [vmem:[%s22393_s2 + $0x8d0] ss:$20 sps:$4 sm:$0xff]   ;;  %v20978_v41 = vld [vmem:[%s22393_s2 + $0xb28] ss:$20 sps:$4 sm:$0xff]  }
 0x396   : > { %20030 = vmatpush3.bf16.msra.mxu0 %v20922_v39  ;;  %v20974_v39 = vld [vmem:[%s22393_s2 + $0x510] ss:$20 sps:$4 sm:$0xff]  }
 0x397   : > { %20031 = vmatprep.subr.bf16.mxu0 %v20925_v40  ;;  %v20976_v40 = vld [vmem:[%s22393_s2 + $0x790] ss:$20 sps:$4 sm:$0xff]  }
 0x398   : > { %20052 = vmatpush3.bf16.msra.mxu1 %v20924_v48  ;;  %v20979_v48 = vld [vmem:[%s22393_s2 + $0xc40] ss:$20 sps:$4 sm:$0xff]  }
 0x399   : > { %20053 = vmatprep.subr.bf16.mxu1 %v20927_v42 }
 0x39a   : > { %20032 = vmatpush3.bf16.msra.mxu0 %v20926_v47  ;;  %v20980_v47 = vld [vmem:[%s22393_s2 + $0xb00] ss:$20 sps:$4 sm:$0xff]  }
 0x39b   : > { %20033 = vmatprep.subr.bf16.mxu0 %v20929_v43 }
 0x39c   : > { %20054 = vmatpush3.bf16.msra.mxu1 %v20928_v49  ;;  %v20981_v49 = vld [vmem:[%s22393_s2 + $0xc18] ss:$20 sps:$4 sm:$0xff]  }
 0x39d   : > { %20055 = vmatprep.subr.bf16.mxu1 %v20931_v50 }
 0x39e   : > { %20034 = vmatpush3.bf16.msra.mxu0 %v20930_v51 }
 0x39f   : > { %20035 = vmatprep.subr.bf16.mxu0 %v20933_v52 }
 0x3a0   : > { %20056 = vmatpush3.bf16.msra.mxu1 %v20932_v53  ;;  %v20983_v53 = vld [vmem:[%s22393_s2 + $0xbf0] ss:$20 sps:$4 sm:$0xff]  }
 0x3a1   : > { %20057 = vmatprep.subr.bf16.mxu1 %v20935_v55 }
 0x3a2   : > { %20036 = vmatpush3.bf16.msra.mxu0 %v20934_v56  ;;  %v20984_v56 = vld [vmem:[%s22393_s2 + $0xab0] ss:$20 sps:$4 sm:$0xff]  }
 0x3a3   : > { %20037 = vmatprep.subr.bf16.mxu0 %v20937_v57  ;;  %v20986_v57 = vld [vmem:[%s22393_s2 + $0xa88] ss:$20 sps:$4 sm:$0xff]  }
 0x3a4   : > { %20058 = vmatpush3.bf16.msra.mxu1 %v20936_v58  ;;  %v20987_v58 = vld [vmem:[%s22393_s2 + $0xba0] ss:$20 sps:$4 sm:$0xff]  }
 0x3a5   : > { %20059 = vmatprep.subr.bf16.mxu1 %v20939_v60 }
 0x3a6   : > { %20038 = vmatpush3.bf16.msra.mxu0 %v20938_v61  ;;  %v20988_v61 = vld [vmem:[%s22393_s2 + $0xa60] ss:$20 sps:$4 sm:$0xff]  }
 0x3a7   : > { %20039 = vmatprep.subr.bf16.mxu0 %v20941_v59 }
 0x3a8   : > { %20060 = vmatpush3.bf16.msra.mxu1 %v20940_v63  ;;  %v20989_v63 = vld [vmem:[%s22393_s2 + $0xb78] ss:$20 sps:$4 sm:$0xff]  }
 0x3a9   : > { %20061 = vmatprep.subr.bf16.mxu1 %v20943_v2  ;;  %v20990_v2 = vld [vmem:[%s22393_s2 + $0xa38] ss:$20 sps:$4 sm:$0xff]  }
 0x3aa   : > { %20040 = vmatpush3.bf16.msra.mxu0 %v20942_v3  ;;  %v20991_v3 = vld [vmem:[%s22393_s2 + $0xb50] ss:$20 sps:$4 sm:$0xff]  }
 0x3ab   : > { %20069 = vmatprep.subr.bf16.mxu0 %v20945_v5  ;;  %v20992_v5 = vld [vmem:[%s22393_s2 + $0xa10] ss:$20 sps:$4 sm:$0xff]  }
 0x3ac   : > { %20062 = vmatpush3.bf16.msra.mxu1 %v20944_v6  ;;  %v1735_v6 = vsub.s32 2, %v22476_v27 }
 0x3ad   : > { %4356 = vmatmul.mubr.bf16.vlgmr.msra.gmra.mxu0 %v22521_v62  ;;  %20091 = vmatprep.subr.bf16.mxu1 %v20947_v9  ;;  %v20955_v62 = vld [vmem:[%s22393_s2 + $0x998] ss:$20 sps:$4 sm:$0xff]   ;;  %v1739_v9 = vsub.s32 3, %v22476_v27 }
 0x3ae   : > { %20070 = vmatpush3.bf16.msra.mxu0 %v20946_v10  ;;  %4435 = vmatprep.mubr.bf16.mxu0 %v22526_v1  ;;  %v20957_v1 = vld [vmem:[%s22393_s2 + $0x6f0] ss:$20 sps:$4 sm:$0xff]   ;;  %v1736_v10 = vrot.slane %v22761_v44, %v1735_v6 }
 0x3af   : > { %4396 = vmatmul.mubr.bf16.vlgmr.msra.gmra.mxu1 %v22532_v4  ;;  %20071 = vmatprep.subr.bf16.mxu0 %v20949_v12  ;;  %v20956_v4 = vld [vmem:[%s22393_s2 + $0x858] ss:$20 sps:$4 sm:$0xff]   ;;  %v1740_v12 = vrot.slane %v22761_v44, %v1739_v9 }
 0x3b0   : > { %20092 = vmatpush3.bf16.msra.mxu1 %v20948_v13  ;;  %4475 = vmatprep.mubr.bf16.mxu1 %v22538_v7  ;;  %v20961_v7 = vld [vmem:[%s22393_s2 + $0x6c8] ss:$20 sps:$4 sm:$0xff]  }
 0x3b1   : > { %20093 = vmatprep.subr.bf16.mxu1 %v20951_v14 }
 0x3b2   : > { %20072 = vmatpush3.bf16.msra.mxu0 %v20950_v15 }
 0x3b3   : > { %20073 = vmatprep.subr.bf16.mxu0 %v20953_v17 }
 0x3b4   : > { %20094 = vmatpush3.bf16.msra.mxu1 %v20952_v54 }
 0x3b5   : > { %20095 = vmatprep.subr.bf16.mxu1 %v20955_v62 }
 0x3b6   : > { %20074 = vmatpush3.bf16.msra.mxu0 %v20954_v19 }
 0x3b7   : > { %20075 = vmatprep.subr.bf16.mxu0 %v20957_v1 }
 0x3b8   : > { %20096 = vmatpush3.bf16.msra.mxu1 %v20956_v4 }
 0x3b9   : > { %20097 = vmatprep.subr.bf16.mxu1 %v20959_v20 }
 0x3ba   : > { %20076 = vmatpush3.bf16.msra.mxu0 %v20958_v21 }
 0x3bb   : > { %20077 = vmatprep.subr.bf16.mxu0 %v20961_v7 }
 0x3bc   : > { %20098 = vmatpush3.bf16.msra.mxu1 %v20960_v23 }
 0x3bd   : > { %20099 = vmatprep.subr.bf16.mxu1 %v20963_v24 }
 0x3be   : > { %20078 = vmatpush3.bf16.msra.mxu0 %v20962_v25 }
 0x3bf   : > { %20079 = vmatprep.subr.bf16.mxu0 %v20965_v26 }
 0x3c0   : > { %20100 = vmatpush3.bf16.msra.mxu1 %v20964_v28 }
 0x3c1   : > { %20101 = vmatprep.subr.bf16.mxu1 %v20967_v29 }
 0x3c2   : > { %20080 = vmatpush3.bf16.msra.mxu0 %v20966_v31 }
 0x3c3   : > { %20081 = vmatprep.subr.bf16.mxu0 %v20969_v32 }
 0x3c4   : > { %20102 = vmatpush3.bf16.msra.mxu1 %v20968_v34 }
 0x3c5   : > { %20103 = vmatprep.subr.bf16.mxu1 %v20971_v35 }
 0x3c6   : > { %20082 = vmatpush3.bf16.msra.mxu0 %v20970_v0 }
 0x3c7   : > { %20083 = vmatprep.subr.bf16.mxu0 %v20973_v18 }
 0x3c8   : > { %20104 = vmatpush3.bf16.msra.mxu1 %v20972_v46 }
 0x3c9   : > { %20105 = vmatprep.subr.bf16.mxu1 %v20975_v37 }
 0x3ca   : > { %20084 = vmatpush3.bf16.msra.mxu0 %v20974_v39 }
 0x3cb   : > { %20113 = vmatprep.subr.bf16.mxu0 %v20977_v8 }
 0x3cc   : > { %20106 = vmatpush3.bf16.msra.mxu1 %v20976_v40 }
 0x3cd   : > { %v4111_v42 = vpop.f32.mrf.mxu0  ;;  %4436 = vmatmul.mubr.bf16.vlgmr.msra.gmra.mxu0 %v22604_v11 }
 0x3ce   : > { %v4112_v45 = vadd.f32 %v4111_v42, %v22855_v36  ;;  %20114 = vmatpush3.bf16.msra.mxu0 %v20978_v41  ;;  %4515 = vmatprep.mubr.bf16.mxu0 %v22624_v22  ;;  %v20982_v36 = vld [vmem:[%s22393_s2 + $0xad8] ss:$20 sps:$4 sm:$0xff]  }
 0x3cf   : > { %v4113_v43 = vpop.f32.mrf.mxu0  ;;  %4476 = vmatmul.mubr.bf16.vlgmr.msra.gmra.mxu1 %v22612_v16  ;;  %20115 = vmatprep.subr.bf16.mxu0 %v20979_v48  ;;  %v4152_v50 = vpop.f32.mrf.mxu1 }
 0x3d0   : > { %20993 = vtanh.f32 %v4112_v45  ;;  %v4114_v51 = vadd.f32 %v4113_v43, %v22860_v38  ;;  %v20985_v38 = vld [vmem:[%s22393_s2 + $0xbc8] ss:$20 sps:$4 sm:$0xff]   ;;  %v4153_v13 = vadd.f32 %v4152_v50, %v1736_v10 }
 0x3d1   : > { %v4115_v11 = vpop.f32.mrf.mxu0  ;;  %v4154_v52 = vpop.f32.mrf.mxu1 }
 0x3d2   : > { %20995 = vtanh.f32 %v4114_v51  ;;  %20116 = vmatpush3.bf16.msra.mxu0 %v20980_v47  ;;  %v4155_v15 = vadd.f32 %v4154_v52, %v1740_v12 }
 0x3d3   : > { %v4116_v22 = vpop.f32.mrf.mxu0  ;;  %20117 = vmatprep.subr.bf16.mxu0 %v20981_v49  ;;  %v4156_v16 = vpop.f32.mrf.mxu1 }
 0x3d4   : > { %v1743_v16 = vsub.s32 4, %v22476_v27 }
 0x3d5   : > { %v4157_v55 = vpop.f32.mrf.mxu1 }
 0x3d6   : > { %20118 = vmatpush3.bf16.msra.mxu0 %v20982_v36  ;;  %v1744_v55 = vrot.slane %v22761_v44, %v1743_v16 }
 0x3d7   : > { %20119 = vmatprep.subr.bf16.mxu0 %v20983_v53 }
 0x3da   : > { %20120 = vmatpush3.bf16.msra.mxu0 %v20984_v56 }
 0x3db   : > { %20121 = vmatprep.subr.bf16.mxu0 %v20985_v38 }
 0x3dd   : > { %v22936_v60 = vpop.eup %20993 }
 0x3de   : > { %20122 = vmatpush3.bf16.msra.mxu0 %v20986_v57 }
 0x3df   : > { %v22939_v59 = vpop.eup %20995  ;;  %20123 = vmatprep.subr.bf16.mxu0 %v20987_v58 }
 0x3e2   : > { %20124 = vmatpush3.bf16.msra.mxu0 %v20988_v61 }
 0x3e3   : > { %20125 = vmatprep.subr.bf16.mxu0 %v20989_v63 }
 0x3e6   : > { %20126 = vmatpush3.bf16.msra.mxu0 %v20990_v2 }
 0x3e7   : > { %20127 = vmatprep.subr.bf16.mxu0 %v20991_v3 }
 0x3ea   : > { %20128 = vmatpush3.bf16.msra.mxu0 %v20992_v5 }
 0x3ed   : > { %4516 = vmatmul.mubr.bf16.vlgmr.msra.gmra.mxu0 %v22689_v30 }
 0x40d   : > { %v4193_v14 = vpop.f32.mrf.mxu0 }
 0x40e   : > { %v4194_v17 = vadd.f32 %v4193_v14, %v4153_v13 }
 0x40f   : > { %v4195_v54 = vpop.f32.mrf.mxu0  ;;  %v4234_v62 = vpop.f32.mrf.mxu1 }
 0x410   : > { %v4196_v19 = vadd.f32 %v4195_v54, %v4155_v15  ;;  %v4235_v1 = vadd.f32 %v4234_v62, %v4194_v17 }
 0x411   : > { %v4197_v4 = vpop.f32.mrf.mxu0  ;;  %v4236_v20 = vpop.f32.mrf.mxu1 }
 0x412   : > { %v4237_v21 = vadd.f32 %v4236_v20, %v4196_v19 }
 0x413   : > { %v4198_v30 = vpop.f32.mrf.mxu0  ;;  %v4238_v7 = vpop.f32.mrf.mxu1 }
 0x415   : > { %v4239_v23 = vpop.f32.mrf.mxu1 }
 0x44d   : > { %v4275_v24 = vpop.f32.mrf.mxu0 }
 0x44e   : > { %v4276_v25 = vadd.f32 %v4275_v24, %v4235_v1 }
 0x44f   : > { %v4277_v26 = vpop.f32.mrf.mxu0  ;;  %v4316_v28 = vpop.f32.mrf.mxu1 }
 0x450   : > { %v4278_v29 = vadd.f32 %v4277_v26, %v4237_v21  ;;  %v4317_v31 = vadd.f32 %v4316_v28, %v4276_v25 }
 0x451   : > { %v4279_v32 = vpop.f32.mrf.mxu0  ;;  %v4318_v34 = vpop.f32.mrf.mxu1 }
 0x452   : > { %20997 = vtanh.f32 %v4317_v31  ;;  %v4319_v35 = vadd.f32 %v4318_v34, %v4278_v29 }
 0x453   : > { %v4280_v0 = vpop.f32.mrf.mxu0  ;;  %v4320_v18 = vpop.f32.mrf.mxu1 }
 0x454   : > { %20999 = vtanh.f32 %v4319_v35 }
 0x455   : > { %v4321_v46 = vpop.f32.mrf.mxu1 }
 0x45f   : > { %v20998_v37 = vpop.eup %20997 }
 0x461   : > { %v21000_v39 = vpop.eup %20999 }
 0x46d   : > { %v20041_v8 = vpop.f32.mrf.mxu0 }
 0x46f   : > { %v20042_v40 = vpop.f32.mrf.mxu0  ;;  %v20063_v41 = vpop.f32.mrf.mxu1 }
 0x470   : > { %v20043_v56 = vadd.f32 %v20042_v40, %v20041_v8 }
 0x471   : > { %v20044_v48 = vpop.f32.mrf.mxu0  ;;  %v20064_v42 = vpop.f32.mrf.mxu1 }
 0x472   : > { %v4358_v38 = vadd.f32 %v20043_v56, %v1744_v55  ;;  %v20065_v57 = vadd.f32 %v20064_v42, %v20063_v41 }
 0x473   : > { %v20045_v45 = vpop.f32.mrf.mxu0  ;;  %v20066_v47 = vpop.f32.mrf.mxu1 }
 0x474   : > { %v4398_v61 = vadd.f32 %v20065_v57, %v4358_v38 }
 0x475   : > { %v20067_v43 = vpop.f32.mrf.mxu1 }
 0x48d   : > { %v20085_v49 = vpop.f32.mrf.mxu0 }
 0x48f   : > { %v20086_v50 = vpop.f32.mrf.mxu0  ;;  %v20107_v51 = vpop.f32.mrf.mxu1 }
 0x490   : > { %v20087_v58 = vadd.f32 %v20086_v50, %v20085_v49 }
 0x491   : > { %v20088_v11 = vpop.f32.mrf.mxu0  ;;  %v20108_v52 = vpop.f32.mrf.mxu1 }
 0x492   : > { %v4438_v63 = vadd.f32 %v20087_v58, %v4398_v61  ;;  %v20109_v2 = vadd.f32 %v20108_v52, %v20107_v51 }
 0x493   : > { %v20089_v36 = vpop.f32.mrf.mxu0  ;;  %v20110_v22 = vpop.f32.mrf.mxu1 }
 0x494   : > { %v4478_v6 = vadd.f32 %v20109_v2, %v4438_v63 }
 0x495   : > { %v20111_v53 = vpop.f32.mrf.mxu1 }
 0x4ad   : > { %v20129_v3 = vpop.f32.mrf.mxu0 }
 0x4af   : > { %v20130_v5 = vpop.f32.mrf.mxu0 }
 0x4b0   : > { %v20131_v9 = vadd.f32 %v20130_v5, %v20129_v3 }
 0x4b1   : > { %v20132_v10 = vpop.f32.mrf.mxu0 }
 0x4b2   : > { %v4518_v12 = vadd.f32 %v20131_v9, %v4478_v6 }
 0x4b3   : > { %v20133_v13 = vpop.f32.mrf.mxu0 }
 0x4b4   : > { %21001 = vtanh.f32 %v4518_v12 }
 0x4be   : > { %4535 = sbr.rel (%p25269_p10) target bundleno = 1230 (0x4ce), region = 104 }
 0x4c1   : > { %v21002_v14 = vpop.eup %21001 }
 0x4c2   : > { %v4532_v15 = vpack.c.bf16 %v21002_v14, %v21002_v14 }
 0x4c3   : > { %v18311_v27 = vpack.c.bf16 %v22939_v59, %v22936_v60  ;;  %v18312_v44 = vpack.c.bf16 %v21000_v39, %v20998_v37 }
 0x4c4   : > { %v4563_v17 = vrot.slane %v4532_v15, %v22483_v33 }
 0x4c5   : > { %v4549_v54 = vrot.slane %v18311_v27, %v22483_v33  ;;  %v4556_v62 = vrot.slane %v18312_v44, %v22483_v33 }
 0x4c6   : > { %v4578_v1 = vrot.slane %v4563_v17, %v22483_v33 }
 0x4c7   : > { %v4564_v19 = vcombine.low %v4549_v54, %v4556_v62 }
 0x4c9   : > { %v4571_v4 = vrot.slane %v4564_v19, %v22483_v33 }
 0x4cb   : > { %v4579_v20 = vcombine.low %v4571_v4, %v4578_v1 }
 0x4cd   : > { %4581 = vst [vmem:[#allocation3] sm:$0x1f] %v4579_v20 }
 0x4ce PF: > { %p18313_p13 = scmp.ne.s32.totalorder %s22048_s21, 1 }
 0x4d0   : > { %4585 = sbr.rel (%p18313_p13) target bundleno = 1248 (0x4e0), region = 108 }
 0x4d5   : > { %v18314_v21 = vpack.c.bf16 %v22939_v59, %v22936_v60  ;;  %v18315_v30 = vpack.c.bf16 %v21000_v39, %v20998_v37  ;;  %v4613_v7 = vrot.slane %v4532_v15, %v22483_v33 }
 0x4d7   : > { %v4599_v23 = vrot.slane %v18314_v21, %v22483_v33  ;;  %v4606_v24 = vrot.slane %v18315_v30, %v22483_v33  ;;  %v4628_v26 = vrot.slane %v4613_v7, %v22483_v33 }
 0x4d9   : > { %v4614_v25 = vcombine.low %v4599_v23, %v4606_v24 }
 0x4db   : > { %v4621_v28 = vrot.slane %v4614_v25, %v22483_v33 }
 0x4dd   : > { %v4629_v29 = vcombine.low %v4621_v28, %v4628_v26 }
 0x4df   : > { %4631 = vst [vmem:[#allocation3 + $0x5] sm:$0x1f] %v4629_v29 }
 0x4e0 PF: > { %p4633_p4 = scmp.lt.s32.totalorder %s22048_s21, 4 }
 0x4e2   : > { %p4634_p9 = pnand %p17908_p8, %p4633_p4 }
 0x4e3   : > { %p18717_p7 = scmp.ne.s32.totalorder (!%p4634_p9), %s22048_s21, 2 }
 0x4e4   : > { %4637 = sbr.rel (%p4634_p9) target bundleno = 1917 (0x77d), region = 112 }
 0x4e9   : > { %v21003_v33 = vld [vmem:[%s22403_s12 + $0x11c] ss:$20 sps:$4 sm:$0xff]   ;;  %v21005_v60 = vld [vmem:[%s22403_s12 + $0x118] ss:$20 sps:$4 sm:$0xff]   ;;  %v21009_v32 = vld [vmem:[%s22403_s12 + $0xf4] ss:$20 sps:$4 sm:$0xff]   ;;  %v5122_v63 = vlaneseq }
 0x4ea   : > { %7310 = vmatprep.subr.bf16.mxu0 %v21003_v33  ;;  %v21006_v59 = vld [vmem:[%s22403_s12 + $0x39c] ss:$20 sps:$4 sm:$0xff]   ;;  %v21008_v31 = vld [vmem:[%s22403_s12 + $0x398] ss:$20 sps:$4 sm:$0xff]   ;;  %v21012_v35 = vld [vmem:[%s22403_s12 + $0x374] ss:$20 sps:$4 sm:$0xff]  }
 0x4eb   : > { %7311 = vmatpush1.bf16.msra.mxu0 %v21005_v60  ;;  %v21011_v34 = vld [vmem:[%s22403_s12 + $0xf0] ss:$20 sps:$4 sm:$0xff]   ;;  %7351 = vmatprep.subr.bf16.mxu1 %v21006_v59  ;;  %v21015_v18 = vld [vmem:[%s22403_s12 + $0xcc] ss:$20 sps:$4 sm:$0xff]   ;;  %v21017_v46 = vld [vmem:[%s22403_s12 + $0xc8] ss:$20 sps:$4 sm:$0xff]  }
 0x4ec   : > { %7352 = vmatpush1.bf16.msra.mxu1 %v21008_v31  ;;  %7312 = vmatprep.subr.bf16.mxu0 %v21009_v32  ;;  %v21014_v0 = vld [vmem:[%s22403_s12 + $0x370] ss:$20 sps:$4 sm:$0xff]   ;;  %v21018_v37 = vld [vmem:[%s22403_s12 + $0x34c] ss:$20 sps:$4 sm:$0xff]   ;;  %v21020_v8 = vld [vmem:[%s22403_s12 + $0x348] ss:$20 sps:$4 sm:$0xff]  }
 0x4ed   : > { %7353 = vmatprep.subr.bf16.mxu1 %v21012_v35  ;;  %v21021_v39 = vld [vmem:[%s22403_s12 + $0xa4] ss:$20 sps:$4 sm:$0xff]   ;;  %v21023_v41 = vld [vmem:[%s22403_s12 + $0xa0] ss:$20 sps:$4 sm:$0xff]   ;;  %v21027_v48 = vld [vmem:[%s22403_s12 + $0x7c] ss:$20 sps:$4 sm:$0xff]  }
 0x4ee   : > { %v21024_v40 = vld [vmem:[%s22403_s12 + $0x324] ss:$20 sps:$4 sm:$0xff]   ;;  %v21026_v42 = vld [vmem:[%s22403_s12 + $0x320] ss:$20 sps:$4 sm:$0xff]   ;;  %v21030_v45 = vld [vmem:[%s22403_s12 + $0x2fc] ss:$20 sps:$4 sm:$0xff]  }
 0x4ef   : > { %7313 = vmatpush1.bf16.msra.mxu0 %v21011_v34  ;;  %v21029_v47 = vld [vmem:[%s22403_s12 + $0x78] ss:$20 sps:$4 sm:$0xff]   ;;  %v21033_v43 = vld [vmem:[%s22403_s12 + $0x54] ss:$20 sps:$4 sm:$0xff]   ;;  %v21035_v51 = vld [vmem:[%s22403_s12 + $0x50] ss:$20 sps:$4 sm:$0xff]  }
 0x4f0   : > { %7314 = vmatprep.subr.bf16.mxu0 %v21015_v18  ;;  %7354 = vmatpush1.bf16.msra.mxu1 %v21014_v0  ;;  %v21032_v49 = vld [vmem:[%s22403_s12 + $0x2f8] ss:$20 sps:$4 sm:$0xff]   ;;  %v21036_v50 = vld [vmem:[%s22403_s12 + $0x2d4] ss:$20 sps:$4 sm:$0xff]   ;;  %v21038_v52 = vld [vmem:[%s22403_s12 + $0x2d0] ss:$20 sps:$4 sm:$0xff]  }
 0x4f1   : > { %7355 = vmatprep.subr.bf16.mxu1 %v21018_v37  ;;  %v21039_v11 = vld [vmem:[%s22403_s12 + $0x2c] ss:$20 sps:$4 sm:$0xff]   ;;  %v21041_v22 = vld [vmem:[%s22403_s12 + $0x28] ss:$20 sps:$4 sm:$0xff]   ;;  %v21045_v53 = vld [vmem:[%s22403_s12 + $0x4] ss:$20 sps:$4 sm:$0xff]  }
 0x4f2   : > { %v21042_v36 = vld [vmem:[%s22403_s12 + $0x2ac] ss:$20 sps:$4 sm:$0xff]   ;;  %v21044_v16 = vld [vmem:[%s22403_s12 + $0x2a8] ss:$20 sps:$4 sm:$0xff]   ;;  %v21048_v55 = vld [vmem:[%s22403_s12 + $0x284] ss:$20 sps:$4 sm:$0xff]  }
 0x4f3   : > { %7315 = vmatpush1.bf16.msra.mxu0 %v21017_v46  ;;  %v21047_v56 = vld [vmem:[%s22403_s12] ss:$20 sps:$4 sm:$0xff]   ;;  %v21051_v38 = vld [vmem:[%s22403_s12 + $0x25c] ss:$20 sps:$4 sm:$0xff]   ;;  %v21053_v61 = vld [vmem:[%s22403_s12 + $0x258] ss:$20 sps:$4 sm:$0xff]  }
 0x4f4   : > { %7316 = vmatprep.subr.bf16.mxu0 %v21021_v39  ;;  %7356 = vmatpush1.bf16.msra.mxu1 %v21020_v8  ;;  %v21050_v57 = vld [vmem:[%s22403_s12 + $0x280] ss:$20 sps:$4 sm:$0xff]   ;;  %v21054_v58 = vld [vmem:[%s22403_s12 + $0x4dc] ss:$20 sps:$4 sm:$0xff]   ;;  %v21944_v2 = vmov 1966171168  }
 0x4f5   : > { %7357 = vmatprep.subr.bf16.mxu1 %v21024_v40  ;;  %v5151_v3 = vunpack.c.l.s4 %v21944_v2  ;;  %v21057_v5 = vld [vmem:[%s22403_s12 + $0x234] ss:$20 sps:$4 sm:$0xff]   ;;  %v21056_v6 = vld [vmem:[%s22403_s12 + $0x4d8] ss:$20 sps:$4 sm:$0xff]   ;;  %v21059_v10 = vld [vmem:[%s22403_s12 + $0x230] ss:$20 sps:$4 sm:$0xff]  }
 0x4f6   : > { %v21060_v9 = vld [vmem:[%s22403_s12 + $0x4b4] ss:$20 sps:$4 sm:$0xff]   ;;  %v23013_v12 = vshrl.u32 %v5122_v63, 7  ;;  %v21063_v14 = vld [vmem:[%s22403_s12 + $0x20c] ss:$20 sps:$4 sm:$0xff]  }
 0x4f7   : > { %7317 = vmatpush1.bf16.msra.mxu0 %v21023_v41  ;;  %v5152_v13 = vunpack.c.0.s8 %v5151_v3  ;;  %v21062_v15 = vld [vmem:[%s22403_s12 + $0x4b0] ss:$20 sps:$4 sm:$0xff]   ;;  %v21066_v27 = vld [vmem:[%s22403_s12 + $0x48c] ss:$20 sps:$4 sm:$0xff]   ;;  %v21065_v44 = vld [vmem:[%s22403_s12 + $0x208] ss:$20 sps:$4 sm:$0xff]  }
 0x4f8   : > { %7318 = vmatprep.subr.bf16.mxu0 %v21027_v48  ;;  %7358 = vmatpush1.bf16.msra.mxu1 %v21026_v42  ;;  %v21069_v54 = vld [vmem:[%s22403_s12 + $0x1e4] ss:$20 sps:$4 sm:$0xff]   ;;  %v21068_v62 = vld [vmem:[%s22403_s12 + $0x488] ss:$20 sps:$4 sm:$0xff]   ;;  %v21071_v4 = vld [vmem:[%s22403_s12 + $0x1e0] ss:$20 sps:$4 sm:$0xff]  }
 0x4f9   : > { %7359 = vmatprep.subr.bf16.mxu1 %v21030_v45  ;;  %v23020_v17 = vsub.s32 %v5152_v13, %v23013_v12  ;;  %v21072_v19 = vld [vmem:[%s22403_s12 + $0x464] ss:$20 sps:$4 sm:$0xff]   ;;  %v21075_v21 = vld [vmem:[%s22403_s12 + $0x1bc] ss:$20 sps:$4 sm:$0xff]   ;;  %v21074_v30 = vld [vmem:[%s22403_s12 + $0x460] ss:$20 sps:$4 sm:$0xff]  }
 0x4fa   : > { %v4638_v1 = vld [vmem:[#allocation3] sm:$0xff]  ;;  %v21083_v59 = vld [vmem:[%s22403_s12 + $0x190] ss:$20 sps:$4 sm:$0xff]   ;;  %v21087_v31 = vld [vmem:[%s22403_s12 + $0x16c] ss:$20 sps:$4 sm:$0xff]  }
 0x4fb   : > { %7319 = vmatpush1.bf16.msra.mxu0 %v21029_v47  ;;  %v5156_v20 = vrot.slane %v4638_v1, %v23020_v17  ;;  %v21078_v23 = vld [vmem:[%s22403_s12 + $0x43c] ss:$20 sps:$4 sm:$0xff]   ;;  %v21077_v24 = vld [vmem:[%s22403_s12 + $0x1b8] ss:$20 sps:$4 sm:$0xff]   ;;  %v21081_v26 = vld [vmem:[%s22403_s12 + $0x194] ss:$20 sps:$4 sm:$0xff]   ;;  %v5149_v33 = vcombine.high %v4638_v1, %v4638_v1 }
 0x4fc   : > { %7320 = vmatprep.subr.bf16.mxu0 %v21033_v43  ;;  %7360 = vmatpush1.bf16.msra.mxu1 %v21032_v49  ;;  %v21080_v28 = vld [vmem:[%s22403_s12 + $0x438] ss:$20 sps:$4 sm:$0xff]   ;;  %v21084_v60 = vld [vmem:[%s22403_s12 + $0x414] ss:$20 sps:$4 sm:$0xff]   ;;  %v21086_v32 = vld [vmem:[%s22403_s12 + $0x410] ss:$20 sps:$4 sm:$0xff]  }
 0x4fd   : > { %7361 = vmatprep.subr.bf16.mxu1 %v21036_v50  ;;  %v5164_v7 = vcombine.high %v5156_v20, %v5156_v20  ;;  %v23047_v34 = vrot.slane %v5149_v33, %v23020_v17  ;;  %v21090_v35 = vld [vmem:[%s22403_s12 + $0x3ec] ss:$20 sps:$4 sm:$0xff]   ;;  %v21089_v0 = vld [vmem:[%s22403_s12 + $0x168] ss:$20 sps:$4 sm:$0xff]   ;;  %v21093_v18 = vld [vmem:[%s22403_s12 + $0x144] ss:$20 sps:$4 sm:$0xff]   ;;  %v23058_v40 = vrot.slane %v5156_v20, %v23020_v17 }
 0x4fe   : > { %v21092_v46 = vld [vmem:[%s22403_s12 + $0x3e8] ss:$20 sps:$4 sm:$0xff]   ;;  %v21096_v39 = vld [vmem:[%s22403_s12 + $0x3c4] ss:$20 sps:$4 sm:$0xff]   ;;  %v21095_v8 = vld [vmem:[%s22403_s12 + $0x140] ss:$20 sps:$4 sm:$0xff]  }
 0x4ff   : > { %7321 = vmatpush1.bf16.msra.mxu0 %v21035_v51  ;;  %v23032_v25 = vrot.slane %v5164_v7, %v23020_v17  ;;  %v5165_v37 = vcombine.high %v23047_v34, %v23047_v34  ;;  %v21101_v41 = vld [vmem:[%s22403_s12 + $0x61c] ss:$20 sps:$4 sm:$0xff]   ;;  %v21098_v48 = vld [vmem:[%s22403_s12 + $0x3c0] ss:$20 sps:$4 sm:$0xff]   ;;  %v21099_v47 = vld [vmem:[%s22403_s12 + $0x618] ss:$20 sps:$4 sm:$0xff]   ;;  %v23069_v43 = vcombine.high %v23058_v40, %v23058_v40 }
 0x500   : > { %7322 = vmatprep.subr.bf16.mxu0 %v21039_v11  ;;  %7362 = vmatpush1.bf16.msra.mxu1 %v21038_v52  ;;  %v21104_v45 = vld [vmem:[%s22403_s12 + $0x89c] ss:$20 sps:$4 sm:$0xff]   ;;  %v21107_v49 = vld [vmem:[%s22403_s12 + $0x5f4] ss:$20 sps:$4 sm:$0xff]   ;;  %v21102_v50 = vld [vmem:[%s22403_s12 + $0x898] ss:$20 sps:$4 sm:$0xff]  }
 0x501   : > { %7363 = vmatprep.subr.bf16.mxu1 %v21042_v36  ;;  %7342 = vmatprep.mubr.bf16.mxu0 %v23032_v25  ;;  %v23039_v29 = vcombine.high %v23032_v25, %v23032_v25  ;;  %v23063_v42 = vrot.slane %v5165_v37, %v23020_v17  ;;  %v21110_v11 = vld [vmem:[%s22403_s12 + $0x874] ss:$20 sps:$4 sm:$0xff]   ;;  %v21105_v52 = vld [vmem:[%s22403_s12 + $0x5f0] ss:$20 sps:$4 sm:$0xff]   ;;  %v21113_v36 = vld [vmem:[%s22403_s12 + $0x5cc] ss:$20 sps:$4 sm:$0xff]  }
 0x502   : > { %v21128_v63 = vld [vmem:[%s22403_s12 + $0x7fc] ss:$20 sps:$4 sm:$0xff]   ;;  %v21123_v2 = vld [vmem:[%s22403_s12 + $0x578] ss:$20 sps:$4 sm:$0xff]   ;;  %v21131_v3 = vld [vmem:[%s22403_s12 + $0x554] ss:$20 sps:$4 sm:$0xff]  }
 0x503   : > { %7323 = vmatpush1.bf16.msra.mxu0 %v21041_v22  ;;  %7383 = vmatprep.mubr.bf16.mxu1 %v23039_v29  ;;  %v23075_v51 = vcombine.high %v23063_v42, %v23063_v42  ;;  %v21108_v22 = vld [vmem:[%s22403_s12 + $0x870] ss:$20 sps:$4 sm:$0xff]   ;;  %v21144_v1 = vld [vmem:[%s22403_s12 + $0x780] ss:$20 sps:$4 sm:$0xff]   ;;  %v21147_v20 = vld [vmem:[%s22403_s12 + $0x758] ss:$20 sps:$4 sm:$0xff]  }
 0x504   : > { %7324 = vmatprep.subr.bf16.mxu0 %v21045_v53  ;;  %7364 = vmatpush1.bf16.msra.mxu1 %v21044_v16  ;;  %v21116_v53 = vld [vmem:[%s22403_s12 + $0x84c] ss:$20 sps:$4 sm:$0xff]   ;;  %v21111_v16 = vld [vmem:[%s22403_s12 + $0x5c8] ss:$20 sps:$4 sm:$0xff]   ;;  %v21132_v13 = vld [vmem:[%s22403_s12 + $0x7d0] ss:$20 sps:$4 sm:$0xff]  }
 0x505   : > { %7365 = vmatprep.subr.bf16.mxu1 %v21048_v55  ;;  %v21119_v55 = vld [vmem:[%s22403_s12 + $0x5a4] ss:$20 sps:$4 sm:$0xff]   ;;  %v21158_v7 = vld [vmem:[%s22403_s12 + $0x9b4] ss:$20 sps:$4 sm:$0xff]  }
 0x506   : > { %v21159_v33 = vld [vmem:[%s22403_s12 + $0x708] ss:$20 sps:$4 sm:$0xff]  }
 0x507   : > { %7325 = vmatpush1.bf16.msra.mxu0 %v21047_v56  ;;  %v21114_v56 = vld [vmem:[%s22403_s12 + $0x848] ss:$20 sps:$4 sm:$0xff]  }
 0x508   : > { %7326 = vmatprep.subr.bf16.mxu0 %v21051_v38  ;;  %7366 = vmatpush1.bf16.msra.mxu1 %v21050_v57  ;;  %v21122_v38 = vld [vmem:[%s22403_s12 + $0x824] ss:$20 sps:$4 sm:$0xff]   ;;  %v21117_v57 = vld [vmem:[%s22403_s12 + $0x5a0] ss:$20 sps:$4 sm:$0xff]  }
 0x509   : > { %7367 = vmatprep.subr.bf16.mxu1 %v21054_v58  ;;  %v21125_v58 = vld [vmem:[%s22403_s12 + $0x57c] ss:$20 sps:$4 sm:$0xff]   ;;  %v21179_v37 = vld [vmem:[%s22403_s12 + $0x694] ss:$20 sps:$4 sm:$0xff]  }
 0x50b   : > { %7327 = vmatpush2.bf16.msra.mxu0 %v21053_v61  ;;  %v21120_v61 = vld [vmem:[%s22403_s12 + $0x820] ss:$20 sps:$4 sm:$0xff]  }
 0x50c   : > { %7328 = vmatprep.subr.bf16.mxu0 %v21057_v5  ;;  %7368 = vmatpush2.bf16.msra.mxu1 %v21056_v6  ;;  %v21126_v5 = vld [vmem:[%s22403_s12 + $0x7f8] ss:$20 sps:$4 sm:$0xff]   ;;  %v21134_v6 = vld [vmem:[%s22403_s12 + $0x7d4] ss:$20 sps:$4 sm:$0xff]  }
 0x50d   : > { %7369 = vmatprep.subr.bf16.mxu1 %v21060_v9  ;;  %v21129_v9 = vld [vmem:[%s22403_s12 + $0x550] ss:$20 sps:$4 sm:$0xff]  }
 0x50f   : > { %7329 = vmatpush2.bf16.msra.mxu0 %v21059_v10  ;;  %v21137_v10 = vld [vmem:[%s22403_s12 + $0x52c] ss:$20 sps:$4 sm:$0xff]  }
 0x510   : > { %7330 = vmatprep.subr.bf16.mxu0 %v21063_v14  ;;  %7370 = vmatpush2.bf16.msra.mxu1 %v21062_v15  ;;  %v21140_v14 = vld [vmem:[%s22403_s12 + $0x7ac] ss:$20 sps:$4 sm:$0xff]   ;;  %v21135_v15 = vld [vmem:[%s22403_s12 + $0x528] ss:$20 sps:$4 sm:$0xff]  }
 0x511   : > { %7371 = vmatprep.subr.bf16.mxu1 %v21066_v27  ;;  %v21143_v27 = vld [vmem:[%s22403_s12 + $0x504] ss:$20 sps:$4 sm:$0xff]  }
 0x513   : > { %7331 = vmatpush2.bf16.msra.mxu0 %v21065_v44  ;;  %v21138_v44 = vld [vmem:[%s22403_s12 + $0x7a8] ss:$20 sps:$4 sm:$0xff]  }
 0x514   : > { %7332 = vmatprep.subr.bf16.mxu0 %v21069_v54  ;;  %7372 = vmatpush2.bf16.msra.mxu1 %v21068_v62  ;;  %v21146_v54 = vld [vmem:[%s22403_s12 + $0x784] ss:$20 sps:$4 sm:$0xff]   ;;  %v21141_v62 = vld [vmem:[%s22403_s12 + $0x500] ss:$20 sps:$4 sm:$0xff]  }
 0x515   : > { %7373 = vmatprep.subr.bf16.mxu1 %v21072_v19  ;;  %v21149_v19 = vld [vmem:[%s22403_s12 + $0x75c] ss:$20 sps:$4 sm:$0xff]  }
 0x517   : > { %7333 = vmatpush2.bf16.msra.mxu0 %v21071_v4  ;;  %v21152_v4 = vld [vmem:[%s22403_s12 + $0x9dc] ss:$20 sps:$4 sm:$0xff]  }
 0x518   : > { %7334 = vmatprep.subr.bf16.mxu0 %v21075_v21  ;;  %7374 = vmatpush2.bf16.msra.mxu1 %v21074_v30  ;;  %v21155_v21 = vld [vmem:[%s22403_s12 + $0x734] ss:$20 sps:$4 sm:$0xff]   ;;  %v21150_v30 = vld [vmem:[%s22403_s12 + $0x9d8] ss:$20 sps:$4 sm:$0xff]  }
 0x519   : > { %7375 = vmatprep.subr.bf16.mxu1 %v21078_v23  ;;  %v21153_v23 = vld [vmem:[%s22403_s12 + $0x730] ss:$20 sps:$4 sm:$0xff]  }
 0x51b   : > { %7335 = vmatpush2.bf16.msra.mxu0 %v21077_v24  ;;  %v21161_v24 = vld [vmem:[%s22403_s12 + $0x70c] ss:$20 sps:$4 sm:$0xff]  }
 0x51c   : > { %7336 = vmatprep.subr.bf16.mxu0 %v21081_v26  ;;  %7376 = vmatpush2.bf16.msra.mxu1 %v21080_v28  ;;  %v21156_v26 = vld [vmem:[%s22403_s12 + $0x9b0] ss:$20 sps:$4 sm:$0xff]   ;;  %v21164_v28 = vld [vmem:[%s22403_s12 + $0x98c] ss:$20 sps:$4 sm:$0xff]  }
 0x51d   : > { %7377 = vmatprep.subr.bf16.mxu1 %v21084_v60  ;;  %v21167_v60 = vld [vmem:[%s22403_s12 + $0x6e4] ss:$20 sps:$4 sm:$0xff]  }
 0x51f   : > { %7337 = vmatpush2.bf16.msra.mxu0 %v21083_v59  ;;  %v21162_v59 = vld [vmem:[%s22403_s12 + $0x988] ss:$20 sps:$4 sm:$0xff]  }
 0x520   : > { %7338 = vmatprep.subr.bf16.mxu0 %v21087_v31  ;;  %7378 = vmatpush2.bf16.msra.mxu1 %v21086_v32  ;;  %v21170_v31 = vld [vmem:[%s22403_s12 + $0x964] ss:$20 sps:$4 sm:$0xff]   ;;  %v21165_v32 = vld [vmem:[%s22403_s12 + $0x6e0] ss:$20 sps:$4 sm:$0xff]  }
 0x521   : > { %7379 = vmatprep.subr.bf16.mxu1 %v21090_v35  ;;  %v21173_v35 = vld [vmem:[%s22403_s12 + $0x6bc] ss:$20 sps:$4 sm:$0xff]  }
 0x523   : > { %7339 = vmatpush2.bf16.msra.mxu0 %v21089_v0  ;;  %v21168_v0 = vld [vmem:[%s22403_s12 + $0x960] ss:$20 sps:$4 sm:$0xff]  }
 0x524   : > { %7340 = vmatprep.subr.bf16.mxu0 %v21093_v18  ;;  %7380 = vmatpush2.bf16.msra.mxu1 %v21092_v46  ;;  %v21176_v18 = vld [vmem:[%s22403_s12 + $0x93c] ss:$20 sps:$4 sm:$0xff]   ;;  %v21171_v46 = vld [vmem:[%s22403_s12 + $0x6b8] ss:$20 sps:$4 sm:$0xff]  }
 0x525   : > { %7381 = vmatprep.subr.bf16.mxu1 %v21096_v39  ;;  %v21174_v39 = vld [vmem:[%s22403_s12 + $0x938] ss:$20 sps:$4 sm:$0xff]  }
 0x527   : > { %7341 = vmatpush2.bf16.msra.mxu0 %v21095_v8  ;;  %v21182_v8 = vld [vmem:[%s22403_s12 + $0x914] ss:$20 sps:$4 sm:$0xff]  }
 0x528   : > { %7392 = vmatprep.subr.bf16.mxu0 %v21101_v41  ;;  %7382 = vmatpush2.bf16.msra.mxu1 %v21098_v48  ;;  %v21177_v41 = vld [vmem:[%s22403_s12 + $0x690] ss:$20 sps:$4 sm:$0xff]   ;;  %v21185_v48 = vld [vmem:[%s22403_s12 + $0x66c] ss:$20 sps:$4 sm:$0xff]  }
 0x529   : > { %7433 = vmatprep.subr.bf16.mxu1 %v21104_v45  ;;  %v21180_v45 = vld [vmem:[%s22403_s12 + $0x910] ss:$20 sps:$4 sm:$0xff]  }
 0x52a   : > { %7343 = vmatmul.mubr.bf16.vlgmr.msra.gmra.mxu0 %v23058_v40 }
 0x52b   : > { %7393 = vmatpush1.bf16.msra.mxu0 %v21099_v47  ;;  %7424 = vmatprep.mubr.bf16.mxu0 %v23063_v42  ;;  %v21188_v47 = vld [vmem:[%s22403_s12 + $0x8ec] ss:$20 sps:$4 sm:$0xff]  }
 0x52c   : > { %7384 = vmatmul.mubr.bf16.vlgmr.msra.gmra.mxu1 %v23069_v43  ;;  %7394 = vmatprep.subr.bf16.mxu0 %v21107_v49  ;;  %v21183_v49 = vld [vmem:[%s22403_s12 + $0x668] ss:$20 sps:$4 sm:$0xff]  }
 0x52d   : > { %7434 = vmatpush1.bf16.msra.mxu1 %v21102_v50  ;;  %7465 = vmatprep.mubr.bf16.mxu1 %v23075_v51  ;;  %v21191_v50 = vld [vmem:[%s22403_s12 + $0x644] ss:$20 sps:$4 sm:$0xff]  }
 0x52e   : > { %7435 = vmatprep.subr.bf16.mxu1 %v21110_v11  ;;  %v21186_v11 = vld [vmem:[%s22403_s12 + $0x8e8] ss:$20 sps:$4 sm:$0xff]  }
 0x52f   : > { %7395 = vmatpush1.bf16.msra.mxu0 %v21105_v52  ;;  %v21194_v52 = vld [vmem:[%s22403_s12 + $0x8c4] ss:$20 sps:$4 sm:$0xff]  }
 0x530   : > { %7396 = vmatprep.subr.bf16.mxu0 %v21113_v36  ;;  %v21189_v36 = vld [vmem:[%s22403_s12 + $0x640] ss:$20 sps:$4 sm:$0xff]  }
 0x531   : > { %7436 = vmatpush1.bf16.msra.mxu1 %v21108_v22  ;;  %v23141_v22 = vrot.slane %v23047_v34, %v23020_v17  ;;  %v21199_v34 = vld [vmem:[%s22403_s12 + $0x120] ss:$20 sps:$4 sm:$0xff]  }
 0x532   : > { %7437 = vmatprep.subr.bf16.mxu1 %v21116_v53  ;;  %v21198_v53 = vld [vmem:[%s22403_s12 + $0xb1c] ss:$20 sps:$4 sm:$0xff]  }
 0x533   : > { %7397 = vmatpush1.bf16.msra.mxu0 %v21111_v16  ;;  %v21192_v16 = vld [vmem:[%s22403_s12 + $0x8c0] ss:$20 sps:$4 sm:$0xff]  }
 0x534   : > { %7398 = vmatprep.subr.bf16.mxu0 %v21119_v55  ;;  %v21201_v55 = vld [vmem:[%s22403_s12 + $0x124] ss:$20 sps:$4 sm:$0xff]  }
 0x535   : > { %7438 = vmatpush1.bf16.msra.mxu1 %v21114_v56  ;;  %v21196_v56 = vld [vmem:[%s22403_s12 + $0xb18] ss:$20 sps:$4 sm:$0xff]  }
 0x536   : > { %7439 = vmatprep.subr.bf16.mxu1 %v21122_v38  ;;  %v23149_v38 = vcombine.high %v23141_v22, %v23141_v22 }
 0x537   : > { %7399 = vmatpush1.bf16.msra.mxu0 %v21117_v57  ;;  %v21204_v57 = vld [vmem:[%s22403_s12 + $0xaf4] ss:$20 sps:$4 sm:$0xff]  }
 0x538   : > { %7400 = vmatprep.subr.bf16.mxu0 %v21125_v58  ;;  %v23152_v58 = vld.sshfl [vmem:[#allocation3 + $0x8] sm:$0x11 pattern:$0x75316420] }
 0x539   : > { %7440 = vmatpush1.bf16.msra.mxu1 %v21120_v61  ;;  %v5205_v61 = vcombine.high %v23152_v58, %v23152_v58 }
 0x53a   : > { %7441 = vmatprep.subr.bf16.mxu1 %v21128_v63  ;;  %v21207_v63 = vld [vmem:[%s22403_s12 + $0xfc] ss:$20 sps:$4 sm:$0xff]  }
 0x53b   : > { %7401 = vmatpush1.bf16.msra.mxu0 %v21123_v2  ;;  %v21202_v2 = vld [vmem:[%s22403_s12 + $0xaf0] ss:$20 sps:$4 sm:$0xff]  }
 0x53c   : > { %7402 = vmatprep.subr.bf16.mxu0 %v21131_v3  ;;  %v23161_v3 = vrot.slane %v5205_v61, %v23020_v17  ;;  %v21277_v61 = vld [vmem:[%s22403_s12 + $0x198] ss:$20 sps:$4 sm:$0xff]  }
 0x53d   : > { %7442 = vmatpush1.bf16.msra.mxu1 %v21126_v5  ;;  %v21210_v5 = vld [vmem:[%s22403_s12 + $0xacc] ss:$20 sps:$4 sm:$0xff]  }
 0x53e   : > { %7443 = vmatprep.subr.bf16.mxu1 %v21134_v6  ;;  %v21205_v6 = vld [vmem:[%s22403_s12 + $0xf8] ss:$20 sps:$4 sm:$0xff]  }
 0x53f   : > { %7403 = vmatpush1.bf16.msra.mxu0 %v21129_v9  ;;  %v21213_v9 = vld [vmem:[%s22403_s12 + $0xd4] ss:$20 sps:$4 sm:$0xff]  }
 0x540   : > { %7404 = vmatprep.subr.bf16.mxu0 %v21137_v10  ;;  %v21208_v10 = vld [vmem:[%s22403_s12 + $0xac8] ss:$20 sps:$4 sm:$0xff]  }
 0x541   : > { %7444 = vmatpush1.bf16.msra.mxu1 %v21132_v13  ;;  %v21216_v13 = vld [vmem:[%s22403_s12 + $0xaa4] ss:$20 sps:$4 sm:$0xff]  }
 0x542   : > { %7445 = vmatprep.subr.bf16.mxu1 %v21140_v14  ;;  %v21211_v14 = vld [vmem:[%s22403_s12 + $0xd0] ss:$20 sps:$4 sm:$0xff]  }
 0x543   : > { %7405 = vmatpush1.bf16.msra.mxu0 %v21135_v15  ;;  %v21219_v15 = vld [vmem:[%s22403_s12 + $0xac] ss:$20 sps:$4 sm:$0xff]  }
 0x544   : > { %7406 = vmatprep.subr.bf16.mxu0 %v21143_v27  ;;  %v21214_v27 = vld [vmem:[%s22403_s12 + $0xaa0] ss:$20 sps:$4 sm:$0xff]  }
 0x545   : > { %7446 = vmatpush1.bf16.msra.mxu1 %v21138_v44  ;;  %v21222_v44 = vld [vmem:[%s22403_s12 + $0xa7c] ss:$20 sps:$4 sm:$0xff]  }
 0x546   : > { %7447 = vmatprep.subr.bf16.mxu1 %v21146_v54  ;;  %v21217_v54 = vld [vmem:[%s22403_s12 + $0xa8] ss:$20 sps:$4 sm:$0xff]  }
 0x547   : > { %7407 = vmatpush1.bf16.msra.mxu0 %v21141_v62  ;;  %v21225_v62 = vld [vmem:[%s22403_s12 + $0x84] ss:$20 sps:$4 sm:$0xff]  }
 0x548   : > { %7408 = vmatprep.subr.bf16.mxu0 %v21149_v19  ;;  %v21220_v19 = vld [vmem:[%s22403_s12 + $0xa78] ss:$20 sps:$4 sm:$0xff]  }
 0x549   : > { %7448 = vmatpush1.bf16.msra.mxu1 %v21144_v1  ;;  %v21228_v1 = vld [vmem:[%s22403_s12 + $0xa54] ss:$20 sps:$4 sm:$0xff]  }
 0x54a   : > { %7449 = vmatprep.subr.bf16.mxu1 %v21152_v4  ;;  %v21223_v4 = vld [vmem:[%s22403_s12 + $0x80] ss:$20 sps:$4 sm:$0xff]  }
 0x54b   : > { %7409 = vmatpush2.bf16.msra.mxu0 %v21147_v20  ;;  %v21231_v20 = vld [vmem:[%s22403_s12 + $0x5c] ss:$20 sps:$4 sm:$0xff]  }
 0x54c   : > { %7410 = vmatprep.subr.bf16.mxu0 %v21155_v21  ;;  %v21226_v21 = vld [vmem:[%s22403_s12 + $0xa50] ss:$20 sps:$4 sm:$0xff]  }
 0x54d   : > { %7450 = vmatpush2.bf16.msra.mxu1 %v21150_v30  ;;  %v21234_v30 = vld [vmem:[%s22403_s12 + $0xa2c] ss:$20 sps:$4 sm:$0xff]  }
 0x54e   : > { %7451 = vmatprep.subr.bf16.mxu1 %v21158_v7  ;;  %v21229_v7 = vld [vmem:[%s22403_s12 + $0x58] ss:$20 sps:$4 sm:$0xff]  }
 0x54f   : > { %7411 = vmatpush2.bf16.msra.mxu0 %v21153_v23  ;;  %v21237_v23 = vld [vmem:[%s22403_s12 + $0x34] ss:$20 sps:$4 sm:$0xff]  }
 0x550   : > { %7412 = vmatprep.subr.bf16.mxu0 %v21161_v24  ;;  %v21232_v24 = vld [vmem:[%s22403_s12 + $0xa28] ss:$20 sps:$4 sm:$0xff]  }
 0x551   : > { %7452 = vmatpush2.bf16.msra.mxu1 %v21156_v26  ;;  %v21240_v26 = vld [vmem:[%s22403_s12 + $0xa04] ss:$20 sps:$4 sm:$0xff]  }
 0x552   : > { %7453 = vmatprep.subr.bf16.mxu1 %v21164_v28  ;;  %v21235_v28 = vld [vmem:[%s22403_s12 + $0x30] ss:$20 sps:$4 sm:$0xff]  }
 0x553   : > { %7413 = vmatpush2.bf16.msra.mxu0 %v21159_v33  ;;  %v21243_v33 = vld [vmem:[%s22403_s12 + $0xc] ss:$20 sps:$4 sm:$0xff]  }
 0x554   : > { %7414 = vmatprep.subr.bf16.mxu0 %v21167_v60  ;;  %v21238_v60 = vld [vmem:[%s22403_s12 + $0xa00] ss:$20 sps:$4 sm:$0xff]  }
 0x555   : > { %7454 = vmatpush2.bf16.msra.mxu1 %v21162_v59  ;;  %v21246_v59 = vld [vmem:[%s22403_s12 + $0xc5c] ss:$20 sps:$4 sm:$0xff]  }
 0x556   : > { %7455 = vmatprep.subr.bf16.mxu1 %v21170_v31  ;;  %v21241_v31 = vld [vmem:[%s22403_s12 + $0x8] ss:$20 sps:$4 sm:$0xff]  }
 0x557   : > { %7415 = vmatpush2.bf16.msra.mxu0 %v21165_v32  ;;  %v21249_v32 = vld [vmem:[%s22403_s12 + $0x264] ss:$20 sps:$4 sm:$0xff]  }
 0x558   : > { %7416 = vmatprep.subr.bf16.mxu0 %v21173_v35  ;;  %v21244_v35 = vld [vmem:[%s22403_s12 + $0xc58] ss:$20 sps:$4 sm:$0xff]  }
 0x559   : > { %7456 = vmatpush2.bf16.msra.mxu1 %v21168_v0  ;;  %v21252_v0 = vld [vmem:[%s22403_s12 + $0xc34] ss:$20 sps:$4 sm:$0xff]  }
 0x55a   : > { %7457 = vmatprep.subr.bf16.mxu1 %v21176_v18  ;;  %v21247_v18 = vld [vmem:[%s22403_s12 + $0x260] ss:$20 sps:$4 sm:$0xff]  }
 0x55b   : > { %7417 = vmatpush2.bf16.msra.mxu0 %v21171_v46  ;;  %v21255_v46 = vld [vmem:[%s22403_s12 + $0x23c] ss:$20 sps:$4 sm:$0xff]  }
 0x55c   : > { %7418 = vmatprep.subr.bf16.mxu0 %v21179_v37  ;;  %v21250_v37 = vld [vmem:[%s22403_s12 + $0xc30] ss:$20 sps:$4 sm:$0xff]  }
 0x55d   : > { %7458 = vmatpush2.bf16.msra.mxu1 %v21174_v39  ;;  %v21258_v39 = vld [vmem:[%s22403_s12 + $0xc0c] ss:$20 sps:$4 sm:$0xff]  }
 0x55e   : > { %7459 = vmatprep.subr.bf16.mxu1 %v21182_v8  ;;  %v21253_v8 = vld [vmem:[%s22403_s12 + $0x238] ss:$20 sps:$4 sm:$0xff]  }
 0x55f   : > { %7419 = vmatpush2.bf16.msra.mxu0 %v21177_v41  ;;  %v21261_v41 = vld [vmem:[%s22403_s12 + $0x214] ss:$20 sps:$4 sm:$0xff]  }
 0x560   : > { %7420 = vmatprep.subr.bf16.mxu0 %v21185_v48  ;;  %v21256_v48 = vld [vmem:[%s22403_s12 + $0xc08] ss:$20 sps:$4 sm:$0xff]  }
 0x561   : > { %7460 = vmatpush2.bf16.msra.mxu1 %v21180_v45  ;;  %v21264_v45 = vld [vmem:[%s22403_s12 + $0xbe4] ss:$20 sps:$4 sm:$0xff]  }
 0x562   : > { %7461 = vmatprep.subr.bf16.mxu1 %v21188_v47  ;;  %v21259_v47 = vld [vmem:[%s22403_s12 + $0x210] ss:$20 sps:$4 sm:$0xff]  }
 0x563   : > { %7421 = vmatpush2.bf16.msra.mxu0 %v21183_v49  ;;  %v21267_v49 = vld [vmem:[%s22403_s12 + $0x1ec] ss:$20 sps:$4 sm:$0xff]  }
 0x564   : > { %7422 = vmatprep.subr.bf16.mxu0 %v21191_v50  ;;  %v21262_v50 = vld [vmem:[%s22403_s12 + $0xbe0] ss:$20 sps:$4 sm:$0xff]  }
 0x565   : > { %7462 = vmatpush2.bf16.msra.mxu1 %v21186_v11  ;;  %v21270_v11 = vld [vmem:[%s22403_s12 + $0xbbc] ss:$20 sps:$4 sm:$0xff]  }
 0x566   : > { %7463 = vmatprep.subr.bf16.mxu1 %v21194_v52  ;;  %v21265_v52 = vld [vmem:[%s22403_s12 + $0x1e8] ss:$20 sps:$4 sm:$0xff]  }
 0x567   : > { %7423 = vmatpush2.bf16.msra.mxu0 %v21189_v36  ;;  %v21273_v36 = vld [vmem:[%s22403_s12 + $0x1c4] ss:$20 sps:$4 sm:$0xff]  }
 0x568   : > { %7474 = vmatprep.subr.bf16.mxu0 %v21198_v53  ;;  %v21268_v53 = vld [vmem:[%s22403_s12 + $0xbb8] ss:$20 sps:$4 sm:$0xff]  }
 0x569   : > { %7464 = vmatpush2.bf16.msra.mxu1 %v21192_v16  ;;  %v21276_v16 = vld [vmem:[%s22403_s12 + $0xb94] ss:$20 sps:$4 sm:$0xff]  }
 0x56a   : > { %7425 = vmatmul.mubr.bf16.vlgmr.msra.gmra.mxu0 %v23141_v22  ;;  %7515 = vmatprep.subr.bf16.mxu1 %v21201_v55  ;;  %v21271_v55 = vld [vmem:[%s22403_s12 + $0x1c0] ss:$20 sps:$4 sm:$0xff]  }
 0x56b   : > { %7475 = vmatpush1.bf16.msra.mxu0 %v21196_v56  ;;  %7506 = vmatprep.mubr.bf16.mxu0 %v23161_v3  ;;  %v21279_v56 = vld [vmem:[%s22403_s12 + $0x19c] ss:$20 sps:$4 sm:$0xff]  }
 0x56c   : > { %7466 = vmatmul.mubr.bf16.vlgmr.msra.gmra.mxu1 %v23149_v38  ;;  %7476 = vmatprep.subr.bf16.mxu0 %v21204_v57  ;;  %v21274_v57 = vld [vmem:[%s22403_s12 + $0xb90] ss:$20 sps:$4 sm:$0xff]  }
 0x56d   : > { %7516 = vmatpush1.bf16.msra.mxu1 %v21199_v34  ;;  %7547 = vmatprep.mubr.bf16.mxu1 %v23032_v25  ;;  %v21282_v34 = vld [vmem:[%s22403_s12 + $0xb6c] ss:$20 sps:$4 sm:$0xff]  }
 0x56e   : > { %7517 = vmatprep.subr.bf16.mxu1 %v21207_v63  ;;  %v21285_v63 = vld [vmem:[%s22403_s12 + $0x174] ss:$20 sps:$4 sm:$0xff]  }
 0x56f   : > { %7477 = vmatpush1.bf16.msra.mxu0 %v21202_v2  ;;  %v21280_v2 = vld [vmem:[%s22403_s12 + $0xb68] ss:$20 sps:$4 sm:$0xff]  }
 0x570   : > { %7478 = vmatprep.subr.bf16.mxu0 %v21210_v5  ;;  %v21288_v5 = vld [vmem:[%s22403_s12 + $0xb44] ss:$20 sps:$4 sm:$0xff]  }
 0x571   : > { %7518 = vmatpush1.bf16.msra.mxu1 %v21205_v6  ;;  %v21283_v6 = vld [vmem:[%s22403_s12 + $0x170] ss:$20 sps:$4 sm:$0xff]  }
 0x572   : > { %7519 = vmatprep.subr.bf16.mxu1 %v21213_v9  ;;  %v21291_v9 = vld [vmem:[%s22403_s12 + $0x14c] ss:$20 sps:$4 sm:$0xff]  }
 0x573   : > { %7479 = vmatpush1.bf16.msra.mxu0 %v21208_v10  ;;  %v21286_v10 = vld [vmem:[%s22403_s12 + $0xb40] ss:$20 sps:$4 sm:$0xff]  }
 0x574   : > { %7480 = vmatprep.subr.bf16.mxu0 %v21216_v13  ;;  %v21294_v13 = vld [vmem:[%s22403_s12 + $0x3a4] ss:$20 sps:$4 sm:$0xff]  }
 0x575   : > { %7520 = vmatpush1.bf16.msra.mxu1 %v21211_v14  ;;  %v21289_v14 = vld [vmem:[%s22403_s12 + $0x148] ss:$20 sps:$4 sm:$0xff]  }
 0x576   : > { %7521 = vmatprep.subr.bf16.mxu1 %v21219_v15  ;;  %v23226_v15 = vrot.slane %v23152_v58, %v23020_v17  ;;  %v21298_v58 = vld [vmem:[%s22403_s12 + $0x378] ss:$20 sps:$4 sm:$0xff]  }
 0x577   : > { %7481 = vmatpush1.bf16.msra.mxu0 %v21214_v27  ;;  %v21297_v27 = vld [vmem:[%s22403_s12 + $0x624] ss:$20 sps:$4 sm:$0xff]  }
 0x578   : > { %7482 = vmatprep.subr.bf16.mxu0 %v21222_v44  ;;  %v21292_v44 = vld [vmem:[%s22403_s12 + $0x3a0] ss:$20 sps:$4 sm:$0xff]  }
 0x579   : > { %7522 = vmatpush1.bf16.msra.mxu1 %v21217_v54  ;;  %v21300_v54 = vld [vmem:[%s22403_s12 + $0x37c] ss:$20 sps:$4 sm:$0xff]  }
 0x57a   : > { %7523 = vmatprep.subr.bf16.mxu1 %v21225_v62  ;;  %v21295_v62 = vld [vmem:[%s22403_s12 + $0x620] ss:$20 sps:$4 sm:$0xff]  }
 0x57b   : > { %7483 = vmatpush1.bf16.msra.mxu0 %v21220_v19  ;;  %v21303_v19 = vld [vmem:[%s22403_s12 + $0x5fc] ss:$20 sps:$4 sm:$0xff]  }
 0x57c   : > { %7484 = vmatprep.subr.bf16.mxu0 %v21228_v1  ;;  %v21306_v1 = vld [vmem:[%s22403_s12 + $0x354] ss:$20 sps:$4 sm:$0xff]  }
 0x57d   : > { %7524 = vmatpush1.bf16.msra.mxu1 %v21223_v4  ;;  %v21301_v4 = vld [vmem:[%s22403_s12 + $0x5f8] ss:$20 sps:$4 sm:$0xff]  }
 0x57e   : > { %7525 = vmatprep.subr.bf16.mxu1 %v21231_v20  ;;  %v21309_v20 = vld [vmem:[%s22403_s12 + $0x5d4] ss:$20 sps:$4 sm:$0xff]  }
 0x57f   : > { %7485 = vmatpush1.bf16.msra.mxu0 %v21226_v21  ;;  %v21304_v21 = vld [vmem:[%s22403_s12 + $0x350] ss:$20 sps:$4 sm:$0xff]  }
 0x580   : > { %7486 = vmatprep.subr.bf16.mxu0 %v21234_v30  ;;  %v21312_v30 = vld [vmem:[%s22403_s12 + $0x32c] ss:$20 sps:$4 sm:$0xff]  }
 0x581   : > { %7526 = vmatpush1.bf16.msra.mxu1 %v21229_v7  ;;  %v21307_v7 = vld [vmem:[%s22403_s12 + $0x5d0] ss:$20 sps:$4 sm:$0xff]  }
 0x582   : > { %7527 = vmatprep.subr.bf16.mxu1 %v21237_v23  ;;  %v21315_v23 = vld [vmem:[%s22403_s12 + $0x5ac] ss:$20 sps:$4 sm:$0xff]  }
 0x583   : > { %7487 = vmatpush1.bf16.msra.mxu0 %v21232_v24  ;;  %v21310_v24 = vld [vmem:[%s22403_s12 + $0x328] ss:$20 sps:$4 sm:$0xff]  }
 0x584   : > { %7488 = vmatprep.subr.bf16.mxu0 %v21240_v26  ;;  %v21318_v26 = vld [vmem:[%s22403_s12 + $0x304] ss:$20 sps:$4 sm:$0xff]  }
 0x585   : > { %7528 = vmatpush1.bf16.msra.mxu1 %v21235_v28  ;;  %v21313_v28 = vld [vmem:[%s22403_s12 + $0x5a8] ss:$20 sps:$4 sm:$0xff]  }
 0x586   : > { %7529 = vmatprep.subr.bf16.mxu1 %v21243_v33  ;;  %v21321_v33 = vld [vmem:[%s22403_s12 + $0x584] ss:$20 sps:$4 sm:$0xff]  }
 0x587   : > { %7489 = vmatpush1.bf16.msra.mxu0 %v21238_v60  ;;  %v21316_v60 = vld [vmem:[%s22403_s12 + $0x300] ss:$20 sps:$4 sm:$0xff]  }
 0x588   : > { %7490 = vmatprep.subr.bf16.mxu0 %v21246_v59  ;;  %v21324_v59 = vld [vmem:[%s22403_s12 + $0x2dc] ss:$20 sps:$4 sm:$0xff]  }
 0x589   : > { %7530 = vmatpush1.bf16.msra.mxu1 %v21241_v31  ;;  %v21319_v31 = vld [vmem:[%s22403_s12 + $0x580] ss:$20 sps:$4 sm:$0xff]  }
 0x58a   : > { %7531 = vmatprep.subr.bf16.mxu1 %v21249_v32  ;;  %v21327_v32 = vld [vmem:[%s22403_s12 + $0x55c] ss:$20 sps:$4 sm:$0xff]  }
 0x58b   : > { %7491 = vmatpush2.bf16.msra.mxu0 %v21244_v35  ;;  %v21322_v35 = vld [vmem:[%s22403_s12 + $0x2d8] ss:$20 sps:$4 sm:$0xff]  }
 0x58c   : > { %7492 = vmatprep.subr.bf16.mxu0 %v21252_v0  ;;  %v21330_v0 = vld [vmem:[%s22403_s12 + $0x2b4] ss:$20 sps:$4 sm:$0xff]  }
 0x58d   : > { %7532 = vmatpush2.bf16.msra.mxu1 %v21247_v18  ;;  %v21325_v18 = vld [vmem:[%s22403_s12 + $0x558] ss:$20 sps:$4 sm:$0xff]  }
 0x58e   : > { %7533 = vmatprep.subr.bf16.mxu1 %v21255_v46  ;;  %v5124_v46 = vsub.s32 0, %v23013_v12 }
 0x58f   : > { %7493 = vmatpush2.bf16.msra.mxu0 %v21250_v37  ;;  %v5128_v37 = vsub.s32 1, %v23013_v12 }
 0x590   : > { %7494 = vmatprep.subr.bf16.mxu0 %v21258_v39  ;;  %v21328_v39 = vld [vmem:[%s22403_s12 + $0x2b0] ss:$20 sps:$4 sm:$0xff]  }
 0x591   : > { %7534 = vmatpush2.bf16.msra.mxu1 %v21253_v8  ;;  %v21333_v8 = vld [vmem:[%s22403_s12 + $0x534] ss:$20 sps:$4 sm:$0xff]  }
 0x592   : > { %7535 = vmatprep.subr.bf16.mxu1 %v21261_v41  ;;  %v21331_v41 = vld [vmem:[%s22403_s12 + $0x530] ss:$20 sps:$4 sm:$0xff]  }
 0x593   : > { %7495 = vmatpush2.bf16.msra.mxu0 %v21256_v48  ;;  %v21336_v48 = vld [vmem:[%s22403_s12 + $0x28c] ss:$20 sps:$4 sm:$0xff]  }
 0x594   : > { %7496 = vmatprep.subr.bf16.mxu0 %v21264_v45  ;;  %v21334_v45 = vld [vmem:[%s22403_s12 + $0x288] ss:$20 sps:$4 sm:$0xff]  }
 0x595   : > { %7536 = vmatpush2.bf16.msra.mxu1 %v21259_v47  ;;  %v21339_v47 = vld [vmem:[%s22403_s12 + $0x50c] ss:$20 sps:$4 sm:$0xff]  }
 0x596   : > { %7537 = vmatprep.subr.bf16.mxu1 %v21267_v49  ;;  %v21337_v49 = vld [vmem:[%s22403_s12 + $0x508] ss:$20 sps:$4 sm:$0xff]  }
 0x597   : > { %7497 = vmatpush2.bf16.msra.mxu0 %v21262_v50  ;;  %v21342_v50 = vld [vmem:[%s22403_s12 + $0x4e4] ss:$20 sps:$4 sm:$0xff]  }
 0x598   : > { %7498 = vmatprep.subr.bf16.mxu0 %v21270_v11  ;;  %v21340_v11 = vld [vmem:[%s22403_s12 + $0x4e0] ss:$20 sps:$4 sm:$0xff]  }
 0x599   : > { %7538 = vmatpush2.bf16.msra.mxu1 %v21265_v52  ;;  %v21345_v52 = vld [vmem:[%s22403_s12 + $0x764] ss:$20 sps:$4 sm:$0xff]  }
 0x59a   : > { %7539 = vmatprep.subr.bf16.mxu1 %v21273_v36  ;;  %v21343_v36 = vld [vmem:[%s22403_s12 + $0x760] ss:$20 sps:$4 sm:$0xff]  }
 0x59b   : > { %7499 = vmatpush2.bf16.msra.mxu0 %v21268_v53  ;;  %v21348_v53 = vld [vmem:[%s22403_s12 + $0x4bc] ss:$20 sps:$4 sm:$0xff]  }
 0x59c   : > { %7500 = vmatprep.subr.bf16.mxu0 %v21276_v16  ;;  %v21346_v16 = vld [vmem:[%s22403_s12 + $0x4b8] ss:$20 sps:$4 sm:$0xff]  }
 0x59d   : > { %7540 = vmatpush2.bf16.msra.mxu1 %v21271_v55  ;;  %v21351_v55 = vld [vmem:[%s22403_s12 + $0x73c] ss:$20 sps:$4 sm:$0xff]  }
 0x59e   : > { %7541 = vmatprep.subr.bf16.mxu1 %v21279_v56  ;;  %v21349_v56 = vld [vmem:[%s22403_s12 + $0x738] ss:$20 sps:$4 sm:$0xff]  }
 0x59f   : > { %7501 = vmatpush2.bf16.msra.mxu0 %v21274_v57  ;;  %v21354_v57 = vld [vmem:[%s22403_s12 + $0x494] ss:$20 sps:$4 sm:$0xff]  }
 0x5a0   : > { %7502 = vmatprep.subr.bf16.mxu0 %v21282_v34  ;;  %v21352_v34 = vld [vmem:[%s22403_s12 + $0x490] ss:$20 sps:$4 sm:$0xff]  }
 0x5a1   : > { %7542 = vmatpush2.bf16.msra.mxu1 %v21277_v61  ;;  %v21357_v61 = vld [vmem:[%s22403_s12 + $0x714] ss:$20 sps:$4 sm:$0xff]  }
 0x5a2   : > { %7543 = vmatprep.subr.bf16.mxu1 %v21285_v63  ;;  %v21355_v63 = vld [vmem:[%s22403_s12 + $0x710] ss:$20 sps:$4 sm:$0xff]  }
 0x5a3   : > { %7503 = vmatpush2.bf16.msra.mxu0 %v21280_v2  ;;  %v21360_v2 = vld [vmem:[%s22403_s12 + $0x46c] ss:$20 sps:$4 sm:$0xff]  }
 0x5a4   : > { %7504 = vmatprep.subr.bf16.mxu0 %v21288_v5  ;;  %v21358_v5 = vld [vmem:[%s22403_s12 + $0x468] ss:$20 sps:$4 sm:$0xff]  }
 0x5a5   : > { %7544 = vmatpush2.bf16.msra.mxu1 %v21283_v6  ;;  %v21363_v6 = vld [vmem:[%s22403_s12 + $0x6ec] ss:$20 sps:$4 sm:$0xff]  }
 0x5a6   : > { %7545 = vmatprep.subr.bf16.mxu1 %v21291_v9  ;;  %v21361_v9 = vld [vmem:[%s22403_s12 + $0x6e8] ss:$20 sps:$4 sm:$0xff]  }
 0x5a7   : > { %7505 = vmatpush2.bf16.msra.mxu0 %v21286_v10  ;;  %v21366_v10 = vld [vmem:[%s22403_s12 + $0x444] ss:$20 sps:$4 sm:$0xff]  }
 0x5a8   : > { %7556 = vmatprep.subr.bf16.mxu0 %v21294_v13  ;;  %v21364_v13 = vld [vmem:[%s22403_s12 + $0x440] ss:$20 sps:$4 sm:$0xff]  }
 0x5a9   : > { %7546 = vmatpush2.bf16.msra.mxu1 %v21289_v14  ;;  %v21369_v14 = vld [vmem:[%s22403_s12 + $0x6c4] ss:$20 sps:$4 sm:$0xff]  }
 0x5aa   : > { %7507 = vmatmul.mubr.bf16.vlgmr.msra.gmra.mxu0 %v23226_v15  ;;  %7597 = vmatprep.subr.bf16.mxu1 %v21297_v27  ;;  %v21367_v27 = vld [vmem:[%s22403_s12 + $0x6c0] ss:$20 sps:$4 sm:$0xff]  }
 0x5ab   : > { %7557 = vmatpush1.bf16.msra.mxu0 %v21292_v44  ;;  %7588 = vmatprep.mubr.bf16.mxu0 %v23039_v29  ;;  %v21372_v44 = vld [vmem:[%s22403_s12 + $0x41c] ss:$20 sps:$4 sm:$0xff]  }
 0x5ac   : > { %7548 = vmatmul.mubr.bf16.vlgmr.msra.gmra.mxu1 %v23058_v40  ;;  %7558 = vmatprep.subr.bf16.mxu0 %v21300_v54  ;;  %v21370_v54 = vld [vmem:[%s22403_s12 + $0x418] ss:$20 sps:$4 sm:$0xff]  }
 0x5ad   : > { %7598 = vmatpush1.bf16.msra.mxu1 %v21295_v62  ;;  %7629 = vmatprep.mubr.bf16.mxu1 %v23063_v42  ;;  %v21375_v62 = vld [vmem:[%s22403_s12 + $0x69c] ss:$20 sps:$4 sm:$0xff]  }
 0x5ae   : > { %7599 = vmatprep.subr.bf16.mxu1 %v21303_v19  ;;  %v21373_v19 = vld [vmem:[%s22403_s12 + $0x698] ss:$20 sps:$4 sm:$0xff]  }
 0x5af   : > { %7559 = vmatpush1.bf16.msra.mxu0 %v21298_v58  ;;  %v21378_v58 = vld [vmem:[%s22403_s12 + $0x3f4] ss:$20 sps:$4 sm:$0xff]  }
 0x5b0   : > { %7560 = vmatprep.subr.bf16.mxu0 %v21306_v1  ;;  %v21376_v1 = vld [vmem:[%s22403_s12 + $0x3f0] ss:$20 sps:$4 sm:$0xff]  }
 0x5b1   : > { %7600 = vmatpush1.bf16.msra.mxu1 %v21301_v4  ;;  %v21381_v4 = vld [vmem:[%s22403_s12 + $0x674] ss:$20 sps:$4 sm:$0xff]  }
 0x5b2   : > { %7601 = vmatprep.subr.bf16.mxu1 %v21309_v20  ;;  %v21379_v20 = vld [vmem:[%s22403_s12 + $0x670] ss:$20 sps:$4 sm:$0xff]  }
 0x5b3   : > { %7561 = vmatpush1.bf16.msra.mxu0 %v21304_v21  ;;  %v21384_v21 = vld [vmem:[%s22403_s12 + $0x3cc] ss:$20 sps:$4 sm:$0xff]  }
 0x5b4   : > { %7562 = vmatprep.subr.bf16.mxu0 %v21312_v30  ;;  %v21382_v30 = vld [vmem:[%s22403_s12 + $0x3c8] ss:$20 sps:$4 sm:$0xff]  }
 0x5b5   : > { %7602 = vmatpush1.bf16.msra.mxu1 %v21307_v7  ;;  %v21387_v7 = vld [vmem:[%s22403_s12 + $0x64c] ss:$20 sps:$4 sm:$0xff]  }
 0x5b6   : > { %7603 = vmatprep.subr.bf16.mxu1 %v21315_v23  ;;  %v23298_v23 = vld [vmem:[%s561_s1] sm:$0x1f] }
 0x5b7   : > { %7563 = vmatpush1.bf16.msra.mxu0 %v21310_v24  ;;  %v21390_v24 = vld [vmem:[%s22403_s12 + $0x8a4] ss:$20 sps:$4 sm:$0xff]  }
 0x5b8   : > { %7564 = vmatprep.subr.bf16.mxu0 %v21318_v26  ;;  %v21385_v26 = vld [vmem:[%s22403_s12 + $0x648] ss:$20 sps:$4 sm:$0xff]  }
 0x5b9   : > { %7604 = vmatpush1.bf16.msra.mxu1 %v21313_v28  ;;  %v21393_v28 = vld [vmem:[%s22403_s12 + $0xb24] ss:$20 sps:$4 sm:$0xff]  }
 0x5ba   : > { %7605 = vmatprep.subr.bf16.mxu1 %v21321_v33  ;;  %v5125_v33 = vrot.slane %v23298_v23, %v5124_v46  ;;  %v21394_v46 = vld [vmem:[%s22403_s12 + $0x878] ss:$20 sps:$4 sm:$0xff]  }
 0x5bb   : > { %7565 = vmatpush1.bf16.msra.mxu0 %v21316_v60  ;;  %v21388_v60 = vld [vmem:[%s22403_s12 + $0x8a0] ss:$20 sps:$4 sm:$0xff]  }
 0x5bc   : > { %7566 = vmatprep.subr.bf16.mxu0 %v21324_v59  ;;  %v21396_v59 = vld [vmem:[%s22403_s12 + $0x87c] ss:$20 sps:$4 sm:$0xff]  }
 0x5bd   : > { %7606 = vmatpush1.bf16.msra.mxu1 %v21319_v31  ;;  %v5129_v31 = vrot.slane %v23298_v23, %v5128_v37  ;;  %v21402_v37 = vld [vmem:[%s22403_s12 + $0x854] ss:$20 sps:$4 sm:$0xff]  }
 0x5be   : > { %7607 = vmatprep.subr.bf16.mxu1 %v21327_v32  ;;  %v21391_v32 = vld [vmem:[%s22403_s12 + $0xb20] ss:$20 sps:$4 sm:$0xff]  }
 0x5bf   : > { %7567 = vmatpush1.bf16.msra.mxu0 %v21322_v35 }
 0x5c0   : > { %7568 = vmatprep.subr.bf16.mxu0 %v21330_v0  ;;  %v21399_v0 = vld [vmem:[%s22403_s12 + $0xafc] ss:$20 sps:$4 sm:$0xff]  }
 0x5c1   : > { %7608 = vmatpush1.bf16.msra.mxu1 %v21325_v18 }
 0x5c2   : > { %7609 = vmatprep.subr.bf16.mxu1 %v21333_v8 }
 0x5c3   : > { %7569 = vmatpush1.bf16.msra.mxu0 %v21328_v39 }
 0x5c4   : > { %7570 = vmatprep.subr.bf16.mxu0 %v21336_v48 }
 0x5c5   : > { %7610 = vmatpush1.bf16.msra.mxu1 %v21331_v41 }
 0x5c6   : > { %7611 = vmatprep.subr.bf16.mxu1 %v21339_v47 }
 0x5c7   : > { %7571 = vmatpush1.bf16.msra.mxu0 %v21334_v45  ;;  %v21397_v45 = vld [vmem:[%s22403_s12 + $0xaf8] ss:$20 sps:$4 sm:$0xff]  }
 0x5c8   : > { %7572 = vmatprep.subr.bf16.mxu0 %v21342_v50  ;;  %v21405_v50 = vld [vmem:[%s22403_s12 + $0xad4] ss:$20 sps:$4 sm:$0xff]  }
 0x5c9   : > { %7612 = vmatpush1.bf16.msra.mxu1 %v21337_v49 }
 0x5ca   : > { %7613 = vmatprep.subr.bf16.mxu1 %v21345_v52  ;;  %v21400_v52 = vld [vmem:[%s22403_s12 + $0x850] ss:$20 sps:$4 sm:$0xff]  }
 0x5cb   : > { %7573 = vmatpush2.bf16.msra.mxu0 %v21340_v11 }
 0x5cc   : > { %7574 = vmatprep.subr.bf16.mxu0 %v21348_v53  ;;  %v21408_v53 = vld [vmem:[%s22403_s12 + $0x82c] ss:$20 sps:$4 sm:$0xff]  }
 0x5cd   : > { %7614 = vmatpush2.bf16.msra.mxu1 %v21343_v36 }
 0x5ce   : > { %7615 = vmatprep.subr.bf16.mxu1 %v21351_v55  ;;  %v21403_v55 = vld [vmem:[%s22403_s12 + $0xad0] ss:$20 sps:$4 sm:$0xff]  }
 0x5cf   : > { %7575 = vmatpush2.bf16.msra.mxu0 %v21346_v16 }
 0x5d0   : > { %7576 = vmatprep.subr.bf16.mxu0 %v21354_v57 }
 0x5d1   : > { %7616 = vmatpush2.bf16.msra.mxu1 %v21349_v56  ;;  %v21411_v56 = vld [vmem:[%s22403_s12 + $0xaac] ss:$20 sps:$4 sm:$0xff]  }
 0x5d2   : > { %7617 = vmatprep.subr.bf16.mxu1 %v21357_v61  ;;  %v21414_v61 = vld [vmem:[%s22403_s12 + $0x804] ss:$20 sps:$4 sm:$0xff]  }
 0x5d3   : > { %7577 = vmatpush2.bf16.msra.mxu0 %v21352_v34  ;;  %v21406_v34 = vld [vmem:[%s22403_s12 + $0x828] ss:$20 sps:$4 sm:$0xff]  }
 0x5d4   : > { %7578 = vmatprep.subr.bf16.mxu0 %v21360_v2  ;;  %v21417_v2 = vld [vmem:[%s22403_s12 + $0xa84] ss:$20 sps:$4 sm:$0xff]  }
 0x5d5   : > { %7618 = vmatpush2.bf16.msra.mxu1 %v21355_v63  ;;  %v21409_v63 = vld [vmem:[%s22403_s12 + $0xaa8] ss:$20 sps:$4 sm:$0xff]  }
 0x5d6   : > { %7619 = vmatprep.subr.bf16.mxu1 %v21363_v6  ;;  %v21420_v6 = vld [vmem:[%s22403_s12 + $0x7dc] ss:$20 sps:$4 sm:$0xff]  }
 0x5d7   : > { %7579 = vmatpush2.bf16.msra.mxu0 %v21358_v5  ;;  %v21412_v5 = vld [vmem:[%s22403_s12 + $0x800] ss:$20 sps:$4 sm:$0xff]  }
 0x5d8   : > { %7580 = vmatprep.subr.bf16.mxu0 %v21366_v10  ;;  %v21423_v10 = vld [vmem:[%s22403_s12 + $0xa5c] ss:$20 sps:$4 sm:$0xff]  }
 0x5d9   : > { %7620 = vmatpush2.bf16.msra.mxu1 %v21361_v9  ;;  %v21415_v9 = vld [vmem:[%s22403_s12 + $0xa80] ss:$20 sps:$4 sm:$0xff]  }
 0x5da   : > { %7621 = vmatprep.subr.bf16.mxu1 %v21369_v14  ;;  %v21426_v14 = vld [vmem:[%s22403_s12 + $0x7b4] ss:$20 sps:$4 sm:$0xff]  }
 0x5db   : > { %7581 = vmatpush2.bf16.msra.mxu0 %v21364_v13  ;;  %v21418_v13 = vld [vmem:[%s22403_s12 + $0x7d8] ss:$20 sps:$4 sm:$0xff]  }
 0x5dc   : > { %7582 = vmatprep.subr.bf16.mxu0 %v21372_v44  ;;  %v21429_v44 = vld [vmem:[%s22403_s12 + $0xa34] ss:$20 sps:$4 sm:$0xff]  }
 0x5dd   : > { %7622 = vmatpush2.bf16.msra.mxu1 %v21367_v27  ;;  %v21421_v27 = vld [vmem:[%s22403_s12 + $0xa58] ss:$20 sps:$4 sm:$0xff]  }
 0x5de   : > { %7623 = vmatprep.subr.bf16.mxu1 %v21375_v62  ;;  %v21432_v62 = vld [vmem:[%s22403_s12 + $0x78c] ss:$20 sps:$4 sm:$0xff]  }
 0x5df   : > { %7583 = vmatpush2.bf16.msra.mxu0 %v21370_v54  ;;  %v21424_v54 = vld [vmem:[%s22403_s12 + $0x7b0] ss:$20 sps:$4 sm:$0xff]  }
 0x5e0   : > { %7584 = vmatprep.subr.bf16.mxu0 %v21378_v58  ;;  %v21435_v58 = vld [vmem:[%s22403_s12 + $0xa0c] ss:$20 sps:$4 sm:$0xff]  }
 0x5e1   : > { %7624 = vmatpush2.bf16.msra.mxu1 %v21373_v19  ;;  %v21427_v19 = vld [vmem:[%s22403_s12 + $0xa30] ss:$20 sps:$4 sm:$0xff]  }
 0x5e2   : > { %7625 = vmatprep.subr.bf16.mxu1 %v21381_v4  ;;  %v21438_v4 = vld [vmem:[%s22403_s12 + $0x9e4] ss:$20 sps:$4 sm:$0xff]  }
 0x5e3   : > { %7585 = vmatpush2.bf16.msra.mxu0 %v21376_v1  ;;  %v21430_v1 = vld [vmem:[%s22403_s12 + $0x788] ss:$20 sps:$4 sm:$0xff]  }
 0x5e4   : > { %7586 = vmatprep.subr.bf16.mxu0 %v21384_v21  ;;  %v21441_v21 = vld [vmem:[%s22403_s12 + $0xc64] ss:$20 sps:$4 sm:$0xff]  }
 0x5e5   : > { %7626 = vmatpush2.bf16.msra.mxu1 %v21379_v20  ;;  %v21433_v20 = vld [vmem:[%s22403_s12 + $0xa08] ss:$20 sps:$4 sm:$0xff]  }
 0x5e6   : > { %7627 = vmatprep.subr.bf16.mxu1 %v21387_v7  ;;  %v21444_v7 = vld [vmem:[%s22403_s12 + $0x9bc] ss:$20 sps:$4 sm:$0xff]  }
 0x5e7   : > { %7587 = vmatpush2.bf16.msra.mxu0 %v21382_v30  ;;  %v21436_v30 = vld [vmem:[%s22403_s12 + $0x9e0] ss:$20 sps:$4 sm:$0xff]  }
 0x5e8   : > { %7638 = vmatprep.subr.bf16.mxu0 %v21390_v24  ;;  %v21439_v24 = vld [vmem:[%s22403_s12 + $0xc60] ss:$20 sps:$4 sm:$0xff]  }
 0x5e9   : > { %7628 = vmatpush2.bf16.msra.mxu1 %v21385_v26  ;;  %v21447_v26 = vld [vmem:[%s22403_s12 + $0xc3c] ss:$20 sps:$4 sm:$0xff]  }
 0x5ea   : > { %v7344_v35 = vpop.f32.mrf.mxu0  ;;  %7589 = vmatmul.mubr.bf16.vlgmr.msra.gmra.mxu0 %v23069_v43  ;;  %7679 = vmatprep.subr.bf16.mxu1 %v21393_v28  ;;  %v21442_v28 = vld [vmem:[%s22403_s12 + $0x9b8] ss:$20 sps:$4 sm:$0xff]  }
 0x5eb   : > { %v7345_v18 = vadd.f32 %v7344_v35, %v5125_v33  ;;  %7639 = vmatpush1.bf16.msra.mxu0 %v21388_v60  ;;  %7670 = vmatprep.mubr.bf16.mxu0 %v23075_v51  ;;  %v21450_v33 = vld [vmem:[%s22403_s12 + $0x994] ss:$20 sps:$4 sm:$0xff]   ;;  %v21445_v60 = vld [vmem:[%s22403_s12 + $0xc38] ss:$20 sps:$4 sm:$0xff]   ;;  %v21451_v35 = vld [vmem:[%s22403_s12 + $0xc10] ss:$20 sps:$4 sm:$0xff]  }
 0x5ec   : > { %v7346_v39 = vpop.f32.mrf.mxu0  ;;  %v7385_v8 = vpop.f32.mrf.mxu1  ;;  %7630 = vmatmul.mubr.bf16.vlgmr.msra.gmra.mxu1 %v23141_v22  ;;  %7640 = vmatprep.subr.bf16.mxu0 %v21396_v59  ;;  %v21453_v59 = vld [vmem:[%s22403_s12 + $0xc14] ss:$20 sps:$4 sm:$0xff]  }
 0x5ed   : > { %v7347_v41 = vadd.f32 %v7346_v39, %v5129_v31  ;;  %v23318_v48 = vadd.f32 %v7385_v8, %v7345_v18  ;;  %7680 = vmatpush1.bf16.msra.mxu1 %v21391_v32  ;;  %7711 = vmatprep.mubr.bf16.mxu1 %v23161_v3  ;;  %v21448_v31 = vld [vmem:[%s22403_s12 + $0x990] ss:$20 sps:$4 sm:$0xff]   ;;  %v21456_v32 = vld [vmem:[%s22403_s12 + $0x96c] ss:$20 sps:$4 sm:$0xff]   ;;  %v21454_v18 = vld [vmem:[%s22403_s12 + $0x968] ss:$20 sps:$4 sm:$0xff]  }
 0x5ee   : > { %v7348_v47 = vpop.f32.mrf.mxu0  ;;  %v7387_v49 = vpop.f32.mrf.mxu1  ;;  %7681 = vmatprep.subr.bf16.mxu1 %v21399_v0  ;;  %v21459_v0 = vld [vmem:[%s22403_s12 + $0xbec] ss:$20 sps:$4 sm:$0xff]   ;;  %v21457_v39 = vld [vmem:[%s22403_s12 + $0xbe8] ss:$20 sps:$4 sm:$0xff]   ;;  %v21465_v8 = vld [vmem:[%s22403_s12 + $0xbc4] ss:$20 sps:$4 sm:$0xff]  }
 0x5ef   : > { %v23323_v11 = vadd.f32 %v7387_v49, %v7347_v41  ;;  %7641 = vmatpush1.bf16.msra.mxu0 %v21394_v46  ;;  %v21462_v46 = vld [vmem:[%s22403_s12 + $0x944] ss:$20 sps:$4 sm:$0xff]   ;;  %v21468_v41 = vld [vmem:[%s22403_s12 + $0x91c] ss:$20 sps:$4 sm:$0xff]  }
 0x5f0   : > { %v7349_v36 = vpop.f32.mrf.mxu0  ;;  %7642 = vmatprep.subr.bf16.mxu0 %v21402_v37  ;;  %v7389_v16 = vpop.f32.mrf.mxu1  ;;  %v21460_v37 = vld [vmem:[%s22403_s12 + $0x940] ss:$20 sps:$4 sm:$0xff]   ;;  %v21471_v47 = vld [vmem:[%s22403_s12 + $0xb9c] ss:$20 sps:$4 sm:$0xff]   ;;  %v21466_v49 = vld [vmem:[%s22403_s12 + $0x918] ss:$20 sps:$4 sm:$0xff]  }
 0x5f1   : > { %7682 = vmatpush1.bf16.msra.mxu1 %v21397_v45  ;;  %v21463_v45 = vld [vmem:[%s22403_s12 + $0xbc0] ss:$20 sps:$4 sm:$0xff]  }
 0x5f2   : > { %7683 = vmatprep.subr.bf16.mxu1 %v21405_v50  ;;  %v7390_v57 = vpop.f32.mrf.mxu1  ;;  %v21474_v50 = vld [vmem:[%s22403_s12 + $0x8f4] ss:$20 sps:$4 sm:$0xff]   ;;  %v21480_v16 = vld [vmem:[%s22403_s12 + $0x8cc] ss:$20 sps:$4 sm:$0xff]  }
 0x5f3   : > { %7643 = vmatpush1.bf16.msra.mxu0 %v21400_v52  ;;  %v21469_v52 = vld [vmem:[%s22403_s12 + $0xb98] ss:$20 sps:$4 sm:$0xff]   ;;  %v21477_v36 = vld [vmem:[%s22403_s12 + $0xb74] ss:$20 sps:$4 sm:$0xff]  }
 0x5f4   : > { %7644 = vmatprep.subr.bf16.mxu0 %v21408_v53  ;;  %v21472_v53 = vld [vmem:[%s22403_s12 + $0x8f0] ss:$20 sps:$4 sm:$0xff]   ;;  %v21478_v57 = vld [vmem:[%s22403_s12 + $0x8c8] ss:$20 sps:$4 sm:$0xff]  }
 0x5f5   : > { %7684 = vmatpush1.bf16.msra.mxu1 %v21403_v55  ;;  %v21475_v55 = vld [vmem:[%s22403_s12 + $0xb70] ss:$20 sps:$4 sm:$0xff]  }
 0x5f6   : > { %7685 = vmatprep.subr.bf16.mxu1 %v21411_v56  ;;  %v21483_v56 = vld [vmem:[%s22403_s12 + $0xb4c] ss:$20 sps:$4 sm:$0xff]  }
 0x5f7   : > { %7645 = vmatpush1.bf16.msra.mxu0 %v21406_v34  ;;  %v21484_v34 = vld [vmem:[%s22403_s12 + $0x268] ss:$20 sps:$4 sm:$0xff]  }
 0x5f8   : > { %7646 = vmatprep.subr.bf16.mxu0 %v21414_v61  ;;  %v21481_v61 = vld [vmem:[%s22403_s12 + $0xb48] ss:$20 sps:$4 sm:$0xff]  }
 0x5f9   : > { %7686 = vmatpush1.bf16.msra.mxu1 %v21409_v63  ;;  %v21486_v63 = vld [vmem:[%s22403_s12 + $0x4e8] ss:$20 sps:$4 sm:$0xff]  }
 0x5fa   : > { %7687 = vmatprep.subr.bf16.mxu1 %v21417_v2  ;;  %v21485_v2 = vld [vmem:[%s22403_s12 + $0x128] ss:$20 sps:$4 sm:$0xff]  }
 0x5fb   : > { %7647 = vmatpush1.bf16.msra.mxu0 %v21412_v5  ;;  %v21488_v5 = vld [vmem:[%s22403_s12 + $0x240] ss:$20 sps:$4 sm:$0xff]  }
 0x5fc   : > { %7648 = vmatprep.subr.bf16.mxu0 %v21420_v6  ;;  %v21487_v6 = vld [vmem:[%s22403_s12 + $0x3a8] ss:$20 sps:$4 sm:$0xff]  }
 0x5fd   : > { %7688 = vmatpush1.bf16.msra.mxu1 %v21415_v9 }
 0x5fe   : > { %7689 = vmatprep.subr.bf16.mxu1 %v21423_v10  ;;  %v21490_v10 = vld [vmem:[%s22403_s12 + $0x4c0] ss:$20 sps:$4 sm:$0xff]  }
 0x5ff   : > { %7649 = vmatpush1.bf16.msra.mxu0 %v21418_v13 }
 0x600   : > { %7650 = vmatprep.subr.bf16.mxu0 %v21426_v14  ;;  %v21489_v14 = vld [vmem:[%s22403_s12 + $0x100] ss:$20 sps:$4 sm:$0xff]  }
 0x601   : > { %7690 = vmatpush1.bf16.msra.mxu1 %v21421_v27 }
 0x602   : > { %7691 = vmatprep.subr.bf16.mxu1 %v21429_v44 }
 0x603   : > { %7651 = vmatpush1.bf16.msra.mxu0 %v21424_v54  ;;  %v21492_v54 = vld [vmem:[%s22403_s12 + $0x218] ss:$20 sps:$4 sm:$0xff]  }
 0x604   : > { %7652 = vmatprep.subr.bf16.mxu0 %v21432_v62 }
 0x605   : > { %7692 = vmatpush1.bf16.msra.mxu1 %v21427_v19 }
 0x606   : > { %7693 = vmatprep.subr.bf16.mxu1 %v21435_v58 }
 0x607   : > { %7653 = vmatpush1.bf16.msra.mxu0 %v21430_v1  ;;  %v21494_v1 = vld [vmem:[%s22403_s12 + $0x498] ss:$20 sps:$4 sm:$0xff]  }
 0x608   : > { %7654 = vmatprep.subr.bf16.mxu0 %v21438_v4 }
 0x609   : > { %7694 = vmatpush1.bf16.msra.mxu1 %v21433_v20  ;;  %v21493_v20 = vld [vmem:[%s22403_s12 + $0xd8] ss:$20 sps:$4 sm:$0xff]  }
 0x60a   : > { %7695 = vmatprep.subr.bf16.mxu1 %v21441_v21  ;;  %v21496_v21 = vld [vmem:[%s22403_s12 + $0x1f0] ss:$20 sps:$4 sm:$0xff]  }
 0x60b   : > { %7655 = vmatpush2.bf16.msra.mxu0 %v21436_v30 }
 0x60c   : > { %7656 = vmatprep.subr.bf16.mxu0 %v21444_v7  ;;  %v21498_v7 = vld [vmem:[%s22403_s12 + $0x470] ss:$20 sps:$4 sm:$0xff]  }
 0x60d   : > { %7696 = vmatpush2.bf16.msra.mxu1 %v21439_v24 }
 0x60e   : > { %7697 = vmatprep.subr.bf16.mxu1 %v21447_v26  ;;  %v21497_v26 = vld [vmem:[%s22403_s12 + $0xb0] ss:$20 sps:$4 sm:$0xff]  }
 0x60f   : > { %7657 = vmatpush2.bf16.msra.mxu0 %v21442_v28  ;;  %v21500_v28 = vld [vmem:[%s22403_s12 + $0x1c8] ss:$20 sps:$4 sm:$0xff]  }
 0x610   : > { %7658 = vmatprep.subr.bf16.mxu0 %v21450_v33  ;;  %v21499_v33 = vld [vmem:[%s22403_s12 + $0x330] ss:$20 sps:$4 sm:$0xff]  }
 0x611   : > { %7698 = vmatpush2.bf16.msra.mxu1 %v21445_v60  ;;  %v21502_v60 = vld [vmem:[%s22403_s12 + $0x448] ss:$20 sps:$4 sm:$0xff]  }
 0x612   : > { %7699 = vmatprep.subr.bf16.mxu1 %v21453_v59  ;;  %v21501_v59 = vld [vmem:[%s22403_s12 + $0x88] ss:$20 sps:$4 sm:$0xff]  }
 0x613   : > { %7659 = vmatpush2.bf16.msra.mxu0 %v21448_v31  ;;  %v21504_v31 = vld [vmem:[%s22403_s12 + $0x1a0] ss:$20 sps:$4 sm:$0xff]  }
 0x614   : > { %7660 = vmatprep.subr.bf16.mxu0 %v21456_v32  ;;  %v21503_v32 = vld [vmem:[%s22403_s12 + $0x308] ss:$20 sps:$4 sm:$0xff]  }
 0x615   : > { %7700 = vmatpush2.bf16.msra.mxu1 %v21451_v35  ;;  %v21506_v35 = vld [vmem:[%s22403_s12 + $0x420] ss:$20 sps:$4 sm:$0xff]  }
 0x616   : > { %7701 = vmatprep.subr.bf16.mxu1 %v21459_v0  ;;  %v21505_v0 = vld [vmem:[%s22403_s12 + $0x60] ss:$20 sps:$4 sm:$0xff]  }
 0x617   : > { %7661 = vmatpush2.bf16.msra.mxu0 %v21454_v18  ;;  %v21508_v18 = vld [vmem:[%s22403_s12 + $0x178] ss:$20 sps:$4 sm:$0xff]  }
 0x618   : > { %7662 = vmatprep.subr.bf16.mxu0 %v21462_v46  ;;  %v21507_v46 = vld [vmem:[%s22403_s12 + $0x2e0] ss:$20 sps:$4 sm:$0xff]  }
 0x619   : > { %7702 = vmatpush2.bf16.msra.mxu1 %v21457_v39  ;;  %v21510_v39 = vld [vmem:[%s22403_s12 + $0x3f8] ss:$20 sps:$4 sm:$0xff]  }
 0x61a   : > { %7703 = vmatprep.subr.bf16.mxu1 %v21465_v8  ;;  %v21509_v8 = vld [vmem:[%s22403_s12 + $0x38] ss:$20 sps:$4 sm:$0xff]  }
 0x61b   : > { %7663 = vmatpush2.bf16.msra.mxu0 %v21460_v37  ;;  %v21512_v37 = vld [vmem:[%s22403_s12 + $0x150] ss:$20 sps:$4 sm:$0xff]  }
 0x61c   : > { %7664 = vmatprep.subr.bf16.mxu0 %v21468_v41  ;;  %v21511_v41 = vld [vmem:[%s22403_s12 + $0x2b8] ss:$20 sps:$4 sm:$0xff]  }
 0x61d   : > { %7704 = vmatpush2.bf16.msra.mxu1 %v21463_v45  ;;  %v21514_v45 = vld [vmem:[%s22403_s12 + $0x3d0] ss:$20 sps:$4 sm:$0xff]  }
 0x61e   : > { %7705 = vmatprep.subr.bf16.mxu1 %v21471_v47  ;;  %v21513_v47 = vld [vmem:[%s22403_s12 + $0x10] ss:$20 sps:$4 sm:$0xff]  }
 0x61f   : > { %7665 = vmatpush2.bf16.msra.mxu0 %v21466_v49  ;;  %v21516_v49 = vld [vmem:[%s22403_s12 + $0x768] ss:$20 sps:$4 sm:$0xff]  }
 0x620   : > { %7666 = vmatprep.subr.bf16.mxu0 %v21474_v50  ;;  %v21515_v50 = vld [vmem:[%s22403_s12 + $0x290] ss:$20 sps:$4 sm:$0xff]  }
 0x621   : > { %7706 = vmatpush2.bf16.msra.mxu1 %v21469_v52  ;;  %v21518_v52 = vld [vmem:[%s22403_s12 + $0x9e8] ss:$20 sps:$4 sm:$0xff]  }
 0x622   : > { %7707 = vmatprep.subr.bf16.mxu1 %v21477_v36  ;;  %v21517_v36 = vld [vmem:[%s22403_s12 + $0x628] ss:$20 sps:$4 sm:$0xff]  }
 0x623   : > { %7667 = vmatpush2.bf16.msra.mxu0 %v21472_v53  ;;  %v21520_v53 = vld [vmem:[%s22403_s12 + $0x740] ss:$20 sps:$4 sm:$0xff]  }
 0x624   : > { %7668 = vmatprep.subr.bf16.mxu0 %v21480_v16  ;;  %v21519_v16 = vld [vmem:[%s22403_s12 + $0x8a8] ss:$20 sps:$4 sm:$0xff]  }
 0x625   : > { %7708 = vmatpush2.bf16.msra.mxu1 %v21475_v55  ;;  %v21522_v55 = vld [vmem:[%s22403_s12 + $0x9c0] ss:$20 sps:$4 sm:$0xff]  }
 0x626   : > { %7709 = vmatprep.subr.bf16.mxu1 %v21483_v56  ;;  %v21521_v56 = vld [vmem:[%s22403_s12 + $0x600] ss:$20 sps:$4 sm:$0xff]  }
 0x627   : > { %7669 = vmatpush2.bf16.msra.mxu0 %v21478_v57  ;;  %v21524_v57 = vld [vmem:[%s22403_s12 + $0x718] ss:$20 sps:$4 sm:$0xff]  }
 0x628   : > { %20135 = vmatprep.subr.bf16.mxu0 %v21484_v34  ;;  %v21523_v34 = vld [vmem:[%s22403_s12 + $0x880] ss:$20 sps:$4 sm:$0xff]  }
 0x629   : > { %7710 = vmatpush2.bf16.msra.mxu1 %v21481_v61  ;;  %v21525_v61 = vld [vmem:[%s22403_s12 + $0x5d8] ss:$20 sps:$4 sm:$0xff]  }
 0x62a   : > { %v7426_v9 = vpop.f32.mrf.mxu0  ;;  %7671 = vmatmul.mubr.bf16.vlgmr.msra.gmra.mxu0 %v23149_v38  ;;  %20157 = vmatprep.subr.bf16.mxu1 %v21486_v63  ;;  %v21530_v63 = vld [vmem:[%s22403_s12 + $0x970] ss:$20 sps:$4 sm:$0xff]  }
 0x62b   : > { %v7427_v13 = vadd.f32 %v7426_v9, %v23318_v48  ;;  %20136 = vmatpush3.bf16.msra.mxu0 %v21485_v2  ;;  %7752 = vmatprep.mubr.bf16.mxu0 %v23032_v25  ;;  %v21491_v48 = vld [vmem:[%s22403_s12 + $0x380] ss:$20 sps:$4 sm:$0xff]   ;;  %v21529_v2 = vld [vmem:[%s22403_s12 + $0x5b0] ss:$20 sps:$4 sm:$0xff]   ;;  %v21533_v9 = vld [vmem:[%s22403_s12 + $0x588] ss:$20 sps:$4 sm:$0xff]  }
 0x62c   : > { %v7428_v27 = vpop.f32.mrf.mxu0  ;;  %v7467_v44 = vpop.f32.mrf.mxu1  ;;  %7712 = vmatmul.mubr.bf16.vlgmr.msra.gmra.mxu1 %v23226_v15  ;;  %20137 = vmatprep.subr.bf16.mxu0 %v21488_v5  ;;  %v21531_v5 = vld [vmem:[%s22403_s12 + $0x830] ss:$20 sps:$4 sm:$0xff]  }
 0x62d   : > { %v7429_v62 = vadd.f32 %v7428_v27, %v23323_v11  ;;  %v23392_v19 = vadd.f32 %v7467_v44, %v7427_v13  ;;  %20158 = vmatpush3.bf16.msra.mxu1 %v21487_v6  ;;  %7792 = vmatprep.mubr.bf16.mxu1 %v23039_v29  ;;  %v21495_v29 = vld [vmem:[%s22403_s12 + $0x358] ss:$20 sps:$4 sm:$0xff]   ;;  %v21534_v6 = vld [vmem:[%s22403_s12 + $0x948] ss:$20 sps:$4 sm:$0xff]   ;;  %v21537_v27 = vld [vmem:[%s22403_s12 + $0x560] ss:$20 sps:$4 sm:$0xff]  }
 0x62e   : > { %v7430_v58 = vpop.f32.mrf.mxu0  ;;  %v7469_v25 = vpop.f32.mrf.mxu1  ;;  %20159 = vmatprep.subr.bf16.mxu1 %v21490_v10  ;;  %v21536_v10 = vld [vmem:[%s22403_s12 + $0x6a0] ss:$20 sps:$4 sm:$0xff]   ;;  %v21535_v13 = vld [vmem:[%s22403_s12 + $0x808] ss:$20 sps:$4 sm:$0xff]   ;;  %v21540_v44 = vld [vmem:[%s22403_s12 + $0x678] ss:$20 sps:$4 sm:$0xff]  }
 0x62f   : > { %v23397_v4 = vadd.f32 %v7469_v25, %v7429_v62  ;;  %20138 = vmatpush3.bf16.msra.mxu0 %v21489_v14  ;;  %v21538_v14 = vld [vmem:[%s22403_s12 + $0x920] ss:$20 sps:$4 sm:$0xff]   ;;  %v21542_v62 = vld [vmem:[%s22403_s12 + $0x8f8] ss:$20 sps:$4 sm:$0xff]   ;;  %v21544_v58 = vld [vmem:[%s22403_s12 + $0x650] ss:$20 sps:$4 sm:$0xff]  }
 0x630   : > { %v7431_v11 = vpop.f32.mrf.mxu0  ;;  %20139 = vmatprep.subr.bf16.mxu0 %v21492_v54  ;;  %v7471_v30 = vpop.f32.mrf.mxu1  ;;  %v21539_v54 = vld [vmem:[%s22403_s12 + $0x7e0] ss:$20 sps:$4 sm:$0xff]   ;;  %v21543_v25 = vld [vmem:[%s22403_s12 + $0x7b8] ss:$20 sps:$4 sm:$0xff]  }
 0x631   : > { %20160 = vmatpush3.bf16.msra.mxu1 %v21491_v48  ;;  %v21541_v48 = vld [vmem:[%s22403_s12 + $0x538] ss:$20 sps:$4 sm:$0xff]   ;;  %v21548_v11 = vld [vmem:[%s22403_s12 + $0xc68] ss:$20 sps:$4 sm:$0xff]  }
 0x632   : > { %20161 = vmatprep.subr.bf16.mxu1 %v21494_v1  ;;  %v7472_v24 = vpop.f32.mrf.mxu1  ;;  %v21546_v1 = vld [vmem:[%s22403_s12 + $0x8d0] ss:$20 sps:$4 sm:$0xff]   ;;  %v21549_v30 = vld [vmem:[%s22403_s12 + $0xb28] ss:$20 sps:$4 sm:$0xff]  }
 0x633   : > { %20140 = vmatpush3.bf16.msra.mxu0 %v21493_v20  ;;  %v21545_v20 = vld [vmem:[%s22403_s12 + $0x510] ss:$20 sps:$4 sm:$0xff]  }
 0x634   : > { %20141 = vmatprep.subr.bf16.mxu0 %v21496_v21  ;;  %v21547_v21 = vld [vmem:[%s22403_s12 + $0x790] ss:$20 sps:$4 sm:$0xff]  }
 0x635   : > { %20162 = vmatpush3.bf16.msra.mxu1 %v21495_v29  ;;  %v21550_v29 = vld [vmem:[%s22403_s12 + $0xc40] ss:$20 sps:$4 sm:$0xff]  }
 0x636   : > { %20163 = vmatprep.subr.bf16.mxu1 %v21498_v7 }
 0x637   : > { %20142 = vmatpush3.bf16.msra.mxu0 %v21497_v26  ;;  %v21551_v26 = vld [vmem:[%s22403_s12 + $0xb00] ss:$20 sps:$4 sm:$0xff]  }
 0x638   : > { %20143 = vmatprep.subr.bf16.mxu0 %v21500_v28 }
 0x639   : > { %20164 = vmatpush3.bf16.msra.mxu1 %v21499_v33  ;;  %v21552_v33 = vld [vmem:[%s22403_s12 + $0xc18] ss:$20 sps:$4 sm:$0xff]  }
 0x63a   : > { %20165 = vmatprep.subr.bf16.mxu1 %v21502_v60 }
 0x63b   : > { %20144 = vmatpush3.bf16.msra.mxu0 %v21501_v59 }
 0x63c   : > { %20145 = vmatprep.subr.bf16.mxu0 %v21504_v31 }
 0x63d   : > { %20166 = vmatpush3.bf16.msra.mxu1 %v21503_v32  ;;  %v21554_v32 = vld [vmem:[%s22403_s12 + $0xbf0] ss:$20 sps:$4 sm:$0xff]  }
 0x63e   : > { %20167 = vmatprep.subr.bf16.mxu1 %v21506_v35 }
 0x63f   : > { %20146 = vmatpush3.bf16.msra.mxu0 %v21505_v0  ;;  %v21555_v0 = vld [vmem:[%s22403_s12 + $0xab0] ss:$20 sps:$4 sm:$0xff]  }
 0x640   : > { %20147 = vmatprep.subr.bf16.mxu0 %v21508_v18  ;;  %v21557_v18 = vld [vmem:[%s22403_s12 + $0xa88] ss:$20 sps:$4 sm:$0xff]  }
 0x641   : > { %20168 = vmatpush3.bf16.msra.mxu1 %v21507_v46  ;;  %v21558_v46 = vld [vmem:[%s22403_s12 + $0xba0] ss:$20 sps:$4 sm:$0xff]  }
 0x642   : > { %20169 = vmatprep.subr.bf16.mxu1 %v21510_v39 }
 0x643   : > { %20148 = vmatpush3.bf16.msra.mxu0 %v21509_v8  ;;  %v21559_v8 = vld [vmem:[%s22403_s12 + $0xa60] ss:$20 sps:$4 sm:$0xff]  }
 0x644   : > { %20149 = vmatprep.subr.bf16.mxu0 %v21512_v37 }
 0x645   : > { %20170 = vmatpush3.bf16.msra.mxu1 %v21511_v41  ;;  %v21560_v41 = vld [vmem:[%s22403_s12 + $0xb78] ss:$20 sps:$4 sm:$0xff]  }
 0x646   : > { %20171 = vmatprep.subr.bf16.mxu1 %v21514_v45  ;;  %v21561_v45 = vld [vmem:[%s22403_s12 + $0xa38] ss:$20 sps:$4 sm:$0xff]  }
 0x647   : > { %20150 = vmatpush3.bf16.msra.mxu0 %v21513_v47  ;;  %v21562_v47 = vld [vmem:[%s22403_s12 + $0xb50] ss:$20 sps:$4 sm:$0xff]  }
 0x648   : > { %20179 = vmatprep.subr.bf16.mxu0 %v21516_v49  ;;  %v21563_v49 = vld [vmem:[%s22403_s12 + $0xa10] ss:$20 sps:$4 sm:$0xff]  }
 0x649   : > { %20172 = vmatpush3.bf16.msra.mxu1 %v21515_v50  ;;  %v5132_v50 = vsub.s32 2, %v23013_v12 }
 0x64a   : > { %7753 = vmatmul.mubr.bf16.vlgmr.msra.gmra.mxu0 %v23058_v40  ;;  %20201 = vmatprep.subr.bf16.mxu1 %v21518_v52  ;;  %v21526_v40 = vld [vmem:[%s22403_s12 + $0x998] ss:$20 sps:$4 sm:$0xff]   ;;  %v5136_v52 = vsub.s32 3, %v23013_v12 }
 0x64b   : > { %20180 = vmatpush3.bf16.msra.mxu0 %v21517_v36  ;;  %7832 = vmatprep.mubr.bf16.mxu0 %v23063_v42  ;;  %v21528_v42 = vld [vmem:[%s22403_s12 + $0x6f0] ss:$20 sps:$4 sm:$0xff]   ;;  %v5133_v36 = vrot.slane %v23298_v23, %v5132_v50 }
 0x64c   : > { %7793 = vmatmul.mubr.bf16.vlgmr.msra.gmra.mxu1 %v23069_v43  ;;  %20181 = vmatprep.subr.bf16.mxu0 %v21520_v53  ;;  %v21527_v43 = vld [vmem:[%s22403_s12 + $0x858] ss:$20 sps:$4 sm:$0xff]   ;;  %v5137_v53 = vrot.slane %v23298_v23, %v5136_v52 }
 0x64d   : > { %20202 = vmatpush3.bf16.msra.mxu1 %v21519_v16  ;;  %7872 = vmatprep.mubr.bf16.mxu1 %v23075_v51  ;;  %v21532_v51 = vld [vmem:[%s22403_s12 + $0x6c8] ss:$20 sps:$4 sm:$0xff]  }
 0x64e   : > { %20203 = vmatprep.subr.bf16.mxu1 %v21522_v55 }
 0x64f   : > { %20182 = vmatpush3.bf16.msra.mxu0 %v21521_v56 }
 0x650   : > { %20183 = vmatprep.subr.bf16.mxu0 %v21524_v57 }
 0x651   : > { %20204 = vmatpush3.bf16.msra.mxu1 %v21523_v34 }
 0x652   : > { %20205 = vmatprep.subr.bf16.mxu1 %v21526_v40 }
 0x653   : > { %20184 = vmatpush3.bf16.msra.mxu0 %v21525_v61 }
 0x654   : > { %20185 = vmatprep.subr.bf16.mxu0 %v21528_v42 }
 0x655   : > { %20206 = vmatpush3.bf16.msra.mxu1 %v21527_v43 }
 0x656   : > { %20207 = vmatprep.subr.bf16.mxu1 %v21530_v63 }
 0x657   : > { %20186 = vmatpush3.bf16.msra.mxu0 %v21529_v2 }
 0x658   : > { %20187 = vmatprep.subr.bf16.mxu0 %v21532_v51 }
 0x659   : > { %20208 = vmatpush3.bf16.msra.mxu1 %v21531_v5 }
 0x65a   : > { %20209 = vmatprep.subr.bf16.mxu1 %v21534_v6 }
 0x65b   : > { %20188 = vmatpush3.bf16.msra.mxu0 %v21533_v9 }
 0x65c   : > { %20189 = vmatprep.subr.bf16.mxu0 %v21536_v10 }
 0x65d   : > { %20210 = vmatpush3.bf16.msra.mxu1 %v21535_v13 }
 0x65e   : > { %20211 = vmatprep.subr.bf16.mxu1 %v21538_v14 }
 0x65f   : > { %20190 = vmatpush3.bf16.msra.mxu0 %v21537_v27 }
 0x660   : > { %20191 = vmatprep.subr.bf16.mxu0 %v21540_v44 }
 0x661   : > { %20212 = vmatpush3.bf16.msra.mxu1 %v21539_v54 }
 0x662   : > { %20213 = vmatprep.subr.bf16.mxu1 %v21542_v62 }
 0x663   : > { %20192 = vmatpush3.bf16.msra.mxu0 %v21541_v48 }
 0x664   : > { %20193 = vmatprep.subr.bf16.mxu0 %v21544_v58 }
 0x665   : > { %20214 = vmatpush3.bf16.msra.mxu1 %v21543_v25 }
 0x666   : > { %20215 = vmatprep.subr.bf16.mxu1 %v21546_v1 }
 0x667   : > { %20194 = vmatpush3.bf16.msra.mxu0 %v21545_v20 }
 0x668   : > { %20223 = vmatprep.subr.bf16.mxu0 %v21548_v11 }
 0x669   : > { %20216 = vmatpush3.bf16.msra.mxu1 %v21547_v21 }
 0x66a   : > { %v7508_v7 = vpop.f32.mrf.mxu0  ;;  %7833 = vmatmul.mubr.bf16.vlgmr.msra.gmra.mxu0 %v23141_v22 }
 0x66b   : > { %v7509_v24 = vadd.f32 %v7508_v7, %v23392_v19  ;;  %20224 = vmatpush3.bf16.msra.mxu0 %v21549_v30  ;;  %7912 = vmatprep.mubr.bf16.mxu0 %v23161_v3  ;;  %v21553_v19 = vld [vmem:[%s22403_s12 + $0xad8] ss:$20 sps:$4 sm:$0xff]  }
 0x66c   : > { %v7510_v28 = vpop.f32.mrf.mxu0  ;;  %7873 = vmatmul.mubr.bf16.vlgmr.msra.gmra.mxu1 %v23149_v38  ;;  %20225 = vmatprep.subr.bf16.mxu0 %v21550_v29  ;;  %v7549_v60 = vpop.f32.mrf.mxu1 }
 0x66d   : > { %21564 = vtanh.f32 %v7509_v24  ;;  %v7511_v59 = vadd.f32 %v7510_v28, %v23397_v4  ;;  %v21556_v4 = vld [vmem:[%s22403_s12 + $0xbc8] ss:$20 sps:$4 sm:$0xff]   ;;  %v7550_v16 = vadd.f32 %v7549_v60, %v5133_v36 }
 0x66e   : > { %v7512_v22 = vpop.f32.mrf.mxu0  ;;  %v7551_v31 = vpop.f32.mrf.mxu1 }
 0x66f   : > { %21566 = vtanh.f32 %v7511_v59  ;;  %20226 = vmatpush3.bf16.msra.mxu0 %v21551_v26  ;;  %v7552_v56 = vadd.f32 %v7551_v31, %v5137_v53 }
 0x670   : > { %v7513_v3 = vpop.f32.mrf.mxu0  ;;  %20227 = vmatprep.subr.bf16.mxu0 %v21552_v33  ;;  %v7553_v38 = vpop.f32.mrf.mxu1 }
 0x671   : > { %v5140_v38 = vsub.s32 4, %v23013_v12 }
 0x672   : > { %v7554_v35 = vpop.f32.mrf.mxu1 }
 0x673   : > { %20228 = vmatpush3.bf16.msra.mxu0 %v21553_v19  ;;  %v5141_v35 = vrot.slane %v23298_v23, %v5140_v38 }
 0x674   : > { %20229 = vmatprep.subr.bf16.mxu0 %v21554_v32 }
 0x677   : > { %20230 = vmatpush3.bf16.msra.mxu0 %v21555_v0 }
 0x678   : > { %20231 = vmatprep.subr.bf16.mxu0 %v21556_v4 }
 0x67a   : > { %v23473_v39 = vpop.eup %21564 }
 0x67b   : > { %20232 = vmatpush3.bf16.msra.mxu0 %v21557_v18 }
 0x67c   : > { %v23476_v37 = vpop.eup %21566  ;;  %20233 = vmatprep.subr.bf16.mxu0 %v21558_v46 }
 0x67f   : > { %20234 = vmatpush3.bf16.msra.mxu0 %v21559_v8 }
 0x680   : > { %20235 = vmatprep.subr.bf16.mxu0 %v21560_v41 }
 0x683   : > { %20236 = vmatpush3.bf16.msra.mxu0 %v21561_v45 }
 0x684   : > { %20237 = vmatprep.subr.bf16.mxu0 %v21562_v47 }
 0x687   : > { %20238 = vmatpush3.bf16.msra.mxu0 %v21563_v49 }
 0x68a   : > { %7913 = vmatmul.mubr.bf16.vlgmr.msra.gmra.mxu0 %v23226_v15 }
 0x6aa   : > { %v7590_v55 = vpop.f32.mrf.mxu0 }
 0x6ab   : > { %v7591_v57 = vadd.f32 %v7590_v55, %v7550_v16 }
 0x6ac   : > { %v7592_v34 = vpop.f32.mrf.mxu0  ;;  %v7631_v40 = vpop.f32.mrf.mxu1 }
 0x6ad   : > { %v7593_v61 = vadd.f32 %v7592_v34, %v7552_v56  ;;  %v7632_v42 = vadd.f32 %v7631_v40, %v7591_v57 }
 0x6ae   : > { %v7594_v43 = vpop.f32.mrf.mxu0  ;;  %v7633_v63 = vpop.f32.mrf.mxu1 }
 0x6af   : > { %v7634_v2 = vadd.f32 %v7633_v63, %v7593_v61 }
 0x6b0   : > { %v7595_v15 = vpop.f32.mrf.mxu0  ;;  %v7635_v51 = vpop.f32.mrf.mxu1 }
 0x6b2   : > { %v7636_v5 = vpop.f32.mrf.mxu1 }
 0x6ea   : > { %v7672_v6 = vpop.f32.mrf.mxu0 }
 0x6eb   : > { %v7673_v9 = vadd.f32 %v7672_v6, %v7632_v42 }
 0x6ec   : > { %v7674_v10 = vpop.f32.mrf.mxu0  ;;  %v7713_v13 = vpop.f32.mrf.mxu1 }
 0x6ed   : > { %v7675_v14 = vadd.f32 %v7674_v10, %v7634_v2  ;;  %v7714_v27 = vadd.f32 %v7713_v13, %v7673_v9 }
 0x6ee   : > { %v7676_v44 = vpop.f32.mrf.mxu0  ;;  %v7715_v54 = vpop.f32.mrf.mxu1 }
 0x6ef   : > { %21568 = vtanh.f32 %v7714_v27  ;;  %v7716_v62 = vadd.f32 %v7715_v54, %v7675_v14 }
 0x6f0   : > { %v7677_v48 = vpop.f32.mrf.mxu0  ;;  %v7717_v58 = vpop.f32.mrf.mxu1 }
 0x6f1   : > { %21570 = vtanh.f32 %v7716_v62 }
 0x6f2   : > { %v7718_v25 = vpop.f32.mrf.mxu1 }
 0x6fc   : > { %v21569_v1 = vpop.eup %21568 }
 0x6fe   : > { %v21571_v20 = vpop.eup %21570 }
 0x70a   : > { %v20151_v11 = vpop.f32.mrf.mxu0 }
 0x70c   : > { %v20152_v21 = vpop.f32.mrf.mxu0  ;;  %v20173_v30 = vpop.f32.mrf.mxu1 }
 0x70d   : > { %v20153_v0 = vadd.f32 %v20152_v21, %v20151_v11 }
 0x70e   : > { %v20154_v29 = vpop.f32.mrf.mxu0  ;;  %v20174_v7 = vpop.f32.mrf.mxu1 }
 0x70f   : > { %v7755_v4 = vadd.f32 %v20153_v0, %v5141_v35  ;;  %v20175_v18 = vadd.f32 %v20174_v7, %v20173_v30 }
 0x710   : > { %v20155_v24 = vpop.f32.mrf.mxu0  ;;  %v20176_v26 = vpop.f32.mrf.mxu1 }
 0x711   : > { %v7795_v8 = vadd.f32 %v20175_v18, %v7755_v4 }
 0x712   : > { %v20177_v28 = vpop.f32.mrf.mxu1 }
 0x72a   : > { %v20195_v33 = vpop.f32.mrf.mxu0 }
 0x72c   : > { %v20196_v60 = vpop.f32.mrf.mxu0  ;;  %v20217_v59 = vpop.f32.mrf.mxu1 }
 0x72d   : > { %v20197_v46 = vadd.f32 %v20196_v60, %v20195_v33 }
 0x72e   : > { %v20198_v22 = vpop.f32.mrf.mxu0  ;;  %v20218_v31 = vpop.f32.mrf.mxu1 }
 0x72f   : > { %v7835_v41 = vadd.f32 %v20197_v46, %v7795_v8  ;;  %v20219_v45 = vadd.f32 %v20218_v31, %v20217_v59 }
 0x730   : > { %v20199_v19 = vpop.f32.mrf.mxu0  ;;  %v20220_v3 = vpop.f32.mrf.mxu1 }
 0x731   : > { %v7875_v50 = vadd.f32 %v20219_v45, %v7835_v41 }
 0x732   : > { %v20221_v32 = vpop.f32.mrf.mxu1 }
 0x74a   : > { %v20239_v47 = vpop.f32.mrf.mxu0 }
 0x74c   : > { %v20240_v49 = vpop.f32.mrf.mxu0 }
 0x74d   : > { %v20241_v52 = vadd.f32 %v20240_v49, %v20239_v47 }
 0x74e   : > { %v20242_v36 = vpop.f32.mrf.mxu0 }
 0x74f   : > { %v7915_v53 = vadd.f32 %v20241_v52, %v7875_v50 }
 0x750   : > { %v20243_v16 = vpop.f32.mrf.mxu0 }
 0x751   : > { %21572 = vtanh.f32 %v7915_v53 }
 0x75b   : > { %7933 = sbr.rel (%p18717_p7) target bundleno = 1899 (0x76b), region = 116 }
 0x75e   : > { %v21573_v55 = vpop.eup %21572 }
 0x75f   : > { %v7929_v56 = vpack.c.bf16 %v21573_v55, %v21573_v55 }
 0x760   : > { %v18718_v12 = vpack.c.bf16 %v23476_v37, %v23473_v39  ;;  %v18719_v23 = vpack.c.bf16 %v21571_v20, %v21569_v1 }
 0x761   : > { %v7961_v57 = vrot.slane %v7929_v56, %v23020_v17 }
 0x762   : > { %v7947_v34 = vrot.slane %v18718_v12, %v23020_v17  ;;  %v7954_v40 = vrot.slane %v18719_v23, %v23020_v17 }
 0x763   : > { %v7976_v42 = vrot.slane %v7961_v57, %v23020_v17 }
 0x764   : > { %v7962_v61 = vcombine.low %v7947_v34, %v7954_v40 }
 0x766   : > { %v7969_v43 = vrot.slane %v7962_v61, %v23020_v17 }
 0x768   : > { %v7977_v63 = vcombine.low %v7969_v43, %v7976_v42 }
 0x76a   : > { %7979 = vst [vmem:[#allocation4] sm:$0x1f] %v7977_v63 }
 0x76b PF: > { %p18720_p12 = scmp.ne.s32.totalorder %s22048_s21, 3 }
 0x76d   : > { %7983 = sbr.rel (%p18720_p12) target bundleno = 1917 (0x77d), region = 120 }
 0x772   : > { %v18721_v2 = vpack.c.bf16 %v23476_v37, %v23473_v39  ;;  %v18722_v15 = vpack.c.bf16 %v21571_v20, %v21569_v1  ;;  %v8011_v51 = vrot.slane %v7929_v56, %v23020_v17 }
 0x774   : > { %v7997_v5 = vrot.slane %v18721_v2, %v23020_v17  ;;  %v8004_v6 = vrot.slane %v18722_v15, %v23020_v17  ;;  %v8026_v10 = vrot.slane %v8011_v51, %v23020_v17 }
 0x776   : > { %v8012_v9 = vcombine.low %v7997_v5, %v8004_v6 }
 0x778   : > { %v8019_v13 = vrot.slane %v8012_v9, %v23020_v17 }
 0x77a   : > { %v8027_v14 = vcombine.low %v8019_v13, %v8026_v10 }
 0x77c   : > { %8029 = vst [vmem:[#allocation4 + $0x5] sm:$0x1f] %v8027_v14 }
 0x77d PF: > { %8033 = sbr.rel (%p4633_p4) target bundleno = 3413 (0xd55), region = 124 }
 0x782   : > { %v8148_v39 = vld [vmem:[%s22413_s18 + $0x380] sm:$0xff]  ;;  %v9320_v18 = vlaneseq  ;;  %v21945_v46 = vmov 1966171168  }
 0x783   : > { %v8156_v37 = vld [vmem:[%s22413_s18 + $0x3c0] sm:$0xff]  ;;  %v9404_v8 = vunpack.c.l.s4 %v21945_v46  ;;  %v8034_v6 = vld [vmem:[#allocation4] sm:$0xff] }
 0x784   : > { %v8404_v17 = vld [vmem:[%s22413_s18 + $0xb80] sm:$0xff]  ;;  %v18838_v27 = vcombine.high %v8148_v39, %v8156_v37  ;;  %v18837_v54 = vcombine.low %v8148_v39, %v8156_v37  ;;  %v23529_v16 = vshrl.u32 %v9320_v18, 7 }
 0x785   : > { %v8412_v44 = vld [vmem:[%s22413_s18 + $0xbc0] sm:$0xff]  ;;  %v9405_v55 = vunpack.c.0.s8 %v9404_v8 }
 0x786   : > { %v8132_v62 = vld [vmem:[%s22413_s18 + $0x300] sm:$0xff]  ;;  %v19094_v58 = vcombine.high %v8404_v17, %v8412_v44  ;;  %v19093_v25 = vcombine.low %v8404_v17, %v8412_v44  ;;  %15883 = vmatprep.subr.bf16.mxu0 %v18838_v27 }
 0x787   : > { %v8140_v48 = vld [vmem:[%s22413_s18 + $0x340] sm:$0xff]  ;;  %15884 = vmatpush1.bf16.msra.mxu0 %v18837_v54  ;;  %v23536_v43 = vsub.s32 %v9405_v55, %v23529_v16 }
 0x788   : > { %v18822_v1 = vcombine.high %v8132_v62, %v8140_v48  ;;  %v8388_v20 = vld [vmem:[%s22413_s18 + $0xb00] sm:$0xff]  ;;  %15924 = vmatprep.subr.bf16.mxu1 %v19094_v58  ;;  %v18821_v26 = vcombine.low %v8132_v62, %v8140_v48 }
 0x789   : > { %v8396_v11 = vld [vmem:[%s22413_s18 + $0xb40] sm:$0xff]  ;;  %15925 = vmatpush1.bf16.msra.mxu1 %v19093_v25  ;;  %v23543_v14 = vrot.slane %v8034_v6, %v23536_v43 }
 0x78a   : > { %v8116_v21 = vld [vmem:[%s22413_s18 + $0x280] sm:$0xff]  ;;  %v19078_v30 = vcombine.high %v8388_v20, %v8396_v11  ;;  %15885 = vmatprep.subr.bf16.mxu0 %v18822_v1  ;;  %v19077_v28 = vcombine.low %v8388_v20, %v8396_v11 }
 0x78b   : > { %v8124_v29 = vld [vmem:[%s22413_s18 + $0x2c0] sm:$0xff]  ;;  %15886 = vmatpush1.bf16.msra.mxu0 %v18821_v26  ;;  %v9417_v27 = vcombine.high %v23543_v14, %v23543_v14 }
 0x78c   : > { %v8372_v7 = vld [vmem:[%s22413_s18 + $0xa80] sm:$0xff]  ;;  %v18806_v33 = vcombine.high %v8116_v21, %v8124_v29  ;;  %15926 = vmatprep.subr.bf16.mxu1 %v19078_v30  ;;  %v18805_v3 = vcombine.low %v8116_v21, %v8124_v29 }
 0x78d   : > { %v8380_v24 = vld [vmem:[%s22413_s18 + $0xac0] sm:$0xff]  ;;  %15927 = vmatpush1.bf16.msra.mxu1 %v19077_v28  ;;  %v23552_v25 = vrot.slane %v9417_v27, %v23536_v43  ;;  %v9402_v28 = vcombine.high %v8034_v6, %v8034_v6 }
 0x78e   : > { %v19062_v60 = vcombine.high %v8372_v7, %v8380_v24  ;;  %v8100_v59 = vld [vmem:[%s22413_s18 + $0x200] sm:$0xff]  ;;  %15887 = vmatprep.subr.bf16.mxu0 %v18806_v33  ;;  %v19061_v32 = vcombine.low %v8372_v7, %v8380_v24 }
 0x78f   : > { %v8108_v22 = vld [vmem:[%s22413_s18 + $0x240] sm:$0xff]  ;;  %15888 = vmatpush1.bf16.msra.mxu0 %v18805_v3  ;;  %15915 = vmatprep.mubr.bf16.mxu0 %v23552_v25  ;;  %v23559_v21 = vcombine.high %v23552_v25, %v23552_v25 }
 0x790   : > { %v8356_v31 = vld [vmem:[%s22413_s18 + $0xa00] sm:$0xff]  ;;  %v18790_v38 = vcombine.high %v8100_v59, %v8108_v22  ;;  %15928 = vmatprep.subr.bf16.mxu1 %v19062_v60  ;;  %v18789_v47 = vcombine.low %v8100_v59, %v8108_v22 }
 0x791   : > { %v8364_v19 = vld [vmem:[%s22413_s18 + $0xa40] sm:$0xff]  ;;  %15929 = vmatpush1.bf16.msra.mxu1 %v19061_v32  ;;  %15956 = vmatprep.mubr.bf16.mxu1 %v23559_v21 }
 0x792   : > { %v19046_v35 = vcombine.high %v8356_v31, %v8364_v19  ;;  %v8084_v0 = vld [vmem:[%s22413_s18 + $0x180] sm:$0xff]  ;;  %15889 = vmatprep.subr.bf16.mxu0 %v18790_v38  ;;  %v19045_v49 = vcombine.low %v8356_v31, %v8364_v19  ;;  %v23569_v38 = vrot.slane %v9402_v28, %v23536_v43 }
 0x793   : > { %v8092_v4 = vld [vmem:[%s22413_s18 + $0x1c0] sm:$0xff]  ;;  %15890 = vmatpush1.bf16.msra.mxu0 %v18789_v47 }
 0x794   : > { %v8340_v41 = vld [vmem:[%s22413_s18 + $0x980] sm:$0xff]  ;;  %v18774_v50 = vcombine.high %v8084_v0, %v8092_v4  ;;  %15930 = vmatprep.subr.bf16.mxu1 %v19046_v35  ;;  %v18773_v23 = vcombine.low %v8084_v0, %v8092_v4  ;;  %v23575_v18 = vrot.slane %v23569_v38, %v23536_v43 }
 0x795   : > { %v8348_v45 = vld [vmem:[%s22413_s18 + $0x9c0] sm:$0xff]  ;;  %15931 = vmatpush1.bf16.msra.mxu1 %v19045_v49 }
 0x796   : > { %v19030_v52 = vcombine.high %v8340_v41, %v8348_v45  ;;  %v8068_v36 = vld [vmem:[%s22413_s18 + $0x100] sm:$0xff]  ;;  %15891 = vmatprep.subr.bf16.mxu0 %v18774_v50  ;;  %v19029_v57 = vcombine.low %v8340_v41, %v8348_v45 }
 0x797   : > { %v8076_v53 = vld [vmem:[%s22413_s18 + $0x140] sm:$0xff]  ;;  %15892 = vmatpush1.bf16.msra.mxu0 %v18773_v23 }
 0x798   : > { %v8324_v56 = vld [vmem:[%s22413_s18 + $0x900] sm:$0xff]  ;;  %v18758_v34 = vcombine.high %v8068_v36, %v8076_v53  ;;  %15932 = vmatprep.subr.bf16.mxu1 %v19030_v52  ;;  %v18757_v15 = vcombine.low %v8068_v36, %v8076_v53 }
 0x799   : > { %v8332_v12 = vld [vmem:[%s22413_s18 + $0x940] sm:$0xff]  ;;  %15933 = vmatpush1.bf16.msra.mxu1 %v19029_v57 }
 0x79a   : > { %v19014_v40 = vcombine.high %v8324_v56, %v8332_v12  ;;  %v8052_v61 = vld [vmem:[%s22413_s18 + $0x80] sm:$0xff]  ;;  %15893 = vmatprep.subr.bf16.mxu0 %v18758_v34  ;;  %v19013_v51 = vcombine.low %v8324_v56, %v8332_v12 }
 0x79b   : > { %v8060_v42 = vld [vmem:[%s22413_s18 + $0xc0] sm:$0xff]  ;;  %15894 = vmatpush1.bf16.msra.mxu0 %v18757_v15 }
 0x79c   : > { %v8308_v63 = vld [vmem:[%s22413_s18 + $0x880] sm:$0xff]  ;;  %v18742_v5 = vcombine.high %v8052_v61, %v8060_v42  ;;  %15934 = vmatprep.subr.bf16.mxu1 %v19014_v40  ;;  %v18741_v17 = vcombine.low %v8052_v61, %v8060_v42 }
 0x79d   : > { %v8316_v2 = vld [vmem:[%s22413_s18 + $0x8c0] sm:$0xff]  ;;  %15935 = vmatpush1.bf16.msra.mxu1 %v19013_v51 }
 0x79e   : > { %v18998_v9 = vcombine.high %v8308_v63, %v8316_v2  ;;  %v8036_v10 = vld [vmem:[%s22413_s18] sm:$0xff]  ;;  %15895 = vmatprep.subr.bf16.mxu0 %v18742_v5  ;;  %v18997_v44 = vcombine.low %v8308_v63, %v8316_v2 }
 0x79f   : > { %v8044_v13 = vld [vmem:[%s22413_s18 + $0x40] sm:$0xff]  ;;  %15896 = vmatpush1.bf16.msra.mxu0 %v18741_v17 }
 0x7a0   : > { %v8292_v39 = vld [vmem:[%s22413_s18 + $0x800] sm:$0xff]  ;;  %v18726_v54 = vcombine.high %v8036_v10, %v8044_v13  ;;  %15936 = vmatprep.subr.bf16.mxu1 %v18998_v9  ;;  %v18725_v11 = vcombine.low %v8036_v10, %v8044_v13 }
 0x7a1   : > { %v8300_v37 = vld [vmem:[%s22413_s18 + $0x840] sm:$0xff]  ;;  %15937 = vmatpush1.bf16.msra.mxu1 %v18997_v44 }
 0x7a2   : > { %v18982_v62 = vcombine.high %v8292_v39, %v8300_v37  ;;  %v8276_v48 = vld [vmem:[%s22413_s18 + $0x780] sm:$0xff]  ;;  %15897 = vmatprep.subr.bf16.mxu0 %v18726_v54  ;;  %v18981_v30 = vcombine.low %v8292_v39, %v8300_v37 }
 0x7a3   : > { %v8284_v58 = vld [vmem:[%s22413_s18 + $0x7c0] sm:$0xff]  ;;  %15898 = vmatpush1.bf16.msra.mxu0 %v18725_v11 }
 0x7a4   : > { %v8532_v1 = vld [vmem:[%s22413_s18 + $0xf80] sm:$0xff]  ;;  %v18966_v29 = vcombine.high %v8276_v48, %v8284_v58  ;;  %15938 = vmatprep.subr.bf16.mxu1 %v18982_v62  ;;  %v18965_v59 = vcombine.low %v8276_v48, %v8284_v58 }
 0x7a5   : > { %v8540_v20 = vld [vmem:[%s22413_s18 + $0xfc0] sm:$0xff]  ;;  %15939 = vmatpush1.bf16.msra.mxu1 %v18981_v30 }
 0x7a6   : > { %v19222_v7 = vcombine.high %v8532_v1, %v8540_v20  ;;  %v8260_v24 = vld [vmem:[%s22413_s18 + $0x700] sm:$0xff]  ;;  %15899 = vmatprep.subr.bf16.mxu0 %v18966_v29  ;;  %v19221_v22 = vcombine.low %v8532_v1, %v8540_v20 }
 0x7a7   : > { %v8268_v26 = vld [vmem:[%s22413_s18 + $0x740] sm:$0xff]  ;;  %15900 = vmatpush2.bf16.msra.mxu0 %v18965_v59 }
 0x7a8   : > { %v8516_v33 = vld [vmem:[%s22413_s18 + $0xf00] sm:$0xff]  ;;  %v18950_v31 = vcombine.high %v8260_v24, %v8268_v26  ;;  %15940 = vmatprep.subr.bf16.mxu1 %v19222_v7  ;;  %v18949_v4 = vcombine.low %v8260_v24, %v8268_v26 }
 0x7a9   : > { %v8524_v60 = vld [vmem:[%s22413_s18 + $0xf40] sm:$0xff]  ;;  %15941 = vmatpush2.bf16.msra.mxu1 %v19221_v22  ;;  %v23605_v22 = vrot.slane %v23543_v14, %v23536_v43 }
 0x7aa   : > { %v19206_v19 = vcombine.high %v8516_v33, %v8524_v60  ;;  %v8244_v3 = vld [vmem:[%s22413_s18 + $0x680] sm:$0xff]  ;;  %15901 = vmatprep.subr.bf16.mxu0 %v18950_v31  ;;  %v19205_v46 = vcombine.low %v8516_v33, %v8524_v60  ;;  %v9418_v60 = vcombine.high %v23569_v38, %v23569_v38 }
 0x7ab   : > { %v8252_v32 = vld [vmem:[%s22413_s18 + $0x6c0] sm:$0xff]  ;;  %15902 = vmatpush2.bf16.msra.mxu0 %v18949_v4  ;;  %v23616_v14 = vcombine.high %v23605_v22, %v23605_v22 }
 0x7ac   : > { %v8500_v35 = vld [vmem:[%s22413_s18 + $0xe80] sm:$0xff]  ;;  %v18934_v8 = vcombine.high %v8244_v3, %v8252_v32  ;;  %15942 = vmatprep.subr.bf16.mxu1 %v19206_v19  ;;  %v18933_v52 = vcombine.low %v8244_v3, %v8252_v32  ;;  %v23612_v4 = vrot.slane %v9418_v60, %v23536_v43 }
 0x7ad   : > { %v8508_v0 = vld [vmem:[%s22413_s18 + $0xec0] sm:$0xff]  ;;  %15943 = vmatpush2.bf16.msra.mxu1 %v19205_v46 }
 0x7ae   : > { %v19190_v41 = vcombine.high %v8500_v35, %v8508_v0  ;;  %v8228_v45 = vld [vmem:[%s22413_s18 + $0x600] sm:$0xff]  ;;  %15903 = vmatprep.subr.bf16.mxu0 %v18934_v8  ;;  %v19189_v36 = vcombine.low %v8500_v35, %v8508_v0 }
 0x7af   : > { %v8236_v47 = vld [vmem:[%s22413_s18 + $0x640] sm:$0xff]  ;;  %15904 = vmatpush2.bf16.msra.mxu0 %v18933_v52 }
 0x7b0   : > { %v8484_v49 = vld [vmem:[%s22413_s18 + $0xe00] sm:$0xff]  ;;  %v18918_v53 = vcombine.high %v8228_v45, %v8236_v47  ;;  %15944 = vmatprep.subr.bf16.mxu1 %v19190_v41  ;;  %v18917_v34 = vcombine.low %v8228_v45, %v8236_v47 }
 0x7b1   : > { %v8492_v50 = vld [vmem:[%s22413_s18 + $0xe40] sm:$0xff]  ;;  %15945 = vmatpush2.bf16.msra.mxu1 %v19189_v36  ;;  %v23625_v36 = vcombine.high %v23612_v4, %v23612_v4 }
 0x7b2   : > { %v19174_v55 = vcombine.high %v8484_v49, %v8492_v50  ;;  %v8212_v56 = vld [vmem:[%s22413_s18 + $0x580] sm:$0xff]  ;;  %15905 = vmatprep.subr.bf16.mxu0 %v18918_v53  ;;  %v19173_v40 = vcombine.low %v8484_v49, %v8492_v50 }
 0x7b3   : > { %v8220_v12 = vld [vmem:[%s22413_s18 + $0x5c0] sm:$0xff]  ;;  %15906 = vmatpush2.bf16.msra.mxu0 %v18917_v34 }
 0x7b4   : > { %v8468_v23 = vld [vmem:[%s22413_s18 + $0xd80] sm:$0xff]  ;;  %v18902_v61 = vcombine.high %v8212_v56, %v8220_v12  ;;  %15946 = vmatprep.subr.bf16.mxu1 %v19174_v55  ;;  %v18901_v5 = vcombine.low %v8212_v56, %v8220_v12 }
 0x7b5   : > { %v8476_v57 = vld [vmem:[%s22413_s18 + $0xdc0] sm:$0xff]  ;;  %15947 = vmatpush2.bf16.msra.mxu1 %v19173_v40 }
 0x7b6   : > { %v19158_v42 = vcombine.high %v8468_v23, %v8476_v57  ;;  %v8196_v63 = vld [vmem:[%s22413_s18 + $0x500] sm:$0xff]  ;;  %15907 = vmatprep.subr.bf16.mxu0 %v18902_v61  ;;  %v19157_v6 = vcombine.low %v8468_v23, %v8476_v57 }
 0x7b7   : > { %v8204_v2 = vld [vmem:[%s22413_s18 + $0x540] sm:$0xff]  ;;  %15908 = vmatpush2.bf16.msra.mxu0 %v18901_v5 }
 0x7b8   : > { %v8452_v15 = vld [vmem:[%s22413_s18 + $0xd00] sm:$0xff]  ;;  %v18886_v9 = vcombine.high %v8196_v63, %v8204_v2  ;;  %15948 = vmatprep.subr.bf16.mxu1 %v19158_v42  ;;  %v18885_v27 = vcombine.low %v8196_v63, %v8204_v2 }
 0x7b9   : > { %v8460_v51 = vld [vmem:[%s22413_s18 + $0xd40] sm:$0xff]  ;;  %15949 = vmatpush2.bf16.msra.mxu1 %v19157_v6 }
 0x7ba   : > { %v19142_v10 = vcombine.high %v8452_v15, %v8460_v51  ;;  %v8180_v13 = vld [vmem:[%s22413_s18 + $0x480] sm:$0xff]  ;;  %15909 = vmatprep.subr.bf16.mxu0 %v18886_v9  ;;  %v19141_v44 = vcombine.low %v8452_v15, %v8460_v51 }
 0x7bb   : > { %v8188_v39 = vld [vmem:[%s22413_s18 + $0x4c0] sm:$0xff]  ;;  %15910 = vmatpush2.bf16.msra.mxu0 %v18885_v27 }
 0x7bc   : > { %v8436_v37 = vld [vmem:[%s22413_s18 + $0xc80] sm:$0xff]  ;;  %v18870_v54 = vcombine.high %v8180_v13, %v8188_v39  ;;  %15950 = vmatprep.subr.bf16.mxu1 %v19142_v10  ;;  %v18869_v11 = vcombine.low %v8180_v13, %v8188_v39 }
 0x7bd   : > { %v8444_v17 = vld [vmem:[%s22413_s18 + $0xcc0] sm:$0xff]  ;;  %15951 = vmatpush2.bf16.msra.mxu1 %v19141_v44 }
 0x7be   : > { %v19126_v62 = vcombine.high %v8436_v37, %v8444_v17  ;;  %v8164_v48 = vld [vmem:[%s22413_s18 + $0x400] sm:$0xff]  ;;  %15911 = vmatprep.subr.bf16.mxu0 %v18870_v54  ;;  %v19125_v30 = vcombine.low %v8436_v37, %v8444_v17 }
 0x7bf   : > { %v8172_v58 = vld [vmem:[%s22413_s18 + $0x440] sm:$0xff]  ;;  %15912 = vmatpush2.bf16.msra.mxu0 %v18869_v11 }
 0x7c0   : > { %v8420_v1 = vld [vmem:[%s22413_s18 + $0xc00] sm:$0xff]  ;;  %v18854_v29 = vcombine.high %v8164_v48, %v8172_v58  ;;  %15952 = vmatprep.subr.bf16.mxu1 %v19126_v62  ;;  %v18853_v59 = vcombine.low %v8164_v48, %v8172_v58 }
 0x7c1   : > { %v8428_v20 = vld [vmem:[%s22413_s18 + $0xc40] sm:$0xff]  ;;  %15953 = vmatpush2.bf16.msra.mxu1 %v19125_v30 }
 0x7c2   : > { %v19110_v7 = vcombine.high %v8420_v1, %v8428_v20  ;;  %v8660_v24 = vld [vmem:[%s22413_s18 + $0x1380] sm:$0xff]  ;;  %15913 = vmatprep.subr.bf16.mxu0 %v18854_v29  ;;  %v19109_v31 = vcombine.low %v8420_v1, %v8428_v20 }
 0x7c3   : > { %v8668_v26 = vld [vmem:[%s22413_s18 + $0x13c0] sm:$0xff]  ;;  %15914 = vmatpush2.bf16.msra.mxu0 %v18853_v59 }
 0x7c4   : > { %v8916_v28 = vld [vmem:[%s22413_s18 + $0x1b80] sm:$0xff]  ;;  %v19350_v19 = vcombine.high %v8660_v24, %v8668_v26  ;;  %15954 = vmatprep.subr.bf16.mxu1 %v19110_v7  ;;  %v19349_v46 = vcombine.low %v8660_v24, %v8668_v26 }
 0x7c5   : > { %v8924_v33 = vld [vmem:[%s22413_s18 + $0x1bc0] sm:$0xff]  ;;  %15955 = vmatpush2.bf16.msra.mxu1 %v19109_v31 }
 0x7c6   : > { %v19606_v3 = vcombine.high %v8916_v28, %v8924_v33  ;;  %v8644_v32 = vld [vmem:[%s22413_s18 + $0x1300] sm:$0xff]  ;;  %15965 = vmatprep.subr.bf16.mxu0 %v19350_v19  ;;  %v19605_v8 = vcombine.low %v8916_v28, %v8924_v33  ;;  %15916 = vmatmul.mubr.bf16.vlgmr.msra.gmra.mxu0 %v23605_v22 }
 0x7c7   : > { %v8652_v35 = vld [vmem:[%s22413_s18 + $0x1340] sm:$0xff]  ;;  %15966 = vmatpush1.bf16.msra.mxu0 %v19349_v46  ;;  %15997 = vmatprep.mubr.bf16.mxu0 %v23612_v4 }
 0x7c8   : > { %v8900_v0 = vld [vmem:[%s22413_s18 + $0x1b00] sm:$0xff]  ;;  %v19334_v41 = vcombine.high %v8644_v32, %v8652_v35  ;;  %16006 = vmatprep.subr.bf16.mxu1 %v19606_v3  ;;  %15957 = vmatmul.mubr.bf16.vlgmr.msra.gmra.mxu1 %v23616_v14  ;;  %v19333_v53 = vcombine.low %v8644_v32, %v8652_v35 }
 0x7c9   : > { %v8908_v38 = vld [vmem:[%s22413_s18 + $0x1b40] sm:$0xff]  ;;  %16007 = vmatpush1.bf16.msra.mxu1 %v19605_v8  ;;  %16038 = vmatprep.mubr.bf16.mxu1 %v23625_v36 }
 0x7ca   : > { %v19590_v45 = vcombine.high %v8900_v0, %v8908_v38  ;;  %v8628_v47 = vld [vmem:[%s22413_s18 + $0x1280] sm:$0xff]  ;;  %15967 = vmatprep.subr.bf16.mxu0 %v19334_v41  ;;  %v19589_v55 = vcombine.low %v8900_v0, %v8908_v38 }
 0x7cb   : > { %v8636_v49 = vld [vmem:[%s22413_s18 + $0x12c0] sm:$0xff]  ;;  %15968 = vmatpush1.bf16.msra.mxu0 %v19333_v53 }
 0x7cc   : > { %v8884_v50 = vld [vmem:[%s22413_s18 + $0x1a80] sm:$0xff]  ;;  %v19318_v56 = vcombine.high %v8628_v47, %v8636_v49  ;;  %16008 = vmatprep.subr.bf16.mxu1 %v19590_v45  ;;  %v19317_v61 = vcombine.low %v8628_v47, %v8636_v49 }
 0x7cd   : > { %v8892_v52 = vld [vmem:[%s22413_s18 + $0x1ac0] sm:$0xff]  ;;  %16009 = vmatpush1.bf16.msra.mxu1 %v19589_v55 }
 0x7ce   : > { %v19574_v12 = vcombine.high %v8884_v50, %v8892_v52  ;;  %v8612_v23 = vld [vmem:[%s22413_s18 + $0x1200] sm:$0xff]  ;;  %15969 = vmatprep.subr.bf16.mxu0 %v19318_v56  ;;  %v19573_v42 = vcombine.low %v8884_v50, %v8892_v52 }
 0x7cf   : > { %v8620_v57 = vld [vmem:[%s22413_s18 + $0x1240] sm:$0xff]  ;;  %15970 = vmatpush1.bf16.msra.mxu0 %v19317_v61 }
 0x7d0   : > { %v8868_v34 = vld [vmem:[%s22413_s18 + $0x1a00] sm:$0xff]  ;;  %v19302_v63 = vcombine.high %v8612_v23, %v8620_v57  ;;  %16010 = vmatprep.subr.bf16.mxu1 %v19574_v12  ;;  %v19301_v9 = vcombine.low %v8612_v23, %v8620_v57 }
 0x7d1   : > { %v8876_v40 = vld [vmem:[%s22413_s18 + $0x1a40] sm:$0xff]  ;;  %16011 = vmatpush1.bf16.msra.mxu1 %v19573_v42 }
 0x7d2   : > { %v19558_v2 = vcombine.high %v8868_v34, %v8876_v40  ;;  %v8596_v15 = vld [vmem:[%s22413_s18 + $0x1180] sm:$0xff]  ;;  %15971 = vmatprep.subr.bf16.mxu0 %v19302_v63  ;;  %v19557_v10 = vcombine.low %v8868_v34, %v8876_v40 }
 0x7d3   : > { %v8604_v51 = vld [vmem:[%s22413_s18 + $0x11c0] sm:$0xff]  ;;  %15972 = vmatpush1.bf16.msra.mxu0 %v19301_v9 }
 0x7d4   : > { %v8852_v5 = vld [vmem:[%s22413_s18 + $0x1980] sm:$0xff]  ;;  %v19286_v13 = vcombine.high %v8596_v15, %v8604_v51  ;;  %16012 = vmatprep.subr.bf16.mxu1 %v19558_v2  ;;  %v19285_v54 = vcombine.low %v8596_v15, %v8604_v51 }
 0x7d5   : > { %v8860_v6 = vld [vmem:[%s22413_s18 + $0x19c0] sm:$0xff]  ;;  %16013 = vmatpush1.bf16.msra.mxu1 %v19557_v10 }
 0x7d6   : > { %v19542_v39 = vcombine.high %v8852_v5, %v8860_v6  ;;  %v8580_v37 = vld [vmem:[%s22413_s18 + $0x1100] sm:$0xff]  ;;  %15973 = vmatprep.subr.bf16.mxu0 %v19286_v13  ;;  %v19541_v62 = vcombine.low %v8852_v5, %v8860_v6 }
 0x7d7   : > { %v8588_v17 = vld [vmem:[%s22413_s18 + $0x1140] sm:$0xff]  ;;  %15974 = vmatpush1.bf16.msra.mxu0 %v19285_v54 }
 0x7d8   : > { %v8836_v27 = vld [vmem:[%s22413_s18 + $0x1900] sm:$0xff]  ;;  %v19270_v48 = vcombine.high %v8580_v37, %v8588_v17  ;;  %16014 = vmatprep.subr.bf16.mxu1 %v19542_v39  ;;  %v19269_v29 = vcombine.low %v8580_v37, %v8588_v17 }
 0x7d9   : > { %v8844_v44 = vld [vmem:[%s22413_s18 + $0x1940] sm:$0xff]  ;;  %16015 = vmatpush1.bf16.msra.mxu1 %v19541_v62 }
 0x7da   : > { %v19526_v58 = vcombine.high %v8836_v27, %v8844_v44  ;;  %v8564_v1 = vld [vmem:[%s22413_s18 + $0x1080] sm:$0xff]  ;;  %15975 = vmatprep.subr.bf16.mxu0 %v19270_v48  ;;  %v19525_v7 = vcombine.low %v8836_v27, %v8844_v44 }
 0x7db   : > { %v8572_v20 = vld [vmem:[%s22413_s18 + $0x10c0] sm:$0xff]  ;;  %15976 = vmatpush1.bf16.msra.mxu0 %v19269_v29 }
 0x7dc   : > { %v8820_v11 = vld [vmem:[%s22413_s18 + $0x1880] sm:$0xff]  ;;  %v19254_v24 = vcombine.high %v8564_v1, %v8572_v20  ;;  %16016 = vmatprep.subr.bf16.mxu1 %v19526_v58  ;;  %v19253_v31 = vcombine.low %v8564_v1, %v8572_v20 }
 0x7dd   : > { %v8828_v30 = vld [vmem:[%s22413_s18 + $0x18c0] sm:$0xff]  ;;  %16017 = vmatpush1.bf16.msra.mxu1 %v19525_v7 }
 0x7de   : > { %v19510_v26 = vcombine.high %v8820_v11, %v8828_v30  ;;  %v8548_v28 = vld [vmem:[%s22413_s18 + $0x1000] sm:$0xff]  ;;  %15977 = vmatprep.subr.bf16.mxu0 %v19254_v24  ;;  %v19509_v19 = vcombine.low %v8820_v11, %v8828_v30 }
 0x7df   : > { %v8556_v33 = vld [vmem:[%s22413_s18 + $0x1040] sm:$0xff]  ;;  %15978 = vmatpush1.bf16.msra.mxu0 %v19253_v31 }
 0x7e0   : > { %v8804_v60 = vld [vmem:[%s22413_s18 + $0x1800] sm:$0xff]  ;;  %v19238_v3 = vcombine.high %v8548_v28, %v8556_v33  ;;  %16018 = vmatprep.subr.bf16.mxu1 %v19510_v26  ;;  %v19237_v8 = vcombine.low %v8548_v28, %v8556_v33 }
 0x7e1   : > { %v8812_v59 = vld [vmem:[%s22413_s18 + $0x1840] sm:$0xff]  ;;  %16019 = vmatpush1.bf16.msra.mxu1 %v19509_v19 }
 0x7e2   : > { %v19494_v32 = vcombine.high %v8804_v60, %v8812_v59  ;;  %v8788_v35 = vld [vmem:[%s22413_s18 + $0x1780] sm:$0xff]  ;;  %15979 = vmatprep.subr.bf16.mxu0 %v19238_v3  ;;  %v19493_v41 = vcombine.low %v8804_v60, %v8812_v59 }
 0x7e3   : > { %v8796_v0 = vld [vmem:[%s22413_s18 + $0x17c0] sm:$0xff]  ;;  %15980 = vmatpush1.bf16.msra.mxu0 %v19237_v8 }
 0x7e4   : > { %v9044_v38 = vld [vmem:[%s22413_s18 + $0x1f80] sm:$0xff]  ;;  %v19478_v45 = vcombine.high %v8788_v35, %v8796_v0  ;;  %16020 = vmatprep.subr.bf16.mxu1 %v19494_v32  ;;  %v19477_v55 = vcombine.low %v8788_v35, %v8796_v0 }
 0x7e5   : > { %v9052_v46 = vld [vmem:[%s22413_s18 + $0x1fc0] sm:$0xff]  ;;  %16021 = vmatpush1.bf16.msra.mxu1 %v19493_v41 }
 0x7e6   : > { %v19734_v47 = vcombine.high %v9044_v38, %v9052_v46  ;;  %v8772_v49 = vld [vmem:[%s22413_s18 + $0x1700] sm:$0xff]  ;;  %15981 = vmatprep.subr.bf16.mxu0 %v19478_v45  ;;  %v19733_v56 = vcombine.low %v9044_v38, %v9052_v46 }
 0x7e7   : > { %v8780_v50 = vld [vmem:[%s22413_s18 + $0x1740] sm:$0xff]  ;;  %15982 = vmatpush2.bf16.msra.mxu0 %v19477_v55  ;;  %v8157_v55 = vld [vmem:[%s22413_s18 + $0x3c8] sm:$0xff] }
 0x7e8   : > { %v9028_v52 = vld [vmem:[%s22413_s18 + $0x1f00] sm:$0xff]  ;;  %v19462_v12 = vcombine.high %v8772_v49, %v8780_v50  ;;  %16022 = vmatprep.subr.bf16.mxu1 %v19734_v47  ;;  %v19461_v42 = vcombine.low %v8772_v49, %v8780_v50 }
 0x7e9   : > { %v9036_v53 = vld [vmem:[%s22413_s18 + $0x1f40] sm:$0xff]  ;;  %16023 = vmatpush2.bf16.msra.mxu1 %v19733_v56  ;;  %v23686_v56 = vld.sshfl [vmem:[#allocation4 + $0x8] sm:$0x11 pattern:$0x75316420] }
 0x7ea   : > { %v19718_v23 = vcombine.high %v9028_v52, %v9036_v53  ;;  %v8756_v57 = vld [vmem:[%s22413_s18 + $0x1680] sm:$0xff]  ;;  %15983 = vmatprep.subr.bf16.mxu0 %v19462_v12  ;;  %v19717_v63 = vcombine.low %v9028_v52, %v9036_v53  ;;  %v8149_v53 = vld [vmem:[%s22413_s18 + $0x388] sm:$0xff] }
 0x7eb   : > { %v8764_v34 = vld [vmem:[%s22413_s18 + $0x16c0] sm:$0xff]  ;;  %15984 = vmatpush2.bf16.msra.mxu0 %v19461_v42  ;;  %v9458_v42 = vcombine.high %v23686_v56, %v23686_v56 }
 0x7ec   : > { %v9012_v40 = vld [vmem:[%s22413_s18 + $0x1e80] sm:$0xff]  ;;  %v19446_v2 = vcombine.high %v8756_v57, %v8764_v34  ;;  %16024 = vmatprep.subr.bf16.mxu1 %v19718_v23  ;;  %v19445_v10 = vcombine.low %v8756_v57, %v8764_v34  ;;  %v18840_v34 = vcombine.high %v8149_v53, %v8157_v55 }
 0x7ed   : > { %v9020_v61 = vld [vmem:[%s22413_s18 + $0x1ec0] sm:$0xff]  ;;  %16025 = vmatpush2.bf16.msra.mxu1 %v19717_v63  ;;  %v8133_v63 = vld [vmem:[%s22413_s18 + $0x308] sm:$0xff] }
 0x7ee   : > { %v19702_v15 = vcombine.high %v9012_v40, %v9020_v61  ;;  %v8740_v51 = vld [vmem:[%s22413_s18 + $0x1600] sm:$0xff]  ;;  %15985 = vmatprep.subr.bf16.mxu0 %v19446_v2  ;;  %v19701_v13 = vcombine.low %v9012_v40, %v9020_v61  ;;  %v8141_v2 = vld [vmem:[%s22413_s18 + $0x348] sm:$0xff] }
 0x7ef   : > { %v8748_v5 = vld [vmem:[%s22413_s18 + $0x1640] sm:$0xff]  ;;  %15986 = vmatpush2.bf16.msra.mxu0 %v19445_v10 }
 0x7f0   : > { %v8996_v6 = vld [vmem:[%s22413_s18 + $0x1e00] sm:$0xff]  ;;  %v19430_v39 = vcombine.high %v8740_v51, %v8748_v5  ;;  %16026 = vmatprep.subr.bf16.mxu1 %v19702_v15  ;;  %v19429_v62 = vcombine.low %v8740_v51, %v8748_v5  ;;  %v23696_v15 = vcombine.high %v23575_v18, %v23575_v18  ;;  %v18839_v5 = vcombine.low %v8149_v53, %v8157_v55 }
 0x7f1   : > { %v9004_v9 = vld [vmem:[%s22413_s18 + $0x1e40] sm:$0xff]  ;;  %16027 = vmatpush2.bf16.msra.mxu1 %v19701_v13 }
 0x7f2   : > { %v19686_v37 = vcombine.high %v8996_v6, %v9004_v9  ;;  %v8724_v17 = vld [vmem:[%s22413_s18 + $0x1580] sm:$0xff]  ;;  %15987 = vmatprep.subr.bf16.mxu0 %v19430_v39  ;;  %v19685_v48 = vcombine.low %v8996_v6, %v9004_v9  ;;  %v18824_v9 = vcombine.high %v8133_v63, %v8141_v2  ;;  %v23701_v39 = vrot.slane %v9458_v42, %v23536_v43 }
 0x7f3   : > { %v8732_v27 = vld [vmem:[%s22413_s18 + $0x15c0] sm:$0xff]  ;;  %15988 = vmatpush2.bf16.msra.mxu0 %v19429_v62 }
 0x7f4   : > { %v8980_v44 = vld [vmem:[%s22413_s18 + $0x1d80] sm:$0xff]  ;;  %v19414_v58 = vcombine.high %v8724_v17, %v8732_v27  ;;  %16028 = vmatprep.subr.bf16.mxu1 %v19686_v37  ;;  %v19413_v7 = vcombine.low %v8724_v17, %v8732_v27  ;;  %v8117_v37 = vld [vmem:[%s22413_s18 + $0x288] sm:$0xff] }
 0x7f5   : > { %v8988_v54 = vld [vmem:[%s22413_s18 + $0x1dc0] sm:$0xff]  ;;  %16029 = vmatpush2.bf16.msra.mxu1 %v19685_v48  ;;  %v8125_v17 = vld [vmem:[%s22413_s18 + $0x2c8] sm:$0xff] }
 0x7f6   : > { %v19670_v1 = vcombine.high %v8980_v44, %v8988_v54  ;;  %v8708_v20 = vld [vmem:[%s22413_s18 + $0x1500] sm:$0xff]  ;;  %15989 = vmatprep.subr.bf16.mxu0 %v19414_v58  ;;  %v19669_v24 = vcombine.low %v8980_v44, %v8988_v54  ;;  %v18823_v44 = vcombine.low %v8133_v63, %v8141_v2  ;;  %v18808_v62 = vcombine.high %v8117_v37, %v8125_v17 }
 0x7f7   : > { %v8716_v11 = vld [vmem:[%s22413_s18 + $0x1540] sm:$0xff]  ;;  %15990 = vmatpush2.bf16.msra.mxu0 %v19413_v7 }
 0x7f8   : > { %v8964_v30 = vld [vmem:[%s22413_s18 + $0x1d00] sm:$0xff]  ;;  %v19398_v26 = vcombine.high %v8708_v20, %v8716_v11  ;;  %16030 = vmatprep.subr.bf16.mxu1 %v19670_v1  ;;  %v19397_v19 = vcombine.low %v8708_v20, %v8716_v11  ;;  %v8101_v1 = vld [vmem:[%s22413_s18 + $0x208] sm:$0xff] }
 0x7f9   : > { %v8972_v29 = vld [vmem:[%s22413_s18 + $0x1d40] sm:$0xff]  ;;  %16031 = vmatpush2.bf16.msra.mxu1 %v19669_v24  ;;  %v8109_v20 = vld [vmem:[%s22413_s18 + $0x248] sm:$0xff] }
 0x7fa   : > { %v19654_v28 = vcombine.high %v8964_v30, %v8972_v29  ;;  %v8692_v33 = vld [vmem:[%s22413_s18 + $0x1480] sm:$0xff]  ;;  %15991 = vmatprep.subr.bf16.mxu0 %v19398_v26  ;;  %v19653_v3 = vcombine.low %v8964_v30, %v8972_v29  ;;  %v18807_v30 = vcombine.low %v8117_v37, %v8125_v17  ;;  %v18792_v7 = vcombine.high %v8101_v1, %v8109_v20 }
 0x7fb   : > { %v8700_v60 = vld [vmem:[%s22413_s18 + $0x14c0] sm:$0xff]  ;;  %15992 = vmatpush2.bf16.msra.mxu0 %v19397_v19 }
 0x7fc   : > { %v8948_v59 = vld [vmem:[%s22413_s18 + $0x1c80] sm:$0xff]  ;;  %v19382_v32 = vcombine.high %v8692_v33, %v8700_v60  ;;  %16032 = vmatprep.subr.bf16.mxu1 %v19654_v28  ;;  %v19381_v41 = vcombine.low %v8692_v33, %v8700_v60  ;;  %v8085_v28 = vld [vmem:[%s22413_s18 + $0x188] sm:$0xff] }
 0x7fd   : > { %v8956_v31 = vld [vmem:[%s22413_s18 + $0x1cc0] sm:$0xff]  ;;  %16033 = vmatpush2.bf16.msra.mxu1 %v19653_v3  ;;  %v8093_v33 = vld [vmem:[%s22413_s18 + $0x1c8] sm:$0xff] }
 0x7fe   : > { %v19638_v35 = vcombine.high %v8948_v59, %v8956_v31  ;;  %v8676_v0 = vld [vmem:[%s22413_s18 + $0x1400] sm:$0xff]  ;;  %15993 = vmatprep.subr.bf16.mxu0 %v19382_v32  ;;  %v19637_v45 = vcombine.low %v8948_v59, %v8956_v31  ;;  %v18791_v59 = vcombine.low %v8101_v1, %v8109_v20  ;;  %v18776_v19 = vcombine.high %v8085_v28, %v8093_v33 }
 0x7ff   : > { %v8684_v38 = vld [vmem:[%s22413_s18 + $0x1440] sm:$0xff]  ;;  %15994 = vmatpush2.bf16.msra.mxu0 %v19381_v41 }
 0x800   : > { %v8932_v46 = vld [vmem:[%s22413_s18 + $0x1c00] sm:$0xff]  ;;  %v19366_v47 = vcombine.high %v8676_v0, %v8684_v38  ;;  %16034 = vmatprep.subr.bf16.mxu1 %v19638_v35  ;;  %v19365_v12 = vcombine.low %v8676_v0, %v8684_v38  ;;  %v8069_v35 = vld [vmem:[%s22413_s18 + $0x108] sm:$0xff] }
 0x801   : > { %v8940_v8 = vld [vmem:[%s22413_s18 + $0x1c40] sm:$0xff]  ;;  %16035 = vmatpush2.bf16.msra.mxu1 %v19637_v45  ;;  %v8077_v0 = vld [vmem:[%s22413_s18 + $0x148] sm:$0xff] }
 0x802   : > { %v19622_v49 = vcombine.high %v8932_v46, %v8940_v8  ;;  %v9172_v50 = vld [vmem:[%s22413_s18 + $0x2380] sm:$0xff]  ;;  %15995 = vmatprep.subr.bf16.mxu0 %v19366_v47  ;;  %v19621_v23 = vcombine.low %v8932_v46, %v8940_v8  ;;  %v18775_v46 = vcombine.low %v8085_v28, %v8093_v33  ;;  %v18760_v41 = vcombine.high %v8069_v35, %v8077_v0 }
 0x803   : > { %v9180_v52 = vld [vmem:[%s22413_s18 + $0x23c0] sm:$0xff]  ;;  %15996 = vmatpush2.bf16.msra.mxu0 %v19365_v12  ;;  %v18759_v53 = vcombine.low %v8069_v35, %v8077_v0 }
 0x804   : > { %v19862_v57 = vcombine.high %v9172_v50, %v9180_v52  ;;  %16036 = vmatprep.subr.bf16.mxu1 %v19622_v49  ;;  %v9156_v40 = vld [vmem:[%s22413_s18 + $0x2300] sm:$0xff]  ;;  %v19861_v51 = vcombine.low %v9172_v50, %v9180_v52  ;;  %v8053_v49 = vld [vmem:[%s22413_s18 + $0x88] sm:$0xff] }
 0x805   : > { %v9164_v61 = vld [vmem:[%s22413_s18 + $0x2340] sm:$0xff]  ;;  %16037 = vmatpush2.bf16.msra.mxu1 %v19621_v23  ;;  %v8061_v50 = vld [vmem:[%s22413_s18 + $0xc8] sm:$0xff] }
 0x806   : > { %16047 = vmatprep.subr.bf16.mxu0 %v19862_v57  ;;  %v19846_v6 = vcombine.high %v9156_v40, %v9164_v61  ;;  %16088 = vmatprep.subr.bf16.mxu1 %v18840_v34  ;;  %v9140_v10 = vld [vmem:[%s22413_s18 + $0x2280] sm:$0xff]  ;;  %v19845_v27 = vcombine.low %v9156_v40, %v9164_v61  ;;  %v18744_v12 = vcombine.high %v8053_v49, %v8061_v50  ;;  %v8037_v34 = vld [vmem:[%s22413_s18 + $0x8] sm:$0xff] }
 0x807   : > { %v9148_v13 = vld [vmem:[%s22413_s18 + $0x22c0] sm:$0xff]  ;;  %15998 = vmatmul.mubr.bf16.vlgmr.msra.gmra.mxu0 %v23575_v18  ;;  %v8045_v40 = vld [vmem:[%s22413_s18 + $0x48] sm:$0xff]  ;;  %v18743_v42 = vcombine.low %v8053_v49, %v8061_v50 }
 0x808   : > { %16039 = vmatmul.mubr.bf16.vlgmr.msra.gmra.mxu1 %v23696_v15  ;;  %16048 = vmatpush1.bf16.msra.mxu0 %v19861_v51  ;;  %v19830_v54 = vcombine.high %v9140_v10, %v9148_v13  ;;  %v9124_v48 = vld [vmem:[%s22413_s18 + $0x2200] sm:$0xff]  ;;  %v19829_v11 = vcombine.low %v9140_v10, %v9148_v13  ;;  %v18728_v2 = vcombine.high %v8037_v34, %v8045_v40 }
 0x809   : > { %16089 = vmatpush1.bf16.msra.mxu1 %v18839_v5  ;;  %16049 = vmatprep.subr.bf16.mxu0 %v19846_v6  ;;  %v9132_v58 = vld [vmem:[%s22413_s18 + $0x2240] sm:$0xff]  ;;  %v8277_v6 = vld [vmem:[%s22413_s18 + $0x788] sm:$0xff]  ;;  %v18727_v13 = vcombine.low %v8037_v34, %v8045_v40 }
 0x80a   : > { %16090 = vmatprep.subr.bf16.mxu1 %v18824_v9  ;;  %16079 = vmatprep.mubr.bf16.mxu0 %v23701_v39  ;;  %v19814_v29 = vcombine.high %v9124_v48, %v9132_v58  ;;  %v9108_v24 = vld [vmem:[%s22413_s18 + $0x2180] sm:$0xff]  ;;  %v19813_v60 = vcombine.low %v9124_v48, %v9132_v58  ;;  %v8285_v9 = vld [vmem:[%s22413_s18 + $0x7c8] sm:$0xff] }
 0x80b   : > { %16120 = vmatprep.mubr.bf16.mxu1 %v23552_v25  ;;  %v9116_v26 = vld [vmem:[%s22413_s18 + $0x21c0] sm:$0xff]  ;;  %v18968_v17 = vcombine.high %v8277_v6, %v8285_v9  ;;  %v18967_v58 = vcombine.low %v8277_v6, %v8285_v9 }
 0x80c   : > { %16050 = vmatpush1.bf16.msra.mxu0 %v19845_v27  ;;  %v19798_v31 = vcombine.high %v9108_v24, %v9116_v26  ;;  %v9092_v3 = vld [vmem:[%s22413_s18 + $0x2100] sm:$0xff]  ;;  %v19797_v38 = vcombine.low %v9108_v24, %v9116_v26 }
 0x80d   : > { %16091 = vmatpush1.bf16.msra.mxu1 %v18823_v44  ;;  %16051 = vmatprep.subr.bf16.mxu0 %v19830_v54  ;;  %v9100_v32 = vld [vmem:[%s22413_s18 + $0x2140] sm:$0xff]  ;;  %v8261_v54 = vld [vmem:[%s22413_s18 + $0x708] sm:$0xff] }
 0x80e   : > { %16092 = vmatprep.subr.bf16.mxu1 %v18808_v62  ;;  %v19782_v8 = vcombine.high %v9092_v3, %v9100_v32  ;;  %v9076_v45 = vld [vmem:[%s22413_s18 + $0x2080] sm:$0xff]  ;;  %v19781_v52 = vcombine.low %v9092_v3, %v9100_v32  ;;  %v8269_v62 = vld [vmem:[%s22413_s18 + $0x748] sm:$0xff] }
 0x80f   : > { %v9084_v47 = vld [vmem:[%s22413_s18 + $0x20c0] sm:$0xff]  ;;  %v18952_v20 = vcombine.high %v8261_v54, %v8269_v62  ;;  %v18951_v26 = vcombine.low %v8261_v54, %v8269_v62 }
 0x810   : > { %16052 = vmatpush1.bf16.msra.mxu0 %v19829_v11  ;;  %v19766_v55 = vcombine.high %v9076_v45, %v9084_v47  ;;  %v9060_v23 = vld [vmem:[%s22413_s18 + $0x2000] sm:$0xff]  ;;  %v19765_v61 = vcombine.low %v9076_v45, %v9084_v47 }
 0x811   : > { %16093 = vmatpush1.bf16.msra.mxu1 %v18807_v30  ;;  %16053 = vmatprep.subr.bf16.mxu0 %v19814_v29  ;;  %v9068_v57 = vld [vmem:[%s22413_s18 + $0x2040] sm:$0xff]  ;;  %v8245_v29 = vld [vmem:[%s22413_s18 + $0x688] sm:$0xff] }
 0x812   : > { %16094 = vmatprep.subr.bf16.mxu1 %v18792_v7  ;;  %v19750_v63 = vcombine.high %v9060_v23, %v9068_v57  ;;  %v9300_v51 = vld [vmem:[%s22413_s18 + $0x2780] sm:$0xff]  ;;  %v19749_v10 = vcombine.low %v9060_v23, %v9068_v57  ;;  %v8253_v7 = vld [vmem:[%s22413_s18 + $0x6c8] sm:$0xff] }
 0x813   : > { %v9308_v5 = vld [vmem:[%s22413_s18 + $0x27c0] sm:$0xff]  ;;  %v18936_v33 = vcombine.high %v8245_v29, %v8253_v7  ;;  %v18935_v32 = vcombine.low %v8245_v29, %v8253_v7 }
 0x814   : > { %16054 = vmatpush1.bf16.msra.mxu0 %v19813_v60  ;;  %v19990_v37 = vcombine.high %v9300_v51, %v9308_v5  ;;  %v9284_v27 = vld [vmem:[%s22413_s18 + $0x2700] sm:$0xff]  ;;  %v19989_v48 = vcombine.low %v9300_v51, %v9308_v5 }
 0x815   : > { %16095 = vmatpush1.bf16.msra.mxu1 %v18791_v59  ;;  %16055 = vmatprep.subr.bf16.mxu0 %v19798_v31  ;;  %v9292_v44 = vld [vmem:[%s22413_s18 + $0x2740] sm:$0xff]  ;;  %v8229_v31 = vld [vmem:[%s22413_s18 + $0x608] sm:$0xff] }
 0x816   : > { %16096 = vmatprep.subr.bf16.mxu1 %v18776_v19  ;;  %v19974_v1 = vcombine.high %v9284_v27, %v9292_v44  ;;  %v9268_v11 = vld [vmem:[%s22413_s18 + $0x2680] sm:$0xff]  ;;  %v19973_v24 = vcombine.low %v9284_v27, %v9292_v44  ;;  %v8237_v19 = vld [vmem:[%s22413_s18 + $0x648] sm:$0xff] }
 0x817   : > { %v9276_v30 = vld [vmem:[%s22413_s18 + $0x26c0] sm:$0xff]  ;;  %v18920_v0 = vcombine.high %v8229_v31, %v8237_v19  ;;  %v18919_v47 = vcombine.low %v8229_v31, %v8237_v19 }
 0x818   : > { %16056 = vmatpush1.bf16.msra.mxu0 %v19797_v38  ;;  %v19958_v28 = vcombine.high %v9268_v11, %v9276_v30  ;;  %v9252_v60 = vld [vmem:[%s22413_s18 + $0x2600] sm:$0xff]  ;;  %v19957_v3 = vcombine.low %v9268_v11, %v9276_v30 }
 0x819   : > { %16097 = vmatpush1.bf16.msra.mxu1 %v18775_v46  ;;  %16057 = vmatprep.subr.bf16.mxu0 %v19782_v8  ;;  %v9260_v59 = vld [vmem:[%s22413_s18 + $0x2640] sm:$0xff]  ;;  %v8213_v8 = vld [vmem:[%s22413_s18 + $0x588] sm:$0xff] }
 0x81a   : > { %16098 = vmatprep.subr.bf16.mxu1 %v18760_v41  ;;  %v19942_v35 = vcombine.high %v9252_v60, %v9260_v59  ;;  %v9236_v38 = vld [vmem:[%s22413_s18 + $0x2580] sm:$0xff]  ;;  %v8221_v41 = vld [vmem:[%s22413_s18 + $0x5c8] sm:$0xff]  ;;  %v19941_v45 = vcombine.low %v9252_v60, %v9260_v59 }
 0x81b   : > { %v9244_v46 = vld [vmem:[%s22413_s18 + $0x25c0] sm:$0xff]  ;;  %v18904_v50 = vcombine.high %v8213_v8, %v8221_v41  ;;  %v18903_v57 = vcombine.low %v8213_v8, %v8221_v41  ;;  %v8653_v60 = vld [vmem:[%s22413_s18 + $0x1348] sm:$0xff] }
 0x81c   : > { %16058 = vmatpush1.bf16.msra.mxu0 %v19781_v52  ;;  %v19926_v49 = vcombine.high %v9236_v38, %v9244_v46  ;;  %v9220_v52 = vld [vmem:[%s22413_s18 + $0x2500] sm:$0xff]  ;;  %v19925_v23 = vcombine.low %v9236_v38, %v9244_v46  ;;  %v8357_v41 = vld [vmem:[%s22413_s18 + $0xa08] sm:$0xff] }
 0x81d   : > { %16099 = vmatpush1.bf16.msra.mxu1 %v18759_v53  ;;  %16059 = vmatprep.subr.bf16.mxu0 %v19766_v55  ;;  %v9228_v53 = vld [vmem:[%s22413_s18 + $0x2540] sm:$0xff]  ;;  %v8197_v55 = vld [vmem:[%s22413_s18 + $0x508] sm:$0xff] }
 0x81e   : > { %16100 = vmatprep.subr.bf16.mxu1 %v18744_v12  ;;  %v8205_v12 = vld [vmem:[%s22413_s18 + $0x548] sm:$0xff]  ;;  %v19910_v34 = vcombine.high %v9220_v52, %v9228_v53  ;;  %v19909_v51 = vcombine.low %v9220_v52, %v9228_v53 }
 0x81f   : > { %v18888_v40 = vcombine.high %v8197_v55, %v8205_v12  ;;  %v18887_v5 = vcombine.low %v8197_v55, %v8205_v12  ;;  %v8341_v12 = vld [vmem:[%s22413_s18 + $0x988] sm:$0xff] }
 0x820   : > { %16060 = vmatpush1.bf16.msra.mxu0 %v19765_v61  ;;  %v9204_v61 = vld [vmem:[%s22413_s18 + $0x2480] sm:$0xff] }
 0x821   : > { %16101 = vmatpush1.bf16.msra.mxu1 %v18743_v42  ;;  %16061 = vmatprep.subr.bf16.mxu0 %v19750_v63  ;;  %v9212_v42 = vld [vmem:[%s22413_s18 + $0x24c0] sm:$0xff]  ;;  %v8181_v63 = vld [vmem:[%s22413_s18 + $0x488] sm:$0xff] }
 0x822   : > { %16102 = vmatprep.subr.bf16.mxu1 %v18728_v2  ;;  %v8189_v2 = vld [vmem:[%s22413_s18 + $0x4c8] sm:$0xff]  ;;  %v19894_v6 = vcombine.high %v9204_v61, %v9212_v42  ;;  %v19893_v27 = vcombine.low %v9204_v61, %v9212_v42 }
 0x823   : > { %v18872_v9 = vcombine.high %v8181_v63, %v8189_v2  ;;  %v18871_v44 = vcombine.low %v8181_v63, %v8189_v2  ;;  %v8325_v2 = vld [vmem:[%s22413_s18 + $0x908] sm:$0xff] }
 0x824   : > { %16062 = vmatpush1.bf16.msra.mxu0 %v19749_v10  ;;  %v9188_v10 = vld [vmem:[%s22413_s18 + $0x2400] sm:$0xff] }
 0x825   : > { %16103 = vmatpush1.bf16.msra.mxu1 %v18727_v13  ;;  %16063 = vmatprep.subr.bf16.mxu0 %v19990_v37  ;;  %v9196_v13 = vld [vmem:[%s22413_s18 + $0x2440] sm:$0xff]  ;;  %v8165_v37 = vld [vmem:[%s22413_s18 + $0x408] sm:$0xff] }
 0x826   : > { %16104 = vmatprep.subr.bf16.mxu1 %v18968_v17  ;;  %v8173_v17 = vld [vmem:[%s22413_s18 + $0x448] sm:$0xff]  ;;  %v19878_v54 = vcombine.high %v9188_v10, %v9196_v13  ;;  %v19877_v11 = vcombine.low %v9188_v10, %v9196_v13 }
 0x827   : > { %v18856_v62 = vcombine.high %v8165_v37, %v8173_v17  ;;  %v18855_v30 = vcombine.low %v8165_v37, %v8173_v17  ;;  %v8309_v17 = vld [vmem:[%s22413_s18 + $0x888] sm:$0xff] }
 0x828   : > { %16064 = vmatpush2.bf16.msra.mxu0 %v19989_v48  ;;  %v8405_v48 = vld [vmem:[%s22413_s18 + $0xb88] sm:$0xff] }
 0x829   : > { %16105 = vmatpush2.bf16.msra.mxu1 %v18967_v58  ;;  %16065 = vmatprep.subr.bf16.mxu0 %v19974_v1  ;;  %v8413_v58 = vld [vmem:[%s22413_s18 + $0xbc8] sm:$0xff] }
 0x82a   : > { %16106 = vmatprep.subr.bf16.mxu1 %v18952_v20  ;;  %v8661_v1 = vld [vmem:[%s22413_s18 + $0x1388] sm:$0xff]  ;;  %v19096_v29 = vcombine.high %v8405_v48, %v8413_v58  ;;  %v19095_v59 = vcombine.low %v8405_v48, %v8413_v58 }
 0x82b   : > { %v8669_v20 = vld [vmem:[%s22413_s18 + $0x13c8] sm:$0xff] }
 0x82c   : > { %16066 = vmatpush2.bf16.msra.mxu0 %v19973_v24  ;;  %v19352_v7 = vcombine.high %v8661_v1, %v8669_v20  ;;  %v8389_v24 = vld [vmem:[%s22413_s18 + $0xb08] sm:$0xff]  ;;  %v19351_v31 = vcombine.low %v8661_v1, %v8669_v20 }
 0x82d   : > { %16107 = vmatpush2.bf16.msra.mxu1 %v18951_v26  ;;  %16067 = vmatprep.subr.bf16.mxu0 %v19958_v28  ;;  %v8397_v26 = vld [vmem:[%s22413_s18 + $0xb48] sm:$0xff]  ;;  %v23769_v28 = vrot.slane %v23686_v56, %v23536_v43 }
 0x82e   : > { %16108 = vmatprep.subr.bf16.mxu1 %v18936_v33  ;;  %v8645_v33 = vld [vmem:[%s22413_s18 + $0x1308] sm:$0xff]  ;;  %v19080_v19 = vcombine.high %v8389_v24, %v8397_v26 }
 0x82f   : > { %v8629_v43 = vld [vmem:[%s22413_s18 + $0x1288] sm:$0xff]  ;;  %v19335_v38 = vcombine.low %v8645_v33, %v8653_v60 }
 0x830   : > { %16068 = vmatpush2.bf16.msra.mxu0 %v19957_v3  ;;  %v19336_v3 = vcombine.high %v8645_v33, %v8653_v60  ;;  %v8637_v56 = vld [vmem:[%s22413_s18 + $0x12c8] sm:$0xff] }
 0x831   : > { %16109 = vmatpush2.bf16.msra.mxu1 %v18935_v32  ;;  %16069 = vmatprep.subr.bf16.mxu0 %v19942_v35  ;;  %v8373_v32 = vld [vmem:[%s22413_s18 + $0xa88] sm:$0xff]  ;;  %v19320_v8 = vcombine.high %v8629_v43, %v8637_v56  ;;  %v19319_v52 = vcombine.low %v8629_v43, %v8637_v56 }
 0x832   : > { %16110 = vmatprep.subr.bf16.mxu1 %v18920_v0  ;;  %v8381_v35 = vld [vmem:[%s22413_s18 + $0xac8] sm:$0xff]  ;;  %v19079_v0 = vcombine.low %v8389_v24, %v8397_v26 }
 0x833   : > { %v19064_v46 = vcombine.high %v8373_v32, %v8381_v35  ;;  %v8293_v20 = vld [vmem:[%s22413_s18 + $0x808] sm:$0xff] }
 0x834   : > { %16070 = vmatpush2.bf16.msra.mxu0 %v19941_v45  ;;  %v8365_v45 = vld [vmem:[%s22413_s18 + $0xa48] sm:$0xff] }
 0x835   : > { %16111 = vmatpush2.bf16.msra.mxu1 %v18919_v47  ;;  %16071 = vmatprep.subr.bf16.mxu0 %v19926_v49  ;;  %v8613_v47 = vld [vmem:[%s22413_s18 + $0x1208] sm:$0xff]  ;;  %v19048_v53 = vcombine.high %v8357_v41, %v8365_v45 }
 0x836   : > { %16112 = vmatprep.subr.bf16.mxu1 %v18904_v50  ;;  %v8621_v49 = vld [vmem:[%s22413_s18 + $0x1248] sm:$0xff]  ;;  %v19063_v50 = vcombine.low %v8373_v32, %v8381_v35 }
 0x837   : > { %v19304_v55 = vcombine.high %v8613_v47, %v8621_v49  ;;  %v19303_v61 = vcombine.low %v8613_v47, %v8621_v49  ;;  %v8533_v60 = vld [vmem:[%s22413_s18 + $0xf88] sm:$0xff] }
 0x838   : > { %16072 = vmatpush2.bf16.msra.mxu0 %v19925_v23  ;;  %v8349_v23 = vld [vmem:[%s22413_s18 + $0x9c8] sm:$0xff] }
 0x839   : > { %16113 = vmatpush2.bf16.msra.mxu1 %v18903_v57  ;;  %16073 = vmatprep.subr.bf16.mxu0 %v19910_v34  ;;  %v8597_v57 = vld [vmem:[%s22413_s18 + $0x1188] sm:$0xff]  ;;  %v19032_v42 = vcombine.high %v8341_v12, %v8349_v23 }
 0x83a   : > { %16114 = vmatprep.subr.bf16.mxu1 %v18888_v40  ;;  %v8605_v34 = vld [vmem:[%s22413_s18 + $0x11c8] sm:$0xff]  ;;  %v19047_v40 = vcombine.low %v8357_v41, %v8365_v45 }
 0x83b   : > { %v19288_v63 = vcombine.high %v8597_v57, %v8605_v34  ;;  %v19287_v10 = vcombine.low %v8597_v57, %v8605_v34  ;;  %v8517_v56 = vld [vmem:[%s22413_s18 + $0xf08] sm:$0xff] }
 0x83c   : > { %16074 = vmatpush2.bf16.msra.mxu0 %v19909_v51  ;;  %v8333_v51 = vld [vmem:[%s22413_s18 + $0x948] sm:$0xff] }
 0x83d   : > { %16115 = vmatpush2.bf16.msra.mxu1 %v18887_v5  ;;  %16075 = vmatprep.subr.bf16.mxu0 %v19894_v6  ;;  %v8581_v5 = vld [vmem:[%s22413_s18 + $0x1108] sm:$0xff]  ;;  %v19016_v13 = vcombine.high %v8325_v2, %v8333_v51 }
 0x83e   : > { %16116 = vmatprep.subr.bf16.mxu1 %v18872_v9  ;;  %v8589_v6 = vld [vmem:[%s22413_s18 + $0x1148] sm:$0xff]  ;;  %v19031_v9 = vcombine.low %v8341_v12, %v8349_v23 }
 0x83f   : > { %v19272_v37 = vcombine.high %v8581_v5, %v8589_v6  ;;  %v19271_v48 = vcombine.low %v8581_v5, %v8589_v6  ;;  %v8501_v49 = vld [vmem:[%s22413_s18 + $0xe88] sm:$0xff] }
 0x840   : > { %16076 = vmatpush2.bf16.msra.mxu0 %v19893_v27  ;;  %v8317_v27 = vld [vmem:[%s22413_s18 + $0x8c8] sm:$0xff] }
 0x841   : > { %16117 = vmatpush2.bf16.msra.mxu1 %v18871_v44  ;;  %16077 = vmatprep.subr.bf16.mxu0 %v19878_v54  ;;  %v8565_v44 = vld [vmem:[%s22413_s18 + $0x1088] sm:$0xff]  ;;  %v19000_v58 = vcombine.high %v8309_v17, %v8317_v27 }
 0x842   : > { %16118 = vmatprep.subr.bf16.mxu1 %v18856_v62  ;;  %v8573_v54 = vld [vmem:[%s22413_s18 + $0x10c8] sm:$0xff]  ;;  %v19015_v62 = vcombine.low %v8325_v2, %v8333_v51 }
 0x843   : > { %v19256_v1 = vcombine.high %v8565_v44, %v8573_v54  ;;  %v19255_v24 = vcombine.low %v8565_v44, %v8573_v54  ;;  %v8485_v34 = vld [vmem:[%s22413_s18 + $0xe08] sm:$0xff] }
 0x844   : > { %16078 = vmatpush2.bf16.msra.mxu0 %v19877_v11  ;;  %v8301_v11 = vld [vmem:[%s22413_s18 + $0x848] sm:$0xff] }
 0x845   : > { %16119 = vmatpush2.bf16.msra.mxu1 %v18855_v30  ;;  %16129 = vmatprep.subr.bf16.mxu0 %v19096_v29  ;;  %v8549_v30 = vld [vmem:[%s22413_s18 + $0x1008] sm:$0xff]  ;;  %v18984_v26 = vcombine.high %v8293_v20, %v8301_v11 }
 0x846   : > { %16170 = vmatprep.subr.bf16.mxu1 %v19352_v7  ;;  %v8557_v29 = vld [vmem:[%s22413_s18 + $0x1048] sm:$0xff]  ;;  %v18999_v7 = vcombine.low %v8309_v17, %v8317_v27 }
 0x847   : > { %16080 = vmatmul.mubr.bf16.vlgmr.msra.gmra.mxu0 %v23769_v28  ;;  %v19240_v33 = vcombine.high %v8549_v30, %v8557_v29  ;;  %v19239_v32 = vcombine.low %v8549_v30, %v8557_v29  ;;  %v8469_v6 = vld [vmem:[%s22413_s18 + $0xd88] sm:$0xff] }
 0x848   : > { %16121 = vmatmul.mubr.bf16.vlgmr.msra.gmra.mxu1 %v23605_v22  ;;  %16130 = vmatpush1.bf16.msra.mxu0 %v19095_v59  ;;  %v8541_v59 = vld [vmem:[%s22413_s18 + $0xfc8] sm:$0xff] }
 0x849   : > { %16171 = vmatpush1.bf16.msra.mxu1 %v19351_v31  ;;  %16131 = vmatprep.subr.bf16.mxu0 %v19080_v19  ;;  %v8789_v31 = vld [vmem:[%s22413_s18 + $0x1788] sm:$0xff]  ;;  %v19224_v35 = vcombine.high %v8533_v60, %v8541_v59 }
 0x84a   : > { %16172 = vmatprep.subr.bf16.mxu1 %v19336_v3  ;;  %16161 = vmatprep.mubr.bf16.mxu0 %v23559_v21  ;;  %v8797_v19 = vld [vmem:[%s22413_s18 + $0x17c8] sm:$0xff]  ;;  %v18983_v3 = vcombine.low %v8293_v20, %v8301_v11 }
 0x84b   : > { %16202 = vmatprep.mubr.bf16.mxu1 %v23612_v4  ;;  %v19480_v43 = vcombine.high %v8789_v31, %v8797_v19  ;;  %v19479_v41 = vcombine.low %v8789_v31, %v8797_v19  ;;  %v8453_v54 = vld [vmem:[%s22413_s18 + $0xd08] sm:$0xff] }
 0x84c   : > { %16132 = vmatpush1.bf16.msra.mxu0 %v19079_v0  ;;  %v8525_v0 = vld [vmem:[%s22413_s18 + $0xf48] sm:$0xff] }
 0x84d   : > { %16173 = vmatpush1.bf16.msra.mxu1 %v19335_v38  ;;  %16133 = vmatprep.subr.bf16.mxu0 %v19064_v46  ;;  %v8773_v38 = vld [vmem:[%s22413_s18 + $0x1708] sm:$0xff]  ;;  %v19208_v45 = vcombine.high %v8517_v56, %v8525_v0 }
 0x84e   : > { %16174 = vmatprep.subr.bf16.mxu1 %v19320_v8  ;;  %v8781_v46 = vld [vmem:[%s22413_s18 + $0x1748] sm:$0xff]  ;;  %v19223_v8 = vcombine.low %v8533_v60, %v8541_v59 }
 0x84f   : > { %v19464_v47 = vcombine.high %v8773_v38, %v8781_v46  ;;  %v19463_v12 = vcombine.low %v8773_v38, %v8781_v46  ;;  %v8437_v29 = vld [vmem:[%s22413_s18 + $0xc88] sm:$0xff] }
 0x850   : > { %16134 = vmatpush1.bf16.msra.mxu0 %v19063_v50  ;;  %v8509_v50 = vld [vmem:[%s22413_s18 + $0xec8] sm:$0xff] }
 0x851   : > { %16175 = vmatpush1.bf16.msra.mxu1 %v19319_v52  ;;  %16135 = vmatprep.subr.bf16.mxu0 %v19048_v53  ;;  %v8757_v52 = vld [vmem:[%s22413_s18 + $0x1688] sm:$0xff]  ;;  %v19192_v23 = vcombine.high %v8501_v49, %v8509_v50 }
 0x852   : > { %16176 = vmatprep.subr.bf16.mxu1 %v19304_v55  ;;  %v8765_v53 = vld [vmem:[%s22413_s18 + $0x16c8] sm:$0xff]  ;;  %v19207_v55 = vcombine.low %v8517_v56, %v8525_v0 }
 0x853   : > { %v19448_v57 = vcombine.high %v8757_v52, %v8765_v53  ;;  %v19447_v2 = vcombine.low %v8757_v52, %v8765_v53  ;;  %v8421_v19 = vld [vmem:[%s22413_s18 + $0xc08] sm:$0xff]  ;;  %v9316_v52 = vld [vmem:[%s22425_s19] sm:$0xff] }
 0x854   : > { %16136 = vmatpush1.bf16.msra.mxu0 %v19047_v40  ;;  %v8493_v40 = vld [vmem:[%s22413_s18 + $0xe48] sm:$0xff] }
 0x855   : > { %16177 = vmatpush1.bf16.msra.mxu1 %v19303_v61  ;;  %16137 = vmatprep.subr.bf16.mxu0 %v19032_v42  ;;  %v8741_v61 = vld [vmem:[%s22413_s18 + $0x1608] sm:$0xff]  ;;  %v19176_v51 = vcombine.high %v8485_v34, %v8493_v40 }
 0x856   : > { %16178 = vmatprep.subr.bf16.mxu1 %v19288_v63  ;;  %v8749_v42 = vld [vmem:[%s22413_s18 + $0x1648] sm:$0xff]  ;;  %v19191_v63 = vcombine.low %v8501_v49, %v8509_v50  ;;  %v9322_v49 = vsub.s32 0, %v23529_v16 }
 0x857   : > { %v19432_v5 = vcombine.high %v8741_v61, %v8749_v42  ;;  %v19431_v17 = vcombine.low %v8741_v61, %v8749_v42  ;;  %v8917_v46 = vld [vmem:[%s22413_s18 + $0x1b88] sm:$0xff] }
 0x858   : > { %16138 = vmatpush1.bf16.msra.mxu0 %v19031_v9  ;;  %v8477_v9 = vld [vmem:[%s22413_s18 + $0xdc8] sm:$0xff]  ;;  %v9323_v61 = vrot.slane %v9316_v52, %v9322_v49 }
 0x859   : > { %16179 = vmatpush1.bf16.msra.mxu1 %v19287_v10  ;;  %16139 = vmatprep.subr.bf16.mxu0 %v19016_v13  ;;  %v8725_v10 = vld [vmem:[%s22413_s18 + $0x1588] sm:$0xff]  ;;  %v19160_v27 = vcombine.high %v8469_v6, %v8477_v9 }
 0x85a   : > { %16180 = vmatprep.subr.bf16.mxu1 %v19272_v37  ;;  %v8733_v13 = vld [vmem:[%s22413_s18 + $0x15c8] sm:$0xff]  ;;  %v19175_v37 = vcombine.low %v8485_v34, %v8493_v40 }
 0x85b   : > { %v19416_v44 = vcombine.high %v8725_v10, %v8733_v13  ;;  %v19415_v20 = vcombine.low %v8725_v10, %v8733_v13  ;;  %v9157_v34 = vld [vmem:[%s22413_s18 + $0x2308] sm:$0xff] }
 0x85c   : > { %16140 = vmatpush1.bf16.msra.mxu0 %v19015_v62  ;;  %v8461_v62 = vld [vmem:[%s22413_s18 + $0xd48] sm:$0xff] }
 0x85d   : > { %16181 = vmatpush1.bf16.msra.mxu1 %v19271_v48  ;;  %16141 = vmatprep.subr.bf16.mxu0 %v19000_v58  ;;  %v8709_v48 = vld [vmem:[%s22413_s18 + $0x1508] sm:$0xff]  ;;  %v19144_v11 = vcombine.high %v8453_v54, %v8461_v62 }
 0x85e   : > { %16182 = vmatprep.subr.bf16.mxu1 %v19256_v1  ;;  %v8717_v58 = vld [vmem:[%s22413_s18 + $0x1548] sm:$0xff]  ;;  %v19159_v1 = vcombine.low %v8469_v6, %v8477_v9 }
 0x85f   : > { %v19400_v30 = vcombine.high %v8709_v48, %v8717_v58  ;;  %v19399_v60 = vcombine.low %v8709_v48, %v8717_v58  ;;  %v9165_v40 = vld [vmem:[%s22413_s18 + $0x2348] sm:$0xff] }
 0x860   : > { %16142 = vmatpush1.bf16.msra.mxu0 %v18999_v7  ;;  %v8445_v7 = vld [vmem:[%s22413_s18 + $0xcc8] sm:$0xff] }
 0x861   : > { %16183 = vmatpush1.bf16.msra.mxu1 %v19255_v24  ;;  %16143 = vmatprep.subr.bf16.mxu0 %v18984_v26  ;;  %v8693_v24 = vld [vmem:[%s22413_s18 + $0x1488] sm:$0xff]  ;;  %v19128_v59 = vcombine.high %v8437_v29, %v8445_v7 }
 0x862   : > { %16184 = vmatprep.subr.bf16.mxu1 %v19240_v33  ;;  %v8701_v26 = vld [vmem:[%s22413_s18 + $0x14c8] sm:$0xff]  ;;  %v19143_v33 = vcombine.low %v8453_v54, %v8461_v62  ;;  %v19847_v62 = vcombine.low %v9157_v34, %v9165_v40 }
 0x863   : > { %v19384_v31 = vcombine.high %v8693_v24, %v8701_v26  ;;  %v19383_v56 = vcombine.low %v8693_v24, %v8701_v26  ;;  %v8885_v6 = vld [vmem:[%s22413_s18 + $0x1a88] sm:$0xff] }
 0x864   : > { %16144 = vmatpush1.bf16.msra.mxu0 %v18983_v3  ;;  %v8429_v3 = vld [vmem:[%s22413_s18 + $0xc48] sm:$0xff] }
 0x865   : > { %16185 = vmatpush1.bf16.msra.mxu1 %v19239_v32  ;;  %16145 = vmatprep.subr.bf16.mxu0 %v19224_v35  ;;  %v8677_v32 = vld [vmem:[%s22413_s18 + $0x1408] sm:$0xff]  ;;  %v19112_v0 = vcombine.high %v8421_v19, %v8429_v3 }
 0x866   : > { %16186 = vmatprep.subr.bf16.mxu1 %v19480_v43  ;;  %v8685_v35 = vld [vmem:[%s22413_s18 + $0x1448] sm:$0xff]  ;;  %v19127_v43 = vcombine.low %v8437_v29, %v8445_v7 }
 0x867   : > { %v19368_v38 = vcombine.high %v8677_v32, %v8685_v35  ;;  %v19367_v50 = vcombine.low %v8677_v32, %v8685_v35  ;;  %v8893_v9 = vld [vmem:[%s22413_s18 + $0x1ac8] sm:$0xff] }
 0x868   : > { %16146 = vmatpush2.bf16.msra.mxu0 %v19223_v8  ;;  %v8925_v8 = vld [vmem:[%s22413_s18 + $0x1bc8] sm:$0xff]  ;;  %v19576_v48 = vcombine.high %v8885_v6, %v8893_v9 }
 0x869   : > { %16187 = vmatpush2.bf16.msra.mxu1 %v19479_v41  ;;  %16147 = vmatprep.subr.bf16.mxu0 %v19208_v45  ;;  %v9173_v41 = vld [vmem:[%s22413_s18 + $0x2388] sm:$0xff]  ;;  %v19608_v53 = vcombine.high %v8917_v46, %v8925_v8  ;;  %v19607_v42 = vcombine.low %v8917_v46, %v8925_v8 }
 0x86a   : > { %16188 = vmatprep.subr.bf16.mxu1 %v19464_v47  ;;  %v9181_v45 = vld [vmem:[%s22413_s18 + $0x23c8] sm:$0xff]  ;;  %v19111_v47 = vcombine.low %v8421_v19, %v8429_v3 }
 0x86b   : > { %v9141_v13 = vld [vmem:[%s22413_s18 + $0x2288] sm:$0xff] }
 0x86c   : > { %16148 = vmatpush2.bf16.msra.mxu0 %v19207_v55  ;;  %v19864_v55 = vcombine.high %v9173_v41, %v9181_v45  ;;  %v8877_v29 = vld [vmem:[%s22413_s18 + $0x1a48] sm:$0xff] }
 0x86d   : > { %16189 = vmatpush2.bf16.msra.mxu1 %v19463_v12  ;;  %16149 = vmatprep.subr.bf16.mxu0 %v19192_v23  ;;  %v9326_v12 = vsub.s32 1, %v23529_v16  ;;  %v8901_v23 = vld [vmem:[%s22413_s18 + $0x1b08] sm:$0xff] }
 0x86e   : > { %16190 = vmatprep.subr.bf16.mxu1 %v19448_v57  ;;  %v8909_v57 = vld [vmem:[%s22413_s18 + $0x1b48] sm:$0xff] }
 0x86f   : > { %v9125_v24 = vld [vmem:[%s22413_s18 + $0x2208] sm:$0xff] }
 0x870   : > { %16150 = vmatpush2.bf16.msra.mxu0 %v19191_v63  ;;  %v19863_v63 = vcombine.low %v9173_v41, %v9181_v45  ;;  %v9133_v26 = vld [vmem:[%s22413_s18 + $0x2248] sm:$0xff] }
 0x871   : > { %16191 = vmatpush2.bf16.msra.mxu1 %v19447_v2  ;;  %16151 = vmatprep.subr.bf16.mxu0 %v19176_v51  ;;  %v19592_v2 = vcombine.high %v8901_v23, %v8909_v57  ;;  %v9327_v51 = vrot.slane %v9316_v52, %v9326_v12  ;;  %v19816_v35 = vcombine.high %v9125_v24, %v9133_v26  ;;  %v9093_v52 = vld [vmem:[%s22413_s18 + $0x2108] sm:$0xff] }
 0x872   : > { %16192 = vmatprep.subr.bf16.mxu1 %v19432_v5  ;;  %v19848_v5 = vcombine.high %v9157_v34, %v9165_v40  ;;  %v19815_v8 = vcombine.low %v9125_v24, %v9133_v26  ;;  %v8821_v40 = vld [vmem:[%s22413_s18 + $0x1888] sm:$0xff] }
 0x873   : > { %v9029_v24 = vld [vmem:[%s22413_s18 + $0x1f08] sm:$0xff] }
 0x874   : > { %16152 = vmatpush2.bf16.msra.mxu0 %v19175_v37  ;;  %v9149_v37 = vld [vmem:[%s22413_s18 + $0x22c8] sm:$0xff] }
 0x875   : > { %16193 = vmatpush2.bf16.msra.mxu1 %v19431_v17  ;;  %16153 = vmatprep.subr.bf16.mxu0 %v19160_v27  ;;  %v19831_v19 = vcombine.low %v9141_v13, %v9149_v37  ;;  %v9037_v26 = vld [vmem:[%s22413_s18 + $0x1f48] sm:$0xff] }
 0x876   : > { %16194 = vmatprep.subr.bf16.mxu1 %v19416_v44  ;;  %v19591_v44 = vcombine.low %v8901_v23, %v8909_v57 }
 0x878   : > { %16154 = vmatpush2.bf16.msra.mxu0 %v19159_v1 }
 0x879   : > { %16195 = vmatpush2.bf16.msra.mxu1 %v19415_v20  ;;  %16155 = vmatprep.subr.bf16.mxu0 %v19144_v11  ;;  %v19832_v11 = vcombine.high %v9141_v13, %v9149_v37  ;;  %v9061_v13 = vld [vmem:[%s22413_s18 + $0x2008] sm:$0xff] }
 0x87a   : > { %16196 = vmatprep.subr.bf16.mxu1 %v19400_v30  ;;  %v8869_v30 = vld [vmem:[%s22413_s18 + $0x1a08] sm:$0xff] }
 0x87b   : > { %v19560_v3 = vcombine.high %v8869_v30, %v8877_v29  ;;  %v19559_v46 = vcombine.low %v8869_v30, %v8877_v29  ;;  %v9069_v37 = vld [vmem:[%s22413_s18 + $0x2048] sm:$0xff] }
 0x87c   : > { %16156 = vmatpush2.bf16.msra.mxu0 %v19143_v33  ;;  %v19751_v30 = vcombine.low %v9061_v13, %v9069_v37 }
 0x87d   : > { %16197 = vmatpush2.bf16.msra.mxu1 %v19399_v60  ;;  %16157 = vmatprep.subr.bf16.mxu0 %v19128_v59  ;;  %v19575_v59 = vcombine.low %v8885_v6, %v8893_v9  ;;  %v8805_v9 = vld [vmem:[%s22413_s18 + $0x1808] sm:$0xff] }
 0x87e   : > { %16198 = vmatprep.subr.bf16.mxu1 %v19384_v31 }
 0x880   : > { %16158 = vmatpush2.bf16.msra.mxu0 %v19127_v43  ;;  %v8853_v43 = vld [vmem:[%s22413_s18 + $0x1988] sm:$0xff] }
 0x881   : > { %16199 = vmatpush2.bf16.msra.mxu1 %v19383_v56  ;;  %16159 = vmatprep.subr.bf16.mxu0 %v19112_v0  ;;  %v8861_v56 = vld [vmem:[%s22413_s18 + $0x19c8] sm:$0xff] }
 0x882   : > { %16200 = vmatprep.subr.bf16.mxu1 %v19368_v38  ;;  %v9109_v0 = vld [vmem:[%s22413_s18 + $0x2188] sm:$0xff]  ;;  %v19544_v41 = vcombine.high %v8853_v43, %v8861_v56 }
 0x883   : > { %v9117_v38 = vld [vmem:[%s22413_s18 + $0x21c8] sm:$0xff] }
 0x884   : > { %16160 = vmatpush2.bf16.msra.mxu0 %v19111_v47  ;;  %v19800_v45 = vcombine.high %v9109_v0, %v9117_v38  ;;  %v8837_v47 = vld [vmem:[%s22413_s18 + $0x1908] sm:$0xff]  ;;  %v19799_v23 = vcombine.low %v9109_v0, %v9117_v38  ;;  %v19719_v38 = vcombine.low %v9029_v24, %v9037_v26 }
 0x885   : > { %16201 = vmatpush2.bf16.msra.mxu1 %v19367_v50  ;;  %16211 = vmatprep.subr.bf16.mxu0 %v19608_v53  ;;  %v8845_v50 = vld [vmem:[%s22413_s18 + $0x1948] sm:$0xff] }
 0x886   : > { %16252 = vmatprep.subr.bf16.mxu1 %v19864_v55  ;;  %v15917_v10 = vpop.f32.mrf.mxu0  ;;  %v9101_v53 = vld [vmem:[%s22413_s18 + $0x2148] sm:$0xff]  ;;  %v19543_v55 = vcombine.low %v8853_v43, %v8861_v56  ;;  %v19528_v57 = vcombine.high %v8837_v47, %v8845_v50 }
 0x887   : > { %16162 = vmatmul.mubr.bf16.vlgmr.msra.gmra.mxu0 %v23616_v14  ;;  %v15918_v17 = vadd.f32 %v15917_v10, %v9323_v61  ;;  %v19784_v34 = vcombine.high %v9093_v52, %v9101_v53  ;;  %v8829_v61 = vld [vmem:[%s22413_s18 + $0x18c8] sm:$0xff] }
 0x888   : > { %v15958_v27 = vpop.f32.mrf.mxu1  ;;  %16203 = vmatmul.mubr.bf16.vlgmr.msra.gmra.mxu1 %v23575_v18  ;;  %16212 = vmatpush1.bf16.msra.mxu0 %v19607_v42  ;;  %v15919_v54 = vpop.f32.mrf.mxu0  ;;  %v9077_v42 = vld [vmem:[%s22413_s18 + $0x2088] sm:$0xff] }
 0x889   : > { %16253 = vmatpush1.bf16.msra.mxu1 %v19863_v63  ;;  %16213 = vmatprep.subr.bf16.mxu0 %v19592_v2  ;;  %v23854_v58 = vadd.f32 %v15958_v27, %v15918_v17  ;;  %v15920_v1 = vadd.f32 %v15919_v54, %v9327_v51  ;;  %v9085_v63 = vld [vmem:[%s22413_s18 + $0x20c8] sm:$0xff]  ;;  %v19527_v2 = vcombine.low %v8837_v47, %v8845_v50 }
 0x88a   : > { %v15960_v20 = vpop.f32.mrf.mxu1  ;;  %16254 = vmatprep.subr.bf16.mxu1 %v19848_v5  ;;  %16243 = vmatprep.mubr.bf16.mxu0 %v23625_v36  ;;  %v15921_v7 = vpop.f32.mrf.mxu0  ;;  %v19783_v51 = vcombine.low %v9093_v52, %v9101_v53  ;;  %v19512_v5 = vcombine.high %v8821_v40, %v8829_v61  ;;  %v19768_v6 = vcombine.high %v9077_v42, %v9085_v63  ;;  %v8813_v10 = vld [vmem:[%s22413_s18 + $0x1848] sm:$0xff] }
 0x88b   : > { %16284 = vmatprep.mubr.bf16.mxu1 %v23701_v39  ;;  %v23862_v33 = vadd.f32 %v15960_v20, %v15920_v1  ;;  %v19511_v17 = vcombine.low %v8821_v40, %v8829_v61  ;;  %v19767_v27 = vcombine.low %v9077_v42, %v9085_v63  ;;  %v19752_v54 = vcombine.high %v9061_v13, %v9069_v37  ;;  %v9301_v1 = vld [vmem:[%s22413_s18 + $0x2788] sm:$0xff] }
 0x88c   : > { %v15962_v60 = vpop.f32.mrf.mxu1  ;;  %16214 = vmatpush1.bf16.msra.mxu0 %v19591_v44  ;;  %v15922_v31 = vpop.f32.mrf.mxu0  ;;  %v19496_v44 = vcombine.high %v8805_v9, %v8813_v10  ;;  %v9309_v20 = vld [vmem:[%s22413_s18 + $0x27c8] sm:$0xff] }
 0x88d   : > { %16255 = vmatpush1.bf16.msra.mxu1 %v19847_v62  ;;  %16215 = vmatprep.subr.bf16.mxu0 %v19576_v48  ;;  %v9045_v62 = vld [vmem:[%s22413_s18 + $0x1f88] sm:$0xff]  ;;  %v19992_v7 = vcombine.high %v9301_v1, %v9309_v20 }
 0x88e   : > { %v15963_v32 = vpop.f32.mrf.mxu1  ;;  %16256 = vmatprep.subr.bf16.mxu1 %v19832_v11  ;;  %v9053_v48 = vld [vmem:[%s22413_s18 + $0x1fc8] sm:$0xff]  ;;  %v19495_v11 = vcombine.low %v8805_v9, %v8813_v10 }
 0x88f   : > { %v19736_v29 = vcombine.high %v9045_v62, %v9053_v48  ;;  %v9285_v60 = vld [vmem:[%s22413_s18 + $0x2708] sm:$0xff]  ;;  %v19735_v31 = vcombine.low %v9045_v62, %v9053_v48 }
 0x890   : > { %16216 = vmatpush1.bf16.msra.mxu0 %v19575_v59  ;;  %v9293_v59 = vld [vmem:[%s22413_s18 + $0x2748] sm:$0xff] }
 0x891   : > { %16257 = vmatpush1.bf16.msra.mxu1 %v19831_v19  ;;  %16217 = vmatprep.subr.bf16.mxu0 %v19560_v3  ;;  %v19991_v19 = vcombine.low %v9301_v1, %v9309_v20  ;;  %v19720_v3 = vcombine.high %v9029_v24, %v9037_v26  ;;  %v19976_v32 = vcombine.high %v9285_v60, %v9293_v59  ;;  %v9021_v43 = vld [vmem:[%s22413_s18 + $0x1ec8] sm:$0xff] }
 0x892   : > { %16258 = vmatprep.subr.bf16.mxu1 %v19816_v35  ;;  %v9013_v35 = vld [vmem:[%s22413_s18 + $0x1e88] sm:$0xff] }
 0x893   : > { %v9269_v56 = vld [vmem:[%s22413_s18 + $0x2688] sm:$0xff]  ;;  %v19703_v53 = vcombine.low %v9013_v35, %v9021_v43 }
 0x894   : > { %16218 = vmatpush1.bf16.msra.mxu0 %v19559_v46  ;;  %v9277_v0 = vld [vmem:[%s22413_s18 + $0x26c8] sm:$0xff]  ;;  %v19975_v46 = vcombine.low %v9285_v60, %v9293_v59 }
 0x895   : > { %16259 = vmatpush1.bf16.msra.mxu1 %v19815_v8  ;;  %16219 = vmatprep.subr.bf16.mxu0 %v19544_v41  ;;  %v19704_v8 = vcombine.high %v9013_v35, %v9021_v43  ;;  %v19960_v41 = vcombine.high %v9269_v56, %v9277_v0  ;;  %v9005_v47 = vld [vmem:[%s22413_s18 + $0x1e48] sm:$0xff]  ;;  %v8158_v35 = vld [vmem:[%s22413_s18 + $0x3d0] sm:$0xff] }
 0x896   : > { %16260 = vmatprep.subr.bf16.mxu1 %v19800_v45  ;;  %v8997_v45 = vld [vmem:[%s22413_s18 + $0x1e08] sm:$0xff]  ;;  %v8406_v43 = vld [vmem:[%s22413_s18 + $0xb90] sm:$0xff] }
 0x897   : > { %v9253_v50 = vld [vmem:[%s22413_s18 + $0x2608] sm:$0xff]  ;;  %v19687_v63 = vcombine.low %v8997_v45, %v9005_v47 }
 0x898   : > { %16220 = vmatpush1.bf16.msra.mxu0 %v19543_v55  ;;  %v9261_v52 = vld [vmem:[%s22413_s18 + $0x2648] sm:$0xff]  ;;  %v19959_v55 = vcombine.low %v9269_v56, %v9277_v0  ;;  %v8414_v56 = vld [vmem:[%s22413_s18 + $0xbd0] sm:$0xff] }
 0x899   : > { %16261 = vmatpush1.bf16.msra.mxu1 %v19799_v23  ;;  %16221 = vmatprep.subr.bf16.mxu0 %v19528_v57  ;;  %v19688_v23 = vcombine.high %v8997_v45, %v9005_v47  ;;  %v19944_v57 = vcombine.high %v9253_v50, %v9261_v52  ;;  %v8989_v40 = vld [vmem:[%s22413_s18 + $0x1dc8] sm:$0xff]  ;;  %v8142_v45 = vld [vmem:[%s22413_s18 + $0x350] sm:$0xff] }
 0x89a   : > { %16262 = vmatprep.subr.bf16.mxu1 %v19784_v34  ;;  %v8981_v34 = vld [vmem:[%s22413_s18 + $0x1d88] sm:$0xff]  ;;  %v8390_v47 = vld [vmem:[%s22413_s18 + $0xb10] sm:$0xff] }
 0x89b   : > { %v9237_v61 = vld [vmem:[%s22413_s18 + $0x2588] sm:$0xff]  ;;  %v19671_v37 = vcombine.low %v8981_v34, %v8989_v40 }
 0x89c   : > { %16222 = vmatpush1.bf16.msra.mxu0 %v19527_v2  ;;  %v9245_v42 = vld [vmem:[%s22413_s18 + $0x25c8] sm:$0xff]  ;;  %v19943_v2 = vcombine.low %v9253_v50, %v9261_v52  ;;  %v8398_v50 = vld [vmem:[%s22413_s18 + $0xb50] sm:$0xff] }
 0x89d   : > { %16263 = vmatpush1.bf16.msra.mxu1 %v19783_v51  ;;  %16223 = vmatprep.subr.bf16.mxu0 %v19512_v5  ;;  %v19672_v51 = vcombine.high %v8981_v34, %v8989_v40  ;;  %v19928_v5 = vcombine.high %v9237_v61, %v9245_v42  ;;  %v8973_v9 = vld [vmem:[%s22413_s18 + $0x1d48] sm:$0xff]  ;;  %v8126_v34 = vld [vmem:[%s22413_s18 + $0x2d0] sm:$0xff] }
 0x89e   : > { %16264 = vmatprep.subr.bf16.mxu1 %v19768_v6  ;;  %v8965_v6 = vld [vmem:[%s22413_s18 + $0x1d08] sm:$0xff] }
 0x89f   : > { %v9221_v10 = vld [vmem:[%s22413_s18 + $0x2508] sm:$0xff]  ;;  %v19655_v20 = vcombine.low %v8965_v6, %v8973_v9 }
 0x8a0   : > { %16224 = vmatpush1.bf16.msra.mxu0 %v19511_v17  ;;  %v9229_v13 = vld [vmem:[%s22413_s18 + $0x2548] sm:$0xff]  ;;  %v19927_v17 = vcombine.low %v9237_v61, %v9245_v42  ;;  %v8374_v61 = vld [vmem:[%s22413_s18 + $0xa90] sm:$0xff] }
 0x8a1   : > { %16265 = vmatpush1.bf16.msra.mxu1 %v19767_v27  ;;  %16225 = vmatprep.subr.bf16.mxu0 %v19496_v44  ;;  %v19656_v27 = vcombine.high %v8965_v6, %v8973_v9  ;;  %v19912_v44 = vcombine.high %v9221_v10, %v9229_v13  ;;  %v8957_v62 = vld [vmem:[%s22413_s18 + $0x1cc8] sm:$0xff]  ;;  %v8382_v42 = vld [vmem:[%s22413_s18 + $0xad0] sm:$0xff]  ;;  %v19081_v6 = vcombine.low %v8390_v47, %v8398_v50 }
 0x8a2   : > { %16266 = vmatprep.subr.bf16.mxu1 %v19752_v54  ;;  %v8949_v54 = vld [vmem:[%s22413_s18 + $0x1c88] sm:$0xff] }
 0x8a3   : > { %v9205_v48 = vld [vmem:[%s22413_s18 + $0x2488] sm:$0xff]  ;;  %v19639_v59 = vcombine.low %v8949_v54, %v8957_v62 }
 0x8a4   : > { %16226 = vmatpush1.bf16.msra.mxu0 %v19495_v11  ;;  %v9213_v1 = vld [vmem:[%s22413_s18 + $0x24c8] sm:$0xff]  ;;  %v19911_v11 = vcombine.low %v9221_v10, %v9229_v13 }
 0x8a5   : > { %16267 = vmatpush1.bf16.msra.mxu1 %v19751_v30  ;;  %16227 = vmatprep.subr.bf16.mxu0 %v19736_v29  ;;  %v19640_v30 = vcombine.high %v8949_v54, %v8957_v62  ;;  %v19896_v29 = vcombine.high %v9205_v48, %v9213_v1  ;;  %v8941_v24 = vld [vmem:[%s22413_s18 + $0x1c48] sm:$0xff]  ;;  %v8358_v54 = vld [vmem:[%s22413_s18 + $0xa10] sm:$0xff] }
 0x8a6   : > { %16268 = vmatprep.subr.bf16.mxu1 %v19992_v7  ;;  %v8933_v7 = vld [vmem:[%s22413_s18 + $0x1c08] sm:$0xff]  ;;  %v8366_v62 = vld [vmem:[%s22413_s18 + $0xa50] sm:$0xff] }
 0x8a7   : > { %v9189_v26 = vld [vmem:[%s22413_s18 + $0x2408] sm:$0xff]  ;;  %v19623_v0 = vcombine.low %v8933_v7, %v8941_v24 }
 0x8a8   : > { %16228 = vmatpush2.bf16.msra.mxu0 %v19735_v31  ;;  %v9197_v60 = vld [vmem:[%s22413_s18 + $0x2448] sm:$0xff]  ;;  %v19895_v31 = vcombine.low %v9205_v48, %v9213_v1 }
 0x8a9   : > { %16269 = vmatpush2.bf16.msra.mxu1 %v19991_v19  ;;  %16229 = vmatprep.subr.bf16.mxu0 %v19720_v3  ;;  %v19624_v19 = vcombine.high %v8933_v7, %v8941_v24  ;;  %v19880_v3 = vcombine.high %v9189_v26, %v9197_v60  ;;  %v19050_v7 = vcombine.high %v8358_v54, %v8366_v62  ;;  %v8086_v24 = vld [vmem:[%s22413_s18 + $0x190] sm:$0xff] }
 0x8aa   : > { %16270 = vmatprep.subr.bf16.mxu1 %v19976_v32  ;;  %v8150_v32 = vld [vmem:[%s22413_s18 + $0x390] sm:$0xff] }
 0x8ab   : > { %v18841_v52 = vcombine.low %v8150_v32, %v8158_v35 }
 0x8ac   : > { %16230 = vmatpush2.bf16.msra.mxu0 %v19719_v38  ;;  %v19879_v38 = vcombine.low %v9189_v26, %v9197_v60  ;;  %v8094_v26 = vld [vmem:[%s22413_s18 + $0x1d0] sm:$0xff] }
 0x8ad   : > { %16271 = vmatpush2.bf16.msra.mxu1 %v19975_v46  ;;  %16231 = vmatprep.subr.bf16.mxu0 %v19704_v8  ;;  %v18842_v46 = vcombine.high %v8150_v32, %v8158_v35  ;;  %v19098_v8 = vcombine.high %v8406_v43, %v8414_v56  ;;  %v8342_v60 = vld [vmem:[%s22413_s18 + $0x990] sm:$0xff] }
 0x8ae   : > { %16272 = vmatprep.subr.bf16.mxu1 %v19960_v41  ;;  %v8134_v41 = vld [vmem:[%s22413_s18 + $0x310] sm:$0xff] }
 0x8af   : > { %v8070_v35 = vld [vmem:[%s22413_s18 + $0x110] sm:$0xff] }
 0x8b0   : > { %16232 = vmatpush2.bf16.msra.mxu0 %v19703_v53  ;;  %v19097_v53 = vcombine.low %v8406_v43, %v8414_v56  ;;  %v8078_v43 = vld [vmem:[%s22413_s18 + $0x150] sm:$0xff] }
 0x8b1   : > { %16273 = vmatpush2.bf16.msra.mxu1 %v19959_v55  ;;  %16233 = vmatprep.subr.bf16.mxu0 %v19688_v23  ;;  %v18826_v55 = vcombine.high %v8134_v41, %v8142_v45  ;;  %v19082_v23 = vcombine.high %v8390_v47, %v8398_v50  ;;  %v8326_v56 = vld [vmem:[%s22413_s18 + $0x910] sm:$0xff] }
 0x8b2   : > { %16274 = vmatprep.subr.bf16.mxu1 %v19944_v57  ;;  %v8118_v57 = vld [vmem:[%s22413_s18 + $0x290] sm:$0xff] }
 0x8b3   : > { %v18810_v9 = vcombine.high %v8118_v57, %v8126_v34  ;;  %v8062_v47 = vld [vmem:[%s22413_s18 + $0xd0] sm:$0xff] }
 0x8b4   : > { %16234 = vmatpush2.bf16.msra.mxu0 %v19687_v63  ;;  %v8310_v50 = vld [vmem:[%s22413_s18 + $0x890] sm:$0xff] }
 0x8b5   : > { %16275 = vmatpush2.bf16.msra.mxu1 %v19943_v2  ;;  %16235 = vmatprep.subr.bf16.mxu0 %v19672_v51  ;;  %v18825_v51 = vcombine.low %v8134_v41, %v8142_v45  ;;  %v8054_v45 = vld [vmem:[%s22413_s18 + $0x90] sm:$0xff] }
 0x8b6   : > { %16276 = vmatprep.subr.bf16.mxu1 %v19928_v5 }
 0x8b8   : > { %16236 = vmatpush2.bf16.msra.mxu0 %v19671_v37 }
 0x8b9   : > { %16277 = vmatpush2.bf16.msra.mxu1 %v19927_v17  ;;  %16237 = vmatprep.subr.bf16.mxu0 %v19656_v27  ;;  %v8102_v17 = vld [vmem:[%s22413_s18 + $0x210] sm:$0xff] }
 0x8ba   : > { %16278 = vmatprep.subr.bf16.mxu1 %v19912_v44  ;;  %v8110_v27 = vld [vmem:[%s22413_s18 + $0x250] sm:$0xff] }
 0x8bc   : > { %16238 = vmatpush2.bf16.msra.mxu0 %v19655_v20 }
 0x8bd   : > { %16279 = vmatpush2.bf16.msra.mxu1 %v19911_v11  ;;  %16239 = vmatprep.subr.bf16.mxu0 %v19640_v30  ;;  %v19065_v11 = vcombine.low %v8374_v61, %v8382_v42  ;;  %v18794_v30 = vcombine.high %v8102_v17, %v8110_v27 }
 0x8be   : > { %16280 = vmatprep.subr.bf16.mxu1 %v19896_v29 }
 0x8c0   : > { %16240 = vmatpush2.bf16.msra.mxu0 %v19639_v59  ;;  %v8350_v59 = vld [vmem:[%s22413_s18 + $0x9d0] sm:$0xff] }
 0x8c1   : > { %16281 = vmatpush2.bf16.msra.mxu1 %v19895_v31  ;;  %16241 = vmatprep.subr.bf16.mxu0 %v19624_v19  ;;  %v18793_v31 = vcombine.low %v8102_v17, %v8110_v27  ;;  %v19049_v19 = vcombine.low %v8358_v54, %v8366_v62  ;;  %v19034_v32 = vcombine.high %v8342_v60, %v8350_v59  ;;  %v8262_v54 = vld [vmem:[%s22413_s18 + $0x710] sm:$0xff] }
 0x8c2   : > { %16282 = vmatprep.subr.bf16.mxu1 %v19880_v3  ;;  %v18778_v3 = vcombine.high %v8086_v24, %v8094_v26  ;;  %v8270_v62 = vld [vmem:[%s22413_s18 + $0x750] sm:$0xff] }
 0x8c4   : > { %16242 = vmatpush2.bf16.msra.mxu0 %v19623_v0  ;;  %v8334_v0 = vld [vmem:[%s22413_s18 + $0x950] sm:$0xff] }
 0x8c5   : > { %16283 = vmatpush2.bf16.msra.mxu1 %v19879_v38  ;;  %16293 = vmatprep.subr.bf16.mxu0 %v18842_v46  ;;  %v18777_v38 = vcombine.low %v8086_v24, %v8094_v26  ;;  %v19033_v46 = vcombine.low %v8342_v60, %v8350_v59  ;;  %v19018_v41 = vcombine.high %v8326_v56, %v8334_v0  ;;  %v8254_v24 = vld [vmem:[%s22413_s18 + $0x6d0] sm:$0xff] }
 0x8c6   : > { %16334 = vmatprep.subr.bf16.mxu1 %v19098_v8  ;;  %v18762_v8 = vcombine.high %v8070_v35, %v8078_v43  ;;  %v8502_v26 = vld [vmem:[%s22413_s18 + $0xe90] sm:$0xff]  ;;  %v18953_v59 = vcombine.low %v8262_v54, %v8270_v62 }
 0x8c7   : > { %v15999_v40 = vpop.f32.mrf.mxu0  ;;  %16244 = vmatmul.mubr.bf16.vlgmr.msra.gmra.mxu0 %v23696_v15  ;;  %v8510_v60 = vld [vmem:[%s22413_s18 + $0xed0] sm:$0xff] }
 0x8c8   : > { %v16000_v63 = vadd.f32 %v15999_v40, %v23854_v58  ;;  %v16040_v2 = vpop.f32.mrf.mxu1  ;;  %16285 = vmatmul.mubr.bf16.vlgmr.msra.gmra.mxu1 %v23769_v28  ;;  %16294 = vmatpush1.bf16.msra.mxu0 %v18841_v52  ;;  %v19066_v58 = vcombine.high %v8374_v61, %v8382_v42  ;;  %v8318_v52 = vld [vmem:[%s22413_s18 + $0x8d0] sm:$0xff] }
 0x8c9   : > { %16335 = vmatpush1.bf16.msra.mxu1 %v19097_v53  ;;  %v16001_v5 = vpop.f32.mrf.mxu0  ;;  %16295 = vmatprep.subr.bf16.mxu0 %v18826_v55  ;;  %v18761_v53 = vcombine.low %v8070_v35, %v8078_v43  ;;  %v19017_v55 = vcombine.low %v8326_v56, %v8334_v0  ;;  %v8046_v40 = vld [vmem:[%s22413_s18 + $0x50] sm:$0xff] }
 0x8ca   : > { %v23927_v10 = vadd.f32 %v16040_v2, %v16000_v63  ;;  %v16002_v13 = vadd.f32 %v16001_v5, %v23862_v33  ;;  %v16042_v37 = vpop.f32.mrf.mxu1  ;;  %16336 = vmatprep.subr.bf16.mxu1 %v19082_v23  ;;  %16325 = vmatprep.mubr.bf16.mxu0 %v23552_v25  ;;  %v18809_v33 = vcombine.low %v8118_v57, %v8126_v34  ;;  %v8038_v34 = vld [vmem:[%s22413_s18 + $0x10] sm:$0xff] }
 0x8cb   : > { %v16003_v44 = vpop.f32.mrf.mxu0  ;;  %16366 = vmatprep.mubr.bf16.mxu1 %v23559_v21  ;;  %v18746_v23 = vcombine.high %v8054_v45, %v8062_v47  ;;  %v19002_v57 = vcombine.high %v8310_v50, %v8318_v52  ;;  %v8294_v61 = vld [vmem:[%s22413_s18 + $0x810] sm:$0xff]  ;;  %v18745_v63 = vcombine.low %v8054_v45, %v8062_v47  ;;  %v19001_v2 = vcombine.low %v8310_v50, %v8318_v52 }
 0x8cc   : > { %v23936_v48 = vadd.f32 %v16042_v37, %v16002_v13  ;;  %v16044_v1 = vpop.f32.mrf.mxu1  ;;  %16296 = vmatpush1.bf16.msra.mxu0 %v18825_v51  ;;  %v8302_v42 = vld [vmem:[%s22413_s18 + $0x850] sm:$0xff]  ;;  %v18730_v51 = vcombine.high %v8038_v34, %v8046_v40 }
 0x8cd   : > { %16337 = vmatpush1.bf16.msra.mxu1 %v19081_v6  ;;  %v16004_v20 = vpop.f32.mrf.mxu0  ;;  %16297 = vmatprep.subr.bf16.mxu0 %v18810_v9  ;;  %v18986_v5 = vcombine.high %v8294_v61, %v8302_v42  ;;  %v8278_v6 = vld [vmem:[%s22413_s18 + $0x790] sm:$0xff]  ;;  %v18985_v17 = vcombine.low %v8294_v61, %v8302_v42 }
 0x8ce   : > { %v16045_v29 = vpop.f32.mrf.mxu1  ;;  %16338 = vmatprep.subr.bf16.mxu1 %v19066_v58  ;;  %v8286_v9 = vld [vmem:[%s22413_s18 + $0x7d0] sm:$0xff]  ;;  %v18729_v58 = vcombine.low %v8038_v34, %v8046_v40 }
 0x8cf   : > { %v8534_v13 = vld [vmem:[%s22413_s18 + $0xf90] sm:$0xff]  ;;  %v18970_v27 = vcombine.high %v8278_v6, %v8286_v9  ;;  %v18969_v20 = vcombine.low %v8278_v6, %v8286_v9 }
 0x8d0   : > { %16298 = vmatpush1.bf16.msra.mxu0 %v18809_v33  ;;  %v8542_v37 = vld [vmem:[%s22413_s18 + $0xfd0] sm:$0xff] }
 0x8d1   : > { %16339 = vmatpush1.bf16.msra.mxu1 %v19065_v11  ;;  %16299 = vmatprep.subr.bf16.mxu0 %v18794_v30  ;;  %v19226_v44 = vcombine.high %v8534_v13, %v8542_v37  ;;  %v8518_v1 = vld [vmem:[%s22413_s18 + $0xf10] sm:$0xff]  ;;  %v19225_v11 = vcombine.low %v8534_v13, %v8542_v37  ;;  %v18954_v30 = vcombine.high %v8262_v54, %v8270_v62 }
 0x8d2   : > { %16340 = vmatprep.subr.bf16.mxu1 %v19050_v7  ;;  %v8526_v33 = vld [vmem:[%s22413_s18 + $0xf50] sm:$0xff] }
 0x8d3   : > { %v19210_v29 = vcombine.high %v8518_v1, %v8526_v33  ;;  %v8246_v7 = vld [vmem:[%s22413_s18 + $0x690] sm:$0xff] }
 0x8d4   : > { %16300 = vmatpush1.bf16.msra.mxu0 %v18793_v31  ;;  %v19209_v31 = vcombine.low %v8518_v1, %v8526_v33  ;;  %v8238_v35 = vld [vmem:[%s22413_s18 + $0x650] sm:$0xff]  ;;  %v18937_v0 = vcombine.low %v8246_v7, %v8254_v24 }
 0x8d5   : > { %16341 = vmatpush1.bf16.msra.mxu1 %v19049_v19  ;;  %16301 = vmatprep.subr.bf16.mxu0 %v18778_v3  ;;  %v18938_v19 = vcombine.high %v8246_v7, %v8254_v24  ;;  %v19194_v3 = vcombine.high %v8502_v26, %v8510_v60  ;;  %v8486_v43 = vld [vmem:[%s22413_s18 + $0xe10] sm:$0xff] }
 0x8d6   : > { %16342 = vmatprep.subr.bf16.mxu1 %v19034_v32  ;;  %v8230_v32 = vld [vmem:[%s22413_s18 + $0x610] sm:$0xff] }
 0x8d7   : > { %v8494_v56 = vld [vmem:[%s22413_s18 + $0xe50] sm:$0xff]  ;;  %v18921_v52 = vcombine.low %v8230_v32, %v8238_v35 }
 0x8d8   : > { %16302 = vmatpush1.bf16.msra.mxu0 %v18777_v38  ;;  %v19193_v38 = vcombine.low %v8502_v26, %v8510_v60  ;;  %v8222_v45 = vld [vmem:[%s22413_s18 + $0x5d0] sm:$0xff] }
 0x8d9   : > { %16343 = vmatpush1.bf16.msra.mxu1 %v19033_v46  ;;  %16303 = vmatprep.subr.bf16.mxu0 %v18762_v8  ;;  %v18922_v46 = vcombine.high %v8230_v32, %v8238_v35  ;;  %v19178_v8 = vcombine.high %v8486_v43, %v8494_v56  ;;  %v8470_v47 = vld [vmem:[%s22413_s18 + $0xd90] sm:$0xff] }
 0x8da   : > { %16344 = vmatprep.subr.bf16.mxu1 %v19018_v41  ;;  %v8214_v41 = vld [vmem:[%s22413_s18 + $0x590] sm:$0xff] }
 0x8db   : > { %v8478_v50 = vld [vmem:[%s22413_s18 + $0xdd0] sm:$0xff]  ;;  %v18905_v42 = vcombine.low %v8214_v41, %v8222_v45 }
 0x8dc   : > { %16304 = vmatpush1.bf16.msra.mxu0 %v18761_v53  ;;  %v19177_v53 = vcombine.low %v8486_v43, %v8494_v56  ;;  %v8206_v34 = vld [vmem:[%s22413_s18 + $0x550] sm:$0xff] }
 0x8dd   : > { %16345 = vmatpush1.bf16.msra.mxu1 %v19017_v55  ;;  %16305 = vmatprep.subr.bf16.mxu0 %v18746_v23  ;;  %v18906_v55 = vcombine.high %v8214_v41, %v8222_v45  ;;  %v19162_v23 = vcombine.high %v8470_v47, %v8478_v50  ;;  %v8454_v40 = vld [vmem:[%s22413_s18 + $0xd10] sm:$0xff] }
 0x8de   : > { %16346 = vmatprep.subr.bf16.mxu1 %v19002_v57  ;;  %v8198_v57 = vld [vmem:[%s22413_s18 + $0x510] sm:$0xff] }
 0x8df   : > { %v8462_v61 = vld [vmem:[%s22413_s18 + $0xd50] sm:$0xff]  ;;  %v18889_v37 = vcombine.low %v8198_v57, %v8206_v34 }
 0x8e0   : > { %16306 = vmatpush1.bf16.msra.mxu0 %v18745_v63  ;;  %v19161_v63 = vcombine.low %v8470_v47, %v8478_v50  ;;  %v8190_v6 = vld [vmem:[%s22413_s18 + $0x4d0] sm:$0xff] }
 0x8e1   : > { %16347 = vmatpush1.bf16.msra.mxu1 %v19001_v2  ;;  %16307 = vmatprep.subr.bf16.mxu0 %v18730_v51  ;;  %v18890_v2 = vcombine.high %v8198_v57, %v8206_v34  ;;  %v19146_v51 = vcombine.high %v8454_v40, %v8462_v61  ;;  %v8438_v9 = vld [vmem:[%s22413_s18 + $0xc90] sm:$0xff] }
 0x8e2   : > { %16348 = vmatprep.subr.bf16.mxu1 %v18986_v5  ;;  %v8182_v5 = vld [vmem:[%s22413_s18 + $0x490] sm:$0xff] }
 0x8e3   : > { %v8446_v13 = vld [vmem:[%s22413_s18 + $0xcd0] sm:$0xff]  ;;  %v18873_v33 = vcombine.low %v8182_v5, %v8190_v6 }
 0x8e4   : > { %16308 = vmatpush1.bf16.msra.mxu0 %v18729_v58  ;;  %v19145_v58 = vcombine.low %v8454_v40, %v8462_v61  ;;  %v8174_v54 = vld [vmem:[%s22413_s18 + $0x450] sm:$0xff] }
 0x8e5   : > { %16349 = vmatpush1.bf16.msra.mxu1 %v18985_v17  ;;  %16309 = vmatprep.subr.bf16.mxu0 %v18970_v27  ;;  %v18874_v17 = vcombine.high %v8182_v5, %v8190_v6  ;;  %v19130_v27 = vcombine.high %v8438_v9, %v8446_v13  ;;  %v8422_v62 = vld [vmem:[%s22413_s18 + $0xc10] sm:$0xff] }
 0x8e6   : > { %16350 = vmatprep.subr.bf16.mxu1 %v19226_v44  ;;  %v8166_v44 = vld [vmem:[%s22413_s18 + $0x410] sm:$0xff] }
 0x8e7   : > { %v8430_v1 = vld [vmem:[%s22413_s18 + $0xc50] sm:$0xff]  ;;  %v18857_v60 = vcombine.low %v8166_v44, %v8174_v54 }
 0x8e8   : > { %16310 = vmatpush2.bf16.msra.mxu0 %v18969_v20  ;;  %v19129_v20 = vcombine.low %v8438_v9, %v8446_v13  ;;  %v8670_v7 = vld [vmem:[%s22413_s18 + $0x13d0] sm:$0xff] }
 0x8e9   : > { %16351 = vmatpush2.bf16.msra.mxu1 %v19225_v11  ;;  %16311 = vmatprep.subr.bf16.mxu0 %v18954_v30  ;;  %v18858_v11 = vcombine.high %v8166_v44, %v8174_v54  ;;  %v19114_v30 = vcombine.high %v8422_v62, %v8430_v1  ;;  %v8918_v24 = vld [vmem:[%s22413_s18 + $0x1b90] sm:$0xff] }
 0x8ea   : > { %16352 = vmatprep.subr.bf16.mxu1 %v19210_v29  ;;  %v8662_v29 = vld [vmem:[%s22413_s18 + $0x1390] sm:$0xff] }
 0x8eb   : > { %v8926_v26 = vld [vmem:[%s22413_s18 + $0x1bd0] sm:$0xff]  ;;  %v19353_v56 = vcombine.low %v8662_v29, %v8670_v7 }
 0x8ec   : > { %16312 = vmatpush2.bf16.msra.mxu0 %v18953_v59  ;;  %v19113_v59 = vcombine.low %v8422_v62, %v8430_v1  ;;  %v8654_v32 = vld [vmem:[%s22413_s18 + $0x1350] sm:$0xff] }
 0x8ed   : > { %16353 = vmatpush2.bf16.msra.mxu1 %v19209_v31  ;;  %16313 = vmatprep.subr.bf16.mxu0 %v18938_v19  ;;  %v19354_v31 = vcombine.high %v8662_v29, %v8670_v7  ;;  %v19610_v19 = vcombine.high %v8918_v24, %v8926_v26  ;;  %v8902_v35 = vld [vmem:[%s22413_s18 + $0x1b10] sm:$0xff] }
 0x8ee   : > { %16354 = vmatprep.subr.bf16.mxu1 %v19194_v3  ;;  %v8646_v3 = vld [vmem:[%s22413_s18 + $0x1310] sm:$0xff] }
 0x8ef   : > { %v8910_v43 = vld [vmem:[%s22413_s18 + $0x1b50] sm:$0xff] }
 0x8f0   : > { %16314 = vmatpush2.bf16.msra.mxu0 %v18937_v0  ;;  %v19609_v0 = vcombine.low %v8918_v24, %v8926_v26  ;;  %v8638_v41 = vld [vmem:[%s22413_s18 + $0x12d0] sm:$0xff]  ;;  %v19593_v57 = vcombine.low %v8902_v35, %v8910_v43 }
 0x8f1   : > { %16355 = vmatpush2.bf16.msra.mxu1 %v19193_v38  ;;  %16315 = vmatprep.subr.bf16.mxu0 %v18922_v46  ;;  %v19338_v38 = vcombine.high %v8646_v3, %v8654_v32  ;;  %v19594_v46 = vcombine.high %v8902_v35, %v8910_v43  ;;  %v8886_v47 = vld [vmem:[%s22413_s18 + $0x1a90] sm:$0xff] }
 0x8f2   : > { %16356 = vmatprep.subr.bf16.mxu1 %v19178_v8  ;;  %v8630_v8 = vld [vmem:[%s22413_s18 + $0x1290] sm:$0xff] }
 0x8f3   : > { %v8894_v50 = vld [vmem:[%s22413_s18 + $0x1ad0] sm:$0xff]  ;;  %v19322_v34 = vcombine.high %v8630_v8, %v8638_v41  ;;  %v19321_v9 = vcombine.low %v8630_v8, %v8638_v41 }
 0x8f4   : > { %16316 = vmatpush2.bf16.msra.mxu0 %v18921_v52  ;;  %v8878_v5 = vld [vmem:[%s22413_s18 + $0x1a50] sm:$0xff] }
 0x8f5   : > { %16357 = vmatpush2.bf16.msra.mxu1 %v19177_v53  ;;  %16317 = vmatprep.subr.bf16.mxu0 %v18906_v55  ;;  %v19337_v55 = vcombine.low %v8646_v3, %v8654_v32  ;;  %v8598_v44 = vld [vmem:[%s22413_s18 + $0x1190] sm:$0xff] }
 0x8f6   : > { %16358 = vmatprep.subr.bf16.mxu1 %v19162_v23  ;;  %v8606_v54 = vld [vmem:[%s22413_s18 + $0x11d0] sm:$0xff] }
 0x8f7   : > { %v8854_v62 = vld [vmem:[%s22413_s18 + $0x1990] sm:$0xff] }
 0x8f8   : > { %16318 = vmatpush2.bf16.msra.mxu0 %v18905_v42  ;;  %v8614_v42 = vld [vmem:[%s22413_s18 + $0x1210] sm:$0xff] }
 0x8f9   : > { %16359 = vmatpush2.bf16.msra.mxu1 %v19161_v63  ;;  %16319 = vmatprep.subr.bf16.mxu0 %v18890_v2  ;;  %v8622_v63 = vld [vmem:[%s22413_s18 + $0x1250] sm:$0xff] }
 0x8fa   : > { %16360 = vmatprep.subr.bf16.mxu1 %v19146_v51  ;;  %v8870_v51 = vld [vmem:[%s22413_s18 + $0x1a10] sm:$0xff] }
 0x8fb   : > { %v8862_v1 = vld [vmem:[%s22413_s18 + $0x19d0] sm:$0xff] }
 0x8fc   : > { %16320 = vmatpush2.bf16.msra.mxu0 %v18889_v37  ;;  %v19577_v37 = vcombine.low %v8886_v47, %v8894_v50  ;;  %v8582_v29 = vld [vmem:[%s22413_s18 + $0x1110] sm:$0xff] }
 0x8fd   : > { %16361 = vmatpush2.bf16.msra.mxu1 %v19145_v58  ;;  %16321 = vmatprep.subr.bf16.mxu0 %v18874_v17  ;;  %v19306_v58 = vcombine.high %v8614_v42, %v8622_v63  ;;  %v8590_v7 = vld [vmem:[%s22413_s18 + $0x1150] sm:$0xff] }
 0x8fe   : > { %16362 = vmatprep.subr.bf16.mxu1 %v19130_v27  ;;  %v19562_v27 = vcombine.high %v8870_v51, %v8878_v5  ;;  %v8838_v24 = vld [vmem:[%s22413_s18 + $0x1910] sm:$0xff] }
 0x8ff   : > { %v8846_v26 = vld [vmem:[%s22413_s18 + $0x1950] sm:$0xff] }
 0x900   : > { %16322 = vmatpush2.bf16.msra.mxu0 %v18873_v33  ;;  %v19305_v33 = vcombine.low %v8614_v42, %v8622_v63  ;;  %v8566_v3 = vld [vmem:[%s22413_s18 + $0x1090] sm:$0xff] }
 0x901   : > { %16363 = vmatpush2.bf16.msra.mxu1 %v19129_v20  ;;  %16323 = vmatprep.subr.bf16.mxu0 %v18858_v11  ;;  %v19561_v20 = vcombine.low %v8870_v51, %v8878_v5  ;;  %v19290_v11 = vcombine.high %v8598_v44, %v8606_v54  ;;  %v8574_v32 = vld [vmem:[%s22413_s18 + $0x10d0] sm:$0xff] }
 0x902   : > { %16364 = vmatprep.subr.bf16.mxu1 %v19114_v30  ;;  %v19546_v30 = vcombine.high %v8854_v62, %v8862_v1  ;;  %v8822_v35 = vld [vmem:[%s22413_s18 + $0x1890] sm:$0xff] }
 0x903   : > { %v8830_v43 = vld [vmem:[%s22413_s18 + $0x18d0] sm:$0xff] }
 0x904   : > { %16324 = vmatpush2.bf16.msra.mxu0 %v18857_v60  ;;  %v19289_v60 = vcombine.low %v8598_v44, %v8606_v54  ;;  %v8550_v8 = vld [vmem:[%s22413_s18 + $0x1010] sm:$0xff] }
 0x905   : > { %16365 = vmatpush2.bf16.msra.mxu1 %v19113_v59  ;;  %16375 = vmatprep.subr.bf16.mxu0 %v19354_v31  ;;  %v19545_v59 = vcombine.low %v8854_v62, %v8862_v1  ;;  %v19274_v31 = vcombine.high %v8582_v29, %v8590_v7  ;;  %v8558_v41 = vld [vmem:[%s22413_s18 + $0x1050] sm:$0xff] }
 0x906   : > { %16416 = vmatprep.subr.bf16.mxu1 %v19610_v19  ;;  %v19530_v19 = vcombine.high %v8838_v24, %v8846_v26  ;;  %v9046_v42 = vld [vmem:[%s22413_s18 + $0x1f90] sm:$0xff] }
 0x907   : > { %v16081_v45 = vpop.f32.mrf.mxu0  ;;  %16326 = vmatmul.mubr.bf16.vlgmr.msra.gmra.mxu0 %v23605_v22  ;;  %v9054_v63 = vld [vmem:[%s22413_s18 + $0x1fd0] sm:$0xff] }
 0x908   : > { %v24000_v52 = vadd.f32 %v16081_v45, %v23927_v10  ;;  %v24002_v53 = vpop.f32.mrf.mxu1  ;;  %16367 = vmatmul.mubr.bf16.vlgmr.msra.gmra.mxu1 %v23616_v14  ;;  %16376 = vmatpush1.bf16.msra.mxu0 %v19353_v56  ;;  %v19578_v10 = vcombine.high %v8886_v47, %v8894_v50  ;;  %v19273_v56 = vcombine.low %v8582_v29, %v8590_v7  ;;  %v8806_v45 = vld [vmem:[%s22413_s18 + $0x1810] sm:$0xff] }
 0x909   : > { %16417 = vmatpush1.bf16.msra.mxu1 %v19609_v0  ;;  %v16083_v23 = vpop.f32.mrf.mxu0  ;;  %16377 = vmatprep.subr.bf16.mxu0 %v19338_v38  ;;  %v19529_v0 = vcombine.low %v8838_v24, %v8846_v26  ;;  %v19258_v38 = vcombine.high %v8566_v3, %v8574_v32  ;;  %v8814_v47 = vld [vmem:[%s22413_s18 + $0x1850] sm:$0xff]  ;;  %v19257_v50 = vcombine.low %v8566_v3, %v8574_v32 }
 0x90a   : > { %v24006_v40 = vadd.f32 %v16083_v23, %v23936_v48  ;;  %v24008_v61 = vpop.f32.mrf.mxu1  ;;  %16418 = vmatprep.subr.bf16.mxu1 %v19594_v46  ;;  %16407 = vmatprep.mubr.bf16.mxu0 %v23612_v4  ;;  %v19514_v46 = vcombine.high %v8822_v35, %v8830_v43  ;;  %v19242_v23 = vcombine.high %v8550_v8, %v8558_v41  ;;  %v8758_v62 = vld [vmem:[%s22413_s18 + $0x1690] sm:$0xff] }
 0x90b   : > { %v16085_v2 = vpop.f32.mrf.mxu0  ;;  %16448 = vmatprep.mubr.bf16.mxu1 %v23625_v36  ;;  %v19497_v51 = vcombine.low %v8806_v45, %v8814_v47  ;;  %v8766_v1 = vld [vmem:[%s22413_s18 + $0x16d0] sm:$0xff] }
 0x90c   : > { %v17539_v48 = vcombine.low %v24000_v52, %v24006_v40  ;;  %v16126_v6 = vpop.f32.mrf.mxu1  ;;  %16378 = vmatpush1.bf16.msra.mxu0 %v19337_v55  ;;  %v19513_v55 = vcombine.low %v8822_v35, %v8830_v43  ;;  %v19241_v2 = vcombine.low %v8550_v8, %v8558_v41  ;;  %v19450_v29 = vcombine.high %v8758_v62, %v8766_v1  ;;  %v8742_v24 = vld [vmem:[%s22413_s18 + $0x1610] sm:$0xff]  ;;  %v8583_v52 = vld [vmem:[%s22413_s18 + $0x1118] sm:$0xff] }
 0x90d   : > { %16419 = vmatpush1.bf16.msra.mxu1 %v19593_v57  ;;  %v16086_v13 = vpop.f32.mrf.mxu0  ;;  %16379 = vmatprep.subr.bf16.mxu0 %v19322_v34  ;;  %v19498_v57 = vcombine.high %v8806_v45, %v8814_v47  ;;  %v8790_v34 = vld [vmem:[%s22413_s18 + $0x1790] sm:$0xff]  ;;  %v19738_v6 = vcombine.high %v9046_v42, %v9054_v63  ;;  %v8591_v40 = vld [vmem:[%s22413_s18 + $0x1158] sm:$0xff] }
 0x90e   : > { %v16127_v17 = vpop.f32.mrf.mxu1  ;;  %16420 = vmatprep.subr.bf16.mxu1 %v19578_v10  ;;  %v8798_v10 = vld [vmem:[%s22413_s18 + $0x17d0] sm:$0xff] }
 0x90f   : > { %v19482_v5 = vcombine.high %v8790_v34, %v8798_v10  ;;  %v8782_v13 = vld [vmem:[%s22413_s18 + $0x1750] sm:$0xff]  ;;  %v19481_v17 = vcombine.low %v8790_v34, %v8798_v10 }
 0x910   : > { %16380 = vmatpush1.bf16.msra.mxu0 %v19321_v9  ;;  %v8774_v9 = vld [vmem:[%s22413_s18 + $0x1710] sm:$0xff] }
 0x911   : > { %16421 = vmatpush1.bf16.msra.mxu1 %v19577_v37  ;;  %16381 = vmatprep.subr.bf16.mxu0 %v19306_v58  ;;  %v9030_v37 = vld [vmem:[%s22413_s18 + $0x1f10] sm:$0xff]  ;;  %v19466_v44 = vcombine.high %v8774_v9, %v8782_v13 }
 0x912   : > { %16422 = vmatprep.subr.bf16.mxu1 %v19562_v27  ;;  %v9038_v58 = vld [vmem:[%s22413_s18 + $0x1f50] sm:$0xff]  ;;  %v19737_v27 = vcombine.low %v9046_v42, %v9054_v63 }
 0x913   : > { %v19722_v54 = vcombine.high %v9030_v37, %v9038_v58  ;;  %v8750_v26 = vld [vmem:[%s22413_s18 + $0x1650] sm:$0xff] }
 0x914   : > { %16382 = vmatpush1.bf16.msra.mxu0 %v19305_v33  ;;  %v9014_v33 = vld [vmem:[%s22413_s18 + $0x1e90] sm:$0xff]  ;;  %v19434_v3 = vcombine.high %v8742_v24, %v8750_v26 }
 0x915   : > { %16423 = vmatpush1.bf16.msra.mxu1 %v19561_v20  ;;  %16383 = vmatprep.subr.bf16.mxu0 %v19290_v11  ;;  %v9022_v20 = vld [vmem:[%s22413_s18 + $0x1ed0] sm:$0xff]  ;;  %v19465_v11 = vcombine.low %v8774_v9, %v8782_v13 }
 0x916   : > { %16424 = vmatprep.subr.bf16.mxu1 %v19546_v30  ;;  %v19721_v30 = vcombine.low %v9030_v37, %v9038_v58  ;;  %v19706_v7 = vcombine.high %v9014_v33, %v9022_v20  ;;  %v8726_v35 = vld [vmem:[%s22413_s18 + $0x1590] sm:$0xff] }
 0x917   : > { %v8734_v43 = vld [vmem:[%s22413_s18 + $0x15d0] sm:$0xff] }
 0x918   : > { %16384 = vmatpush1.bf16.msra.mxu0 %v19289_v60  ;;  %v8998_v60 = vld [vmem:[%s22413_s18 + $0x1e10] sm:$0xff]  ;;  %v19418_v8 = vcombine.high %v8726_v35, %v8734_v43 }
 0x919   : > { %16425 = vmatpush1.bf16.msra.mxu1 %v19545_v59  ;;  %16385 = vmatprep.subr.bf16.mxu0 %v19274_v31  ;;  %v9006_v59 = vld [vmem:[%s22413_s18 + $0x1e50] sm:$0xff]  ;;  %v19449_v31 = vcombine.low %v8758_v62, %v8766_v1 }
 0x91a   : > { %16426 = vmatprep.subr.bf16.mxu1 %v19530_v19  ;;  %v19705_v19 = vcombine.low %v9014_v33, %v9022_v20  ;;  %v19690_v32 = vcombine.high %v8998_v60, %v9006_v59  ;;  %v8710_v45 = vld [vmem:[%s22413_s18 + $0x1510] sm:$0xff] }
 0x91b   : > { %v8718_v47 = vld [vmem:[%s22413_s18 + $0x1550] sm:$0xff] }
 0x91c   : > { %16386 = vmatpush1.bf16.msra.mxu0 %v19273_v56  ;;  %v8982_v56 = vld [vmem:[%s22413_s18 + $0x1d90] sm:$0xff]  ;;  %v19402_v34 = vcombine.high %v8710_v45, %v8718_v47 }
 0x91d   : > { %16427 = vmatpush1.bf16.msra.mxu1 %v19529_v0  ;;  %16387 = vmatprep.subr.bf16.mxu0 %v19258_v38  ;;  %v8990_v0 = vld [vmem:[%s22413_s18 + $0x1dd0] sm:$0xff]  ;;  %v19433_v38 = vcombine.low %v8742_v24, %v8750_v26 }
 0x91e   : > { %16428 = vmatprep.subr.bf16.mxu1 %v19514_v46  ;;  %v19689_v46 = vcombine.low %v8998_v60, %v9006_v59  ;;  %v19674_v41 = vcombine.high %v8982_v56, %v8990_v0  ;;  %v8694_v42 = vld [vmem:[%s22413_s18 + $0x1490] sm:$0xff] }
 0x91f   : > { %v8702_v63 = vld [vmem:[%s22413_s18 + $0x14d0] sm:$0xff] }
 0x920   : > { %16388 = vmatpush1.bf16.msra.mxu0 %v19257_v50  ;;  %v8966_v50 = vld [vmem:[%s22413_s18 + $0x1d10] sm:$0xff]  ;;  %v19386_v9 = vcombine.high %v8694_v42, %v8702_v63 }
 0x921   : > { %16429 = vmatpush1.bf16.msra.mxu1 %v19513_v55  ;;  %16389 = vmatprep.subr.bf16.mxu0 %v19242_v23  ;;  %v8974_v55 = vld [vmem:[%s22413_s18 + $0x1d50] sm:$0xff]  ;;  %v19417_v23 = vcombine.low %v8726_v35, %v8734_v43 }
 0x922   : > { %16430 = vmatprep.subr.bf16.mxu1 %v19498_v57  ;;  %v19673_v57 = vcombine.low %v8982_v56, %v8990_v0  ;;  %v19658_v10 = vcombine.high %v8966_v50, %v8974_v55  ;;  %v8678_v37 = vld [vmem:[%s22413_s18 + $0x1410] sm:$0xff] }
 0x923   : > { %v8686_v58 = vld [vmem:[%s22413_s18 + $0x1450] sm:$0xff] }
 0x924   : > { %16390 = vmatpush1.bf16.msra.mxu0 %v19241_v2  ;;  %v8950_v2 = vld [vmem:[%s22413_s18 + $0x1c90] sm:$0xff]  ;;  %v19370_v62 = vcombine.high %v8678_v37, %v8686_v58 }
 0x925   : > { %16431 = vmatpush1.bf16.msra.mxu1 %v19497_v51  ;;  %16391 = vmatprep.subr.bf16.mxu0 %v19482_v5  ;;  %v8958_v51 = vld [vmem:[%s22413_s18 + $0x1cd0] sm:$0xff]  ;;  %v19401_v5 = vcombine.low %v8710_v45, %v8718_v47 }
 0x926   : > { %16432 = vmatprep.subr.bf16.mxu1 %v19738_v6  ;;  %v19657_v6 = vcombine.low %v8966_v50, %v8974_v55  ;;  %v19642_v13 = vcombine.high %v8950_v2, %v8958_v51  ;;  %v9174_v33 = vld [vmem:[%s22413_s18 + $0x2390] sm:$0xff] }
 0x927   : > { %v9182_v20 = vld [vmem:[%s22413_s18 + $0x23d0] sm:$0xff] }
 0x928   : > { %16392 = vmatpush2.bf16.msra.mxu0 %v19481_v17  ;;  %v8934_v17 = vld [vmem:[%s22413_s18 + $0x1c10] sm:$0xff]  ;;  %v19866_v24 = vcombine.high %v9174_v33, %v9182_v20 }
 0x929   : > { %16433 = vmatpush2.bf16.msra.mxu1 %v19737_v27  ;;  %16393 = vmatprep.subr.bf16.mxu0 %v19466_v44  ;;  %v8942_v27 = vld [vmem:[%s22413_s18 + $0x1c50] sm:$0xff]  ;;  %v19385_v44 = vcombine.low %v8694_v42, %v8702_v63  ;;  %v8103_v63 = vld [vmem:[%s22413_s18 + $0x218] sm:$0xff] }
 0x92a   : > { %16434 = vmatprep.subr.bf16.mxu1 %v19722_v54  ;;  %v19641_v54 = vcombine.low %v8950_v2, %v8958_v51  ;;  %v19626_v1 = vcombine.high %v8934_v17, %v8942_v27  ;;  %v9158_v60 = vld [vmem:[%s22413_s18 + $0x2310] sm:$0xff]  ;;  %v8111_v2 = vld [vmem:[%s22413_s18 + $0x258] sm:$0xff] }
 0x92b   : > { %v9166_v59 = vld [vmem:[%s22413_s18 + $0x2350] sm:$0xff] }
 0x92c   : > { %16394 = vmatpush2.bf16.msra.mxu0 %v19465_v11  ;;  %v8151_v11 = vld [vmem:[%s22413_s18 + $0x398] sm:$0xff]  ;;  %v19850_v35 = vcombine.high %v9158_v60, %v9166_v59  ;;  %v9142_v56 = vld [vmem:[%s22413_s18 + $0x2290] sm:$0xff]  ;;  %v19849_v45 = vcombine.low %v9158_v60, %v9166_v59 }
 0x92d   : > { %16435 = vmatpush2.bf16.msra.mxu1 %v19721_v30  ;;  %16395 = vmatprep.subr.bf16.mxu0 %v19450_v29  ;;  %v8159_v30 = vld [vmem:[%s22413_s18 + $0x3d8] sm:$0xff]  ;;  %v19369_v29 = vcombine.low %v8678_v37, %v8686_v58  ;;  %v9150_v0 = vld [vmem:[%s22413_s18 + $0x22d0] sm:$0xff]  ;;  %v18796_v58 = vcombine.high %v8103_v63, %v8111_v2 }
 0x92e   : > { %16436 = vmatprep.subr.bf16.mxu1 %v19706_v7  ;;  %v19625_v7 = vcombine.low %v8934_v17, %v8942_v27  ;;  %v18844_v26 = vcombine.high %v8151_v11, %v8159_v30  ;;  %v19834_v55 = vcombine.high %v9142_v56, %v9150_v0  ;;  %v9110_v17 = vld [vmem:[%s22413_s18 + $0x2190] sm:$0xff] }
 0x92f   : > { %v9118_v27 = vld [vmem:[%s22413_s18 + $0x21d0] sm:$0xff] }
 0x930   : > { %16396 = vmatpush2.bf16.msra.mxu0 %v19449_v31  ;;  %v8135_v31 = vld [vmem:[%s22413_s18 + $0x318] sm:$0xff] }
 0x931   : > { %16437 = vmatpush2.bf16.msra.mxu1 %v19705_v19  ;;  %16397 = vmatprep.subr.bf16.mxu0 %v19434_v3  ;;  %v8143_v19 = vld [vmem:[%s22413_s18 + $0x358] sm:$0xff]  ;;  %v19865_v3 = vcombine.low %v9174_v33, %v9182_v20  ;;  %v19802_v33 = vcombine.high %v9110_v17, %v9118_v27 }
 0x932   : > { %16438 = vmatprep.subr.bf16.mxu1 %v19690_v32  ;;  %v18843_v32 = vcombine.low %v8151_v11, %v8159_v30  ;;  %v18828_v43 = vcombine.high %v8135_v31, %v8143_v19  ;;  %v18827_v50 = vcombine.low %v8135_v31, %v8143_v19  ;;  %v9094_v11 = vld [vmem:[%s22413_s18 + $0x2110] sm:$0xff] }
 0x933   : > { %v9102_v30 = vld [vmem:[%s22413_s18 + $0x2150] sm:$0xff] }
 0x934   : > { %16398 = vmatpush2.bf16.msra.mxu0 %v19433_v38  ;;  %v19786_v60 = vcombine.high %v9094_v11, %v9102_v30  ;;  %v9078_v31 = vld [vmem:[%s22413_s18 + $0x2090] sm:$0xff] }
 0x935   : > { %16439 = vmatpush2.bf16.msra.mxu1 %v19689_v46  ;;  %16399 = vmatprep.subr.bf16.mxu0 %v19418_v8  ;;  %v8119_v46 = vld [vmem:[%s22413_s18 + $0x298] sm:$0xff]  ;;  %v9086_v19 = vld [vmem:[%s22413_s18 + $0x20d0] sm:$0xff] }
 0x936   : > { %16440 = vmatprep.subr.bf16.mxu1 %v19674_v41  ;;  %v8127_v8 = vld [vmem:[%s22413_s18 + $0x2d8] sm:$0xff] }
 0x938   : > { %16400 = vmatpush2.bf16.msra.mxu0 %v19417_v23 }
 0x939   : > { %16441 = vmatpush2.bf16.msra.mxu1 %v19673_v57  ;;  %16401 = vmatprep.subr.bf16.mxu0 %v19402_v34  ;;  %v18812_v57 = vcombine.high %v8119_v46, %v8127_v8  ;;  %v9126_v34 = vld [vmem:[%s22413_s18 + $0x2210] sm:$0xff] }
 0x93a   : > { %16442 = vmatprep.subr.bf16.mxu1 %v19658_v10  ;;  %v9134_v10 = vld [vmem:[%s22413_s18 + $0x2250] sm:$0xff] }
 0x93c   : > { %16402 = vmatpush2.bf16.msra.mxu0 %v19401_v5  ;;  %v19833_v5 = vcombine.low %v9142_v56, %v9150_v0  ;;  %v19770_v56 = vcombine.high %v9078_v31, %v9086_v19 }
 0x93d   : > { %16443 = vmatpush2.bf16.msra.mxu1 %v19657_v6  ;;  %16403 = vmatprep.subr.bf16.mxu0 %v19386_v9  ;;  %v18811_v9 = vcombine.low %v8119_v46, %v8127_v8  ;;  %v9062_v46 = vld [vmem:[%s22413_s18 + $0x2010] sm:$0xff] }
 0x93e   : > { %16444 = vmatprep.subr.bf16.mxu1 %v19642_v13  ;;  %v19818_v13 = vcombine.high %v9126_v34, %v9134_v10  ;;  %v9070_v8 = vld [vmem:[%s22413_s18 + $0x2050] sm:$0xff] }
 0x940   : > { %16404 = vmatpush2.bf16.msra.mxu0 %v19385_v44  ;;  %v8087_v44 = vld [vmem:[%s22413_s18 + $0x198] sm:$0xff] }
 0x941   : > { %16445 = vmatpush2.bf16.msra.mxu1 %v19641_v54  ;;  %16405 = vmatprep.subr.bf16.mxu0 %v19370_v62  ;;  %v8095_v54 = vld [vmem:[%s22413_s18 + $0x1d8] sm:$0xff]  ;;  %v19817_v62 = vcombine.low %v9126_v34, %v9134_v10  ;;  %v19754_v34 = vcombine.high %v9062_v46, %v9070_v8 }
 0x942   : > { %16446 = vmatprep.subr.bf16.mxu1 %v19626_v1  ;;  %v18795_v1 = vcombine.low %v8103_v63, %v8111_v2  ;;  %v18780_v20 = vcombine.high %v8087_v44, %v8095_v54  ;;  %v9310_v63 = vld [vmem:[%s22413_s18 + $0x27d0] sm:$0xff]  ;;  %v8279_v2 = vld [vmem:[%s22413_s18 + $0x798] sm:$0xff] }
 0x944   : > { %16406 = vmatpush2.bf16.msra.mxu0 %v19369_v29  ;;  %v8071_v29 = vld [vmem:[%s22413_s18 + $0x118] sm:$0xff] }
 0x945   : > { %16447 = vmatpush2.bf16.msra.mxu1 %v19625_v7  ;;  %16457 = vmatprep.subr.bf16.mxu0 %v19866_v24  ;;  %v8079_v7 = vld [vmem:[%s22413_s18 + $0x158] sm:$0xff]  ;;  %v19801_v24 = vcombine.low %v9110_v17, %v9118_v27 }
 0x946   : > { %16498 = vmatprep.subr.bf16.mxu1 %v18844_v26  ;;  %v18779_v26 = vcombine.low %v8087_v44, %v8095_v54  ;;  %v18764_v59 = vcombine.high %v8071_v29, %v8079_v7  ;;  %v8263_v17 = vld [vmem:[%s22413_s18 + $0x718] sm:$0xff] }
 0x947   : > { %v24076_v38 = vpop.f32.mrf.mxu0  ;;  %16408 = vmatmul.mubr.bf16.vlgmr.msra.gmra.mxu0 %v23575_v18  ;;  %v8271_v27 = vld [vmem:[%s22413_s18 + $0x758] sm:$0xff] }
 0x948   : > { %v24081_v41 = vpop.f32.mrf.mxu1  ;;  %16449 = vmatmul.mubr.bf16.vlgmr.msra.gmra.mxu1 %v23696_v15  ;;  %16458 = vmatpush1.bf16.msra.mxu0 %v19865_v3  ;;  %v8055_v3 = vld [vmem:[%s22413_s18 + $0x98] sm:$0xff] }
 0x949   : > { %16499 = vmatpush1.bf16.msra.mxu1 %v18843_v32  ;;  %v24084_v47 = vpop.f32.mrf.mxu0  ;;  %16459 = vmatprep.subr.bf16.mxu0 %v19850_v35  ;;  %v8063_v32 = vld [vmem:[%s22413_s18 + $0xd8] sm:$0xff]  ;;  %v19785_v35 = vcombine.low %v9094_v11, %v9102_v30 }
 0x94a   : > { %v24086_v23 = vpop.f32.mrf.mxu1  ;;  %16500 = vmatprep.subr.bf16.mxu1 %v18828_v43  ;;  %16489 = vmatprep.mubr.bf16.mxu0 %v23701_v39  ;;  %v18763_v43 = vcombine.low %v8071_v29, %v8079_v7  ;;  %v18748_v0 = vcombine.high %v8055_v3, %v8063_v32  ;;  %v8247_v11 = vld [vmem:[%s22413_s18 + $0x698] sm:$0xff]  ;;  %v18955_v7 = vcombine.low %v8263_v17, %v8271_v27 }
 0x94b   : > { %v16167_v42 = vpop.f32.mrf.mxu0  ;;  %16530 = vmatprep.mubr.bf16.mxu1 %v23552_v25  ;;  %v8255_v30 = vld [vmem:[%s22413_s18 + $0x6d8] sm:$0xff] }
 0x94c   : > { %v16208_v51 = vpop.f32.mrf.mxu1  ;;  %16460 = vmatpush1.bf16.msra.mxu0 %v19849_v45  ;;  %v8039_v45 = vld [vmem:[%s22413_s18 + $0x18] sm:$0xff]  ;;  %v9302_v42 = vld [vmem:[%s22413_s18 + $0x2790] sm:$0xff] }
 0x94d   : > { %16501 = vmatpush1.bf16.msra.mxu1 %v18827_v50  ;;  %v16168_v6 = vpop.f32.mrf.mxu0  ;;  %16461 = vmatprep.subr.bf16.mxu0 %v19834_v55  ;;  %v8047_v50 = vld [vmem:[%s22413_s18 + $0x58] sm:$0xff]  ;;  %v19769_v55 = vcombine.low %v9078_v31, %v9086_v19  ;;  %v19993_v44 = vcombine.low %v9302_v42, %v9310_v63 }
 0x94e   : > { %v16209_v37 = vpop.f32.mrf.mxu1  ;;  %16502 = vmatprep.subr.bf16.mxu1 %v18812_v57  ;;  %v18747_v57 = vcombine.low %v8055_v3, %v8063_v32  ;;  %v18732_v10 = vcombine.high %v8039_v45, %v8047_v50  ;;  %v8287_v51 = vld [vmem:[%s22413_s18 + $0x7d8] sm:$0xff]  ;;  %v18731_v6 = vcombine.low %v8039_v45, %v8047_v50  ;;  %v18939_v32 = vcombine.low %v8247_v11, %v8255_v30 }
 0x94f   : > { %v9286_v37 = vld [vmem:[%s22413_s18 + $0x2710] sm:$0xff]  ;;  %v18971_v54 = vcombine.low %v8279_v2, %v8287_v51  ;;  %v8231_v31 = vld [vmem:[%s22413_s18 + $0x618] sm:$0xff] }
 0x950   : > { %16462 = vmatpush1.bf16.msra.mxu0 %v19833_v5  ;;  %v19753_v5 = vcombine.low %v9062_v46, %v9070_v8  ;;  %v8239_v19 = vld [vmem:[%s22413_s18 + $0x658] sm:$0xff] }
 0x951   : > { %16503 = vmatpush1.bf16.msra.mxu1 %v18811_v9  ;;  %16463 = vmatprep.subr.bf16.mxu0 %v19818_v13  ;;  %v19994_v9 = vcombine.high %v9302_v42, %v9310_v63  ;;  %v18972_v13 = vcombine.high %v8279_v2, %v8287_v51  ;;  %v8215_v46 = vld [vmem:[%s22413_s18 + $0x598] sm:$0xff]  ;;  %v18923_v50 = vcombine.low %v8231_v31, %v8239_v19 }
 0x952   : > { %16504 = vmatprep.subr.bf16.mxu1 %v18796_v58  ;;  %v9294_v58 = vld [vmem:[%s22413_s18 + $0x2750] sm:$0xff]  ;;  %v8223_v8 = vld [vmem:[%s22413_s18 + $0x5d8] sm:$0xff] }
 0x953   : > { %v19977_v29 = vcombine.low %v9286_v37, %v9294_v58  ;;  %v8199_v42 = vld [vmem:[%s22413_s18 + $0x518] sm:$0xff]  ;;  %v18907_v51 = vcombine.low %v8215_v46, %v8223_v8 }
 0x954   : > { %16464 = vmatpush1.bf16.msra.mxu0 %v19817_v62  ;;  %v19978_v62 = vcombine.high %v9286_v37, %v9294_v58  ;;  %v8207_v63 = vld [vmem:[%s22413_s18 + $0x558] sm:$0xff] }
 0x955   : > { %16505 = vmatpush1.bf16.msra.mxu1 %v18795_v1  ;;  %16465 = vmatprep.subr.bf16.mxu0 %v19802_v33  ;;  %v18956_v1 = vcombine.high %v8263_v17, %v8271_v27  ;;  %v9270_v33 = vld [vmem:[%s22413_s18 + $0x2690] sm:$0xff]  ;;  %v8183_v37 = vld [vmem:[%s22413_s18 + $0x498] sm:$0xff]  ;;  %v9330_v17 = vsub.s32 2, %v23529_v16 }
 0x956   : > { %16506 = vmatprep.subr.bf16.mxu1 %v18780_v20  ;;  %v9278_v20 = vld [vmem:[%s22413_s18 + $0x26d0] sm:$0xff]  ;;  %v8191_v58 = vld [vmem:[%s22413_s18 + $0x4d8] sm:$0xff] }
 0x957   : > { %v19961_v3 = vcombine.low %v9270_v33, %v9278_v20 }
 0x958   : > { %16466 = vmatpush1.bf16.msra.mxu0 %v19801_v24  ;;  %v19962_v24 = vcombine.high %v9270_v33, %v9278_v20  ;;  %v9190_v33 = vld [vmem:[%s22413_s18 + $0x2410] sm:$0xff] }
 0x959   : > { %16507 = vmatpush1.bf16.msra.mxu1 %v18779_v26  ;;  %16467 = vmatprep.subr.bf16.mxu0 %v19786_v60  ;;  %v18940_v26 = vcombine.high %v8247_v11, %v8255_v30  ;;  %v9254_v60 = vld [vmem:[%s22413_s18 + $0x2610] sm:$0xff]  ;;  %v8167_v11 = vld [vmem:[%s22413_s18 + $0x418] sm:$0xff] }
 0x95a   : > { %16508 = vmatprep.subr.bf16.mxu1 %v18764_v59  ;;  %v9262_v59 = vld [vmem:[%s22413_s18 + $0x2650] sm:$0xff]  ;;  %v8175_v30 = vld [vmem:[%s22413_s18 + $0x458] sm:$0xff] }
 0x95b   : > { %v19945_v45 = vcombine.low %v9254_v60, %v9262_v59  ;;  %v9198_v20 = vld [vmem:[%s22413_s18 + $0x2450] sm:$0xff] }
 0x95c   : > { %16468 = vmatpush1.bf16.msra.mxu0 %v19785_v35  ;;  %v19946_v35 = vcombine.high %v9254_v60, %v9262_v59  ;;  %v19882_v60 = vcombine.high %v9190_v33, %v9198_v20 }
 0x95d   : > { %16509 = vmatpush1.bf16.msra.mxu1 %v18763_v43  ;;  %16469 = vmatprep.subr.bf16.mxu0 %v19770_v56  ;;  %v18924_v43 = vcombine.high %v8231_v31, %v8239_v19  ;;  %v9238_v56 = vld [vmem:[%s22413_s18 + $0x2590] sm:$0xff]  ;;  %v18860_v31 = vcombine.high %v8167_v11, %v8175_v30  ;;  %v8407_v19 = vld [vmem:[%s22413_s18 + $0xb98] sm:$0xff] }
 0x95e   : > { %16510 = vmatprep.subr.bf16.mxu1 %v18748_v0  ;;  %v9246_v0 = vld [vmem:[%s22413_s18 + $0x25d0] sm:$0xff] }
 0x95f   : > { %v19929_v2 = vcombine.low %v9238_v56, %v9246_v0 }
 0x960   : > { %16470 = vmatpush1.bf16.msra.mxu0 %v19769_v55  ;;  %v19930_v55 = vcombine.high %v9238_v56, %v9246_v0  ;;  %v19881_v56 = vcombine.low %v9190_v33, %v9198_v20  ;;  %v18859_v0 = vcombine.low %v8167_v11, %v8175_v30 }
 0x961   : > { %16511 = vmatpush1.bf16.msra.mxu1 %v18747_v57  ;;  %16471 = vmatprep.subr.bf16.mxu0 %v19754_v34  ;;  %v18908_v57 = vcombine.high %v8215_v46, %v8223_v8  ;;  %v9222_v34 = vld [vmem:[%s22413_s18 + $0x2510] sm:$0xff] }
 0x962   : > { %16512 = vmatprep.subr.bf16.mxu1 %v18732_v10  ;;  %v9230_v10 = vld [vmem:[%s22413_s18 + $0x2550] sm:$0xff] }
 0x963   : > { %v19913_v27 = vcombine.low %v9222_v34, %v9230_v10 }
 0x964   : > { %16472 = vmatpush1.bf16.msra.mxu0 %v19753_v5  ;;  %v19914_v5 = vcombine.high %v9222_v34, %v9230_v10  ;;  %v8647_v34 = vld [vmem:[%s22413_s18 + $0x1318] sm:$0xff] }
 0x965   : > { %16513 = vmatpush1.bf16.msra.mxu1 %v18731_v6  ;;  %16473 = vmatprep.subr.bf16.mxu0 %v19994_v9  ;;  %v18892_v6 = vcombine.high %v8199_v42, %v8207_v63  ;;  %v9206_v9 = vld [vmem:[%s22413_s18 + $0x2490] sm:$0xff]  ;;  %v8655_v10 = vld [vmem:[%s22413_s18 + $0x1358] sm:$0xff] }
 0x966   : > { %16514 = vmatprep.subr.bf16.mxu1 %v18972_v13  ;;  %v9214_v13 = vld [vmem:[%s22413_s18 + $0x24d0] sm:$0xff]  ;;  %v19339_v33 = vcombine.low %v8647_v34, %v8655_v10 }
 0x968   : > { %16474 = vmatpush2.bf16.msra.mxu0 %v19993_v44  ;;  %v18891_v44 = vcombine.low %v8199_v42, %v8207_v63  ;;  %v21946_v42 = vmov 1983009808  }
 0x969   : > { %16515 = vmatpush2.bf16.msra.mxu1 %v18971_v54  ;;  %16475 = vmatprep.subr.bf16.mxu0 %v19978_v62  ;;  %v19898_v54 = vcombine.high %v9206_v9, %v9214_v13  ;;  %v9334_v62 = vsub.s32 3, %v23529_v16 }
 0x96a   : > { %16516 = vmatprep.subr.bf16.mxu1 %v18956_v1  ;;  %v18876_v1 = vcombine.high %v8183_v37, %v8191_v58 }
 0x96c   : > { %16476 = vmatpush2.bf16.msra.mxu0 %v19977_v29  ;;  %v24145_v29 = vld [vmem:[%s22425_s19] sm:$0xff] }
 0x96d   : > { %16517 = vmatpush2.bf16.msra.mxu1 %v18955_v7  ;;  %16477 = vmatprep.subr.bf16.mxu0 %v19962_v24  ;;  %v9331_v7 = vrot.slane %v24145_v29, %v9330_v17  ;;  %v19897_v24 = vcombine.low %v9206_v9, %v9214_v13  ;;  %v9335_v59 = vrot.slane %v24145_v29, %v9334_v62  ;;  %v8383_v9 = vld [vmem:[%s22413_s18 + $0xad8] sm:$0xff] }
 0x96e   : > { %16518 = vmatprep.subr.bf16.mxu1 %v18940_v26  ;;  %v18875_v26 = vcombine.low %v8183_v37, %v8191_v58  ;;  %v8631_v37 = vld [vmem:[%s22413_s18 + $0x1298] sm:$0xff] }
 0x96f   : > { %v16125_v8 = vadd.f32 %v24008_v61, %v9335_v59  ;;  %v8639_v58 = vld [vmem:[%s22413_s18 + $0x12d8] sm:$0xff] }
 0x970   : > { %16478 = vmatpush2.bf16.msra.mxu0 %v19961_v3  ;;  %v8415_v3 = vld [vmem:[%s22413_s18 + $0xbd8] sm:$0xff] }
 0x971   : > { %16519 = vmatpush2.bf16.msra.mxu1 %v18939_v32  ;;  %16479 = vmatprep.subr.bf16.mxu0 %v19946_v35  ;;  %v8663_v32 = vld [vmem:[%s22413_s18 + $0x1398] sm:$0xff]  ;;  %v19100_v46 = vcombine.high %v8407_v19, %v8415_v3  ;;  %v16166_v63 = vadd.f32 %v24084_v47, %v16125_v8 }
 0x972   : > { %16520 = vmatprep.subr.bf16.mxu1 %v18924_v43  ;;  %v8671_v35 = vld [vmem:[%s22413_s18 + $0x13d8] sm:$0xff]  ;;  %v16123_v43 = vadd.f32 %v24002_v53, %v9331_v7  ;;  %v17542_v53 = vunpack.c.l.s4 %v21946_v42  ;;  %v19324_v7 = vcombine.high %v8631_v37, %v8639_v58 }
 0x973   : > { %v19355_v61 = vcombine.low %v8663_v32, %v8671_v35  ;;  %v16207_v47 = vadd.f32 %v24086_v23, %v16166_v63  ;;  %v8367_v23 = vld [vmem:[%s22413_s18 + $0xa58] sm:$0xff] }
 0x974   : > { %16480 = vmatpush2.bf16.msra.mxu0 %v19945_v45  ;;  %v16164_v45 = vadd.f32 %v24076_v38, %v16123_v43  ;;  %v8623_v59 = vld [vmem:[%s22413_s18 + $0x1258] sm:$0xff] }
 0x975   : > { %16521 = vmatpush2.bf16.msra.mxu1 %v18923_v50  ;;  %16481 = vmatprep.subr.bf16.mxu0 %v19930_v55  ;;  %v19356_v50 = vcombine.high %v8663_v32, %v8671_v35  ;;  %v8391_v55 = vld [vmem:[%s22413_s18 + $0xb18] sm:$0xff] }
 0x976   : > { %16522 = vmatprep.subr.bf16.mxu1 %v18908_v57  ;;  %v8399_v57 = vld [vmem:[%s22413_s18 + $0xb58] sm:$0xff] }
 0x977   : > { %v19084_v38 = vcombine.high %v8391_v55, %v8399_v57 }
 0x978   : > { %16482 = vmatpush2.bf16.msra.mxu0 %v19929_v2  ;;  %v19099_v2 = vcombine.low %v8407_v19, %v8415_v3 }
 0x979   : > { %16523 = vmatpush2.bf16.msra.mxu1 %v18907_v51  ;;  %16483 = vmatprep.subr.bf16.mxu0 %v19914_v5  ;;  %v16205_v51 = vadd.f32 %v24081_v41, %v16164_v45  ;;  %v19340_v5 = vcombine.high %v8647_v34, %v8655_v10  ;;  %v19083_v41 = vcombine.low %v8391_v55, %v8399_v57  ;;  %v8351_v55 = vld [vmem:[%s22413_s18 + $0x9d8] sm:$0xff] }
 0x97a   : > { %16524 = vmatprep.subr.bf16.mxu1 %v18892_v6  ;;  %v8375_v6 = vld [vmem:[%s22413_s18 + $0xa98] sm:$0xff] }
 0x97b   : > { %v19068_v20 = vcombine.high %v8375_v6, %v8383_v9  ;;  %v19067_v35 = vcombine.low %v8375_v6, %v8383_v9  ;;  %v8599_v57 = vld [vmem:[%s22413_s18 + $0x1198] sm:$0xff] }
 0x97c   : > { %16484 = vmatpush2.bf16.msra.mxu0 %v19913_v27  ;;  %v17543_v27 = vunpack.c.0.s8 %v17542_v53  ;;  %v8607_v34 = vld [vmem:[%s22413_s18 + $0x11d8] sm:$0xff] }
 0x97d   : > { %16525 = vmatpush2.bf16.msra.mxu1 %v18891_v44  ;;  %16485 = vmatprep.subr.bf16.mxu0 %v19898_v54  ;;  %v19291_v6 = vcombine.low %v8599_v57, %v8607_v34 }
 0x97e   : > { %16526 = vmatprep.subr.bf16.mxu1 %v18876_v1 }
 0x980   : > { %16486 = vmatpush2.bf16.msra.mxu0 %v19897_v24  ;;  %v8359_v24 = vld [vmem:[%s22413_s18 + $0xa18] sm:$0xff] }
 0x981   : > { %16527 = vmatpush2.bf16.msra.mxu1 %v18875_v26  ;;  %16487 = vmatprep.subr.bf16.mxu0 %v19882_v60  ;;  %v8615_v60 = vld [vmem:[%s22413_s18 + $0x1218] sm:$0xff]  ;;  %v19051_v53 = vcombine.low %v8359_v24, %v8367_v23 }
 0x982   : > { %16528 = vmatprep.subr.bf16.mxu1 %v18860_v31  ;;  %v24180_v31 = vsub.s32 %v17543_v27, %v23529_v16  ;;  %v19308_v45 = vcombine.high %v8615_v60, %v8623_v59  ;;  %v19307_v63 = vcombine.low %v8615_v60, %v8623_v59  ;;  %v8567_v27 = vld [vmem:[%s22413_s18 + $0x1098] sm:$0xff] }
 0x983   : > { %v8535_v60 = vld [vmem:[%s22413_s18 + $0xf98] sm:$0xff] }
 0x984   : > { %16488 = vmatpush2.bf16.msra.mxu0 %v19881_v56  ;;  %v19323_v56 = vcombine.low %v8631_v37, %v8639_v58  ;;  %v17547_v10 = vrot.slane %v17539_v48, %v24180_v31  ;;  %v8311_v37 = vld [vmem:[%s22413_s18 + $0x898] sm:$0xff] }
 0x985   : > { %16529 = vmatpush2.bf16.msra.mxu1 %v18859_v0  ;;  %16539 = vmatprep.subr.bf16.mxu0 %v19100_v46  ;;  %v19052_v0 = vcombine.high %v8359_v24, %v8367_v23  ;;  %v8319_v58 = vld [vmem:[%s22413_s18 + $0x8d8] sm:$0xff] }
 0x986   : > { %16580 = vmatprep.subr.bf16.mxu1 %v19356_v50  ;;  %v8343_v50 = vld [vmem:[%s22413_s18 + $0x998] sm:$0xff] }
 0x987   : > { %v16245_v13 = vpop.f32.mrf.mxu0  ;;  %16490 = vmatmul.mubr.bf16.vlgmr.msra.gmra.mxu0 %v23769_v28  ;;  %v19035_v48 = vcombine.low %v8343_v50, %v8351_v55  ;;  %v8543_v59 = vld [vmem:[%s22413_s18 + $0xfd8] sm:$0xff] }
 0x988   : > { %v16246_v44 = vadd.f32 %v16245_v13, %v16205_v51  ;;  %v16286_v54 = vpop.f32.mrf.mxu1  ;;  %16531 = vmatmul.mubr.bf16.vlgmr.msra.gmra.mxu1 %v23605_v22  ;;  %16540 = vmatpush1.bf16.msra.mxu0 %v19099_v2  ;;  %v19036_v2 = vcombine.high %v8343_v50, %v8351_v55  ;;  %v8327_v51 = vld [vmem:[%s22413_s18 + $0x918] sm:$0xff]  ;;  %v19276_v13 = vcombine.high %v8583_v52, %v8591_v40 }
 0x989   : > { %16581 = vmatpush1.bf16.msra.mxu1 %v19355_v61  ;;  %v16247_v1 = vpop.f32.mrf.mxu0  ;;  %16541 = vmatprep.subr.bf16.mxu0 %v19084_v38  ;;  %v19292_v38 = vcombine.high %v8599_v57, %v8607_v34  ;;  %v19227_v50 = vcombine.low %v8535_v60, %v8543_v59 }
 0x98a   : > { %v16248_v11 = vadd.f32 %v16247_v1, %v16207_v47  ;;  %v16288_v30 = vpop.f32.mrf.mxu1  ;;  %16582 = vmatprep.subr.bf16.mxu1 %v19340_v5  ;;  %16571 = vmatprep.mubr.bf16.mxu0 %v23559_v21  ;;  %v16287_v19 = vadd.f32 %v16286_v54, %v16246_v44  ;;  %v8335_v5 = vld [vmem:[%s22413_s18 + $0x958] sm:$0xff]  ;;  %v19275_v54 = vcombine.low %v8583_v52, %v8591_v40 }
 0x98b   : > { %v16249_v26 = vpop.f32.mrf.mxu0  ;;  %16612 = vmatprep.mubr.bf16.mxu1 %v23612_v4  ;;  %v19020_v9 = vcombine.high %v8327_v51, %v8335_v5  ;;  %v8575_v47 = vld [vmem:[%s22413_s18 + $0x10d8] sm:$0xff]  ;;  %v19019_v44 = vcombine.low %v8327_v51, %v8335_v5 }
 0x98c   : > { %v16289_v3 = vadd.f32 %v16288_v30, %v16248_v11  ;;  %v16290_v32 = vpop.f32.mrf.mxu1  ;;  %16542 = vmatpush1.bf16.msra.mxu0 %v19083_v41  ;;  %v19004_v41 = vcombine.high %v8311_v37, %v8319_v58  ;;  %v19260_v1 = vcombine.high %v8567_v27, %v8575_v47  ;;  %v8551_v11 = vld [vmem:[%s22413_s18 + $0x1018] sm:$0xff]  ;;  %v19259_v24 = vcombine.low %v8567_v27, %v8575_v47 }
 0x98d   : > { %16583 = vmatpush1.bf16.msra.mxu1 %v19339_v33  ;;  %v16250_v43 = vpop.f32.mrf.mxu0  ;;  %16543 = vmatprep.subr.bf16.mxu0 %v19068_v20  ;;  %v8295_v33 = vld [vmem:[%s22413_s18 + $0x818] sm:$0xff] }
 0x98e   : > { %v17540_v46 = vcombine.low %v16287_v19, %v16289_v3  ;;  %v16291_v8 = vpop.f32.mrf.mxu1  ;;  %16584 = vmatprep.subr.bf16.mxu1 %v19324_v7  ;;  %v8303_v20 = vld [vmem:[%s22413_s18 + $0x858] sm:$0xff]  ;;  %v19003_v7 = vcombine.low %v8311_v37, %v8319_v58  ;;  %v19228_v43 = vcombine.high %v8535_v60, %v8543_v59 }
 0x98f   : > { %v8559_v30 = vld [vmem:[%s22413_s18 + $0x1058] sm:$0xff]  ;;  %v18988_v23 = vcombine.high %v8295_v33, %v8303_v20  ;;  %v18987_v32 = vcombine.low %v8295_v33, %v8303_v20 }
 0x990   : > { %v17554_v42 = vrot.slane %v17540_v46, %v24180_v31  ;;  %16544 = vmatpush1.bf16.msra.mxu0 %v19067_v35  ;;  %v19244_v26 = vcombine.high %v8551_v11, %v8559_v30  ;;  %v8791_v19 = vld [vmem:[%s22413_s18 + $0x1798] sm:$0xff]  ;;  %v19243_v35 = vcombine.low %v8551_v11, %v8559_v30 }
 0x991   : > { %16585 = vmatpush1.bf16.msra.mxu1 %v19323_v56  ;;  %16545 = vmatprep.subr.bf16.mxu0 %v19052_v0  ;;  %v8799_v3 = vld [vmem:[%s22413_s18 + $0x17d8] sm:$0xff] }
 0x992   : > { %v17555_v61 = vcombine.low %v17547_v10, %v17554_v42  ;;  %16586 = vmatprep.subr.bf16.mxu1 %v19308_v45  ;;  %v19484_v56 = vcombine.high %v8791_v19, %v8799_v3  ;;  %v8519_v0 = vld [vmem:[%s22413_s18 + $0xf18] sm:$0xff]  ;;  %v19483_v55 = vcombine.low %v8791_v19, %v8799_v3 }
 0x993   : > { %v8527_v46 = vld [vmem:[%s22413_s18 + $0xf58] sm:$0xff] }
 0x994   : > { %17611 = vst [vmem:[%s22423_s5] sm:$0xff] %v17555_v61  ;;  %16546 = vmatpush1.bf16.msra.mxu0 %v19051_v53  ;;  %v8775_v8 = vld [vmem:[%s22413_s18 + $0x1718] sm:$0xff]  ;;  %v19212_v57 = vcombine.high %v8519_v0, %v8527_v46 }
 0x995   : > { %16587 = vmatpush1.bf16.msra.mxu1 %v19307_v63  ;;  %16547 = vmatprep.subr.bf16.mxu0 %v19036_v2  ;;  %v8783_v45 = vld [vmem:[%s22413_s18 + $0x1758] sm:$0xff]  ;;  %v19211_v2 = vcombine.low %v8519_v0, %v8527_v46 }
 0x996   : > { %16588 = vmatprep.subr.bf16.mxu1 %v19292_v38  ;;  %v19468_v34 = vcombine.high %v8775_v8, %v8783_v45  ;;  %v8503_v10 = vld [vmem:[%s22413_s18 + $0xe98] sm:$0xff]  ;;  %v19467_v61 = vcombine.low %v8775_v8, %v8783_v45 }
 0x997   : > { %v8511_v42 = vld [vmem:[%s22413_s18 + $0xed8] sm:$0xff] }
 0x998   : > { %16548 = vmatpush1.bf16.msra.mxu0 %v19035_v48  ;;  %v8759_v53 = vld [vmem:[%s22413_s18 + $0x1698] sm:$0xff]  ;;  %v19196_v38 = vcombine.high %v8503_v10, %v8511_v42 }
 0x999   : > { %16589 = vmatpush1.bf16.msra.mxu1 %v19291_v6  ;;  %16549 = vmatprep.subr.bf16.mxu0 %v19020_v9  ;;  %v8767_v63 = vld [vmem:[%s22413_s18 + $0x16d8] sm:$0xff]  ;;  %v19195_v6 = vcombine.low %v8503_v10, %v8511_v42 }
 0x99a   : > { %16590 = vmatprep.subr.bf16.mxu1 %v19276_v13  ;;  %v19452_v51 = vcombine.high %v8759_v53, %v8767_v63  ;;  %v8487_v5 = vld [vmem:[%s22413_s18 + $0xe18] sm:$0xff]  ;;  %v19451_v9 = vcombine.low %v8759_v53, %v8767_v63 }
 0x99b   : > { %v8495_v52 = vld [vmem:[%s22413_s18 + $0xe58] sm:$0xff] }
 0x99c   : > { %16550 = vmatpush1.bf16.msra.mxu0 %v19019_v44  ;;  %v8743_v40 = vld [vmem:[%s22413_s18 + $0x1618] sm:$0xff]  ;;  %v19180_v13 = vcombine.high %v8487_v5, %v8495_v52 }
 0x99d   : > { %16591 = vmatpush1.bf16.msra.mxu1 %v19275_v54  ;;  %16551 = vmatprep.subr.bf16.mxu0 %v19004_v41  ;;  %v8751_v48 = vld [vmem:[%s22413_s18 + $0x1658] sm:$0xff]  ;;  %v19179_v54 = vcombine.low %v8487_v5, %v8495_v52 }
 0x99e   : > { %16592 = vmatprep.subr.bf16.mxu1 %v19260_v1  ;;  %v19436_v37 = vcombine.high %v8743_v40, %v8751_v48  ;;  %v8471_v58 = vld [vmem:[%s22413_s18 + $0xd98] sm:$0xff]  ;;  %v19435_v41 = vcombine.low %v8743_v40, %v8751_v48  ;;  %v9342_v40 = vsub.s32 5, %v23529_v16 }
 0x99f   : > { %v8479_v27 = vld [vmem:[%s22413_s18 + $0xdd8] sm:$0xff] }
 0x9a0   : > { %16552 = vmatpush1.bf16.msra.mxu0 %v19003_v7  ;;  %v8727_v47 = vld [vmem:[%s22413_s18 + $0x1598] sm:$0xff]  ;;  %v19164_v1 = vcombine.high %v8471_v58, %v8479_v27 }
 0x9a1   : > { %16593 = vmatpush1.bf16.msra.mxu1 %v19259_v24  ;;  %16553 = vmatprep.subr.bf16.mxu0 %v18988_v23  ;;  %v8735_v44 = vld [vmem:[%s22413_s18 + $0x15d8] sm:$0xff]  ;;  %v19163_v24 = vcombine.low %v8471_v58, %v8479_v27 }
 0x9a2   : > { %16594 = vmatprep.subr.bf16.mxu1 %v19244_v26  ;;  %v19420_v33 = vcombine.high %v8727_v47, %v8735_v44  ;;  %v8455_v20 = vld [vmem:[%s22413_s18 + $0xd18] sm:$0xff]  ;;  %v19419_v23 = vcombine.low %v8727_v47, %v8735_v44  ;;  %v9343_v44 = vrot.slane %v24145_v29, %v9342_v40 }
 0x9a3   : > { %v8463_v11 = vld [vmem:[%s22413_s18 + $0xd58] sm:$0xff] }
 0x9a4   : > { %16554 = vmatpush1.bf16.msra.mxu0 %v18987_v32  ;;  %v8711_v30 = vld [vmem:[%s22413_s18 + $0x1518] sm:$0xff]  ;;  %v19148_v26 = vcombine.high %v8455_v20, %v8463_v11 }
 0x9a5   : > { %16595 = vmatpush1.bf16.msra.mxu1 %v19243_v35  ;;  %16555 = vmatprep.subr.bf16.mxu0 %v19228_v43  ;;  %v8719_v7 = vld [vmem:[%s22413_s18 + $0x1558] sm:$0xff]  ;;  %v19147_v35 = vcombine.low %v8455_v20, %v8463_v11 }
 0x9a6   : > { %16596 = vmatprep.subr.bf16.mxu1 %v19484_v56  ;;  %v19404_v60 = vcombine.high %v8711_v30, %v8719_v7  ;;  %v8439_v59 = vld [vmem:[%s22413_s18 + $0xc98] sm:$0xff]  ;;  %v19403_v43 = vcombine.low %v8711_v30, %v8719_v7 }
 0x9a7   : > { %v8447_v19 = vld [vmem:[%s22413_s18 + $0xcd8] sm:$0xff] }
 0x9a8   : > { %16556 = vmatpush2.bf16.msra.mxu0 %v19227_v50  ;;  %v8695_v3 = vld [vmem:[%s22413_s18 + $0x1498] sm:$0xff]  ;;  %v19132_v56 = vcombine.high %v8439_v59, %v8447_v19 }
 0x9a9   : > { %16597 = vmatpush2.bf16.msra.mxu1 %v19483_v55  ;;  %16557 = vmatprep.subr.bf16.mxu0 %v19212_v57  ;;  %v8703_v32 = vld [vmem:[%s22413_s18 + $0x14d8] sm:$0xff]  ;;  %v19131_v55 = vcombine.low %v8439_v59, %v8447_v19 }
 0x9aa   : > { %16598 = vmatprep.subr.bf16.mxu1 %v19468_v34  ;;  %v19388_v0 = vcombine.high %v8695_v3, %v8703_v32  ;;  %v8423_v46 = vld [vmem:[%s22413_s18 + $0xc18] sm:$0xff]  ;;  %v19387_v57 = vcombine.low %v8695_v3, %v8703_v32 }
 0x9ab   : > { %v8431_v8 = vld [vmem:[%s22413_s18 + $0xc58] sm:$0xff] }
 0x9ac   : > { %16558 = vmatpush2.bf16.msra.mxu0 %v19211_v2  ;;  %v8679_v45 = vld [vmem:[%s22413_s18 + $0x1418] sm:$0xff]  ;;  %v19116_v34 = vcombine.high %v8423_v46, %v8431_v8 }
 0x9ad   : > { %16599 = vmatpush2.bf16.msra.mxu1 %v19467_v61  ;;  %16559 = vmatprep.subr.bf16.mxu0 %v19196_v38  ;;  %v8687_v50 = vld [vmem:[%s22413_s18 + $0x1458] sm:$0xff]  ;;  %v19115_v61 = vcombine.low %v8423_v46, %v8431_v8  ;;  %v9338_v38 = vsub.s32 4, %v23529_v16 }
 0x9ae   : > { %16600 = vmatprep.subr.bf16.mxu1 %v19452_v51  ;;  %v19372_v10 = vcombine.high %v8679_v45, %v8687_v50  ;;  %v8919_v42 = vld [vmem:[%s22413_s18 + $0x1b98] sm:$0xff]  ;;  %v19371_v51 = vcombine.low %v8679_v45, %v8687_v50 }
 0x9af   : > { %v8927_v53 = vld [vmem:[%s22413_s18 + $0x1bd8] sm:$0xff] }
 0x9b0   : > { %16560 = vmatpush2.bf16.msra.mxu0 %v19195_v6  ;;  %v9175_v63 = vld [vmem:[%s22413_s18 + $0x2398] sm:$0xff]  ;;  %v19612_v5 = vcombine.high %v8919_v42, %v8927_v53  ;;  %v19611_v58 = vcombine.low %v8919_v42, %v8927_v53 }
 0x9b1   : > { %16601 = vmatpush2.bf16.msra.mxu1 %v19451_v9  ;;  %16561 = vmatprep.subr.bf16.mxu0 %v19180_v13  ;;  %v9183_v2 = vld [vmem:[%s22413_s18 + $0x23d8] sm:$0xff] }
 0x9b2   : > { %16602 = vmatprep.subr.bf16.mxu1 %v19436_v37  ;;  %v19868_v52 = vcombine.high %v9175_v63, %v9183_v2  ;;  %v8903_v48 = vld [vmem:[%s22413_s18 + $0x1b18] sm:$0xff]  ;;  %v9339_v37 = vrot.slane %v24145_v29, %v9338_v38  ;;  %v19867_v27 = vcombine.low %v9175_v63, %v9183_v2 }
 0x9b3   : > { %v8911_v6 = vld [vmem:[%s22413_s18 + $0x1b58] sm:$0xff] }
 0x9b4   : > { %16562 = vmatpush2.bf16.msra.mxu0 %v19179_v54  ;;  %v9159_v9 = vld [vmem:[%s22413_s18 + $0x2318] sm:$0xff]  ;;  %v19596_v47 = vcombine.high %v8903_v48, %v8911_v6 }
 0x9b5   : > { %16603 = vmatpush2.bf16.msra.mxu1 %v19435_v41  ;;  %16563 = vmatprep.subr.bf16.mxu0 %v19164_v1  ;;  %v9167_v13 = vld [vmem:[%s22413_s18 + $0x2358] sm:$0xff] }
 0x9b6   : > { %16604 = vmatprep.subr.bf16.mxu1 %v19420_v33  ;;  %v19852_v54 = vcombine.high %v9159_v9, %v9167_v13  ;;  %v8887_v41 = vld [vmem:[%s22413_s18 + $0x1a98] sm:$0xff] }
 0x9b7   : > { %v8895_v1 = vld [vmem:[%s22413_s18 + $0x1ad8] sm:$0xff] }
 0x9b8   : > { %16564 = vmatpush2.bf16.msra.mxu0 %v19163_v24  ;;  %v9143_v20 = vld [vmem:[%s22413_s18 + $0x2298] sm:$0xff]  ;;  %v19595_v24 = vcombine.low %v8903_v48, %v8911_v6  ;;  %v19579_v45 = vcombine.low %v8887_v41, %v8895_v1 }
 0x9b9   : > { %16605 = vmatpush2.bf16.msra.mxu1 %v19419_v23  ;;  %16565 = vmatprep.subr.bf16.mxu0 %v19148_v26  ;;  %v9151_v11 = vld [vmem:[%s22413_s18 + $0x22d8] sm:$0xff]  ;;  %v19851_v23 = vcombine.low %v9159_v9, %v9167_v13  ;;  %v19580_v26 = vcombine.high %v8887_v41, %v8895_v1 }
 0x9ba   : > { %16606 = vmatprep.subr.bf16.mxu1 %v19404_v60  ;;  %v19836_v3 = vcombine.high %v9143_v20, %v9151_v11  ;;  %v8871_v32 = vld [vmem:[%s22413_s18 + $0x1a18] sm:$0xff] }
 0x9bb   : > { %v8855_v42 = vld [vmem:[%s22413_s18 + $0x1998] sm:$0xff] }
 0x9bc   : > { %16566 = vmatpush2.bf16.msra.mxu0 %v19147_v35  ;;  %v8879_v35 = vld [vmem:[%s22413_s18 + $0x1a58] sm:$0xff] }
 0x9bd   : > { %16607 = vmatpush2.bf16.msra.mxu1 %v19403_v43  ;;  %16567 = vmatprep.subr.bf16.mxu0 %v19132_v56  ;;  %v9127_v56 = vld [vmem:[%s22413_s18 + $0x2218] sm:$0xff] }
 0x9be   : > { %16608 = vmatprep.subr.bf16.mxu1 %v19388_v0  ;;  %v9135_v0 = vld [vmem:[%s22413_s18 + $0x2258] sm:$0xff] }
 0x9bf   : > { %v8863_v53 = vld [vmem:[%s22413_s18 + $0x19d8] sm:$0xff] }
 0x9c0   : > { %16568 = vmatpush2.bf16.msra.mxu0 %v19131_v55  ;;  %v19835_v55 = vcombine.low %v9143_v20, %v9151_v11  ;;  %v9111_v63 = vld [vmem:[%s22413_s18 + $0x2198] sm:$0xff] }
 0x9c1   : > { %16609 = vmatpush2.bf16.msra.mxu1 %v19387_v57  ;;  %16569 = vmatprep.subr.bf16.mxu0 %v19116_v34  ;;  %v19564_v57 = vcombine.high %v8871_v32, %v8879_v35  ;;  %v9119_v2 = vld [vmem:[%s22413_s18 + $0x21d8] sm:$0xff] }
 0x9c2   : > { %16610 = vmatprep.subr.bf16.mxu1 %v19372_v10  ;;  %v19820_v10 = vcombine.high %v9127_v56, %v9135_v0  ;;  %v8839_v48 = vld [vmem:[%s22413_s18 + $0x1918] sm:$0xff] }
 0x9c3   : > { %v8847_v6 = vld [vmem:[%s22413_s18 + $0x1958] sm:$0xff] }
 0x9c4   : > { %16570 = vmatpush2.bf16.msra.mxu0 %v19115_v61  ;;  %v19563_v61 = vcombine.low %v8871_v32, %v8879_v35  ;;  %v9095_v9 = vld [vmem:[%s22413_s18 + $0x2118] sm:$0xff] }
 0x9c5   : > { %16611 = vmatpush2.bf16.msra.mxu1 %v19371_v51  ;;  %16621 = vmatprep.subr.bf16.mxu0 %v19612_v5  ;;  %v19819_v51 = vcombine.low %v9127_v56, %v9135_v0  ;;  %v19548_v5 = vcombine.high %v8855_v42, %v8863_v53  ;;  %v9103_v13 = vld [vmem:[%s22413_s18 + $0x2158] sm:$0xff] }
 0x9c6   : > { %16662 = vmatprep.subr.bf16.mxu1 %v19868_v52  ;;  %v19804_v52 = vcombine.high %v9111_v63, %v9119_v2  ;;  %v9079_v41 = vld [vmem:[%s22413_s18 + $0x2098] sm:$0xff]  ;;  %v19787_v20 = vcombine.low %v9095_v9, %v9103_v13 }
 0x9c7   : > { %v16327_v33 = vpop.f32.mrf.mxu0  ;;  %16572 = vmatmul.mubr.bf16.vlgmr.msra.gmra.mxu0 %v23616_v14  ;;  %v9087_v1 = vld [vmem:[%s22413_s18 + $0x20d8] sm:$0xff] }
 0x9c8   : > { %v16328_v30 = vadd.f32 %v16327_v33, %v9339_v37  ;;  %v16368_v7 = vpop.f32.mrf.mxu1  ;;  %16613 = vmatmul.mubr.bf16.vlgmr.msra.gmra.mxu1 %v23575_v18  ;;  %16622 = vmatpush1.bf16.msra.mxu0 %v19611_v58  ;;  %v19547_v37 = vcombine.low %v8855_v42, %v8863_v53  ;;  %v19803_v58 = vcombine.low %v9111_v63, %v9119_v2  ;;  %v9047_v32 = vld [vmem:[%s22413_s18 + $0x1f98] sm:$0xff] }
 0x9c9   : > { %16663 = vmatpush1.bf16.msra.mxu1 %v19867_v27  ;;  %v16329_v29 = vpop.f32.mrf.mxu0  ;;  %16623 = vmatprep.subr.bf16.mxu0 %v19596_v47  ;;  %v19532_v27 = vcombine.high %v8839_v48, %v8847_v6  ;;  %v19788_v47 = vcombine.high %v9095_v9, %v9103_v13  ;;  %v19531_v33 = vcombine.low %v8839_v48, %v8847_v6  ;;  %v9055_v35 = vld [vmem:[%s22413_s18 + $0x1fd8] sm:$0xff] }
 0x9ca   : > { %v24258_v60 = vadd.f32 %v16368_v7, %v16328_v30  ;;  %v16330_v59 = vadd.f32 %v16329_v29, %v9343_v44  ;;  %v16370_v19 = vpop.f32.mrf.mxu1  ;;  %16664 = vmatprep.subr.bf16.mxu1 %v19852_v54  ;;  %16653 = vmatprep.mubr.bf16.mxu0 %v23625_v36  ;;  %v8823_v44 = vld [vmem:[%s22413_s18 + $0x1898] sm:$0xff]  ;;  %v19772_v30 = vcombine.high %v9079_v41, %v9087_v1 }
 0x9cb   : > { %v16331_v43 = vpop.f32.mrf.mxu0  ;;  %16694 = vmatprep.mubr.bf16.mxu1 %v23701_v39  ;;  %v8831_v54 = vld [vmem:[%s22413_s18 + $0x18d8] sm:$0xff]  ;;  %v19739_v42 = vcombine.low %v9047_v32, %v9055_v35 }
 0x9cc   : > { %v24266_v46 = vadd.f32 %v16370_v19, %v16330_v59  ;;  %v16372_v8 = vpop.f32.mrf.mxu1  ;;  %16624 = vmatpush1.bf16.msra.mxu0 %v19595_v24  ;;  %v19516_v11 = vcombine.high %v8823_v44, %v8831_v54  ;;  %v8807_v7 = vld [vmem:[%s22413_s18 + $0x1818] sm:$0xff]  ;;  %v19771_v59 = vcombine.low %v9079_v41, %v9087_v1 }
 0x9cd   : > { %16665 = vmatpush1.bf16.msra.mxu1 %v19851_v23  ;;  %v16332_v50 = vpop.f32.mrf.mxu0  ;;  %16625 = vmatprep.subr.bf16.mxu0 %v19580_v26  ;;  %v8815_v24 = vld [vmem:[%s22413_s18 + $0x1858] sm:$0xff]  ;;  %v19515_v26 = vcombine.low %v8823_v44, %v8831_v54 }
 0x9ce   : > { %v16373_v34 = vpop.f32.mrf.mxu1  ;;  %16666 = vmatprep.subr.bf16.mxu1 %v19836_v3  ;;  %v9063_v29 = vld [vmem:[%s22413_s18 + $0x2018] sm:$0xff]  ;;  %v19500_v19 = vcombine.high %v8807_v7, %v8815_v24  ;;  %v19499_v0 = vcombine.low %v8807_v7, %v8815_v24 }
 0x9cf   : > { %v9071_v23 = vld [vmem:[%s22413_s18 + $0x2058] sm:$0xff] }
 0x9d0   : > { %16626 = vmatpush1.bf16.msra.mxu0 %v19579_v45  ;;  %v19756_v3 = vcombine.high %v9063_v29, %v9071_v23  ;;  %v9303_v43 = vld [vmem:[%s22413_s18 + $0x2798] sm:$0xff]  ;;  %v19755_v8 = vcombine.low %v9063_v29, %v9071_v23  ;;  %v19740_v45 = vcombine.high %v9047_v32, %v9055_v35 }
 0x9d1   : > { %16667 = vmatpush1.bf16.msra.mxu1 %v19835_v55  ;;  %16627 = vmatprep.subr.bf16.mxu0 %v19564_v57  ;;  %v9311_v56 = vld [vmem:[%s22413_s18 + $0x27d8] sm:$0xff] }
 0x9d2   : > { %16668 = vmatprep.subr.bf16.mxu1 %v19820_v10  ;;  %v19996_v50 = vcombine.high %v9303_v43, %v9311_v56  ;;  %v9031_v55 = vld [vmem:[%s22413_s18 + $0x1f18] sm:$0xff]  ;;  %v19995_v53 = vcombine.low %v9303_v43, %v9311_v56 }
 0x9d3   : > { %v9039_v57 = vld [vmem:[%s22413_s18 + $0x1f58] sm:$0xff] }
 0x9d4   : > { %16628 = vmatpush1.bf16.msra.mxu0 %v19563_v61  ;;  %v9287_v34 = vld [vmem:[%s22413_s18 + $0x2718] sm:$0xff]  ;;  %v19724_v63 = vcombine.high %v9031_v55, %v9039_v57  ;;  %v19723_v48 = vcombine.low %v9031_v55, %v9039_v57 }
 0x9d5   : > { %16669 = vmatpush1.bf16.msra.mxu1 %v19819_v51  ;;  %16629 = vmatprep.subr.bf16.mxu0 %v19548_v5  ;;  %v9295_v10 = vld [vmem:[%s22413_s18 + $0x2758] sm:$0xff] }
 0x9d6   : > { %16670 = vmatprep.subr.bf16.mxu1 %v19804_v52  ;;  %v19980_v2 = vcombine.high %v9287_v34, %v9295_v10  ;;  %v9015_v61 = vld [vmem:[%s22413_s18 + $0x1e98] sm:$0xff]  ;;  %v19979_v6 = vcombine.low %v9287_v34, %v9295_v10 }
 0x9d7   : > { %v9023_v51 = vld [vmem:[%s22413_s18 + $0x1ed8] sm:$0xff] }
 0x9d8   : > { %16630 = vmatpush1.bf16.msra.mxu0 %v19547_v37  ;;  %v9271_v5 = vld [vmem:[%s22413_s18 + $0x2698] sm:$0xff]  ;;  %v19708_v9 = vcombine.high %v9015_v61, %v9023_v51  ;;  %v19707_v44 = vcombine.low %v9015_v61, %v9023_v51 }
 0x9d9   : > { %16671 = vmatpush1.bf16.msra.mxu1 %v19803_v58  ;;  %16631 = vmatprep.subr.bf16.mxu0 %v19532_v27  ;;  %v9279_v52 = vld [vmem:[%s22413_s18 + $0x26d8] sm:$0xff] }
 0x9da   : > { %16672 = vmatprep.subr.bf16.mxu1 %v19788_v47  ;;  %v19964_v13 = vcombine.high %v9271_v5, %v9279_v52  ;;  %v8999_v37 = vld [vmem:[%s22413_s18 + $0x1e18] sm:$0xff]  ;;  %v19963_v54 = vcombine.low %v9271_v5, %v9279_v52 }
 0x9db   : > { %v9007_v58 = vld [vmem:[%s22413_s18 + $0x1e58] sm:$0xff] }
 0x9dc   : > { %16632 = vmatpush1.bf16.msra.mxu0 %v19531_v33  ;;  %v9255_v27 = vld [vmem:[%s22413_s18 + $0x2618] sm:$0xff]  ;;  %v19692_v41 = vcombine.high %v8999_v37, %v9007_v58  ;;  %v19691_v7 = vcombine.low %v8999_v37, %v9007_v58 }
 0x9dd   : > { %16673 = vmatpush1.bf16.msra.mxu1 %v19787_v20  ;;  %16633 = vmatprep.subr.bf16.mxu0 %v19516_v11  ;;  %v9263_v47 = vld [vmem:[%s22413_s18 + $0x2658] sm:$0xff] }
 0x9de   : > { %16674 = vmatprep.subr.bf16.mxu1 %v19772_v30  ;;  %v19948_v1 = vcombine.high %v9255_v27, %v9263_v47  ;;  %v8983_v33 = vld [vmem:[%s22413_s18 + $0x1d98] sm:$0xff]  ;;  %v19947_v24 = vcombine.low %v9255_v27, %v9263_v47 }
 0x9df   : > { %v8991_v20 = vld [vmem:[%s22413_s18 + $0x1dd8] sm:$0xff] }
 0x9e0   : > { %16634 = vmatpush1.bf16.msra.mxu0 %v19515_v26  ;;  %v9239_v11 = vld [vmem:[%s22413_s18 + $0x2598] sm:$0xff]  ;;  %v19676_v29 = vcombine.high %v8983_v33, %v8991_v20  ;;  %v19675_v32 = vcombine.low %v8983_v33, %v8991_v20 }
 0x9e1   : > { %16675 = vmatpush1.bf16.msra.mxu1 %v19771_v59  ;;  %16635 = vmatprep.subr.bf16.mxu0 %v19500_v19  ;;  %v9247_v30 = vld [vmem:[%s22413_s18 + $0x25d8] sm:$0xff] }
 0x9e2   : > { %16676 = vmatprep.subr.bf16.mxu1 %v19756_v3  ;;  %v19932_v23 = vcombine.high %v9239_v11, %v9247_v30  ;;  %v8967_v26 = vld [vmem:[%s22413_s18 + $0x1d18] sm:$0xff]  ;;  %v19931_v35 = vcombine.low %v9239_v11, %v9247_v30 }
 0x9e3   : > { %v8975_v59 = vld [vmem:[%s22413_s18 + $0x1d58] sm:$0xff] }
 0x9e4   : > { %16636 = vmatpush1.bf16.msra.mxu0 %v19499_v0  ;;  %v9223_v19 = vld [vmem:[%s22413_s18 + $0x2518] sm:$0xff]  ;;  %v19660_v43 = vcombine.high %v8967_v26, %v8975_v59  ;;  %v19659_v55 = vcombine.low %v8967_v26, %v8975_v59  ;;  %v8384_v26 = vld [vmem:[%s22413_s18 + $0xae0] sm:$0xff] }
 0x9e5   : > { %16677 = vmatpush1.bf16.msra.mxu1 %v19755_v8  ;;  %16637 = vmatprep.subr.bf16.mxu0 %v19740_v45  ;;  %v9231_v3 = vld [vmem:[%s22413_s18 + $0x2558] sm:$0xff] }
 0x9e6   : > { %16678 = vmatprep.subr.bf16.mxu1 %v19996_v50  ;;  %v19916_v56 = vcombine.high %v9223_v19, %v9231_v3  ;;  %v8951_v0 = vld [vmem:[%s22413_s18 + $0x1c98] sm:$0xff]  ;;  %v19915_v57 = vcombine.low %v9223_v19, %v9231_v3 }
 0x9e7   : > { %v8959_v8 = vld [vmem:[%s22413_s18 + $0x1cd8] sm:$0xff] }
 0x9e8   : > { %16638 = vmatpush2.bf16.msra.mxu0 %v19739_v42  ;;  %v9207_v45 = vld [vmem:[%s22413_s18 + $0x2498] sm:$0xff]  ;;  %v19644_v34 = vcombine.high %v8951_v0, %v8959_v8  ;;  %v19643_v61 = vcombine.low %v8951_v0, %v8959_v8 }
 0x9e9   : > { %16679 = vmatpush2.bf16.msra.mxu1 %v19995_v53  ;;  %16639 = vmatprep.subr.bf16.mxu0 %v19724_v63  ;;  %v9215_v50 = vld [vmem:[%s22413_s18 + $0x24d8] sm:$0xff] }
 0x9ea   : > { %16680 = vmatprep.subr.bf16.mxu1 %v19980_v2  ;;  %v19900_v10 = vcombine.high %v9207_v45, %v9215_v50  ;;  %v8935_v42 = vld [vmem:[%s22413_s18 + $0x1c18] sm:$0xff]  ;;  %v19899_v51 = vcombine.low %v9207_v45, %v9215_v50  ;;  %v8104_v45 = vld [vmem:[%s22413_s18 + $0x220] sm:$0xff] }
 0x9eb   : > { %v8943_v53 = vld [vmem:[%s22413_s18 + $0x1c58] sm:$0xff]  ;;  %v8112_v50 = vld [vmem:[%s22413_s18 + $0x260] sm:$0xff] }
 0x9ec   : > { %16640 = vmatpush2.bf16.msra.mxu0 %v19723_v48  ;;  %v9191_v63 = vld [vmem:[%s22413_s18 + $0x2418] sm:$0xff]  ;;  %v19628_v5 = vcombine.high %v8935_v42, %v8943_v53  ;;  %v8152_v48 = vld [vmem:[%s22413_s18 + $0x3a0] sm:$0xff]  ;;  %v19627_v37 = vcombine.low %v8935_v42, %v8943_v53 }
 0x9ed   : > { %16681 = vmatpush2.bf16.msra.mxu1 %v19979_v6  ;;  %16641 = vmatprep.subr.bf16.mxu0 %v19708_v9  ;;  %v9199_v2 = vld [vmem:[%s22413_s18 + $0x2458] sm:$0xff]  ;;  %v8160_v6 = vld [vmem:[%s22413_s18 + $0x3e0] sm:$0xff] }
 0x9ee   : > { %16682 = vmatprep.subr.bf16.mxu1 %v19964_v13  ;;  %v19884_v52 = vcombine.high %v9191_v63, %v9199_v2  ;;  %v8408_v9 = vld [vmem:[%s22413_s18 + $0xba0] sm:$0xff]  ;;  %v19883_v58 = vcombine.low %v9191_v63, %v9199_v2  ;;  %v18846_v27 = vcombine.high %v8152_v48, %v8160_v6  ;;  %v18845_v33 = vcombine.low %v8152_v48, %v8160_v6 }
 0x9ef   : > { %v8416_v13 = vld [vmem:[%s22413_s18 + $0xbe0] sm:$0xff]  ;;  %v18798_v2 = vcombine.high %v8104_v45, %v8112_v50 }
 0x9f0   : > { %16642 = vmatpush2.bf16.msra.mxu0 %v19707_v44  ;;  %v19102_v47 = vcombine.high %v8408_v9, %v8416_v13  ;;  %v8136_v44 = vld [vmem:[%s22413_s18 + $0x320] sm:$0xff]  ;;  %v19101_v20 = vcombine.low %v8408_v9, %v8416_v13  ;;  %v18797_v9 = vcombine.low %v8104_v45, %v8112_v50 }
 0x9f1   : > { %16683 = vmatpush2.bf16.msra.mxu1 %v19963_v54  ;;  %16643 = vmatprep.subr.bf16.mxu0 %v19692_v41  ;;  %v8144_v54 = vld [vmem:[%s22413_s18 + $0x360] sm:$0xff] }
 0x9f2   : > { %16684 = vmatprep.subr.bf16.mxu1 %v19948_v1  ;;  %v8392_v41 = vld [vmem:[%s22413_s18 + $0xb20] sm:$0xff]  ;;  %v18830_v11 = vcombine.high %v8136_v44, %v8144_v54  ;;  %v18829_v3 = vcombine.low %v8136_v44, %v8144_v54 }
 0x9f3   : > { %v8400_v1 = vld [vmem:[%s22413_s18 + $0xb60] sm:$0xff] }
 0x9f4   : > { %16644 = vmatpush2.bf16.msra.mxu0 %v19691_v7  ;;  %v19086_v30 = vcombine.high %v8392_v41, %v8400_v1  ;;  %v8120_v7 = vld [vmem:[%s22413_s18 + $0x2a0] sm:$0xff] }
 0x9f5   : > { %16685 = vmatpush2.bf16.msra.mxu1 %v19947_v24  ;;  %16645 = vmatprep.subr.bf16.mxu0 %v19676_v29  ;;  %v8128_v24 = vld [vmem:[%s22413_s18 + $0x2e0] sm:$0xff] }
 0x9f6   : > { %16686 = vmatprep.subr.bf16.mxu1 %v19932_v23  ;;  %v8376_v23 = vld [vmem:[%s22413_s18 + $0xaa0] sm:$0xff] }
 0x9f7   : > { %v19069_v63 = vcombine.low %v8376_v23, %v8384_v26  ;;  %v8344_v48 = vld [vmem:[%s22413_s18 + $0x9a0] sm:$0xff] }
 0x9f8   : > { %16646 = vmatpush2.bf16.msra.mxu0 %v19675_v32  ;;  %v8352_v6 = vld [vmem:[%s22413_s18 + $0x9e0] sm:$0xff] }
 0x9f9   : > { %16687 = vmatpush2.bf16.msra.mxu1 %v19931_v35  ;;  %16647 = vmatprep.subr.bf16.mxu0 %v19660_v43  ;;  %v19085_v35 = vcombine.low %v8392_v41, %v8400_v1  ;;  %v18814_v43 = vcombine.high %v8120_v7, %v8128_v24  ;;  %v8328_v44 = vld [vmem:[%s22413_s18 + $0x920] sm:$0xff]  ;;  %v19037_v1 = vcombine.low %v8344_v48, %v8352_v6 }
 0x9fa   : > { %16688 = vmatprep.subr.bf16.mxu1 %v19916_v56  ;;  %v8336_v54 = vld [vmem:[%s22413_s18 + $0x960] sm:$0xff] }
 0x9fb   : > { %v8280_v45 = vld [vmem:[%s22413_s18 + $0x7a0] sm:$0xff] }
 0x9fc   : > { %16648 = vmatpush2.bf16.msra.mxu0 %v19659_v55  ;;  %v8288_v50 = vld [vmem:[%s22413_s18 + $0x7e0] sm:$0xff] }
 0x9fd   : > { %16689 = vmatpush2.bf16.msra.mxu1 %v19915_v57  ;;  %16649 = vmatprep.subr.bf16.mxu0 %v19644_v34  ;;  %v8360_v57 = vld [vmem:[%s22413_s18 + $0xa20] sm:$0xff] }
 0x9fe   : > { %16690 = vmatprep.subr.bf16.mxu1 %v19900_v10  ;;  %v8368_v34 = vld [vmem:[%s22413_s18 + $0xa60] sm:$0xff] }
 0x9ff   : > { %v19053_v13 = vcombine.low %v8360_v57, %v8368_v34 }
 0xa00   : > { %16650 = vmatpush2.bf16.msra.mxu0 %v19643_v61 }
 0xa01   : > { %16691 = vmatpush2.bf16.msra.mxu1 %v19899_v51  ;;  %16651 = vmatprep.subr.bf16.mxu0 %v19628_v5  ;;  %v19054_v51 = vcombine.high %v8360_v57, %v8368_v34  ;;  %v8088_v5 = vld [vmem:[%s22413_s18 + $0x1a0] sm:$0xff] }
 0xa02   : > { %16692 = vmatprep.subr.bf16.mxu1 %v19884_v52  ;;  %v8096_v52 = vld [vmem:[%s22413_s18 + $0x1e0] sm:$0xff] }
 0xa03   : > { %v18781_v41 = vcombine.low %v8088_v5, %v8096_v52  ;;  %v8544_v57 = vld [vmem:[%s22413_s18 + $0xfe0] sm:$0xff] }
 0xa04   : > { %16652 = vmatpush2.bf16.msra.mxu0 %v19627_v37  ;;  %v18782_v37 = vcombine.high %v8088_v5, %v8096_v52  ;;  %v18973_v5 = vcombine.low %v8280_v45, %v8288_v50 }
 0xa05   : > { %16693 = vmatpush2.bf16.msra.mxu1 %v19883_v58  ;;  %16703 = vmatprep.subr.bf16.mxu0 %v18846_v27  ;;  %v19038_v58 = vcombine.high %v8344_v48, %v8352_v6  ;;  %v8072_v27 = vld [vmem:[%s22413_s18 + $0x120] sm:$0xff] }
 0xa06   : > { %16744 = vmatprep.subr.bf16.mxu1 %v19102_v47  ;;  %v8080_v47 = vld [vmem:[%s22413_s18 + $0x160] sm:$0xff] }
 0xa07   : > { %v16409_v29 = vpop.f32.mrf.mxu0  ;;  %16654 = vmatmul.mubr.bf16.vlgmr.msra.gmra.mxu0 %v23696_v15 }
 0xa08   : > { %v16410_v59 = vadd.f32 %v16409_v29, %v24258_v60  ;;  %v16450_v19 = vpop.f32.mrf.mxu1  ;;  %16695 = vmatmul.mubr.bf16.vlgmr.msra.gmra.mxu1 %v23769_v28  ;;  %16704 = vmatpush1.bf16.msra.mxu0 %v18845_v33  ;;  %v19070_v60 = vcombine.high %v8376_v23, %v8384_v26  ;;  %v18766_v33 = vcombine.high %v8072_v27, %v8080_v47 }
 0xa09   : > { %16745 = vmatpush1.bf16.msra.mxu1 %v19101_v20  ;;  %v16411_v32 = vpop.f32.mrf.mxu0  ;;  %16705 = vmatprep.subr.bf16.mxu0 %v18830_v11  ;;  %v19022_v20 = vcombine.high %v8328_v44, %v8336_v54  ;;  %v8056_v11 = vld [vmem:[%s22413_s18 + $0xa0] sm:$0xff]  ;;  %v18765_v29 = vcombine.low %v8072_v27, %v8080_v47  ;;  %v19021_v23 = vcombine.low %v8328_v44, %v8336_v54 }
 0xa0a   : > { %v24331_v56 = vadd.f32 %v16450_v19, %v16410_v59  ;;  %v16412_v0 = vadd.f32 %v16411_v32, %v24266_v46  ;;  %v16452_v8 = vpop.f32.mrf.mxu1  ;;  %16746 = vmatprep.subr.bf16.mxu1 %v19086_v30  ;;  %16735 = vmatprep.mubr.bf16.mxu0 %v23552_v25  ;;  %v18813_v46 = vcombine.low %v8120_v7, %v8128_v24  ;;  %v8064_v30 = vld [vmem:[%s22413_s18 + $0xe0] sm:$0xff] }
 0xa0b   : > { %v16413_v55 = vpop.f32.mrf.mxu0  ;;  %16776 = vmatprep.mubr.bf16.mxu1 %v23559_v21  ;;  %v8312_v7 = vld [vmem:[%s22413_s18 + $0x8a0] sm:$0xff]  ;;  %v18750_v26 = vcombine.high %v8056_v11, %v8064_v30 }
 0xa0c   : > { %v24340_v10 = vadd.f32 %v16452_v8, %v16412_v0  ;;  %v16454_v42 = vpop.f32.mrf.mxu1  ;;  %16706 = vmatpush1.bf16.msra.mxu0 %v18829_v3  ;;  %v8320_v24 = vld [vmem:[%s22413_s18 + $0x8e0] sm:$0xff] }
 0xa0d   : > { %16747 = vmatpush1.bf16.msra.mxu1 %v19085_v35  ;;  %v16414_v53 = vpop.f32.mrf.mxu0  ;;  %16707 = vmatprep.subr.bf16.mxu0 %v18814_v43  ;;  %v19006_v59 = vcombine.high %v8312_v7, %v8320_v24  ;;  %v8040_v19 = vld [vmem:[%s22413_s18 + $0x20] sm:$0xff]  ;;  %v18749_v43 = vcombine.low %v8056_v11, %v8064_v30  ;;  %v19005_v0 = vcombine.low %v8312_v7, %v8320_v24 }
 0xa0e   : > { %v16455_v61 = vpop.f32.mrf.mxu1  ;;  %16748 = vmatprep.subr.bf16.mxu1 %v19070_v60  ;;  %v8048_v3 = vld [vmem:[%s22413_s18 + $0x60] sm:$0xff] }
 0xa0f   : > { %v8296_v32 = vld [vmem:[%s22413_s18 + $0x820] sm:$0xff]  ;;  %v18734_v8 = vcombine.high %v8040_v19, %v8048_v3  ;;  %v18733_v34 = vcombine.low %v8040_v19, %v8048_v3 }
 0xa10   : > { %16708 = vmatpush1.bf16.msra.mxu0 %v18813_v46  ;;  %v8304_v35 = vld [vmem:[%s22413_s18 + $0x860] sm:$0xff]  ;;  %v18974_v46 = vcombine.high %v8280_v45, %v8288_v50 }
 0xa11   : > { %16749 = vmatpush1.bf16.msra.mxu1 %v19069_v63  ;;  %16709 = vmatprep.subr.bf16.mxu0 %v18798_v2  ;;  %v18990_v60 = vcombine.high %v8296_v32, %v8304_v35  ;;  %v8536_v55 = vld [vmem:[%s22413_s18 + $0xfa0] sm:$0xff]  ;;  %v18989_v42 = vcombine.low %v8296_v32, %v8304_v35 }
 0xa12   : > { %16750 = vmatprep.subr.bf16.mxu1 %v19054_v51  ;;  %v19230_v53 = vcombine.high %v8536_v55, %v8544_v57  ;;  %v8264_v63 = vld [vmem:[%s22413_s18 + $0x720] sm:$0xff]  ;;  %v19229_v52 = vcombine.low %v8536_v55, %v8544_v57 }
 0xa13   : > { %v8272_v2 = vld [vmem:[%s22413_s18 + $0x760] sm:$0xff] }
 0xa14   : > { %16710 = vmatpush1.bf16.msra.mxu0 %v18797_v9  ;;  %v8520_v61 = vld [vmem:[%s22413_s18 + $0xf20] sm:$0xff]  ;;  %v18958_v48 = vcombine.high %v8264_v63, %v8272_v2  ;;  %v18957_v27 = vcombine.low %v8264_v63, %v8272_v2 }
 0xa15   : > { %16751 = vmatpush1.bf16.msra.mxu1 %v19053_v13  ;;  %16711 = vmatprep.subr.bf16.mxu0 %v18782_v37  ;;  %v8528_v51 = vld [vmem:[%s22413_s18 + $0xf60] sm:$0xff] }
 0xa16   : > { %16752 = vmatprep.subr.bf16.mxu1 %v19038_v58  ;;  %v19214_v6 = vcombine.high %v8520_v61, %v8528_v51  ;;  %v8248_v9 = vld [vmem:[%s22413_s18 + $0x6a0] sm:$0xff]  ;;  %v19213_v47 = vcombine.low %v8520_v61, %v8528_v51 }
 0xa17   : > { %v8256_v13 = vld [vmem:[%s22413_s18 + $0x6e0] sm:$0xff] }
 0xa18   : > { %16712 = vmatpush1.bf16.msra.mxu0 %v18781_v41  ;;  %v8504_v37 = vld [vmem:[%s22413_s18 + $0xea0] sm:$0xff]  ;;  %v18942_v44 = vcombine.high %v8248_v9, %v8256_v13  ;;  %v18941_v11 = vcombine.low %v8248_v9, %v8256_v13 }
 0xa19   : > { %16753 = vmatpush1.bf16.msra.mxu1 %v19037_v1  ;;  %16713 = vmatprep.subr.bf16.mxu0 %v18766_v33  ;;  %v8512_v58 = vld [vmem:[%s22413_s18 + $0xee0] sm:$0xff] }
 0xa1a   : > { %16754 = vmatprep.subr.bf16.mxu1 %v19022_v20  ;;  %v19198_v54 = vcombine.high %v8504_v37, %v8512_v58  ;;  %v8232_v41 = vld [vmem:[%s22413_s18 + $0x620] sm:$0xff]  ;;  %v19197_v30 = vcombine.low %v8504_v37, %v8512_v58 }
 0xa1b   : > { %v8240_v1 = vld [vmem:[%s22413_s18 + $0x660] sm:$0xff] }
 0xa1c   : > { %16714 = vmatpush1.bf16.msra.mxu0 %v18765_v29  ;;  %v8488_v33 = vld [vmem:[%s22413_s18 + $0xe20] sm:$0xff]  ;;  %v18926_v7 = vcombine.high %v8232_v41, %v8240_v1  ;;  %v18925_v19 = vcombine.low %v8232_v41, %v8240_v1 }
 0xa1d   : > { %16755 = vmatpush1.bf16.msra.mxu1 %v19021_v23  ;;  %16715 = vmatprep.subr.bf16.mxu0 %v18750_v26  ;;  %v8496_v20 = vld [vmem:[%s22413_s18 + $0xe60] sm:$0xff] }
 0xa1e   : > { %16756 = vmatprep.subr.bf16.mxu1 %v19006_v59  ;;  %v19182_v24 = vcombine.high %v8488_v33, %v8496_v20  ;;  %v8216_v29 = vld [vmem:[%s22413_s18 + $0x5a0] sm:$0xff]  ;;  %v19181_v3 = vcombine.low %v8488_v33, %v8496_v20 }
 0xa1f   : > { %v8224_v23 = vld [vmem:[%s22413_s18 + $0x5e0] sm:$0xff] }
 0xa20   : > { %16716 = vmatpush1.bf16.msra.mxu0 %v18749_v43  ;;  %v8472_v26 = vld [vmem:[%s22413_s18 + $0xda0] sm:$0xff]  ;;  %v18910_v32 = vcombine.high %v8216_v29, %v8224_v23  ;;  %v18909_v45 = vcombine.low %v8216_v29, %v8224_v23 }
 0xa21   : > { %16757 = vmatpush1.bf16.msra.mxu1 %v19005_v0  ;;  %16717 = vmatprep.subr.bf16.mxu0 %v18734_v8  ;;  %v8480_v59 = vld [vmem:[%s22413_s18 + $0xde0] sm:$0xff] }
 0xa22   : > { %16758 = vmatprep.subr.bf16.mxu1 %v18990_v60  ;;  %v19166_v35 = vcombine.high %v8472_v26, %v8480_v59  ;;  %v8200_v43 = vld [vmem:[%s22413_s18 + $0x520] sm:$0xff]  ;;  %v19165_v50 = vcombine.low %v8472_v26, %v8480_v59 }
 0xa23   : > { %v8208_v0 = vld [vmem:[%s22413_s18 + $0x560] sm:$0xff] }
 0xa24   : > { %16718 = vmatpush1.bf16.msra.mxu0 %v18733_v34  ;;  %v8456_v8 = vld [vmem:[%s22413_s18 + $0xd20] sm:$0xff]  ;;  %v18894_v55 = vcombine.high %v8200_v43, %v8208_v0  ;;  %v18893_v63 = vcombine.low %v8200_v43, %v8208_v0 }
 0xa25   : > { %16759 = vmatpush1.bf16.msra.mxu1 %v18989_v42  ;;  %16719 = vmatprep.subr.bf16.mxu0 %v18974_v46  ;;  %v8464_v60 = vld [vmem:[%s22413_s18 + $0xd60] sm:$0xff] }
 0xa26   : > { %16760 = vmatprep.subr.bf16.mxu1 %v19230_v53  ;;  %v19150_v57 = vcombine.high %v8456_v8, %v8464_v60  ;;  %v8184_v34 = vld [vmem:[%s22413_s18 + $0x4a0] sm:$0xff]  ;;  %v19149_v2 = vcombine.low %v8456_v8, %v8464_v60 }
 0xa27   : > { %v8192_v42 = vld [vmem:[%s22413_s18 + $0x4e0] sm:$0xff] }
 0xa28   : > { %16720 = vmatpush2.bf16.msra.mxu0 %v18973_v5  ;;  %v8440_v46 = vld [vmem:[%s22413_s18 + $0xca0] sm:$0xff]  ;;  %v18878_v61 = vcombine.high %v8184_v34, %v8192_v42  ;;  %v18877_v9 = vcombine.low %v8184_v34, %v8192_v42 }
 0xa29   : > { %16761 = vmatpush2.bf16.msra.mxu1 %v19229_v52  ;;  %16721 = vmatprep.subr.bf16.mxu0 %v18958_v48  ;;  %v8448_v53 = vld [vmem:[%s22413_s18 + $0xce0] sm:$0xff] }
 0xa2a   : > { %16762 = vmatprep.subr.bf16.mxu1 %v19214_v6  ;;  %v19134_v51 = vcombine.high %v8440_v46, %v8448_v53  ;;  %v8168_v5 = vld [vmem:[%s22413_s18 + $0x420] sm:$0xff]  ;;  %v19133_v13 = vcombine.low %v8440_v46, %v8448_v53 }
 0xa2b   : > { %v8176_v52 = vld [vmem:[%s22413_s18 + $0x460] sm:$0xff] }
 0xa2c   : > { %16722 = vmatpush2.bf16.msra.mxu0 %v18957_v27  ;;  %v8424_v48 = vld [vmem:[%s22413_s18 + $0xc20] sm:$0xff]  ;;  %v18862_v37 = vcombine.high %v8168_v5, %v8176_v52  ;;  %v18861_v41 = vcombine.low %v8168_v5, %v8176_v52 }
 0xa2d   : > { %16763 = vmatpush2.bf16.msra.mxu1 %v19213_v47  ;;  %16723 = vmatprep.subr.bf16.mxu0 %v18942_v44  ;;  %v8432_v6 = vld [vmem:[%s22413_s18 + $0xc60] sm:$0xff] }
 0xa2e   : > { %16764 = vmatprep.subr.bf16.mxu1 %v19198_v54  ;;  %v19118_v58 = vcombine.high %v8424_v48, %v8432_v6  ;;  %v8664_v27 = vld [vmem:[%s22413_s18 + $0x13a0] sm:$0xff]  ;;  %v19117_v1 = vcombine.low %v8424_v48, %v8432_v6 }
 0xa2f   : > { %v8672_v47 = vld [vmem:[%s22413_s18 + $0x13e0] sm:$0xff] }
 0xa30   : > { %16724 = vmatpush2.bf16.msra.mxu0 %v18941_v11  ;;  %v8920_v44 = vld [vmem:[%s22413_s18 + $0x1ba0] sm:$0xff]  ;;  %v19358_v33 = vcombine.high %v8664_v27, %v8672_v47  ;;  %v19357_v29 = vcombine.low %v8664_v27, %v8672_v47 }
 0xa31   : > { %16765 = vmatpush2.bf16.msra.mxu1 %v19197_v30  ;;  %16725 = vmatprep.subr.bf16.mxu0 %v18926_v7  ;;  %v8928_v54 = vld [vmem:[%s22413_s18 + $0x1be0] sm:$0xff] }
 0xa32   : > { %16766 = vmatprep.subr.bf16.mxu1 %v19182_v24  ;;  %v19614_v20 = vcombine.high %v8920_v44, %v8928_v54  ;;  %v8648_v11 = vld [vmem:[%s22413_s18 + $0x1320] sm:$0xff]  ;;  %v19613_v23 = vcombine.low %v8920_v44, %v8928_v54 }
 0xa33   : > { %v8656_v30 = vld [vmem:[%s22413_s18 + $0x1360] sm:$0xff] }
 0xa34   : > { %16726 = vmatpush2.bf16.msra.mxu0 %v18925_v19  ;;  %v8904_v7 = vld [vmem:[%s22413_s18 + $0x1b20] sm:$0xff]  ;;  %v19342_v26 = vcombine.high %v8648_v11, %v8656_v30  ;;  %v19341_v60 = vcombine.low %v8648_v11, %v8656_v30 }
 0xa35   : > { %16767 = vmatpush2.bf16.msra.mxu1 %v19181_v3  ;;  %16727 = vmatprep.subr.bf16.mxu0 %v18910_v32  ;;  %v8912_v24 = vld [vmem:[%s22413_s18 + $0x1b60] sm:$0xff] }
 0xa36   : > { %16768 = vmatprep.subr.bf16.mxu1 %v19166_v35  ;;  %v19598_v59 = vcombine.high %v8904_v7, %v8912_v24  ;;  %v8632_v19 = vld [vmem:[%s22413_s18 + $0x12a0] sm:$0xff] }
 0xa37   : > { %v8640_v3 = vld [vmem:[%s22413_s18 + $0x12e0] sm:$0xff] }
 0xa38   : > { %16728 = vmatpush2.bf16.msra.mxu0 %v18909_v45  ;;  %v8888_v35 = vld [vmem:[%s22413_s18 + $0x1aa0] sm:$0xff] }
 0xa39   : > { %16769 = vmatpush2.bf16.msra.mxu1 %v19165_v50  ;;  %16729 = vmatprep.subr.bf16.mxu0 %v18894_v55  ;;  %v8896_v43 = vld [vmem:[%s22413_s18 + $0x1ae0] sm:$0xff]  ;;  %v19597_v50 = vcombine.low %v8904_v7, %v8912_v24  ;;  %v19326_v55 = vcombine.high %v8632_v19, %v8640_v3 }
 0xa3a   : > { %16770 = vmatprep.subr.bf16.mxu1 %v19150_v57  ;;  %v8616_v42 = vld [vmem:[%s22413_s18 + $0x1220] sm:$0xff]  ;;  %v19581_v52 = vcombine.low %v8888_v35, %v8896_v43 }
 0xa3b   : > { %v8624_v46 = vld [vmem:[%s22413_s18 + $0x1260] sm:$0xff] }
 0xa3c   : > { %16730 = vmatpush2.bf16.msra.mxu0 %v18893_v63  ;;  %v8872_v63 = vld [vmem:[%s22413_s18 + $0x1a20] sm:$0xff]  ;;  %v19310_v48 = vcombine.high %v8616_v42, %v8624_v46  ;;  %v19309_v47 = vcombine.low %v8616_v42, %v8624_v46 }
 0xa3d   : > { %16771 = vmatpush2.bf16.msra.mxu1 %v19149_v2  ;;  %16731 = vmatprep.subr.bf16.mxu0 %v18878_v61  ;;  %v8880_v2 = vld [vmem:[%s22413_s18 + $0x1a60] sm:$0xff] }
 0xa3e   : > { %16772 = vmatprep.subr.bf16.mxu1 %v19134_v51  ;;  %v19325_v51 = vcombine.low %v8632_v19, %v8640_v3  ;;  %v8864_v27 = vld [vmem:[%s22413_s18 + $0x19e0] sm:$0xff]  ;;  %v19565_v44 = vcombine.low %v8872_v63, %v8880_v2 }
 0xa3f   : > { %v8848_v11 = vld [vmem:[%s22413_s18 + $0x1960] sm:$0xff] }
 0xa40   : > { %16732 = vmatpush2.bf16.msra.mxu0 %v18877_v9  ;;  %v19566_v9 = vcombine.high %v8872_v63, %v8880_v2  ;;  %v8832_v19 = vld [vmem:[%s22413_s18 + $0x18e0] sm:$0xff] }
 0xa41   : > { %16773 = vmatpush2.bf16.msra.mxu1 %v19133_v13  ;;  %16733 = vmatprep.subr.bf16.mxu0 %v18862_v37  ;;  %v8600_v13 = vld [vmem:[%s22413_s18 + $0x11a0] sm:$0xff] }
 0xa42   : > { %16774 = vmatprep.subr.bf16.mxu1 %v19118_v58  ;;  %v8608_v37 = vld [vmem:[%s22413_s18 + $0x11e0] sm:$0xff] }
 0xa43   : > { %v8856_v58 = vld [vmem:[%s22413_s18 + $0x19a0] sm:$0xff]  ;;  %v19294_v54 = vcombine.high %v8600_v13, %v8608_v37  ;;  %v19293_v30 = vcombine.low %v8600_v13, %v8608_v37 }
 0xa44   : > { %16734 = vmatpush2.bf16.msra.mxu0 %v18861_v41  ;;  %v19550_v41 = vcombine.high %v8856_v58, %v8864_v27  ;;  %v19549_v7 = vcombine.low %v8856_v58, %v8864_v27  ;;  %v8792_v63 = vld [vmem:[%s22413_s18 + $0x17a0] sm:$0xff] }
 0xa45   : > { %16775 = vmatpush2.bf16.msra.mxu1 %v19117_v1  ;;  %16785 = vmatprep.subr.bf16.mxu0 %v19358_v33  ;;  %v8584_v1 = vld [vmem:[%s22413_s18 + $0x1120] sm:$0xff] }
 0xa46   : > { %16826 = vmatprep.subr.bf16.mxu1 %v19614_v20  ;;  %v8592_v33 = vld [vmem:[%s22413_s18 + $0x1160] sm:$0xff] }
 0xa47   : > { %v16491_v32 = vpop.f32.mrf.mxu0  ;;  %16736 = vmatmul.mubr.bf16.vlgmr.msra.gmra.mxu0 %v23605_v22  ;;  %v8840_v20 = vld [vmem:[%s22413_s18 + $0x1920] sm:$0xff]  ;;  %v19278_v24 = vcombine.high %v8584_v1, %v8592_v33  ;;  %v19277_v3 = vcombine.low %v8584_v1, %v8592_v33 }
 0xa48   : > { %v24404_v0 = vadd.f32 %v16491_v32, %v24331_v56  ;;  %v24406_v8 = vpop.f32.mrf.mxu1  ;;  %16777 = vmatmul.mubr.bf16.vlgmr.msra.gmra.mxu1 %v23616_v14  ;;  %16786 = vmatpush1.bf16.msra.mxu0 %v19357_v29  ;;  %v19582_v56 = vcombine.high %v8888_v35, %v8896_v43  ;;  %v19534_v29 = vcombine.high %v8840_v20, %v8848_v11  ;;  %v8800_v2 = vld [vmem:[%s22413_s18 + $0x17e0] sm:$0xff] }
 0xa49   : > { %16827 = vmatpush1.bf16.msra.mxu1 %v19613_v23  ;;  %v16493_v45 = vpop.f32.mrf.mxu0  ;;  %16787 = vmatprep.subr.bf16.mxu0 %v19342_v26  ;;  %v8568_v23 = vld [vmem:[%s22413_s18 + $0x10a0] sm:$0xff]  ;;  %v19533_v32 = vcombine.low %v8840_v20, %v8848_v11  ;;  %v19485_v27 = vcombine.low %v8792_v63, %v8800_v2 }
 0xa4a   : > { %v24410_v57 = vadd.f32 %v16493_v45, %v24340_v10  ;;  %v24412_v34 = vpop.f32.mrf.mxu1  ;;  %16828 = vmatprep.subr.bf16.mxu1 %v19598_v59  ;;  %16817 = vmatprep.mubr.bf16.mxu0 %v23612_v4  ;;  %v8576_v26 = vld [vmem:[%s22413_s18 + $0x10e0] sm:$0xff] }
 0xa4b   : > { %v16495_v53 = vpop.f32.mrf.mxu0  ;;  %16858 = vmatprep.mubr.bf16.mxu1 %v23625_v36  ;;  %v8824_v59 = vld [vmem:[%s22413_s18 + $0x18a0] sm:$0xff]  ;;  %v19262_v35 = vcombine.high %v8568_v23, %v8576_v26 }
 0xa4c   : > { %v17556_v10 = vcombine.low %v24404_v0, %v24410_v57  ;;  %v16536_v61 = vpop.f32.mrf.mxu1  ;;  %16788 = vmatpush1.bf16.msra.mxu0 %v19341_v60  ;;  %v19518_v43 = vcombine.high %v8824_v59, %v8832_v19  ;;  %v8552_v60 = vld [vmem:[%s22413_s18 + $0x1020] sm:$0xff]  ;;  %v19517_v42 = vcombine.low %v8824_v59, %v8832_v19  ;;  %v8585_v0 = vld [vmem:[%s22413_s18 + $0x1128] sm:$0xff] }
 0xa4d   : > { %16829 = vmatpush1.bf16.msra.mxu1 %v19597_v50  ;;  %v16496_v5 = vpop.f32.mrf.mxu0  ;;  %16789 = vmatprep.subr.bf16.mxu0 %v19326_v55  ;;  %v8560_v45 = vld [vmem:[%s22413_s18 + $0x1060] sm:$0xff]  ;;  %v8593_v57 = vld [vmem:[%s22413_s18 + $0x1168] sm:$0xff] }
 0xa4e   : > { %v16537_v6 = vpop.f32.mrf.mxu1  ;;  %16830 = vmatprep.subr.bf16.mxu1 %v19582_v56  ;;  %v8808_v50 = vld [vmem:[%s22413_s18 + $0x1820] sm:$0xff]  ;;  %v19261_v56 = vcombine.low %v8568_v23, %v8576_v26  ;;  %v19246_v46 = vcombine.high %v8552_v60, %v8560_v45  ;;  %v19245_v5 = vcombine.low %v8552_v60, %v8560_v45 }
 0xa4f   : > { %v8816_v55 = vld [vmem:[%s22413_s18 + $0x1860] sm:$0xff] }
 0xa50   : > { %16790 = vmatpush1.bf16.msra.mxu0 %v19325_v51  ;;  %v19502_v53 = vcombine.high %v8808_v50, %v8816_v55  ;;  %v9048_v61 = vld [vmem:[%s22413_s18 + $0x1fa0] sm:$0xff] }
 0xa51   : > { %16831 = vmatpush1.bf16.msra.mxu1 %v19581_v52  ;;  %16791 = vmatprep.subr.bf16.mxu0 %v19310_v48  ;;  %v9056_v51 = vld [vmem:[%s22413_s18 + $0x1fe0] sm:$0xff]  ;;  %v19501_v52 = vcombine.low %v8808_v50, %v8816_v55  ;;  %v19486_v48 = vcombine.high %v8792_v63, %v8800_v2 }
 0xa52   : > { %16832 = vmatprep.subr.bf16.mxu1 %v19566_v9  ;;  %v19742_v6 = vcombine.high %v9048_v61, %v9056_v51  ;;  %v8776_v9 = vld [vmem:[%s22413_s18 + $0x1720] sm:$0xff] }
 0xa53   : > { %v8784_v13 = vld [vmem:[%s22413_s18 + $0x1760] sm:$0xff] }
 0xa54   : > { %16792 = vmatpush1.bf16.msra.mxu0 %v19309_v47  ;;  %v9032_v37 = vld [vmem:[%s22413_s18 + $0x1f20] sm:$0xff]  ;;  %v19741_v47 = vcombine.low %v9048_v61, %v9056_v51  ;;  %v19469_v11 = vcombine.low %v8776_v9, %v8784_v13 }
 0xa55   : > { %16833 = vmatpush1.bf16.msra.mxu1 %v19565_v44  ;;  %16793 = vmatprep.subr.bf16.mxu0 %v19294_v54  ;;  %v9040_v58 = vld [vmem:[%s22413_s18 + $0x1f60] sm:$0xff]  ;;  %v19470_v44 = vcombine.high %v8776_v9, %v8784_v13 }
 0xa56   : > { %16834 = vmatprep.subr.bf16.mxu1 %v19550_v41  ;;  %v19726_v54 = vcombine.high %v9032_v37, %v9040_v58  ;;  %v8760_v41 = vld [vmem:[%s22413_s18 + $0x16a0] sm:$0xff] }
 0xa57   : > { %v8768_v1 = vld [vmem:[%s22413_s18 + $0x16e0] sm:$0xff] }
 0xa58   : > { %16794 = vmatpush1.bf16.msra.mxu0 %v19293_v30  ;;  %v9016_v33 = vld [vmem:[%s22413_s18 + $0x1ea0] sm:$0xff]  ;;  %v19725_v30 = vcombine.low %v9032_v37, %v9040_v58  ;;  %v19453_v19 = vcombine.low %v8760_v41, %v8768_v1 }
 0xa59   : > { %16835 = vmatpush1.bf16.msra.mxu1 %v19549_v7  ;;  %16795 = vmatprep.subr.bf16.mxu0 %v19278_v24  ;;  %v9024_v20 = vld [vmem:[%s22413_s18 + $0x1ee0] sm:$0xff]  ;;  %v19454_v7 = vcombine.high %v8760_v41, %v8768_v1 }
 0xa5a   : > { %16836 = vmatprep.subr.bf16.mxu1 %v19534_v29  ;;  %v19710_v24 = vcombine.high %v9016_v33, %v9024_v20  ;;  %v8744_v29 = vld [vmem:[%s22413_s18 + $0x1620] sm:$0xff] }
 0xa5b   : > { %v8752_v23 = vld [vmem:[%s22413_s18 + $0x1660] sm:$0xff] }
 0xa5c   : > { %16796 = vmatpush1.bf16.msra.mxu0 %v19277_v3  ;;  %v9000_v26 = vld [vmem:[%s22413_s18 + $0x1e20] sm:$0xff]  ;;  %v19709_v3 = vcombine.low %v9016_v33, %v9024_v20  ;;  %v19437_v55 = vcombine.low %v8744_v29, %v8752_v23 }
 0xa5d   : > { %16837 = vmatpush1.bf16.msra.mxu1 %v19533_v32  ;;  %16797 = vmatprep.subr.bf16.mxu0 %v19262_v35  ;;  %v9008_v59 = vld [vmem:[%s22413_s18 + $0x1e60] sm:$0xff]  ;;  %v19438_v32 = vcombine.high %v8744_v29, %v8752_v23  ;;  %v8153_v23 = vld [vmem:[%s22413_s18 + $0x3a8] sm:$0xff] }
 0xa5e   : > { %16838 = vmatprep.subr.bf16.mxu1 %v19518_v43  ;;  %v19694_v35 = vcombine.high %v9000_v26, %v9008_v59  ;;  %v8728_v43 = vld [vmem:[%s22413_s18 + $0x15a0] sm:$0xff] }
 0xa5f   : > { %v8736_v60 = vld [vmem:[%s22413_s18 + $0x15e0] sm:$0xff] }
 0xa60   : > { %16798 = vmatpush1.bf16.msra.mxu0 %v19261_v56  ;;  %v8984_v45 = vld [vmem:[%s22413_s18 + $0x1da0] sm:$0xff]  ;;  %v19693_v56 = vcombine.low %v9000_v26, %v9008_v59  ;;  %v19421_v51 = vcombine.low %v8728_v43, %v8736_v60  ;;  %v8161_v26 = vld [vmem:[%s22413_s18 + $0x3e8] sm:$0xff] }
 0xa61   : > { %16839 = vmatpush1.bf16.msra.mxu1 %v19517_v42  ;;  %16799 = vmatprep.subr.bf16.mxu0 %v19246_v46  ;;  %v8992_v50 = vld [vmem:[%s22413_s18 + $0x1de0] sm:$0xff]  ;;  %v19422_v42 = vcombine.high %v8728_v43, %v8736_v60  ;;  %v8137_v60 = vld [vmem:[%s22413_s18 + $0x328] sm:$0xff] }
 0xa62   : > { %16840 = vmatprep.subr.bf16.mxu1 %v19502_v53  ;;  %v19678_v46 = vcombine.high %v8984_v45, %v8992_v50  ;;  %v8712_v53 = vld [vmem:[%s22413_s18 + $0x1520] sm:$0xff] }
 0xa63   : > { %v8720_v63 = vld [vmem:[%s22413_s18 + $0x1560] sm:$0xff] }
 0xa64   : > { %16800 = vmatpush1.bf16.msra.mxu0 %v19245_v5  ;;  %v8968_v2 = vld [vmem:[%s22413_s18 + $0x1d20] sm:$0xff]  ;;  %v19677_v5 = vcombine.low %v8984_v45, %v8992_v50  ;;  %v19405_v58 = vcombine.low %v8712_v53, %v8720_v63  ;;  %v8145_v45 = vld [vmem:[%s22413_s18 + $0x368] sm:$0xff] }
 0xa65   : > { %16841 = vmatpush1.bf16.msra.mxu1 %v19501_v52  ;;  %16801 = vmatprep.subr.bf16.mxu0 %v19486_v48  ;;  %v8976_v61 = vld [vmem:[%s22413_s18 + $0x1d60] sm:$0xff]  ;;  %v19406_v52 = vcombine.high %v8712_v53, %v8720_v63 }
 0xa66   : > { %16842 = vmatprep.subr.bf16.mxu1 %v19742_v6  ;;  %v19662_v48 = vcombine.high %v8968_v2, %v8976_v61  ;;  %v8696_v6 = vld [vmem:[%s22413_s18 + $0x14a0] sm:$0xff] }
 0xa67   : > { %v8704_v9 = vld [vmem:[%s22413_s18 + $0x14e0] sm:$0xff] }
 0xa68   : > { %16802 = vmatpush2.bf16.msra.mxu0 %v19485_v27  ;;  %v8952_v13 = vld [vmem:[%s22413_s18 + $0x1ca0] sm:$0xff]  ;;  %v19661_v27 = vcombine.low %v8968_v2, %v8976_v61  ;;  %v19389_v20 = vcombine.low %v8696_v6, %v8704_v9  ;;  %v8121_v2 = vld [vmem:[%s22413_s18 + $0x2a8] sm:$0xff] }
 0xa69   : > { %16843 = vmatpush2.bf16.msra.mxu1 %v19741_v47  ;;  %16803 = vmatprep.subr.bf16.mxu0 %v19470_v44  ;;  %v8960_v37 = vld [vmem:[%s22413_s18 + $0x1ce0] sm:$0xff]  ;;  %v19390_v47 = vcombine.high %v8696_v6, %v8704_v9  ;;  %v8129_v61 = vld [vmem:[%s22413_s18 + $0x2e8] sm:$0xff] }
 0xa6a   : > { %16844 = vmatprep.subr.bf16.mxu1 %v19726_v54  ;;  %v19646_v44 = vcombine.high %v8952_v13, %v8960_v37  ;;  %v8680_v54 = vld [vmem:[%s22413_s18 + $0x1420] sm:$0xff] }
 0xa6b   : > { %v8688_v41 = vld [vmem:[%s22413_s18 + $0x1460] sm:$0xff] }
 0xa6c   : > { %16804 = vmatpush2.bf16.msra.mxu0 %v19469_v11  ;;  %v8936_v1 = vld [vmem:[%s22413_s18 + $0x1c20] sm:$0xff]  ;;  %v19645_v11 = vcombine.low %v8952_v13, %v8960_v37  ;;  %v19373_v59 = vcombine.low %v8680_v54, %v8688_v41  ;;  %v18816_v13 = vcombine.high %v8121_v2, %v8129_v61 }
 0xa6d   : > { %16845 = vmatpush2.bf16.msra.mxu1 %v19725_v30  ;;  %16805 = vmatprep.subr.bf16.mxu0 %v19454_v7  ;;  %v8944_v33 = vld [vmem:[%s22413_s18 + $0x1c60] sm:$0xff]  ;;  %v19374_v30 = vcombine.high %v8680_v54, %v8688_v41 }
 0xa6e   : > { %16846 = vmatprep.subr.bf16.mxu1 %v19710_v24  ;;  %v19630_v7 = vcombine.high %v8936_v1, %v8944_v33  ;;  %v9176_v24 = vld [vmem:[%s22413_s18 + $0x23a0] sm:$0xff] }
 0xa6f   : > { %v9184_v29 = vld [vmem:[%s22413_s18 + $0x23e0] sm:$0xff] }
 0xa70   : > { %16806 = vmatpush2.bf16.msra.mxu0 %v19453_v19  ;;  %v19629_v19 = vcombine.low %v8936_v1, %v8944_v33  ;;  %v9168_v43 = vld [vmem:[%s22413_s18 + $0x2360] sm:$0xff]  ;;  %v19869_v50 = vcombine.low %v9176_v24, %v9184_v29  ;;  %v18815_v33 = vcombine.low %v8121_v2, %v8129_v61  ;;  %v8065_v2 = vld [vmem:[%s22413_s18 + $0xe8] sm:$0xff] }
 0xa71   : > { %16847 = vmatpush2.bf16.msra.mxu1 %v19709_v3  ;;  %16807 = vmatprep.subr.bf16.mxu0 %v19438_v32  ;;  %v19870_v3 = vcombine.high %v9176_v24, %v9184_v29  ;;  %v18848_v32 = vcombine.high %v8153_v23, %v8161_v26  ;;  %v9152_v53 = vld [vmem:[%s22413_s18 + $0x22e0] sm:$0xff]  ;;  %v8089_v29 = vld [vmem:[%s22413_s18 + $0x1a8] sm:$0xff] }
 0xa72   : > { %16848 = vmatprep.subr.bf16.mxu1 %v19694_v35  ;;  %v9160_v35 = vld [vmem:[%s22413_s18 + $0x2320] sm:$0xff] }
 0xa73   : > { %v9128_v37 = vld [vmem:[%s22413_s18 + $0x2220] sm:$0xff] }
 0xa74   : > { %16808 = vmatpush2.bf16.msra.mxu0 %v19437_v55  ;;  %v18847_v55 = vcombine.low %v8153_v23, %v8161_v26  ;;  %v9120_v24 = vld [vmem:[%s22413_s18 + $0x21e0] sm:$0xff]  ;;  %v8097_v23 = vld [vmem:[%s22413_s18 + $0x1e8] sm:$0xff] }
 0xa75   : > { %16849 = vmatpush2.bf16.msra.mxu1 %v19693_v56  ;;  %16809 = vmatprep.subr.bf16.mxu0 %v19422_v42  ;;  %v19854_v56 = vcombine.high %v9160_v35, %v9168_v43  ;;  %v18832_v42 = vcombine.high %v8137_v60, %v8145_v45 }
 0xa76   : > { %16850 = vmatprep.subr.bf16.mxu1 %v19678_v46  ;;  %v9144_v46 = vld [vmem:[%s22413_s18 + $0x22a0] sm:$0xff] }
 0xa77   : > { %v19838_v6 = vcombine.high %v9144_v46, %v9152_v53  ;;  %v19837_v41 = vcombine.low %v9144_v46, %v9152_v53  ;;  %v9088_v46 = vld [vmem:[%s22413_s18 + $0x20e0] sm:$0xff]  ;;  %v8057_v53 = vld [vmem:[%s22413_s18 + $0xa8] sm:$0xff] }
 0xa78   : > { %16810 = vmatpush2.bf16.msra.mxu0 %v19421_v51 }
 0xa79   : > { %16851 = vmatpush2.bf16.msra.mxu1 %v19677_v5  ;;  %16811 = vmatprep.subr.bf16.mxu0 %v19406_v52  ;;  %v19853_v5 = vcombine.low %v9160_v35, %v9168_v43  ;;  %v9104_v35 = vld [vmem:[%s22413_s18 + $0x2160] sm:$0xff]  ;;  %v8073_v43 = vld [vmem:[%s22413_s18 + $0x128] sm:$0xff] }
 0xa7a   : > { %16852 = vmatprep.subr.bf16.mxu1 %v19662_v48  ;;  %v18831_v48 = vcombine.low %v8137_v60, %v8145_v45  ;;  %v8081_v60 = vld [vmem:[%s22413_s18 + $0x168] sm:$0xff] }
 0xa7c   : > { %16812 = vmatpush2.bf16.msra.mxu0 %v19405_v58  ;;  %v9136_v58 = vld [vmem:[%s22413_s18 + $0x2260] sm:$0xff] }
 0xa7d   : > { %16853 = vmatpush2.bf16.msra.mxu1 %v19661_v27  ;;  %16813 = vmatprep.subr.bf16.mxu0 %v19390_v47  ;;  %v8105_v47 = vld [vmem:[%s22413_s18 + $0x228] sm:$0xff]  ;;  %v19821_v26 = vcombine.low %v9128_v37, %v9136_v58 }
 0xa7e   : > { %16854 = vmatprep.subr.bf16.mxu1 %v19646_v44  ;;  %v8113_v44 = vld [vmem:[%s22413_s18 + $0x268] sm:$0xff] }
 0xa80   : > { %16814 = vmatpush2.bf16.msra.mxu0 %v19389_v20  ;;  %v19822_v20 = vcombine.high %v9128_v37, %v9136_v58  ;;  %v9072_v37 = vld [vmem:[%s22413_s18 + $0x2060] sm:$0xff]  ;;  %v8041_v58 = vld [vmem:[%s22413_s18 + $0x28] sm:$0xff] }
 0xa81   : > { %16855 = vmatpush2.bf16.msra.mxu1 %v19645_v11  ;;  %16815 = vmatprep.subr.bf16.mxu0 %v19374_v30  ;;  %v18800_v30 = vcombine.high %v8105_v47, %v8113_v44 }
 0xa82   : > { %16856 = vmatprep.subr.bf16.mxu1 %v19630_v7  ;;  %v9112_v7 = vld [vmem:[%s22413_s18 + $0x21a0] sm:$0xff] }
 0xa83   : > { %v19805_v45 = vcombine.low %v9112_v7, %v9120_v24 }
 0xa84   : > { %16816 = vmatpush2.bf16.msra.mxu0 %v19373_v59  ;;  %v18799_v59 = vcombine.low %v8105_v47, %v8113_v44  ;;  %v18751_v44 = vcombine.low %v8057_v53, %v8065_v2 }
 0xa85   : > { %16857 = vmatpush2.bf16.msra.mxu1 %v19629_v19  ;;  %16867 = vmatprep.subr.bf16.mxu0 %v19870_v3  ;;  %v19806_v19 = vcombine.high %v9112_v7, %v9120_v24  ;;  %v18784_v3 = vcombine.high %v8089_v29, %v8097_v23 }
 0xa86   : > { %16908 = vmatprep.subr.bf16.mxu1 %v18848_v32  ;;  %v9096_v32 = vld [vmem:[%s22413_s18 + $0x2120] sm:$0xff] }
 0xa87   : > { %v24480_v63 = vpop.f32.mrf.mxu0  ;;  %16818 = vmatmul.mubr.bf16.vlgmr.msra.gmra.mxu0 %v23575_v18  ;;  %v19789_v61 = vcombine.low %v9096_v32, %v9104_v35 }
 0xa88   : > { %v24485_v51 = vpop.f32.mrf.mxu1  ;;  %16859 = vmatmul.mubr.bf16.vlgmr.msra.gmra.mxu1 %v23696_v15  ;;  %16868 = vmatpush1.bf16.msra.mxu0 %v19869_v50  ;;  %v18783_v50 = vcombine.low %v8089_v29, %v8097_v23  ;;  %v9288_v23 = vld [vmem:[%s22413_s18 + $0x2720] sm:$0xff] }
 0xa89   : > { %16909 = vmatpush1.bf16.msra.mxu1 %v18847_v55  ;;  %v24488_v52 = vpop.f32.mrf.mxu0  ;;  %16869 = vmatprep.subr.bf16.mxu0 %v19854_v56  ;;  %v19790_v55 = vcombine.high %v9096_v32, %v9104_v35  ;;  %v18768_v56 = vcombine.high %v8073_v43, %v8081_v60 }
 0xa8a   : > { %v24490_v9 = vpop.f32.mrf.mxu1  ;;  %16910 = vmatprep.subr.bf16.mxu1 %v18832_v42  ;;  %16899 = vmatprep.mubr.bf16.mxu0 %v23701_v39  ;;  %v9080_v42 = vld [vmem:[%s22413_s18 + $0x20a0] sm:$0xff] }
 0xa8b   : > { %v16577_v27 = vpop.f32.mrf.mxu0  ;;  %16940 = vmatprep.mubr.bf16.mxu1 %v23552_v25  ;;  %v19773_v47 = vcombine.low %v9080_v42, %v9088_v46 }
 0xa8c   : > { %v16618_v54 = vpop.f32.mrf.mxu1  ;;  %16870 = vmatpush1.bf16.msra.mxu0 %v19853_v5  ;;  %v18767_v5 = vcombine.low %v8073_v43, %v8081_v60  ;;  %v8049_v27 = vld [vmem:[%s22413_s18 + $0x68] sm:$0xff]  ;;  %v9272_v60 = vld [vmem:[%s22413_s18 + $0x26a0] sm:$0xff] }
 0xa8d   : > { %16911 = vmatpush1.bf16.msra.mxu1 %v18831_v48  ;;  %v16578_v1 = vpop.f32.mrf.mxu0  ;;  %16871 = vmatprep.subr.bf16.mxu0 %v19838_v6  ;;  %v19774_v48 = vcombine.high %v9080_v42, %v9088_v46  ;;  %v18752_v6 = vcombine.high %v8057_v53, %v8065_v2  ;;  %v18735_v7 = vcombine.low %v8041_v58, %v8049_v27  ;;  %v9256_v2 = vld [vmem:[%s22413_s18 + $0x2620] sm:$0xff] }
 0xa8e   : > { %v16619_v11 = vpop.f32.mrf.mxu1  ;;  %16912 = vmatprep.subr.bf16.mxu1 %v18816_v13  ;;  %v9064_v13 = vld [vmem:[%s22413_s18 + $0x2020] sm:$0xff] }
 0xa8f   : > { %v19758_v54 = vcombine.high %v9064_v13, %v9072_v37  ;;  %v9304_v1 = vld [vmem:[%s22413_s18 + $0x27a0] sm:$0xff]  ;;  %v8289_v11 = vld [vmem:[%s22413_s18 + $0x7e8] sm:$0xff] }
 0xa90   : > { %16872 = vmatpush1.bf16.msra.mxu0 %v19837_v41  ;;  %v18736_v41 = vcombine.high %v8041_v58, %v8049_v27  ;;  %v9240_v27 = vld [vmem:[%s22413_s18 + $0x25a0] sm:$0xff] }
 0xa91   : > { %16913 = vmatpush1.bf16.msra.mxu1 %v18815_v33  ;;  %16873 = vmatprep.subr.bf16.mxu0 %v19822_v20  ;;  %v9312_v33 = vld [vmem:[%s22413_s18 + $0x27e0] sm:$0xff]  ;;  %v8281_v20 = vld [vmem:[%s22413_s18 + $0x7a8] sm:$0xff] }
 0xa92   : > { %16914 = vmatprep.subr.bf16.mxu1 %v18800_v30  ;;  %v19757_v30 = vcombine.low %v9064_v13, %v9072_v37  ;;  %v19998_v24 = vcombine.high %v9304_v1, %v9312_v33  ;;  %v18976_v29 = vcombine.high %v8281_v20, %v8289_v11  ;;  %v18975_v32 = vcombine.low %v8281_v20, %v8289_v11  ;;  %v9224_v11 = vld [vmem:[%s22413_s18 + $0x2520] sm:$0xff] }
 0xa94   : > { %16874 = vmatpush1.bf16.msra.mxu0 %v19821_v26  ;;  %v9296_v26 = vld [vmem:[%s22413_s18 + $0x2760] sm:$0xff] }
 0xa95   : > { %16915 = vmatpush1.bf16.msra.mxu1 %v18799_v59  ;;  %16875 = vmatprep.subr.bf16.mxu0 %v19806_v19  ;;  %v8265_v59 = vld [vmem:[%s22413_s18 + $0x728] sm:$0xff]  ;;  %v19982_v35 = vcombine.high %v9288_v23, %v9296_v26 }
 0xa96   : > { %16916 = vmatprep.subr.bf16.mxu1 %v18784_v3  ;;  %v8273_v19 = vld [vmem:[%s22413_s18 + $0x768] sm:$0xff]  ;;  %v19997_v3 = vcombine.low %v9304_v1, %v9312_v33 }
 0xa97   : > { %v18960_v43 = vcombine.high %v8265_v59, %v8273_v19  ;;  %v18959_v42 = vcombine.low %v8265_v59, %v8273_v19  ;;  %v9208_v19 = vld [vmem:[%s22413_s18 + $0x24a0] sm:$0xff] }
 0xa98   : > { %16876 = vmatpush1.bf16.msra.mxu0 %v19805_v45  ;;  %v9280_v45 = vld [vmem:[%s22413_s18 + $0x26e0] sm:$0xff] }
 0xa99   : > { %16917 = vmatpush1.bf16.msra.mxu1 %v18783_v50  ;;  %16877 = vmatprep.subr.bf16.mxu0 %v19790_v55  ;;  %v8249_v50 = vld [vmem:[%s22413_s18 + $0x6a8] sm:$0xff]  ;;  %v19966_v46 = vcombine.high %v9272_v60, %v9280_v45 }
 0xa9a   : > { %16918 = vmatprep.subr.bf16.mxu1 %v18768_v56  ;;  %v8257_v55 = vld [vmem:[%s22413_s18 + $0x6e8] sm:$0xff]  ;;  %v19981_v56 = vcombine.low %v9288_v23, %v9296_v26 }
 0xa9b   : > { %v18944_v53 = vcombine.high %v8249_v50, %v8257_v55  ;;  %v18943_v13 = vcombine.low %v8249_v50, %v8257_v55  ;;  %v9350_v55 = vsub.s32 7, %v23529_v16 }
 0xa9c   : > { %16878 = vmatpush1.bf16.msra.mxu0 %v19789_v61  ;;  %v9264_v61 = vld [vmem:[%s22413_s18 + $0x2660] sm:$0xff] }
 0xa9d   : > { %16919 = vmatpush1.bf16.msra.mxu1 %v18767_v5  ;;  %16879 = vmatprep.subr.bf16.mxu0 %v19774_v48  ;;  %v8233_v5 = vld [vmem:[%s22413_s18 + $0x628] sm:$0xff]  ;;  %v19950_v37 = vcombine.high %v9256_v2, %v9264_v61 }
 0xa9e   : > { %16920 = vmatprep.subr.bf16.mxu1 %v18752_v6  ;;  %v8241_v48 = vld [vmem:[%s22413_s18 + $0x668] sm:$0xff]  ;;  %v19965_v6 = vcombine.low %v9272_v60, %v9280_v45 }
 0xa9f   : > { %v18928_v58 = vcombine.high %v8233_v5, %v8241_v48  ;;  %v18927_v1 = vcombine.low %v8233_v5, %v8241_v48 }
 0xaa0   : > { %16880 = vmatpush1.bf16.msra.mxu0 %v19773_v47  ;;  %v9248_v47 = vld [vmem:[%s22413_s18 + $0x25e0] sm:$0xff] }
 0xaa1   : > { %16921 = vmatpush1.bf16.msra.mxu1 %v18751_v44  ;;  %16881 = vmatprep.subr.bf16.mxu0 %v19758_v54  ;;  %v8217_v44 = vld [vmem:[%s22413_s18 + $0x5a8] sm:$0xff]  ;;  %v19934_v33 = vcombine.high %v9240_v27, %v9248_v47 }
 0xaa2   : > { %16922 = vmatprep.subr.bf16.mxu1 %v18736_v41  ;;  %v8225_v54 = vld [vmem:[%s22413_s18 + $0x5e8] sm:$0xff]  ;;  %v19949_v41 = vcombine.low %v9256_v2, %v9264_v61  ;;  %v21576_v61 = vld [vmem:[%s22425_s19] sm:$0xff] }
 0xaa3   : > { %v18912_v20 = vcombine.high %v8217_v44, %v8225_v54  ;;  %v18911_v23 = vcombine.low %v8217_v44, %v8225_v54  ;;  %v8177_v2 = vld [vmem:[%s22413_s18 + $0x468] sm:$0xff] }
 0xaa4   : > { %16882 = vmatpush1.bf16.msra.mxu0 %v19757_v30  ;;  %v9232_v30 = vld [vmem:[%s22413_s18 + $0x2560] sm:$0xff]  ;;  %v8665_v44 = vld [vmem:[%s22413_s18 + $0x13a8] sm:$0xff] }
 0xaa5   : > { %16923 = vmatpush1.bf16.msra.mxu1 %v18735_v7  ;;  %16883 = vmatprep.subr.bf16.mxu0 %v19998_v24  ;;  %v8201_v7 = vld [vmem:[%s22413_s18 + $0x528] sm:$0xff]  ;;  %v19918_v26 = vcombine.high %v9224_v11, %v9232_v30  ;;  %v19917_v60 = vcombine.low %v9224_v11, %v9232_v30 }
 0xaa6   : > { %16924 = vmatprep.subr.bf16.mxu1 %v18976_v29  ;;  %v8209_v24 = vld [vmem:[%s22413_s18 + $0x568] sm:$0xff]  ;;  %v19933_v29 = vcombine.low %v9240_v27, %v9248_v47 }
 0xaa7   : > { %v18896_v59 = vcombine.high %v8201_v7, %v8209_v24  ;;  %v18895_v45 = vcombine.low %v8201_v7, %v8209_v24  ;;  %v8409_v27 = vld [vmem:[%s22413_s18 + $0xba8] sm:$0xff] }
 0xaa8   : > { %16884 = vmatpush2.bf16.msra.mxu0 %v19997_v3  ;;  %v9216_v3 = vld [vmem:[%s22413_s18 + $0x24e0] sm:$0xff]  ;;  %v8417_v47 = vld [vmem:[%s22413_s18 + $0xbe8] sm:$0xff] }
 0xaa9   : > { %16925 = vmatpush2.bf16.msra.mxu1 %v18975_v32  ;;  %16885 = vmatprep.subr.bf16.mxu0 %v19982_v35  ;;  %v8185_v32 = vld [vmem:[%s22413_s18 + $0x4a8] sm:$0xff]  ;;  %v19902_v50 = vcombine.high %v9208_v19, %v9216_v3  ;;  %v19901_v48 = vcombine.low %v9208_v19, %v9216_v3 }
 0xaaa   : > { %16926 = vmatprep.subr.bf16.mxu1 %v18960_v43  ;;  %v8193_v35 = vld [vmem:[%s22413_s18 + $0x4e8] sm:$0xff]  ;;  %v9346_v43 = vsub.s32 6, %v23529_v16 }
 0xaab   : > { %v8673_v54 = vld [vmem:[%s22413_s18 + $0x13e8] sm:$0xff] }
 0xaac   : > { %16886 = vmatpush2.bf16.msra.mxu0 %v19981_v56  ;;  %v18880_v56 = vcombine.high %v8185_v32, %v8193_v35  ;;  %v9347_v5 = vrot.slane %v21576_v61, %v9346_v43  ;;  %v19360_v7 = vcombine.high %v8665_v44, %v8673_v54  ;;  %v8393_v24 = vld [vmem:[%s22413_s18 + $0xb28] sm:$0xff]  ;;  %v19359_v19 = vcombine.low %v8665_v44, %v8673_v54 }
 0xaad   : > { %16927 = vmatpush2.bf16.msra.mxu1 %v18959_v42  ;;  %16887 = vmatprep.subr.bf16.mxu0 %v19966_v46  ;;  %v9192_v42 = vld [vmem:[%s22413_s18 + $0x2420] sm:$0xff] }
 0xaae   : > { %16928 = vmatprep.subr.bf16.mxu1 %v18944_v53  ;;  %v9200_v46 = vld [vmem:[%s22413_s18 + $0x2460] sm:$0xff]  ;;  %v8169_v53 = vld [vmem:[%s22413_s18 + $0x428] sm:$0xff] }
 0xab0   : > { %16888 = vmatpush2.bf16.msra.mxu0 %v19965_v6  ;;  %v18879_v6 = vcombine.low %v8185_v32, %v8193_v35  ;;  %v8377_v32 = vld [vmem:[%s22413_s18 + $0xaa8] sm:$0xff] }
 0xab1   : > { %16929 = vmatpush2.bf16.msra.mxu1 %v18943_v13  ;;  %16889 = vmatprep.subr.bf16.mxu0 %v19950_v37  ;;  %v19886_v13 = vcombine.high %v9192_v42, %v9200_v46  ;;  %v9351_v37 = vrot.slane %v21576_v61, %v9350_v55  ;;  %v8385_v35 = vld [vmem:[%s22413_s18 + $0xae8] sm:$0xff] }
 0xab2   : > { %16930 = vmatprep.subr.bf16.mxu1 %v18928_v58  ;;  %v18864_v58 = vcombine.high %v8169_v53, %v8177_v2  ;;  %v19071_v54 = vcombine.low %v8377_v32, %v8385_v35 }
 0xab3   : > { %v16535_v11 = vadd.f32 %v24412_v34, %v9351_v37  ;;  %v8617_v37 = vld [vmem:[%s22413_s18 + $0x1228] sm:$0xff] }
 0xab4   : > { %16890 = vmatpush2.bf16.msra.mxu0 %v19949_v41  ;;  %v16533_v41 = vadd.f32 %v24406_v8, %v9347_v5 }
 0xab5   : > { %16931 = vmatpush2.bf16.msra.mxu1 %v18927_v1  ;;  %16891 = vmatprep.subr.bf16.mxu0 %v19934_v33  ;;  %v19885_v1 = vcombine.low %v9192_v42, %v9200_v46  ;;  %v18863_v33 = vcombine.low %v8169_v53, %v8177_v2  ;;  %v16576_v8 = vadd.f32 %v24488_v52, %v16535_v11 }
 0xab6   : > { %16932 = vmatprep.subr.bf16.mxu1 %v18912_v20  ;;  %v19104_v20 = vcombine.high %v8409_v27, %v8417_v47  ;;  %v16574_v30 = vadd.f32 %v24480_v63, %v16533_v41  ;;  %v19072_v2 = vcombine.high %v8377_v32, %v8385_v35  ;;  %v8329_v32 = vld [vmem:[%s22413_s18 + $0x928] sm:$0xff] }
 0xab7   : > { %v16617_v52 = vadd.f32 %v24490_v9, %v16576_v8  ;;  %v8369_v9 = vld [vmem:[%s22413_s18 + $0xa68] sm:$0xff] }
 0xab8   : > { %16892 = vmatpush2.bf16.msra.mxu0 %v19933_v29  ;;  %v8401_v29 = vld [vmem:[%s22413_s18 + $0xb68] sm:$0xff]  ;;  %v16615_v63 = vadd.f32 %v24485_v51, %v16574_v30 }
 0xab9   : > { %16933 = vmatpush2.bf16.msra.mxu1 %v18911_v23  ;;  %16893 = vmatprep.subr.bf16.mxu0 %v19918_v26  ;;  %v8649_v23 = vld [vmem:[%s22413_s18 + $0x1328] sm:$0xff]  ;;  %v19088_v34 = vcombine.high %v8393_v24, %v8401_v29  ;;  %v19087_v51 = vcombine.low %v8393_v24, %v8401_v29 }
 0xaba   : > { %16934 = vmatprep.subr.bf16.mxu1 %v18896_v59  ;;  %v8657_v26 = vld [vmem:[%s22413_s18 + $0x1368] sm:$0xff]  ;;  %v19103_v59 = vcombine.low %v8409_v27, %v8417_v47 }
 0xabb   : > { %v19344_v3 = vcombine.high %v8649_v23, %v8657_v26  ;;  %v19343_v53 = vcombine.low %v8649_v23, %v8657_v26  ;;  %v8353_v24 = vld [vmem:[%s22413_s18 + $0x9e8] sm:$0xff]  ;;  %v17564_v26 = vrot.slane %v17556_v10, %v24180_v31 }
 0xabc   : > { %16894 = vmatpush2.bf16.msra.mxu0 %v19917_v60  ;;  %v8601_v29 = vld [vmem:[%s22413_s18 + $0x11a8] sm:$0xff] }
 0xabd   : > { %16935 = vmatpush2.bf16.msra.mxu1 %v18895_v45  ;;  %16895 = vmatprep.subr.bf16.mxu0 %v19902_v50  ;;  %v8633_v45 = vld [vmem:[%s22413_s18 + $0x12a8] sm:$0xff] }
 0xabe   : > { %16936 = vmatprep.subr.bf16.mxu1 %v18880_v56  ;;  %v8641_v50 = vld [vmem:[%s22413_s18 + $0x12e8] sm:$0xff] }
 0xabf   : > { %v8609_v23 = vld [vmem:[%s22413_s18 + $0x11e8] sm:$0xff] }
 0xac0   : > { %16896 = vmatpush2.bf16.msra.mxu0 %v19901_v48  ;;  %v19328_v48 = vcombine.high %v8633_v45, %v8641_v50  ;;  %v8337_v35 = vld [vmem:[%s22413_s18 + $0x968] sm:$0xff] }
 0xac1   : > { %16937 = vmatpush2.bf16.msra.mxu1 %v18879_v6  ;;  %16897 = vmatprep.subr.bf16.mxu0 %v19886_v13  ;;  %v8361_v6 = vld [vmem:[%s22413_s18 + $0xa28] sm:$0xff] }
 0xac2   : > { %16938 = vmatprep.subr.bf16.mxu1 %v18864_v58  ;;  %v8625_v58 = vld [vmem:[%s22413_s18 + $0x1268] sm:$0xff] }
 0xac3   : > { %v19312_v30 = vcombine.high %v8617_v37, %v8625_v58 }
 0xac4   : > { %16898 = vmatpush2.bf16.msra.mxu0 %v19885_v1  ;;  %v19327_v1 = vcombine.low %v8633_v45, %v8641_v50  ;;  %v19024_v45 = vcombine.high %v8329_v32, %v8337_v35  ;;  %v19280_v50 = vcombine.high %v8585_v0, %v8593_v57 }
 0xac5   : > { %16939 = vmatpush2.bf16.msra.mxu1 %v18863_v33  ;;  %16949 = vmatprep.subr.bf16.mxu0 %v19104_v20  ;;  %v19056_v33 = vcombine.high %v8361_v6, %v8369_v9 }
 0xac6   : > { %16990 = vmatprep.subr.bf16.mxu1 %v19360_v7  ;;  %v8345_v7 = vld [vmem:[%s22413_s18 + $0x9a8] sm:$0xff] }
 0xac7   : > { %v16655_v60 = vpop.f32.mrf.mxu0  ;;  %16900 = vmatmul.mubr.bf16.vlgmr.msra.gmra.mxu0 %v23769_v28  ;;  %v19039_v10 = vcombine.low %v8345_v7, %v8353_v24 }
 0xac8   : > { %v16656_v56 = vadd.f32 %v16655_v60, %v16615_v63  ;;  %v16696_v42 = vpop.f32.mrf.mxu1  ;;  %16941 = vmatmul.mubr.bf16.vlgmr.msra.gmra.mxu1 %v23605_v22  ;;  %16950 = vmatpush1.bf16.msra.mxu0 %v19103_v59  ;;  %v19055_v59 = vcombine.low %v8361_v6, %v8369_v9  ;;  %v19295_v60 = vcombine.low %v8601_v29, %v8609_v23  ;;  %v8553_v6 = vld [vmem:[%s22413_s18 + $0x1028] sm:$0xff] }
 0xac9   : > { %16991 = vmatpush1.bf16.msra.mxu1 %v19359_v19  ;;  %v16657_v46 = vpop.f32.mrf.mxu0  ;;  %16951 = vmatprep.subr.bf16.mxu0 %v19088_v34  ;;  %v19311_v19 = vcombine.low %v8617_v37, %v8625_v58  ;;  %v19040_v34 = vcombine.high %v8345_v7, %v8353_v24  ;;  %v8561_v9 = vld [vmem:[%s22413_s18 + $0x1068] sm:$0xff] }
 0xaca   : > { %v16658_v61 = vadd.f32 %v16657_v46, %v16617_v52  ;;  %v16698_v5 = vpop.f32.mrf.mxu1  ;;  %16992 = vmatprep.subr.bf16.mxu1 %v19344_v3  ;;  %16981 = vmatprep.mubr.bf16.mxu0 %v23559_v21  ;;  %v16697_v27 = vadd.f32 %v16696_v42, %v16656_v56  ;;  %v19296_v3 = vcombine.high %v8601_v29, %v8609_v23  ;;  %v8313_v52 = vld [vmem:[%s22413_s18 + $0x8a8] sm:$0xff] }
 0xacb   : > { %v16659_v13 = vpop.f32.mrf.mxu0  ;;  %17022 = vmatprep.mubr.bf16.mxu1 %v23612_v4  ;;  %v8321_v56 = vld [vmem:[%s22413_s18 + $0x8e8] sm:$0xff]  ;;  %v19023_v46 = vcombine.low %v8329_v32, %v8337_v35 }
 0xacc   : > { %v16699_v47 = vadd.f32 %v16698_v5, %v16658_v61  ;;  %v16700_v44 = vpop.f32.mrf.mxu1  ;;  %16952 = vmatpush1.bf16.msra.mxu0 %v19087_v51  ;;  %v8569_v42 = vld [vmem:[%s22413_s18 + $0x10a8] sm:$0xff]  ;;  %v19007_v13 = vcombine.low %v8313_v52, %v8321_v56 }
 0xacd   : > { %16993 = vmatpush1.bf16.msra.mxu1 %v19343_v53  ;;  %v16660_v41 = vpop.f32.mrf.mxu0  ;;  %16953 = vmatprep.subr.bf16.mxu0 %v19072_v2  ;;  %v8577_v51 = vld [vmem:[%s22413_s18 + $0x10e8] sm:$0xff]  ;;  %v19279_v53 = vcombine.low %v8585_v0, %v8593_v57  ;;  %v19008_v2 = vcombine.high %v8313_v52, %v8321_v56 }
 0xace   : > { %v17557_v20 = vcombine.low %v16697_v27, %v16699_v47  ;;  %v16701_v11 = vpop.f32.mrf.mxu1  ;;  %16994 = vmatprep.subr.bf16.mxu1 %v19328_v48  ;;  %v19264_v61 = vcombine.high %v8569_v42, %v8577_v51  ;;  %v8297_v5 = vld [vmem:[%s22413_s18 + $0x828] sm:$0xff]  ;;  %v19263_v37 = vcombine.low %v8569_v42, %v8577_v51  ;;  %v19248_v27 = vcombine.high %v8553_v6, %v8561_v9 }
 0xacf   : > { %v8305_v48 = vld [vmem:[%s22413_s18 + $0x868] sm:$0xff] }
 0xad0   : > { %v17571_v8 = vrot.slane %v17557_v20, %v24180_v31  ;;  %16954 = vmatpush1.bf16.msra.mxu0 %v19071_v54  ;;  %v18992_v58 = vcombine.high %v8297_v5, %v8305_v48  ;;  %v8537_v47 = vld [vmem:[%s22413_s18 + $0xfa8] sm:$0xff] }
 0xad1   : > { %16995 = vmatpush1.bf16.msra.mxu1 %v19327_v1  ;;  %16955 = vmatprep.subr.bf16.mxu0 %v19056_v33  ;;  %v8545_v44 = vld [vmem:[%s22413_s18 + $0xfe8] sm:$0xff]  ;;  %v18991_v1 = vcombine.low %v8297_v5, %v8305_v48  ;;  %v19247_v33 = vcombine.low %v8553_v6, %v8561_v9 }
 0xad2   : > { %v17572_v63 = vcombine.low %v17564_v26, %v17571_v8  ;;  %16996 = vmatprep.subr.bf16.mxu1 %v19312_v30  ;;  %v8793_v54 = vld [vmem:[%s22413_s18 + $0x17a8] sm:$0xff]  ;;  %v19232_v20 = vcombine.high %v8537_v47, %v8545_v44  ;;  %v19231_v23 = vcombine.low %v8537_v47, %v8545_v44 }
 0xad3   : > { %v8801_v41 = vld [vmem:[%s22413_s18 + $0x17e8] sm:$0xff] }
 0xad4   : > { %17612 = vst [vmem:[%s22423_s5 + $0x8] sm:$0xff] %v17572_v63  ;;  %16956 = vmatpush1.bf16.msra.mxu0 %v19055_v59  ;;  %v19488_v11 = vcombine.high %v8793_v54, %v8801_v41  ;;  %v8521_v30 = vld [vmem:[%s22413_s18 + $0xf28] sm:$0xff]  ;;  %v19487_v26 = vcombine.low %v8793_v54, %v8801_v41 }
 0xad5   : > { %16997 = vmatpush1.bf16.msra.mxu1 %v19311_v19  ;;  %16957 = vmatprep.subr.bf16.mxu0 %v19040_v34  ;;  %v8529_v7 = vld [vmem:[%s22413_s18 + $0xf68] sm:$0xff] }
 0xad6   : > { %16998 = vmatprep.subr.bf16.mxu1 %v19296_v3  ;;  %v8777_v24 = vld [vmem:[%s22413_s18 + $0x1728] sm:$0xff]  ;;  %v19216_v8 = vcombine.high %v8521_v30, %v8529_v7  ;;  %v19215_v32 = vcombine.low %v8521_v30, %v8529_v7 }
 0xad7   : > { %v8785_v29 = vld [vmem:[%s22413_s18 + $0x1768] sm:$0xff] }
 0xad8   : > { %16958 = vmatpush1.bf16.msra.mxu0 %v19039_v10  ;;  %v19472_v59 = vcombine.high %v8777_v24, %v8785_v29  ;;  %v8505_v19 = vld [vmem:[%s22413_s18 + $0xea8] sm:$0xff]  ;;  %v19471_v35 = vcombine.low %v8777_v24, %v8785_v29 }
 0xad9   : > { %16999 = vmatpush1.bf16.msra.mxu1 %v19295_v60  ;;  %16959 = vmatprep.subr.bf16.mxu0 %v19024_v45  ;;  %v8513_v34 = vld [vmem:[%s22413_s18 + $0xee8] sm:$0xff] }
 0xada   : > { %17000 = vmatprep.subr.bf16.mxu1 %v19280_v50  ;;  %v8761_v63 = vld [vmem:[%s22413_s18 + $0x16a8] sm:$0xff]  ;;  %v19200_v0 = vcombine.high %v8505_v19, %v8513_v34  ;;  %v19199_v52 = vcombine.low %v8505_v19, %v8513_v34 }
 0xadb   : > { %v8769_v3 = vld [vmem:[%s22413_s18 + $0x16e8] sm:$0xff] }
 0xadc   : > { %16960 = vmatpush1.bf16.msra.mxu0 %v19023_v46  ;;  %v19456_v57 = vcombine.high %v8761_v63, %v8769_v3  ;;  %v8489_v10 = vld [vmem:[%s22413_s18 + $0xe28] sm:$0xff]  ;;  %v19455_v56 = vcombine.low %v8761_v63, %v8769_v3 }
 0xadd   : > { %17001 = vmatpush1.bf16.msra.mxu1 %v19279_v53  ;;  %16961 = vmatprep.subr.bf16.mxu0 %v19008_v2  ;;  %v8497_v60 = vld [vmem:[%s22413_s18 + $0xe68] sm:$0xff] }
 0xade   : > { %17002 = vmatprep.subr.bf16.mxu1 %v19264_v61  ;;  %v8745_v45 = vld [vmem:[%s22413_s18 + $0x1628] sm:$0xff]  ;;  %v19184_v42 = vcombine.high %v8489_v10, %v8497_v60  ;;  %v19183_v5 = vcombine.low %v8489_v10, %v8497_v60 }
 0xadf   : > { %v8753_v50 = vld [vmem:[%s22413_s18 + $0x1668] sm:$0xff] }
 0xae0   : > { %16962 = vmatpush1.bf16.msra.mxu0 %v19007_v13  ;;  %v19440_v51 = vcombine.high %v8745_v45, %v8753_v50  ;;  %v8473_v46 = vld [vmem:[%s22413_s18 + $0xda8] sm:$0xff]  ;;  %v19439_v48 = vcombine.low %v8745_v45, %v8753_v50 }
 0xae1   : > { %17003 = vmatpush1.bf16.msra.mxu1 %v19263_v37  ;;  %16963 = vmatprep.subr.bf16.mxu0 %v18992_v58  ;;  %v8481_v53 = vld [vmem:[%s22413_s18 + $0xde8] sm:$0xff] }
 0xae2   : > { %17004 = vmatprep.subr.bf16.mxu1 %v19248_v27  ;;  %v8729_v2 = vld [vmem:[%s22413_s18 + $0x15a8] sm:$0xff]  ;;  %v19168_v6 = vcombine.high %v8473_v46, %v8481_v53  ;;  %v19167_v47 = vcombine.low %v8473_v46, %v8481_v53 }
 0xae3   : > { %v8737_v61 = vld [vmem:[%s22413_s18 + $0x15e8] sm:$0xff] }
 0xae4   : > { %16964 = vmatpush1.bf16.msra.mxu0 %v18991_v1  ;;  %v19424_v9 = vcombine.high %v8729_v2, %v8737_v61  ;;  %v8457_v13 = vld [vmem:[%s22413_s18 + $0xd28] sm:$0xff]  ;;  %v19423_v44 = vcombine.low %v8729_v2, %v8737_v61 }
 0xae5   : > { %17005 = vmatpush1.bf16.msra.mxu1 %v19247_v33  ;;  %16965 = vmatprep.subr.bf16.mxu0 %v19232_v20  ;;  %v8465_v37 = vld [vmem:[%s22413_s18 + $0xd68] sm:$0xff] }
 0xae6   : > { %17006 = vmatprep.subr.bf16.mxu1 %v19488_v11  ;;  %v8713_v58 = vld [vmem:[%s22413_s18 + $0x1528] sm:$0xff]  ;;  %v19152_v54 = vcombine.high %v8457_v13, %v8465_v37  ;;  %v19151_v30 = vcombine.low %v8457_v13, %v8465_v37 }
 0xae7   : > { %v8721_v27 = vld [vmem:[%s22413_s18 + $0x1568] sm:$0xff] }
 0xae8   : > { %16966 = vmatpush2.bf16.msra.mxu0 %v19231_v23  ;;  %v19408_v41 = vcombine.high %v8713_v58, %v8721_v27  ;;  %v8441_v1 = vld [vmem:[%s22413_s18 + $0xca8] sm:$0xff]  ;;  %v19407_v7 = vcombine.low %v8713_v58, %v8721_v27 }
 0xae9   : > { %17007 = vmatpush2.bf16.msra.mxu1 %v19487_v26  ;;  %16967 = vmatprep.subr.bf16.mxu0 %v19216_v8  ;;  %v8449_v33 = vld [vmem:[%s22413_s18 + $0xce8] sm:$0xff] }
 0xaea   : > { %17008 = vmatprep.subr.bf16.mxu1 %v19472_v59  ;;  %v8697_v20 = vld [vmem:[%s22413_s18 + $0x14a8] sm:$0xff]  ;;  %v19136_v24 = vcombine.high %v8441_v1, %v8449_v33  ;;  %v19135_v19 = vcombine.low %v8441_v1, %v8449_v33 }
 0xaeb   : > { %v8705_v11 = vld [vmem:[%s22413_s18 + $0x14e8] sm:$0xff] }
 0xaec   : > { %16968 = vmatpush2.bf16.msra.mxu0 %v19215_v32  ;;  %v19392_v29 = vcombine.high %v8697_v20, %v8705_v11  ;;  %v8425_v23 = vld [vmem:[%s22413_s18 + $0xc28] sm:$0xff]  ;;  %v19391_v34 = vcombine.low %v8697_v20, %v8705_v11 }
 0xaed   : > { %17009 = vmatpush2.bf16.msra.mxu1 %v19471_v35  ;;  %16969 = vmatprep.subr.bf16.mxu0 %v19200_v0  ;;  %v8433_v26 = vld [vmem:[%s22413_s18 + $0xc68] sm:$0xff] }
 0xaee   : > { %17010 = vmatprep.subr.bf16.mxu1 %v19456_v57  ;;  %v8681_v8 = vld [vmem:[%s22413_s18 + $0x1428] sm:$0xff]  ;;  %v19120_v63 = vcombine.high %v8425_v23, %v8433_v26  ;;  %v19119_v10 = vcombine.low %v8425_v23, %v8433_v26 }
 0xaef   : > { %v8689_v59 = vld [vmem:[%s22413_s18 + $0x1468] sm:$0xff] }
 0xaf0   : > { %16970 = vmatpush2.bf16.msra.mxu0 %v19199_v52  ;;  %v19376_v3 = vcombine.high %v8681_v8, %v8689_v59  ;;  %v8921_v32 = vld [vmem:[%s22413_s18 + $0x1ba8] sm:$0xff]  ;;  %v19375_v60 = vcombine.low %v8681_v8, %v8689_v59 }
 0xaf1   : > { %17011 = vmatpush2.bf16.msra.mxu1 %v19455_v56  ;;  %16971 = vmatprep.subr.bf16.mxu0 %v19184_v42  ;;  %v8929_v35 = vld [vmem:[%s22413_s18 + $0x1be8] sm:$0xff] }
 0xaf2   : > { %17012 = vmatprep.subr.bf16.mxu1 %v19440_v51  ;;  %v9177_v0 = vld [vmem:[%s22413_s18 + $0x23a8] sm:$0xff]  ;;  %v19616_v50 = vcombine.high %v8921_v32, %v8929_v35  ;;  %v19615_v2 = vcombine.low %v8921_v32, %v8929_v35 }
 0xaf3   : > { %v9185_v57 = vld [vmem:[%s22413_s18 + $0x23e8] sm:$0xff] }
 0xaf4   : > { %16972 = vmatpush2.bf16.msra.mxu0 %v19183_v5  ;;  %v9317_v45 = vld [vmem:[%s22425_s19 + $0x8] sm:$0xff]  ;;  %v19872_v52 = vcombine.high %v9177_v0, %v9185_v57  ;;  %v19871_v61 = vcombine.low %v9177_v0, %v9185_v57 }
 0xaf5   : > { %17013 = vmatpush2.bf16.msra.mxu1 %v19439_v48  ;;  %16973 = vmatprep.subr.bf16.mxu0 %v19168_v6  ;;  %v8905_v56 = vld [vmem:[%s22413_s18 + $0x1b28] sm:$0xff]  ;;  %v9355_v53 = vrot.slane %v9317_v45, %v9322_v49  ;;  %v9359_v48 = vrot.slane %v9317_v45, %v9326_v12 }
 0xaf6   : > { %17014 = vmatprep.subr.bf16.mxu1 %v19424_v9  ;;  %v8913_v42 = vld [vmem:[%s22413_s18 + $0x1b68] sm:$0xff] }
 0xaf7   : > { %v9161_v51 = vld [vmem:[%s22413_s18 + $0x2328] sm:$0xff]  ;;  %v19600_v5 = vcombine.high %v8905_v56, %v8913_v42 }
 0xaf8   : > { %16974 = vmatpush2.bf16.msra.mxu0 %v19167_v47  ;;  %v9169_v46 = vld [vmem:[%s22413_s18 + $0x2368] sm:$0xff] }
 0xaf9   : > { %17015 = vmatpush2.bf16.msra.mxu1 %v19423_v44  ;;  %16975 = vmatprep.subr.bf16.mxu0 %v19152_v54  ;;  %v19856_v6 = vcombine.high %v9161_v51, %v9169_v46  ;;  %v8889_v9 = vld [vmem:[%s22413_s18 + $0x1aa8] sm:$0xff]  ;;  %v19599_v44 = vcombine.low %v8905_v56, %v8913_v42  ;;  %v19855_v54 = vcombine.low %v9161_v51, %v9169_v46 }
 0xafa   : > { %17016 = vmatprep.subr.bf16.mxu1 %v19408_v41  ;;  %v8897_v13 = vld [vmem:[%s22413_s18 + $0x1ae8] sm:$0xff] }
 0xafb   : > { %v9145_v58 = vld [vmem:[%s22413_s18 + $0x22a8] sm:$0xff]  ;;  %v19584_v41 = vcombine.high %v8889_v9, %v8897_v13  ;;  %v19583_v59 = vcombine.low %v8889_v9, %v8897_v13 }
 0xafc   : > { %16976 = vmatpush2.bf16.msra.mxu0 %v19151_v30  ;;  %v9153_v27 = vld [vmem:[%s22413_s18 + $0x22e8] sm:$0xff] }
 0xafd   : > { %17017 = vmatpush2.bf16.msra.mxu1 %v19407_v7  ;;  %16977 = vmatprep.subr.bf16.mxu0 %v19136_v24  ;;  %v19840_v11 = vcombine.high %v9145_v58, %v9153_v27  ;;  %v8873_v30 = vld [vmem:[%s22413_s18 + $0x1a28] sm:$0xff] }
 0xafe   : > { %17018 = vmatprep.subr.bf16.mxu1 %v19392_v29  ;;  %v8881_v7 = vld [vmem:[%s22413_s18 + $0x1a68] sm:$0xff] }
 0xaff   : > { %v9129_v29 = vld [vmem:[%s22413_s18 + $0x2228] sm:$0xff] }
 0xb00   : > { %16978 = vmatpush2.bf16.msra.mxu0 %v19135_v19  ;;  %v9137_v23 = vld [vmem:[%s22413_s18 + $0x2268] sm:$0xff] }
 0xb01   : > { %17019 = vmatpush2.bf16.msra.mxu1 %v19391_v34  ;;  %16979 = vmatprep.subr.bf16.mxu0 %v19120_v63  ;;  %v19839_v34 = vcombine.low %v9145_v58, %v9153_v27  ;;  %v19568_v63 = vcombine.high %v8873_v30, %v8881_v7  ;;  %v19824_v32 = vcombine.high %v9129_v29, %v9137_v23  ;;  %v8857_v35 = vld [vmem:[%s22413_s18 + $0x19a8] sm:$0xff] }
 0xb02   : > { %17020 = vmatprep.subr.bf16.mxu1 %v19376_v3  ;;  %v8865_v0 = vld [vmem:[%s22413_s18 + $0x19e8] sm:$0xff]  ;;  %v19823_v45 = vcombine.low %v9129_v29, %v9137_v23 }
 0xb03   : > { %v9113_v57 = vld [vmem:[%s22413_s18 + $0x21a8] sm:$0xff] }
 0xb04   : > { %16980 = vmatpush2.bf16.msra.mxu0 %v19119_v10  ;;  %v9121_v10 = vld [vmem:[%s22413_s18 + $0x21e8] sm:$0xff] }
 0xb05   : > { %17021 = vmatpush2.bf16.msra.mxu1 %v19375_v60  ;;  %17031 = vmatprep.subr.bf16.mxu0 %v19616_v50  ;;  %v19567_v60 = vcombine.low %v8873_v30, %v8881_v7  ;;  %v19552_v50 = vcombine.high %v8857_v35, %v8865_v0  ;;  %v8841_v56 = vld [vmem:[%s22413_s18 + $0x1928] sm:$0xff] }
 0xb06   : > { %17072 = vmatprep.subr.bf16.mxu1 %v19872_v52  ;;  %v19808_v52 = vcombine.high %v9113_v57, %v9121_v10  ;;  %v8849_v42 = vld [vmem:[%s22413_s18 + $0x1968] sm:$0xff] }
 0xb07   : > { %v16737_v37 = vpop.f32.mrf.mxu0  ;;  %16982 = vmatmul.mubr.bf16.vlgmr.msra.gmra.mxu0 %v23616_v14  ;;  %v9097_v51 = vld [vmem:[%s22413_s18 + $0x2128] sm:$0xff] }
 0xb08   : > { %v16738_v47 = vadd.f32 %v16737_v37, %v9355_v53  ;;  %v16778_v49 = vpop.f32.mrf.mxu1  ;;  %17023 = vmatmul.mubr.bf16.vlgmr.msra.gmra.mxu1 %v23575_v18  ;;  %17032 = vmatpush1.bf16.msra.mxu0 %v19615_v2  ;;  %v9105_v46 = vld [vmem:[%s22413_s18 + $0x2168] sm:$0xff]  ;;  %v19551_v53 = vcombine.low %v8857_v35, %v8865_v0  ;;  %v19807_v2 = vcombine.low %v9113_v57, %v9121_v10 }
 0xb09   : > { %17073 = vmatpush1.bf16.msra.mxu1 %v19871_v61  ;;  %v16739_v12 = vpop.f32.mrf.mxu0  ;;  %17033 = vmatprep.subr.bf16.mxu0 %v19600_v5  ;;  %v19536_v61 = vcombine.high %v8841_v56, %v8849_v42  ;;  %v19792_v5 = vcombine.high %v9097_v51, %v9105_v46  ;;  %v9081_v9 = vld [vmem:[%s22413_s18 + $0x20a8] sm:$0xff]  ;;  %v19535_v37 = vcombine.low %v8841_v56, %v8849_v42 }
 0xb0a   : > { %v24652_v1 = vadd.f32 %v16778_v49, %v16738_v47  ;;  %v16740_v33 = vadd.f32 %v16739_v12, %v9359_v48  ;;  %v16780_v20 = vpop.f32.mrf.mxu1  ;;  %17074 = vmatprep.subr.bf16.mxu1 %v19856_v6  ;;  %17063 = vmatprep.mubr.bf16.mxu0 %v23625_v36  ;;  %v8825_v48 = vld [vmem:[%s22413_s18 + $0x18a8] sm:$0xff]  ;;  %v19791_v58 = vcombine.low %v9097_v51, %v9105_v46 }
 0xb0b   : > { %v16741_v24 = vpop.f32.mrf.mxu0  ;;  %17104 = vmatprep.mubr.bf16.mxu1 %v23701_v39  ;;  %v8833_v6 = vld [vmem:[%s22413_s18 + $0x18e8] sm:$0xff] }
 0xb0c   : > { %v24660_v26 = vadd.f32 %v16780_v20, %v16740_v33  ;;  %v16782_v8 = vpop.f32.mrf.mxu1  ;;  %17034 = vmatpush1.bf16.msra.mxu0 %v19599_v44  ;;  %v9089_v13 = vld [vmem:[%s22413_s18 + $0x20e8] sm:$0xff]  ;;  %v19520_v27 = vcombine.high %v8825_v48, %v8833_v6 }
 0xb0d   : > { %17075 = vmatpush1.bf16.msra.mxu1 %v19855_v54  ;;  %v16742_v19 = vpop.f32.mrf.mxu0  ;;  %17035 = vmatprep.subr.bf16.mxu0 %v19584_v41  ;;  %v19776_v47 = vcombine.high %v9081_v9, %v9089_v13  ;;  %v8809_v49 = vld [vmem:[%s22413_s18 + $0x1828] sm:$0xff]  ;;  %v19519_v41 = vcombine.low %v8825_v48, %v8833_v6  ;;  %v19775_v33 = vcombine.low %v9081_v9, %v9089_v13 }
 0xb0e   : > { %v16783_v3 = vpop.f32.mrf.mxu1  ;;  %17076 = vmatprep.subr.bf16.mxu1 %v19840_v11  ;;  %v8817_v44 = vld [vmem:[%s22413_s18 + $0x1868] sm:$0xff] }
 0xb0f   : > { %v9065_v12 = vld [vmem:[%s22413_s18 + $0x2028] sm:$0xff]  ;;  %v19504_v20 = vcombine.high %v8809_v49, %v8817_v44  ;;  %v19503_v23 = vcombine.low %v8809_v49, %v8817_v44 }
 0xb10   : > { %17036 = vmatpush1.bf16.msra.mxu0 %v19583_v59  ;;  %v9073_v54 = vld [vmem:[%s22413_s18 + $0x2068] sm:$0xff] }
 0xb11   : > { %17077 = vmatpush1.bf16.msra.mxu1 %v19839_v34  ;;  %17037 = vmatprep.subr.bf16.mxu0 %v19568_v63  ;;  %v19760_v11 = vcombine.high %v9065_v12, %v9073_v54  ;;  %v9049_v30 = vld [vmem:[%s22413_s18 + $0x1fa8] sm:$0xff]  ;;  %v19759_v8 = vcombine.low %v9065_v12, %v9073_v54 }
 0xb12   : > { %17078 = vmatprep.subr.bf16.mxu1 %v19824_v32  ;;  %v9057_v7 = vld [vmem:[%s22413_s18 + $0x1fe8] sm:$0xff] }
 0xb13   : > { %v9305_v24 = vld [vmem:[%s22413_s18 + $0x27a8] sm:$0xff]  ;;  %v19744_v59 = vcombine.high %v9049_v30, %v9057_v7  ;;  %v19743_v35 = vcombine.low %v9049_v30, %v9057_v7 }
 0xb14   : > { %17038 = vmatpush1.bf16.msra.mxu0 %v19567_v60  ;;  %v9313_v29 = vld [vmem:[%s22413_s18 + $0x27e8] sm:$0xff] }
 0xb15   : > { %17079 = vmatpush1.bf16.msra.mxu1 %v19823_v45  ;;  %17039 = vmatprep.subr.bf16.mxu0 %v19552_v50  ;;  %v20000_v19 = vcombine.high %v9305_v24, %v9313_v29  ;;  %v9033_v34 = vld [vmem:[%s22413_s18 + $0x1f28] sm:$0xff]  ;;  %v19999_v0 = vcombine.low %v9305_v24, %v9313_v29 }
 0xb16   : > { %17080 = vmatprep.subr.bf16.mxu1 %v19808_v52  ;;  %v9041_v63 = vld [vmem:[%s22413_s18 + $0x1f68] sm:$0xff] }
 0xb17   : > { %v9289_v3 = vld [vmem:[%s22413_s18 + $0x2728] sm:$0xff]  ;;  %v19728_v57 = vcombine.high %v9033_v34, %v9041_v63  ;;  %v19727_v56 = vcombine.low %v9033_v34, %v9041_v63 }
 0xb18   : > { %17040 = vmatpush1.bf16.msra.mxu0 %v19551_v53  ;;  %v9297_v32 = vld [vmem:[%s22413_s18 + $0x2768] sm:$0xff] }
 0xb19   : > { %17081 = vmatpush1.bf16.msra.mxu1 %v19807_v2  ;;  %17041 = vmatprep.subr.bf16.mxu0 %v19536_v61  ;;  %v19984_v10 = vcombine.high %v9289_v3, %v9297_v32  ;;  %v9017_v60 = vld [vmem:[%s22413_s18 + $0x1ea8] sm:$0xff]  ;;  %v19983_v42 = vcombine.low %v9289_v3, %v9297_v32 }
 0xb1a   : > { %17082 = vmatprep.subr.bf16.mxu1 %v19792_v5  ;;  %v9025_v45 = vld [vmem:[%s22413_s18 + $0x1ee8] sm:$0xff] }
 0xb1b   : > { %v9273_v50 = vld [vmem:[%s22413_s18 + $0x26a8] sm:$0xff]  ;;  %v19712_v51 = vcombine.high %v9017_v60, %v9025_v45  ;;  %v19711_v48 = vcombine.low %v9017_v60, %v9025_v45 }
 0xb1c   : > { %17042 = vmatpush1.bf16.msra.mxu0 %v19535_v37  ;;  %v9281_v52 = vld [vmem:[%s22413_s18 + $0x26e8] sm:$0xff] }
 0xb1d   : > { %17083 = vmatpush1.bf16.msra.mxu1 %v19791_v58  ;;  %17043 = vmatprep.subr.bf16.mxu0 %v19520_v27  ;;  %v19968_v46 = vcombine.high %v9273_v50, %v9281_v52  ;;  %v9001_v53 = vld [vmem:[%s22413_s18 + $0x1e28] sm:$0xff]  ;;  %v19967_v6 = vcombine.low %v9273_v50, %v9281_v52 }
 0xb1e   : > { %17084 = vmatprep.subr.bf16.mxu1 %v19776_v47  ;;  %v9009_v2 = vld [vmem:[%s22413_s18 + $0x1e68] sm:$0xff] }
 0xb1f   : > { %v9257_v61 = vld [vmem:[%s22413_s18 + $0x2628] sm:$0xff]  ;;  %v19696_v9 = vcombine.high %v9001_v53, %v9009_v2  ;;  %v19695_v49 = vcombine.low %v9001_v53, %v9009_v2 }
 0xb20   : > { %17044 = vmatpush1.bf16.msra.mxu0 %v19519_v41  ;;  %v9265_v5 = vld [vmem:[%s22413_s18 + $0x2668] sm:$0xff] }
 0xb21   : > { %17085 = vmatpush1.bf16.msra.mxu1 %v19775_v33  ;;  %17045 = vmatprep.subr.bf16.mxu0 %v19504_v20  ;;  %v19952_v13 = vcombine.high %v9257_v61, %v9265_v5  ;;  %v8985_v37 = vld [vmem:[%s22413_s18 + $0x1da8] sm:$0xff]  ;;  %v19951_v44 = vcombine.low %v9257_v61, %v9265_v5 }
 0xb22   : > { %17086 = vmatprep.subr.bf16.mxu1 %v19760_v11  ;;  %v8993_v58 = vld [vmem:[%s22413_s18 + $0x1de8] sm:$0xff] }
 0xb23   : > { %v9241_v27 = vld [vmem:[%s22413_s18 + $0x25a8] sm:$0xff]  ;;  %v19680_v12 = vcombine.high %v8985_v37, %v8993_v58  ;;  %v19679_v30 = vcombine.low %v8985_v37, %v8993_v58 }
 0xb24   : > { %17046 = vmatpush1.bf16.msra.mxu0 %v19503_v23  ;;  %v9249_v47 = vld [vmem:[%s22413_s18 + $0x25e8] sm:$0xff] }
 0xb25   : > { %17087 = vmatpush1.bf16.msra.mxu1 %v19759_v8  ;;  %17047 = vmatprep.subr.bf16.mxu0 %v19744_v59  ;;  %v19936_v54 = vcombine.high %v9241_v27, %v9249_v47  ;;  %v8969_v41 = vld [vmem:[%s22413_s18 + $0x1d28] sm:$0xff]  ;;  %v19935_v7 = vcombine.low %v9241_v27, %v9249_v47 }
 0xb26   : > { %17088 = vmatprep.subr.bf16.mxu1 %v20000_v19  ;;  %v8977_v33 = vld [vmem:[%s22413_s18 + $0x1d68] sm:$0xff] }
 0xb27   : > { %v9225_v20 = vld [vmem:[%s22413_s18 + $0x2528] sm:$0xff]  ;;  %v19664_v24 = vcombine.high %v8969_v41, %v8977_v33  ;;  %v19663_v34 = vcombine.low %v8969_v41, %v8977_v33  ;;  %v8386_v41 = vld [vmem:[%s22413_s18 + $0xaf0] sm:$0xff] }
 0xb28   : > { %17048 = vmatpush2.bf16.msra.mxu0 %v19743_v35  ;;  %v9233_v11 = vld [vmem:[%s22413_s18 + $0x2568] sm:$0xff] }
 0xb29   : > { %17089 = vmatpush2.bf16.msra.mxu1 %v19999_v0  ;;  %17049 = vmatprep.subr.bf16.mxu0 %v19728_v57  ;;  %v19920_v29 = vcombine.high %v9225_v20, %v9233_v11  ;;  %v8953_v23 = vld [vmem:[%s22413_s18 + $0x1ca8] sm:$0xff]  ;;  %v19919_v63 = vcombine.low %v9225_v20, %v9233_v11 }
 0xb2a   : > { %17090 = vmatprep.subr.bf16.mxu1 %v19984_v10  ;;  %v8961_v8 = vld [vmem:[%s22413_s18 + $0x1ce8] sm:$0xff] }
 0xb2b   : > { %v9209_v59 = vld [vmem:[%s22413_s18 + $0x24a8] sm:$0xff]  ;;  %v19648_v3 = vcombine.high %v8953_v23, %v8961_v8  ;;  %v19647_v60 = vcombine.low %v8953_v23, %v8961_v8 }
 0xb2c   : > { %17050 = vmatpush2.bf16.msra.mxu0 %v19727_v56  ;;  %v9217_v19 = vld [vmem:[%s22413_s18 + $0x24e8] sm:$0xff]  ;;  %v8154_v56 = vld [vmem:[%s22413_s18 + $0x3b0] sm:$0xff] }
 0xb2d   : > { %17091 = vmatpush2.bf16.msra.mxu1 %v19983_v42  ;;  %17051 = vmatprep.subr.bf16.mxu0 %v19712_v51  ;;  %v19904_v32 = vcombine.high %v9209_v59, %v9217_v19  ;;  %v8937_v35 = vld [vmem:[%s22413_s18 + $0x1c28] sm:$0xff]  ;;  %v19903_v45 = vcombine.low %v9209_v59, %v9217_v19  ;;  %v8162_v42 = vld [vmem:[%s22413_s18 + $0x3f0] sm:$0xff] }
 0xb2e   : > { %17092 = vmatprep.subr.bf16.mxu1 %v19968_v46  ;;  %v8945_v0 = vld [vmem:[%s22413_s18 + $0x1c68] sm:$0xff]  ;;  %v8410_v51 = vld [vmem:[%s22413_s18 + $0xbb0] sm:$0xff]  ;;  %v18850_v61 = vcombine.high %v8154_v56, %v8162_v42  ;;  %v18849_v37 = vcombine.low %v8154_v56, %v8162_v42 }
 0xb2f   : > { %v9193_v57 = vld [vmem:[%s22413_s18 + $0x2428] sm:$0xff]  ;;  %v19632_v50 = vcombine.high %v8937_v35, %v8945_v0  ;;  %v8418_v46 = vld [vmem:[%s22413_s18 + $0xbf0] sm:$0xff]  ;;  %v19631_v53 = vcombine.low %v8937_v35, %v8945_v0 }
 0xb30   : > { %17052 = vmatpush2.bf16.msra.mxu0 %v19711_v48  ;;  %v9201_v10 = vld [vmem:[%s22413_s18 + $0x2468] sm:$0xff]  ;;  %v19106_v5 = vcombine.high %v8410_v51, %v8418_v46  ;;  %v8138_v48 = vld [vmem:[%s22413_s18 + $0x330] sm:$0xff]  ;;  %v19105_v58 = vcombine.low %v8410_v51, %v8418_v46 }
 0xb31   : > { %17093 = vmatpush2.bf16.msra.mxu1 %v19967_v6  ;;  %17053 = vmatprep.subr.bf16.mxu0 %v19696_v9  ;;  %v19888_v52 = vcombine.high %v9193_v57, %v9201_v10  ;;  %v19887_v2 = vcombine.low %v9193_v57, %v9201_v10  ;;  %v8146_v6 = vld [vmem:[%s22413_s18 + $0x370] sm:$0xff] }
 0xb32   : > { %17094 = vmatprep.subr.bf16.mxu1 %v19952_v13  ;;  %v8394_v9 = vld [vmem:[%s22413_s18 + $0xb30] sm:$0xff]  ;;  %v18834_v27 = vcombine.high %v8138_v48, %v8146_v6  ;;  %v18833_v11 = vcombine.low %v8138_v48, %v8146_v6 }
 0xb33   : > { %v8402_v13 = vld [vmem:[%s22413_s18 + $0xb70] sm:$0xff] }
 0xb34   : > { %17054 = vmatpush2.bf16.msra.mxu0 %v19695_v49  ;;  %v19090_v47 = vcombine.high %v8394_v9, %v8402_v13  ;;  %v8122_v49 = vld [vmem:[%s22413_s18 + $0x2b0] sm:$0xff] }
 0xb35   : > { %17095 = vmatpush2.bf16.msra.mxu1 %v19951_v44  ;;  %17055 = vmatprep.subr.bf16.mxu0 %v19680_v12  ;;  %v8130_v44 = vld [vmem:[%s22413_s18 + $0x2f0] sm:$0xff] }
 0xb36   : > { %17096 = vmatprep.subr.bf16.mxu1 %v19936_v54  ;;  %v8378_v54 = vld [vmem:[%s22413_s18 + $0xab0] sm:$0xff] }
 0xb37   : > { %v8106_v59 = vld [vmem:[%s22413_s18 + $0x230] sm:$0xff]  ;;  %v19073_v57 = vcombine.low %v8378_v54, %v8386_v41 }
 0xb38   : > { %17056 = vmatpush2.bf16.msra.mxu0 %v19679_v30  ;;  %v8114_v19 = vld [vmem:[%s22413_s18 + $0x270] sm:$0xff] }
 0xb39   : > { %17097 = vmatpush2.bf16.msra.mxu1 %v19935_v7  ;;  %17057 = vmatprep.subr.bf16.mxu0 %v19664_v24  ;;  %v19089_v7 = vcombine.low %v8394_v9, %v8402_v13  ;;  %v18818_v24 = vcombine.high %v8122_v49, %v8130_v44  ;;  %v18802_v10 = vcombine.high %v8106_v59, %v8114_v19  ;;  %v8346_v56 = vld [vmem:[%s22413_s18 + $0x9b0] sm:$0xff] }
 0xb3a   : > { %17098 = vmatprep.subr.bf16.mxu1 %v19920_v29  ;;  %v8354_v42 = vld [vmem:[%s22413_s18 + $0x9f0] sm:$0xff]  ;;  %v18801_v51 = vcombine.low %v8106_v59, %v8114_v19 }
 0xb3b   : > { %v8330_v48 = vld [vmem:[%s22413_s18 + $0x930] sm:$0xff]  ;;  %v19041_v13 = vcombine.low %v8346_v56, %v8354_v42 }
 0xb3c   : > { %17058 = vmatpush2.bf16.msra.mxu0 %v19663_v34  ;;  %v8338_v6 = vld [vmem:[%s22413_s18 + $0x970] sm:$0xff] }
 0xb3d   : > { %17099 = vmatpush2.bf16.msra.mxu1 %v19919_v63  ;;  %17059 = vmatprep.subr.bf16.mxu0 %v19648_v3  ;;  %v8362_v63 = vld [vmem:[%s22413_s18 + $0xa30] sm:$0xff] }
 0xb3e   : > { %17100 = vmatprep.subr.bf16.mxu1 %v19904_v32  ;;  %v8370_v3 = vld [vmem:[%s22413_s18 + $0xa70] sm:$0xff] }
 0xb3f   : > { %v19057_v46 = vcombine.low %v8362_v63, %v8370_v3  ;;  %v8282_v59 = vld [vmem:[%s22413_s18 + $0x7b0] sm:$0xff] }
 0xb40   : > { %17060 = vmatpush2.bf16.msra.mxu0 %v19647_v60  ;;  %v8290_v19 = vld [vmem:[%s22413_s18 + $0x7f0] sm:$0xff] }
 0xb41   : > { %17101 = vmatpush2.bf16.msra.mxu1 %v19903_v45  ;;  %17061 = vmatprep.subr.bf16.mxu0 %v19632_v50  ;;  %v19058_v45 = vcombine.high %v8362_v63, %v8370_v3  ;;  %v8090_v50 = vld [vmem:[%s22413_s18 + $0x1b0] sm:$0xff] }
 0xb42   : > { %17102 = vmatprep.subr.bf16.mxu1 %v19888_v52  ;;  %v8098_v52 = vld [vmem:[%s22413_s18 + $0x1f0] sm:$0xff] }
 0xb43   : > { %v18785_v9 = vcombine.low %v8090_v50, %v8098_v52  ;;  %v8546_v63 = vld [vmem:[%s22413_s18 + $0xff0] sm:$0xff] }
 0xb44   : > { %17062 = vmatpush2.bf16.msra.mxu0 %v19631_v53  ;;  %v18786_v53 = vcombine.high %v8090_v50, %v8098_v52  ;;  %v18977_v50 = vcombine.low %v8282_v59, %v8290_v19 }
 0xb45   : > { %17103 = vmatpush2.bf16.msra.mxu1 %v19887_v2  ;;  %17113 = vmatprep.subr.bf16.mxu0 %v18850_v61  ;;  %v19042_v2 = vcombine.high %v8346_v56, %v8354_v42  ;;  %v8074_v61 = vld [vmem:[%s22413_s18 + $0x130] sm:$0xff] }
 0xb46   : > { %17154 = vmatprep.subr.bf16.mxu1 %v19106_v5  ;;  %v8082_v5 = vld [vmem:[%s22413_s18 + $0x170] sm:$0xff] }
 0xb47   : > { %v16819_v12 = vpop.f32.mrf.mxu0  ;;  %17064 = vmatmul.mubr.bf16.vlgmr.msra.gmra.mxu0 %v23696_v15 }
 0xb48   : > { %v16820_v33 = vadd.f32 %v16819_v12, %v24652_v1  ;;  %v16860_v20 = vpop.f32.mrf.mxu1  ;;  %17105 = vmatmul.mubr.bf16.vlgmr.msra.gmra.mxu1 %v23769_v28  ;;  %17114 = vmatpush1.bf16.msra.mxu0 %v18849_v37  ;;  %v19074_v1 = vcombine.high %v8378_v54, %v8386_v41  ;;  %v18770_v37 = vcombine.high %v8074_v61, %v8082_v5 }
 0xb49   : > { %17155 = vmatpush1.bf16.msra.mxu1 %v19105_v58  ;;  %v16821_v30 = vpop.f32.mrf.mxu0  ;;  %17115 = vmatprep.subr.bf16.mxu0 %v18834_v27  ;;  %v19026_v58 = vcombine.high %v8330_v48, %v8338_v6  ;;  %v8058_v27 = vld [vmem:[%s22413_s18 + $0xb0] sm:$0xff]  ;;  %v18769_v12 = vcombine.low %v8074_v61, %v8082_v5  ;;  %v19025_v54 = vcombine.low %v8330_v48, %v8338_v6 }
 0xb4a   : > { %v24725_v29 = vadd.f32 %v16860_v20, %v16820_v33  ;;  %v16822_v23 = vadd.f32 %v16821_v30, %v24660_v26  ;;  %v16862_v8 = vpop.f32.mrf.mxu1  ;;  %17156 = vmatprep.subr.bf16.mxu1 %v19090_v47  ;;  %17145 = vmatprep.mubr.bf16.mxu0 %v23552_v25  ;;  %v18817_v26 = vcombine.low %v8122_v49, %v8130_v44  ;;  %v8066_v47 = vld [vmem:[%s22413_s18 + $0xf0] sm:$0xff] }
 0xb4b   : > { %v16823_v34 = vpop.f32.mrf.mxu0  ;;  %17186 = vmatprep.mubr.bf16.mxu1 %v23559_v21  ;;  %v8314_v49 = vld [vmem:[%s22413_s18 + $0x8b0] sm:$0xff]  ;;  %v18754_v41 = vcombine.high %v8058_v27, %v8066_v47 }
 0xb4c   : > { %v24734_v32 = vadd.f32 %v16862_v8, %v16822_v23  ;;  %v16864_v35 = vpop.f32.mrf.mxu1  ;;  %17116 = vmatpush1.bf16.msra.mxu0 %v18833_v11  ;;  %v8322_v44 = vld [vmem:[%s22413_s18 + $0x8f0] sm:$0xff] }
 0xb4d   : > { %17157 = vmatpush1.bf16.msra.mxu1 %v19089_v7  ;;  %v16824_v0 = vpop.f32.mrf.mxu0  ;;  %17117 = vmatprep.subr.bf16.mxu0 %v18818_v24  ;;  %v19010_v33 = vcombine.high %v8314_v49, %v8322_v44  ;;  %v8042_v20 = vld [vmem:[%s22413_s18 + $0x30] sm:$0xff]  ;;  %v18753_v24 = vcombine.low %v8058_v27, %v8066_v47  ;;  %v19009_v23 = vcombine.low %v8314_v49, %v8322_v44 }
 0xb4e   : > { %v16865_v60 = vpop.f32.mrf.mxu1  ;;  %17158 = vmatprep.subr.bf16.mxu1 %v19074_v1  ;;  %v8050_v11 = vld [vmem:[%s22413_s18 + $0x70] sm:$0xff] }
 0xb4f   : > { %v8298_v30 = vld [vmem:[%s22413_s18 + $0x830] sm:$0xff]  ;;  %v18738_v8 = vcombine.high %v8042_v20, %v8050_v11  ;;  %v18737_v3 = vcombine.low %v8042_v20, %v8050_v11 }
 0xb50   : > { %17118 = vmatpush1.bf16.msra.mxu0 %v18817_v26  ;;  %v8306_v7 = vld [vmem:[%s22413_s18 + $0x870] sm:$0xff]  ;;  %v18978_v26 = vcombine.high %v8282_v59, %v8290_v19 }
 0xb51   : > { %17159 = vmatpush1.bf16.msra.mxu1 %v19073_v57  ;;  %17119 = vmatprep.subr.bf16.mxu0 %v18802_v10  ;;  %v18994_v1 = vcombine.high %v8298_v30, %v8306_v7  ;;  %v8538_v34 = vld [vmem:[%s22413_s18 + $0xfb0] sm:$0xff]  ;;  %v18993_v35 = vcombine.low %v8298_v30, %v8306_v7 }
 0xb52   : > { %17160 = vmatprep.subr.bf16.mxu1 %v19058_v45  ;;  %v19234_v0 = vcombine.high %v8538_v34, %v8546_v63  ;;  %v8266_v57 = vld [vmem:[%s22413_s18 + $0x730] sm:$0xff]  ;;  %v19233_v52 = vcombine.low %v8538_v34, %v8546_v63 }
 0xb53   : > { %v8274_v10 = vld [vmem:[%s22413_s18 + $0x770] sm:$0xff] }
 0xb54   : > { %17120 = vmatpush1.bf16.msra.mxu0 %v18801_v51  ;;  %v8522_v60 = vld [vmem:[%s22413_s18 + $0xf30] sm:$0xff]  ;;  %v18962_v56 = vcombine.high %v8266_v57, %v8274_v10  ;;  %v18961_v61 = vcombine.low %v8266_v57, %v8274_v10 }
 0xb55   : > { %17161 = vmatpush1.bf16.msra.mxu1 %v19057_v46  ;;  %17121 = vmatprep.subr.bf16.mxu0 %v18786_v53  ;;  %v8530_v45 = vld [vmem:[%s22413_s18 + $0xf70] sm:$0xff] }
 0xb56   : > { %17162 = vmatprep.subr.bf16.mxu1 %v19042_v2  ;;  %v19218_v42 = vcombine.high %v8522_v60, %v8530_v45  ;;  %v8250_v51 = vld [vmem:[%s22413_s18 + $0x6b0] sm:$0xff]  ;;  %v19217_v5 = vcombine.low %v8522_v60, %v8530_v45 }
 0xb57   : > { %v8258_v46 = vld [vmem:[%s22413_s18 + $0x6f0] sm:$0xff] }
 0xb58   : > { %17122 = vmatpush1.bf16.msra.mxu0 %v18785_v9  ;;  %v8506_v53 = vld [vmem:[%s22413_s18 + $0xeb0] sm:$0xff]  ;;  %v18946_v48 = vcombine.high %v8250_v51, %v8258_v46  ;;  %v18945_v27 = vcombine.low %v8250_v51, %v8258_v46 }
 0xb59   : > { %17163 = vmatpush1.bf16.msra.mxu1 %v19041_v13  ;;  %17123 = vmatprep.subr.bf16.mxu0 %v18770_v37  ;;  %v8514_v2 = vld [vmem:[%s22413_s18 + $0xef0] sm:$0xff] }
 0xb5a   : > { %17164 = vmatprep.subr.bf16.mxu1 %v19026_v58  ;;  %v19202_v6 = vcombine.high %v8506_v53, %v8514_v2  ;;  %v8234_v9 = vld [vmem:[%s22413_s18 + $0x630] sm:$0xff]  ;;  %v19201_v47 = vcombine.low %v8506_v53, %v8514_v2 }
 0xb5b   : > { %v8242_v13 = vld [vmem:[%s22413_s18 + $0x670] sm:$0xff] }
 0xb5c   : > { %17124 = vmatpush1.bf16.msra.mxu0 %v18769_v12  ;;  %v8490_v37 = vld [vmem:[%s22413_s18 + $0xe30] sm:$0xff]  ;;  %v18930_v49 = vcombine.high %v8234_v9, %v8242_v13  ;;  %v18929_v20 = vcombine.low %v8234_v9, %v8242_v13 }
 0xb5d   : > { %17165 = vmatpush1.bf16.msra.mxu1 %v19025_v54  ;;  %17125 = vmatprep.subr.bf16.mxu0 %v18754_v41  ;;  %v8498_v58 = vld [vmem:[%s22413_s18 + $0xe70] sm:$0xff] }
 0xb5e   : > { %17166 = vmatprep.subr.bf16.mxu1 %v19010_v33  ;;  %v19186_v44 = vcombine.high %v8490_v37, %v8498_v58  ;;  %v8218_v12 = vld [vmem:[%s22413_s18 + $0x5b0] sm:$0xff]  ;;  %v19185_v11 = vcombine.low %v8490_v37, %v8498_v58 }
 0xb5f   : > { %v8226_v54 = vld [vmem:[%s22413_s18 + $0x5f0] sm:$0xff] }
 0xb60   : > { %17126 = vmatpush1.bf16.msra.mxu0 %v18753_v24  ;;  %v8474_v41 = vld [vmem:[%s22413_s18 + $0xdb0] sm:$0xff]  ;;  %v18914_v30 = vcombine.high %v8218_v12, %v8226_v54  ;;  %v18913_v59 = vcombine.low %v8218_v12, %v8226_v54 }
 0xb61   : > { %17167 = vmatpush1.bf16.msra.mxu1 %v19009_v23  ;;  %17127 = vmatprep.subr.bf16.mxu0 %v18738_v8  ;;  %v8482_v33 = vld [vmem:[%s22413_s18 + $0xdf0] sm:$0xff] }
 0xb62   : > { %17168 = vmatprep.subr.bf16.mxu1 %v18994_v1  ;;  %v19170_v7 = vcombine.high %v8474_v41, %v8482_v33  ;;  %v8202_v24 = vld [vmem:[%s22413_s18 + $0x530] sm:$0xff]  ;;  %v19169_v19 = vcombine.low %v8474_v41, %v8482_v33 }
 0xb63   : > { %v8210_v23 = vld [vmem:[%s22413_s18 + $0x570] sm:$0xff] }
 0xb64   : > { %17128 = vmatpush1.bf16.msra.mxu0 %v18737_v3  ;;  %v8458_v8 = vld [vmem:[%s22413_s18 + $0xd30] sm:$0xff]  ;;  %v18898_v34 = vcombine.high %v8202_v24, %v8210_v23  ;;  %v18897_v57 = vcombine.low %v8202_v24, %v8210_v23 }
 0xb65   : > { %17169 = vmatpush1.bf16.msra.mxu1 %v18993_v35  ;;  %17129 = vmatprep.subr.bf16.mxu0 %v18978_v26  ;;  %v8466_v1 = vld [vmem:[%s22413_s18 + $0xd70] sm:$0xff] }
 0xb66   : > { %17170 = vmatprep.subr.bf16.mxu1 %v19234_v0  ;;  %v19154_v63 = vcombine.high %v8458_v8, %v8466_v1  ;;  %v8186_v3 = vld [vmem:[%s22413_s18 + $0x4b0] sm:$0xff]  ;;  %v19153_v10 = vcombine.low %v8458_v8, %v8466_v1 }
 0xb67   : > { %v8194_v35 = vld [vmem:[%s22413_s18 + $0x4f0] sm:$0xff] }
 0xb68   : > { %17130 = vmatpush2.bf16.msra.mxu0 %v18977_v50  ;;  %v8442_v26 = vld [vmem:[%s22413_s18 + $0xcb0] sm:$0xff]  ;;  %v18882_v60 = vcombine.high %v8186_v3, %v8194_v35  ;;  %v18881_v51 = vcombine.low %v8186_v3, %v8194_v35 }
 0xb69   : > { %17171 = vmatpush2.bf16.msra.mxu1 %v19233_v52  ;;  %17131 = vmatprep.subr.bf16.mxu0 %v18962_v56  ;;  %v8450_v0 = vld [vmem:[%s22413_s18 + $0xcf0] sm:$0xff] }
 0xb6a   : > { %17172 = vmatprep.subr.bf16.mxu1 %v19218_v42  ;;  %v19138_v45 = vcombine.high %v8442_v26, %v8450_v0  ;;  %v8170_v50 = vld [vmem:[%s22413_s18 + $0x430] sm:$0xff]  ;;  %v19137_v46 = vcombine.low %v8442_v26, %v8450_v0 }
 0xb6b   : > { %v8178_v52 = vld [vmem:[%s22413_s18 + $0x470] sm:$0xff] }
 0xb6c   : > { %17132 = vmatpush2.bf16.msra.mxu0 %v18961_v61  ;;  %v8426_v56 = vld [vmem:[%s22413_s18 + $0xc30] sm:$0xff]  ;;  %v18866_v53 = vcombine.high %v8170_v50, %v8178_v52  ;;  %v18865_v9 = vcombine.low %v8170_v50, %v8178_v52 }
 0xb6d   : > { %17173 = vmatpush2.bf16.msra.mxu1 %v19217_v5  ;;  %17133 = vmatprep.subr.bf16.mxu0 %v18946_v48  ;;  %v8434_v42 = vld [vmem:[%s22413_s18 + $0xc70] sm:$0xff] }
 0xb6e   : > { %17174 = vmatprep.subr.bf16.mxu1 %v19202_v6  ;;  %v19122_v2 = vcombine.high %v8426_v56, %v8434_v42  ;;  %v8666_v61 = vld [vmem:[%s22413_s18 + $0x13b0] sm:$0xff]  ;;  %v19121_v13 = vcombine.low %v8426_v56, %v8434_v42 }
 0xb6f   : > { %v8674_v5 = vld [vmem:[%s22413_s18 + $0x13f0] sm:$0xff] }
 0xb70   : > { %17134 = vmatpush2.bf16.msra.mxu0 %v18945_v27  ;;  %v8922_v48 = vld [vmem:[%s22413_s18 + $0x1bb0] sm:$0xff]  ;;  %v19362_v37 = vcombine.high %v8666_v61, %v8674_v5  ;;  %v19361_v12 = vcombine.low %v8666_v61, %v8674_v5 }
 0xb71   : > { %17175 = vmatpush2.bf16.msra.mxu1 %v19201_v47  ;;  %17135 = vmatprep.subr.bf16.mxu0 %v18930_v49  ;;  %v8930_v6 = vld [vmem:[%s22413_s18 + $0x1bf0] sm:$0xff] }
 0xb72   : > { %17176 = vmatprep.subr.bf16.mxu1 %v19186_v44  ;;  %v19618_v58 = vcombine.high %v8922_v48, %v8930_v6  ;;  %v8650_v27 = vld [vmem:[%s22413_s18 + $0x1330] sm:$0xff]  ;;  %v19617_v54 = vcombine.low %v8922_v48, %v8930_v6 }
 0xb73   : > { %v8658_v47 = vld [vmem:[%s22413_s18 + $0x1370] sm:$0xff] }
 0xb74   : > { %17136 = vmatpush2.bf16.msra.mxu0 %v18929_v20  ;;  %v8906_v49 = vld [vmem:[%s22413_s18 + $0x1b30] sm:$0xff]  ;;  %v19346_v41 = vcombine.high %v8650_v27, %v8658_v47  ;;  %v19345_v1 = vcombine.low %v8650_v27, %v8658_v47 }
 0xb75   : > { %17177 = vmatpush2.bf16.msra.mxu1 %v19185_v11  ;;  %17137 = vmatprep.subr.bf16.mxu0 %v18914_v30  ;;  %v8914_v44 = vld [vmem:[%s22413_s18 + $0x1b70] sm:$0xff] }
 0xb76   : > { %17178 = vmatprep.subr.bf16.mxu1 %v19170_v7  ;;  %v19602_v33 = vcombine.high %v8906_v49, %v8914_v44  ;;  %v8634_v20 = vld [vmem:[%s22413_s18 + $0x12b0] sm:$0xff] }
 0xb77   : > { %v8642_v11 = vld [vmem:[%s22413_s18 + $0x12f0] sm:$0xff] }
 0xb78   : > { %17138 = vmatpush2.bf16.msra.mxu0 %v18913_v59  ;;  %v8890_v7 = vld [vmem:[%s22413_s18 + $0x1ab0] sm:$0xff] }
 0xb79   : > { %17179 = vmatpush2.bf16.msra.mxu1 %v19169_v19  ;;  %17139 = vmatprep.subr.bf16.mxu0 %v18898_v34  ;;  %v8898_v24 = vld [vmem:[%s22413_s18 + $0x1af0] sm:$0xff]  ;;  %v19601_v19 = vcombine.low %v8906_v49, %v8914_v44  ;;  %v19330_v34 = vcombine.high %v8634_v20, %v8642_v11 }
 0xb7a   : > { %17180 = vmatprep.subr.bf16.mxu1 %v19154_v63  ;;  %v8618_v35 = vld [vmem:[%s22413_s18 + $0x1230] sm:$0xff]  ;;  %v19585_v52 = vcombine.low %v8890_v7, %v8898_v24 }
 0xb7b   : > { %v8626_v26 = vld [vmem:[%s22413_s18 + $0x1270] sm:$0xff] }
 0xb7c   : > { %17140 = vmatpush2.bf16.msra.mxu0 %v18897_v57  ;;  %v8874_v57 = vld [vmem:[%s22413_s18 + $0x1a30] sm:$0xff]  ;;  %v19314_v56 = vcombine.high %v8618_v35, %v8626_v26  ;;  %v19313_v5 = vcombine.low %v8618_v35, %v8626_v26 }
 0xb7d   : > { %17181 = vmatpush2.bf16.msra.mxu1 %v19153_v10  ;;  %17141 = vmatprep.subr.bf16.mxu0 %v18882_v60  ;;  %v8882_v10 = vld [vmem:[%s22413_s18 + $0x1a70] sm:$0xff] }
 0xb7e   : > { %17182 = vmatprep.subr.bf16.mxu1 %v19138_v45  ;;  %v19329_v45 = vcombine.low %v8634_v20, %v8642_v11  ;;  %v8866_v61 = vld [vmem:[%s22413_s18 + $0x19f0] sm:$0xff]  ;;  %v19569_v48 = vcombine.low %v8874_v57, %v8882_v10 }
 0xb7f   : > { %v8850_v27 = vld [vmem:[%s22413_s18 + $0x1970] sm:$0xff] }
 0xb80   : > { %17142 = vmatpush2.bf16.msra.mxu0 %v18881_v51  ;;  %v19570_v51 = vcombine.high %v8874_v57, %v8882_v10  ;;  %v8834_v20 = vld [vmem:[%s22413_s18 + $0x18f0] sm:$0xff] }
 0xb81   : > { %17183 = vmatpush2.bf16.msra.mxu1 %v19137_v46  ;;  %17143 = vmatprep.subr.bf16.mxu0 %v18866_v53  ;;  %v8602_v46 = vld [vmem:[%s22413_s18 + $0x11b0] sm:$0xff] }
 0xb82   : > { %17184 = vmatprep.subr.bf16.mxu1 %v19122_v2  ;;  %v8610_v53 = vld [vmem:[%s22413_s18 + $0x11f0] sm:$0xff] }
 0xb83   : > { %v8858_v2 = vld [vmem:[%s22413_s18 + $0x19b0] sm:$0xff]  ;;  %v19298_v6 = vcombine.high %v8602_v46, %v8610_v53  ;;  %v19297_v47 = vcombine.low %v8602_v46, %v8610_v53 }
 0xb84   : > { %17144 = vmatpush2.bf16.msra.mxu0 %v18865_v9  ;;  %v19554_v9 = vcombine.high %v8858_v2, %v8866_v61  ;;  %v19553_v49 = vcombine.low %v8858_v2, %v8866_v61  ;;  %v8794_v57 = vld [vmem:[%s22413_s18 + $0x17b0] sm:$0xff] }
 0xb85   : > { %17185 = vmatpush2.bf16.msra.mxu1 %v19121_v13  ;;  %17195 = vmatprep.subr.bf16.mxu0 %v19362_v37  ;;  %v8586_v13 = vld [vmem:[%s22413_s18 + $0x1130] sm:$0xff] }
 0xb86   : > { %17236 = vmatprep.subr.bf16.mxu1 %v19618_v58  ;;  %v8594_v37 = vld [vmem:[%s22413_s18 + $0x1170] sm:$0xff] }
 0xb87   : > { %v16901_v30 = vpop.f32.mrf.mxu0  ;;  %17146 = vmatmul.mubr.bf16.vlgmr.msra.gmra.mxu0 %v23605_v22  ;;  %v8842_v58 = vld [vmem:[%s22413_s18 + $0x1930] sm:$0xff]  ;;  %v19282_v44 = vcombine.high %v8586_v13, %v8594_v37  ;;  %v19281_v11 = vcombine.low %v8586_v13, %v8594_v37 }
 0xb88   : > { %v24798_v23 = vadd.f32 %v16901_v30, %v24725_v29  ;;  %v24800_v8 = vpop.f32.mrf.mxu1  ;;  %17187 = vmatmul.mubr.bf16.vlgmr.msra.gmra.mxu1 %v23616_v14  ;;  %17196 = vmatpush1.bf16.msra.mxu0 %v19361_v12  ;;  %v19586_v29 = vcombine.high %v8890_v7, %v8898_v24  ;;  %v19538_v12 = vcombine.high %v8842_v58, %v8850_v27  ;;  %v8802_v10 = vld [vmem:[%s22413_s18 + $0x17f0] sm:$0xff] }
 0xb89   : > { %17237 = vmatpush1.bf16.msra.mxu1 %v19617_v54  ;;  %v16903_v59 = vpop.f32.mrf.mxu0  ;;  %17197 = vmatprep.subr.bf16.mxu0 %v19346_v41  ;;  %v8570_v54 = vld [vmem:[%s22413_s18 + $0x10b0] sm:$0xff]  ;;  %v19537_v30 = vcombine.low %v8842_v58, %v8850_v27  ;;  %v19489_v61 = vcombine.low %v8794_v57, %v8802_v10 }
 0xb8a   : > { %v24804_v63 = vadd.f32 %v16903_v59, %v24734_v32  ;;  %v24806_v3 = vpop.f32.mrf.mxu1  ;;  %17238 = vmatprep.subr.bf16.mxu1 %v19602_v33  ;;  %17227 = vmatprep.mubr.bf16.mxu0 %v23612_v4  ;;  %v8578_v41 = vld [vmem:[%s22413_s18 + $0x10f0] sm:$0xff] }
 0xb8b   : > { %v16905_v0 = vpop.f32.mrf.mxu0  ;;  %17268 = vmatprep.mubr.bf16.mxu1 %v23625_v36  ;;  %v8826_v33 = vld [vmem:[%s22413_s18 + $0x18b0] sm:$0xff]  ;;  %v19266_v7 = vcombine.high %v8570_v54, %v8578_v41 }
 0xb8c   : > { %v17573_v32 = vcombine.low %v24798_v23, %v24804_v63  ;;  %v16946_v60 = vpop.f32.mrf.mxu1  ;;  %17198 = vmatpush1.bf16.msra.mxu0 %v19345_v1  ;;  %v19522_v24 = vcombine.high %v8826_v33, %v8834_v20  ;;  %v8554_v1 = vld [vmem:[%s22413_s18 + $0x1030] sm:$0xff]  ;;  %v19521_v35 = vcombine.low %v8826_v33, %v8834_v20  ;;  %v8587_v23 = vld [vmem:[%s22413_s18 + $0x1138] sm:$0xff] }
 0xb8d   : > { %17239 = vmatpush1.bf16.msra.mxu1 %v19601_v19  ;;  %v16906_v50 = vpop.f32.mrf.mxu0  ;;  %17199 = vmatprep.subr.bf16.mxu0 %v19330_v34  ;;  %v8562_v59 = vld [vmem:[%s22413_s18 + $0x1070] sm:$0xff]  ;;  %v8595_v63 = vld [vmem:[%s22413_s18 + $0x1178] sm:$0xff] }
 0xb8e   : > { %v16947_v42 = vpop.f32.mrf.mxu1  ;;  %17240 = vmatprep.subr.bf16.mxu1 %v19586_v29  ;;  %v8810_v19 = vld [vmem:[%s22413_s18 + $0x1830] sm:$0xff]  ;;  %v19265_v29 = vcombine.low %v8570_v54, %v8578_v41  ;;  %v19250_v26 = vcombine.high %v8554_v1, %v8562_v59  ;;  %v19249_v50 = vcombine.low %v8554_v1, %v8562_v59 }
 0xb8f   : > { %v8818_v34 = vld [vmem:[%s22413_s18 + $0x1870] sm:$0xff] }
 0xb90   : > { %17200 = vmatpush1.bf16.msra.mxu0 %v19329_v45  ;;  %v19506_v0 = vcombine.high %v8810_v19, %v8818_v34  ;;  %v9050_v60 = vld [vmem:[%s22413_s18 + $0x1fb0] sm:$0xff] }
 0xb91   : > { %17241 = vmatpush1.bf16.msra.mxu1 %v19585_v52  ;;  %17201 = vmatprep.subr.bf16.mxu0 %v19314_v56  ;;  %v9058_v45 = vld [vmem:[%s22413_s18 + $0x1ff0] sm:$0xff]  ;;  %v19505_v52 = vcombine.low %v8810_v19, %v8818_v34  ;;  %v19490_v56 = vcombine.high %v8794_v57, %v8802_v10 }
 0xb92   : > { %17242 = vmatprep.subr.bf16.mxu1 %v19570_v51  ;;  %v19746_v42 = vcombine.high %v9050_v60, %v9058_v45  ;;  %v8778_v51 = vld [vmem:[%s22413_s18 + $0x1730] sm:$0xff] }
 0xb93   : > { %v8786_v46 = vld [vmem:[%s22413_s18 + $0x1770] sm:$0xff] }
 0xb94   : > { %17202 = vmatpush1.bf16.msra.mxu0 %v19313_v5  ;;  %v9034_v53 = vld [vmem:[%s22413_s18 + $0x1f30] sm:$0xff]  ;;  %v19745_v5 = vcombine.low %v9050_v60, %v9058_v45  ;;  %v19473_v27 = vcombine.low %v8778_v51, %v8786_v46 }
 0xb95   : > { %17243 = vmatpush1.bf16.msra.mxu1 %v19569_v48  ;;  %17203 = vmatprep.subr.bf16.mxu0 %v19298_v6  ;;  %v9042_v2 = vld [vmem:[%s22413_s18 + $0x1f70] sm:$0xff]  ;;  %v19474_v48 = vcombine.high %v8778_v51, %v8786_v46 }
 0xb96   : > { %17244 = vmatprep.subr.bf16.mxu1 %v19554_v9  ;;  %v19730_v6 = vcombine.high %v9034_v53, %v9042_v2  ;;  %v8762_v9 = vld [vmem:[%s22413_s18 + $0x16b0] sm:$0xff] }
 0xb97   : > { %v8770_v13 = vld [vmem:[%s22413_s18 + $0x16f0] sm:$0xff] }
 0xb98   : > { %17204 = vmatpush1.bf16.msra.mxu0 %v19297_v47  ;;  %v9018_v37 = vld [vmem:[%s22413_s18 + $0x1eb0] sm:$0xff]  ;;  %v19729_v47 = vcombine.low %v9034_v53, %v9042_v2  ;;  %v19457_v20 = vcombine.low %v8762_v9, %v8770_v13 }
 0xb99   : > { %17245 = vmatpush1.bf16.msra.mxu1 %v19553_v49  ;;  %17205 = vmatprep.subr.bf16.mxu0 %v19282_v44  ;;  %v9026_v58 = vld [vmem:[%s22413_s18 + $0x1ef0] sm:$0xff]  ;;  %v19458_v49 = vcombine.high %v8762_v9, %v8770_v13 }
 0xb9a   : > { %17246 = vmatprep.subr.bf16.mxu1 %v19538_v12  ;;  %v19714_v44 = vcombine.high %v9018_v37, %v9026_v58  ;;  %v8746_v12 = vld [vmem:[%s22413_s18 + $0x1630] sm:$0xff] }
 0xb9b   : > { %v8754_v54 = vld [vmem:[%s22413_s18 + $0x1670] sm:$0xff] }
 0xb9c   : > { %17206 = vmatpush1.bf16.msra.mxu0 %v19281_v11  ;;  %v9002_v41 = vld [vmem:[%s22413_s18 + $0x1e30] sm:$0xff]  ;;  %v19713_v11 = vcombine.low %v9018_v37, %v9026_v58  ;;  %v19441_v34 = vcombine.low %v8746_v12, %v8754_v54 }
 0xb9d   : > { %17247 = vmatpush1.bf16.msra.mxu1 %v19537_v30  ;;  %17207 = vmatprep.subr.bf16.mxu0 %v19266_v7  ;;  %v9010_v33 = vld [vmem:[%s22413_s18 + $0x1e70] sm:$0xff]  ;;  %v19442_v30 = vcombine.high %v8746_v12, %v8754_v54  ;;  %v8155_v54 = vld [vmem:[%s22413_s18 + $0x3b8] sm:$0xff] }
 0xb9e   : > { %17248 = vmatprep.subr.bf16.mxu1 %v19522_v24  ;;  %v19698_v7 = vcombine.high %v9002_v41, %v9010_v33  ;;  %v8730_v24 = vld [vmem:[%s22413_s18 + $0x15b0] sm:$0xff] }
 0xb9f   : > { %v8738_v1 = vld [vmem:[%s22413_s18 + $0x15f0] sm:$0xff] }
 0xba0   : > { %17208 = vmatpush1.bf16.msra.mxu0 %v19265_v29  ;;  %v8986_v59 = vld [vmem:[%s22413_s18 + $0x1db0] sm:$0xff]  ;;  %v19697_v29 = vcombine.low %v9002_v41, %v9010_v33  ;;  %v19425_v45 = vcombine.low %v8730_v24, %v8738_v1  ;;  %v8163_v41 = vld [vmem:[%s22413_s18 + $0x3f8] sm:$0xff] }
 0xba1   : > { %17249 = vmatpush1.bf16.msra.mxu1 %v19521_v35  ;;  %17209 = vmatprep.subr.bf16.mxu0 %v19250_v26  ;;  %v8994_v19 = vld [vmem:[%s22413_s18 + $0x1df0] sm:$0xff]  ;;  %v19426_v35 = vcombine.high %v8730_v24, %v8738_v1  ;;  %v8139_v1 = vld [vmem:[%s22413_s18 + $0x338] sm:$0xff] }
 0xba2   : > { %17250 = vmatprep.subr.bf16.mxu1 %v19506_v0  ;;  %v19682_v26 = vcombine.high %v8986_v59, %v8994_v19  ;;  %v8714_v0 = vld [vmem:[%s22413_s18 + $0x1530] sm:$0xff] }
 0xba3   : > { %v8722_v57 = vld [vmem:[%s22413_s18 + $0x1570] sm:$0xff] }
 0xba4   : > { %17210 = vmatpush1.bf16.msra.mxu0 %v19249_v50  ;;  %v8970_v10 = vld [vmem:[%s22413_s18 + $0x1d30] sm:$0xff]  ;;  %v19681_v50 = vcombine.low %v8986_v59, %v8994_v19  ;;  %v19409_v2 = vcombine.low %v8714_v0, %v8722_v57  ;;  %v8147_v59 = vld [vmem:[%s22413_s18 + $0x378] sm:$0xff] }
 0xba5   : > { %17251 = vmatpush1.bf16.msra.mxu1 %v19505_v52  ;;  %17211 = vmatprep.subr.bf16.mxu0 %v19490_v56  ;;  %v8978_v60 = vld [vmem:[%s22413_s18 + $0x1d70] sm:$0xff]  ;;  %v19410_v52 = vcombine.high %v8714_v0, %v8722_v57 }
 0xba6   : > { %17252 = vmatprep.subr.bf16.mxu1 %v19746_v42  ;;  %v19666_v56 = vcombine.high %v8970_v10, %v8978_v60  ;;  %v8698_v42 = vld [vmem:[%s22413_s18 + $0x14b0] sm:$0xff] }
 0xba7   : > { %v8706_v51 = vld [vmem:[%s22413_s18 + $0x14f0] sm:$0xff] }
 0xba8   : > { %17212 = vmatpush2.bf16.msra.mxu0 %v19489_v61  ;;  %v8954_v46 = vld [vmem:[%s22413_s18 + $0x1cb0] sm:$0xff]  ;;  %v19665_v61 = vcombine.low %v8970_v10, %v8978_v60  ;;  %v19393_v58 = vcombine.low %v8698_v42, %v8706_v51  ;;  %v8123_v10 = vld [vmem:[%s22413_s18 + $0x2b8] sm:$0xff] }
 0xba9   : > { %17253 = vmatpush2.bf16.msra.mxu1 %v19745_v5  ;;  %17213 = vmatprep.subr.bf16.mxu0 %v19474_v48  ;;  %v8962_v53 = vld [vmem:[%s22413_s18 + $0x1cf0] sm:$0xff]  ;;  %v19394_v5 = vcombine.high %v8698_v42, %v8706_v51  ;;  %v8131_v60 = vld [vmem:[%s22413_s18 + $0x2f8] sm:$0xff] }
 0xbaa   : > { %17254 = vmatprep.subr.bf16.mxu1 %v19730_v6  ;;  %v19650_v48 = vcombine.high %v8954_v46, %v8962_v53  ;;  %v8682_v6 = vld [vmem:[%s22413_s18 + $0x1430] sm:$0xff] }
 0xbab   : > { %v8690_v9 = vld [vmem:[%s22413_s18 + $0x1470] sm:$0xff] }
 0xbac   : > { %17214 = vmatpush2.bf16.msra.mxu0 %v19473_v27  ;;  %v8938_v13 = vld [vmem:[%s22413_s18 + $0x1c30] sm:$0xff]  ;;  %v19649_v27 = vcombine.low %v8954_v46, %v8962_v53  ;;  %v19377_v33 = vcombine.low %v8682_v6, %v8690_v9  ;;  %v18820_v46 = vcombine.high %v8123_v10, %v8131_v60 }
 0xbad   : > { %17255 = vmatpush2.bf16.msra.mxu1 %v19729_v47  ;;  %17215 = vmatprep.subr.bf16.mxu0 %v19458_v49  ;;  %v8946_v37 = vld [vmem:[%s22413_s18 + $0x1c70] sm:$0xff]  ;;  %v19378_v47 = vcombine.high %v8682_v6, %v8690_v9 }
 0xbae   : > { %17256 = vmatprep.subr.bf16.mxu1 %v19714_v44  ;;  %v19634_v49 = vcombine.high %v8938_v13, %v8946_v37  ;;  %v9178_v44 = vld [vmem:[%s22413_s18 + $0x23b0] sm:$0xff] }
 0xbaf   : > { %v9186_v12 = vld [vmem:[%s22413_s18 + $0x23f0] sm:$0xff] }
 0xbb0   : > { %17216 = vmatpush2.bf16.msra.mxu0 %v19457_v20  ;;  %v19633_v20 = vcombine.low %v8938_v13, %v8946_v37  ;;  %v9170_v24 = vld [vmem:[%s22413_s18 + $0x2370] sm:$0xff]  ;;  %v19873_v19 = vcombine.low %v9178_v44, %v9186_v12  ;;  %v18819_v37 = vcombine.low %v8123_v10, %v8131_v60 }
 0xbb1   : > { %17257 = vmatpush2.bf16.msra.mxu1 %v19713_v11  ;;  %17217 = vmatprep.subr.bf16.mxu0 %v19442_v30  ;;  %v19874_v11 = vcombine.high %v9178_v44, %v9186_v12  ;;  %v18852_v30 = vcombine.high %v8155_v54, %v8163_v41  ;;  %v9154_v0 = vld [vmem:[%s22413_s18 + $0x22f0] sm:$0xff]  ;;  %v8091_v12 = vld [vmem:[%s22413_s18 + $0x1b8] sm:$0xff] }
 0xbb2   : > { %17258 = vmatprep.subr.bf16.mxu1 %v19698_v7  ;;  %v9162_v7 = vld [vmem:[%s22413_s18 + $0x2330] sm:$0xff] }
 0xbb3   : > { %v9130_v53 = vld [vmem:[%s22413_s18 + $0x2230] sm:$0xff] }
 0xbb4   : > { %17218 = vmatpush2.bf16.msra.mxu0 %v19441_v34  ;;  %v18851_v34 = vcombine.low %v8155_v54, %v8163_v41  ;;  %v9122_v44 = vld [vmem:[%s22413_s18 + $0x21f0] sm:$0xff]  ;;  %v8099_v54 = vld [vmem:[%s22413_s18 + $0x1f8] sm:$0xff] }
 0xbb5   : > { %17259 = vmatpush2.bf16.msra.mxu1 %v19697_v29  ;;  %17219 = vmatprep.subr.bf16.mxu0 %v19426_v35  ;;  %v19858_v29 = vcombine.high %v9162_v7, %v9170_v24  ;;  %v18836_v35 = vcombine.high %v8139_v1, %v8147_v59 }
 0xbb6   : > { %17260 = vmatprep.subr.bf16.mxu1 %v19682_v26  ;;  %v9146_v26 = vld [vmem:[%s22413_s18 + $0x22b0] sm:$0xff] }
 0xbb7   : > { %v19842_v42 = vcombine.high %v9146_v26, %v9154_v0  ;;  %v19841_v9 = vcombine.low %v9146_v26, %v9154_v0  ;;  %v8059_v26 = vld [vmem:[%s22413_s18 + $0xb8] sm:$0xff] }
 0xbb8   : > { %17220 = vmatpush2.bf16.msra.mxu0 %v19425_v45  ;;  %v8067_v0 = vld [vmem:[%s22413_s18 + $0xf8] sm:$0xff] }
 0xbb9   : > { %17261 = vmatpush2.bf16.msra.mxu1 %v19681_v50  ;;  %17221 = vmatprep.subr.bf16.mxu0 %v19410_v52  ;;  %v19857_v50 = vcombine.low %v9162_v7, %v9170_v24  ;;  %v8075_v7 = vld [vmem:[%s22413_s18 + $0x138] sm:$0xff] }
 0xbba   : > { %17262 = vmatprep.subr.bf16.mxu1 %v19666_v56  ;;  %v18835_v56 = vcombine.low %v8139_v1, %v8147_v59  ;;  %v8083_v24 = vld [vmem:[%s22413_s18 + $0x178] sm:$0xff]  ;;  %v18787_v59 = vcombine.low %v8091_v12, %v8099_v54 }
 0xbbb   : > { %v18771_v60 = vcombine.low %v8075_v7, %v8083_v24 }
 0xbbc   : > { %17222 = vmatpush2.bf16.msra.mxu0 %v19409_v2  ;;  %v9138_v2 = vld [vmem:[%s22413_s18 + $0x2270] sm:$0xff] }
 0xbbd   : > { %17263 = vmatpush2.bf16.msra.mxu1 %v19665_v61  ;;  %17223 = vmatprep.subr.bf16.mxu0 %v19394_v5  ;;  %v8107_v5 = vld [vmem:[%s22413_s18 + $0x238] sm:$0xff] }
 0xbbe   : > { %17264 = vmatprep.subr.bf16.mxu1 %v19650_v48  ;;  %v8115_v48 = vld [vmem:[%s22413_s18 + $0x278] sm:$0xff] }
 0xbbf   : > { %v18803_v41 = vcombine.low %v8107_v5, %v8115_v48 }
 0xbc0   : > { %17224 = vmatpush2.bf16.msra.mxu0 %v19393_v58  ;;  %v19826_v58 = vcombine.high %v9130_v53, %v9138_v2 }
 0xbc1   : > { %17265 = vmatpush2.bf16.msra.mxu1 %v19649_v27  ;;  %17225 = vmatprep.subr.bf16.mxu0 %v19378_v47  ;;  %v18804_v47 = vcombine.high %v8107_v5, %v8115_v48  ;;  %v18755_v5 = vcombine.low %v8059_v26, %v8067_v0 }
 0xbc2   : > { %17266 = vmatprep.subr.bf16.mxu1 %v19634_v49  ;;  %v9114_v49 = vld [vmem:[%s22413_s18 + $0x21b0] sm:$0xff] }
 0xbc3   : > { %v19809_v1 = vcombine.low %v9114_v49, %v9122_v44 }
 0xbc4   : > { %17226 = vmatpush2.bf16.msra.mxu0 %v19377_v33  ;;  %v19810_v33 = vcombine.high %v9114_v49, %v9122_v44 }
 0xbc5   : > { %17267 = vmatpush2.bf16.msra.mxu1 %v19633_v20  ;;  %17277 = vmatprep.subr.bf16.mxu0 %v19874_v11  ;;  %v18788_v20 = vcombine.high %v8091_v12, %v8099_v54  ;;  %v9098_v11 = vld [vmem:[%s22413_s18 + $0x2130] sm:$0xff] }
 0xbc6   : > { %17318 = vmatprep.subr.bf16.mxu1 %v18852_v30  ;;  %v9106_v30 = vld [vmem:[%s22413_s18 + $0x2170] sm:$0xff] }
 0xbc7   : > { %v24874_v57 = vpop.f32.mrf.mxu0  ;;  %17228 = vmatmul.mubr.bf16.vlgmr.msra.gmra.mxu0 %v23575_v18  ;;  %v19793_v10 = vcombine.low %v9098_v11, %v9106_v30  ;;  %v9290_v12 = vld [vmem:[%s22413_s18 + $0x2730] sm:$0xff] }
 0xbc8   : > { %v24879_v45 = vpop.f32.mrf.mxu1  ;;  %17269 = vmatmul.mubr.bf16.vlgmr.msra.gmra.mxu1 %v23696_v15  ;;  %17278 = vmatpush1.bf16.msra.mxu0 %v19873_v19  ;;  %v19794_v19 = vcombine.high %v9098_v11, %v9106_v30  ;;  %v9298_v54 = vld [vmem:[%s22413_s18 + $0x2770] sm:$0xff] }
 0xbc9   : > { %17319 = vmatpush1.bf16.msra.mxu1 %v18851_v34  ;;  %v24882_v52 = vpop.f32.mrf.mxu0  ;;  %17279 = vmatprep.subr.bf16.mxu0 %v19858_v29  ;;  %v18772_v34 = vcombine.high %v8075_v7, %v8083_v24  ;;  %v9082_v29 = vld [vmem:[%s22413_s18 + $0x20b0] sm:$0xff]  ;;  %v19986_v11 = vcombine.high %v9290_v12, %v9298_v54 }
 0xbca   : > { %v24884_v51 = vpop.f32.mrf.mxu1  ;;  %17320 = vmatprep.subr.bf16.mxu1 %v18836_v35  ;;  %17309 = vmatprep.mubr.bf16.mxu0 %v23701_v39  ;;  %v9090_v35 = vld [vmem:[%s22413_s18 + $0x20f0] sm:$0xff] }
 0xbcb   : > { %v16987_v61 = vpop.f32.mrf.mxu0  ;;  %17350 = vmatprep.mubr.bf16.mxu1 %v23552_v25  ;;  %v19825_v25 = vcombine.low %v9130_v53, %v9138_v2  ;;  %v8043_v53 = vld [vmem:[%s22413_s18 + $0x38] sm:$0xff]  ;;  %v9274_v7 = vld [vmem:[%s22413_s18 + $0x26b0] sm:$0xff] }
 0xbcc   : > { %v17028_v6 = vpop.f32.mrf.mxu1  ;;  %17280 = vmatpush1.bf16.msra.mxu0 %v19857_v50  ;;  %v19778_v50 = vcombine.high %v9082_v29, %v9090_v35  ;;  %v8051_v2 = vld [vmem:[%s22413_s18 + $0x78] sm:$0xff]  ;;  %v19777_v61 = vcombine.low %v9082_v29, %v9090_v35  ;;  %v9282_v24 = vld [vmem:[%s22413_s18 + $0x26f0] sm:$0xff] }
 0xbcd   : > { %17321 = vmatpush1.bf16.msra.mxu1 %v18835_v56  ;;  %v16988_v13 = vpop.f32.mrf.mxu0  ;;  %17281 = vmatprep.subr.bf16.mxu0 %v19842_v42  ;;  %v18756_v56 = vcombine.high %v8059_v26, %v8067_v0  ;;  %v9066_v42 = vld [vmem:[%s22413_s18 + $0x2030] sm:$0xff]  ;;  %v18740_v6 = vcombine.high %v8043_v53, %v8051_v2  ;;  %v19970_v29 = vcombine.high %v9274_v7, %v9282_v24 }
 0xbce   : > { %v17029_v27 = vpop.f32.mrf.mxu1  ;;  %17322 = vmatprep.subr.bf16.mxu1 %v18820_v46  ;;  %v9074_v46 = vld [vmem:[%s22413_s18 + $0x2070] sm:$0xff] }
 0xbcf   : > { %v19762_v48 = vcombine.high %v9066_v42, %v9074_v46  ;;  %v9314_v13 = vld [vmem:[%s22413_s18 + $0x27f0] sm:$0xff]  ;;  %v19761_v27 = vcombine.low %v9066_v42, %v9074_v46 }
 0xbd0   : > { %17282 = vmatpush1.bf16.msra.mxu0 %v19841_v9  ;;  %v9306_v9 = vld [vmem:[%s22413_s18 + $0x27b0] sm:$0xff] }
 0xbd1   : > { %17323 = vmatpush1.bf16.msra.mxu1 %v18819_v37  ;;  %17283 = vmatprep.subr.bf16.mxu0 %v19826_v58  ;;  %v8283_v37 = vld [vmem:[%s22413_s18 + $0x7b8] sm:$0xff]  ;;  %v20002_v49 = vcombine.high %v9306_v9, %v9314_v13  ;;  %v9258_v26 = vld [vmem:[%s22413_s18 + $0x2630] sm:$0xff] }
 0xbd2   : > { %17324 = vmatprep.subr.bf16.mxu1 %v18804_v47  ;;  %v8291_v58 = vld [vmem:[%s22413_s18 + $0x7f8] sm:$0xff]  ;;  %v18739_v47 = vcombine.low %v8043_v53, %v8051_v2  ;;  %v9266_v0 = vld [vmem:[%s22413_s18 + $0x2670] sm:$0xff] }
 0xbd3   : > { %v18980_v44 = vcombine.high %v8283_v37, %v8291_v58  ;;  %v19954_v42 = vcombine.high %v9258_v26, %v9266_v0  ;;  %v9242_v53 = vld [vmem:[%s22413_s18 + $0x25b0] sm:$0xff] }
 0xbd4   : > { %17284 = vmatpush1.bf16.msra.mxu0 %v19825_v25  ;;  %v8267_v25 = vld [vmem:[%s22413_s18 + $0x738] sm:$0xff]  ;;  %v9250_v2 = vld [vmem:[%s22413_s18 + $0x25f0] sm:$0xff] }
 0xbd5   : > { %17325 = vmatpush1.bf16.msra.mxu1 %v18803_v41  ;;  %17285 = vmatprep.subr.bf16.mxu0 %v19810_v33  ;;  %v8275_v41 = vld [vmem:[%s22413_s18 + $0x778] sm:$0xff]  ;;  %v20001_v33 = vcombine.low %v9306_v9, %v9314_v13  ;;  %v19938_v9 = vcombine.high %v9242_v53, %v9250_v2 }
 0xbd6   : > { %17326 = vmatprep.subr.bf16.mxu1 %v18788_v20  ;;  %v18979_v20 = vcombine.low %v8283_v37, %v8291_v58  ;;  %v18964_v30 = vcombine.high %v8267_v25, %v8275_v41  ;;  %v9226_v37 = vld [vmem:[%s22413_s18 + $0x2530] sm:$0xff] }
 0xbd7   : > { %v9234_v58 = vld [vmem:[%s22413_s18 + $0x2570] sm:$0xff] }
 0xbd8   : > { %17286 = vmatpush1.bf16.msra.mxu0 %v19809_v1  ;;  %v8251_v1 = vld [vmem:[%s22413_s18 + $0x6b8] sm:$0xff] }
 0xbd9   : > { %17327 = vmatpush1.bf16.msra.mxu1 %v18787_v59  ;;  %17287 = vmatprep.subr.bf16.mxu0 %v19794_v19  ;;  %v8259_v59 = vld [vmem:[%s22413_s18 + $0x6f8] sm:$0xff]  ;;  %v19985_v19 = vcombine.low %v9290_v12, %v9298_v54  ;;  %v19922_v12 = vcombine.high %v9226_v37, %v9234_v58 }
 0xbda   : > { %17328 = vmatprep.subr.bf16.mxu1 %v18772_v34  ;;  %v18963_v34 = vcombine.low %v8267_v25, %v8275_v41  ;;  %v18948_v35 = vcombine.high %v8251_v1, %v8259_v59  ;;  %v9210_v25 = vld [vmem:[%s22413_s18 + $0x24b0] sm:$0xff] }
 0xbdb   : > { %v9218_v41 = vld [vmem:[%s22413_s18 + $0x24f0] sm:$0xff] }
 0xbdc   : > { %17288 = vmatpush1.bf16.msra.mxu0 %v19793_v10  ;;  %v8235_v10 = vld [vmem:[%s22413_s18 + $0x638] sm:$0xff] }
 0xbdd   : > { %17329 = vmatpush1.bf16.msra.mxu1 %v18771_v60  ;;  %17289 = vmatprep.subr.bf16.mxu0 %v19778_v50  ;;  %v8243_v60 = vld [vmem:[%s22413_s18 + $0x678] sm:$0xff]  ;;  %v19969_v50 = vcombine.low %v9274_v7, %v9282_v24  ;;  %v19906_v7 = vcombine.high %v9210_v25, %v9218_v41 }
 0xbde   : > { %17330 = vmatprep.subr.bf16.mxu1 %v18756_v56  ;;  %v18947_v56 = vcombine.low %v8251_v1, %v8259_v59  ;;  %v18932_v46 = vcombine.high %v8235_v10, %v8243_v60  ;;  %v9194_v1 = vld [vmem:[%s22413_s18 + $0x2430] sm:$0xff] }
 0xbdf   : > { %v9202_v59 = vld [vmem:[%s22413_s18 + $0x2470] sm:$0xff] }
 0xbe0   : > { %17290 = vmatpush1.bf16.msra.mxu0 %v19777_v61  ;;  %v8219_v61 = vld [vmem:[%s22413_s18 + $0x5b8] sm:$0xff] }
 0xbe1   : > { %17331 = vmatpush1.bf16.msra.mxu1 %v18755_v5  ;;  %17291 = vmatprep.subr.bf16.mxu0 %v19762_v48  ;;  %v8227_v5 = vld [vmem:[%s22413_s18 + $0x5f8] sm:$0xff]  ;;  %v19953_v48 = vcombine.low %v9258_v26, %v9266_v0  ;;  %v19905_v26 = vcombine.low %v9210_v25, %v9218_v41 }
 0xbe2   : > { %17332 = vmatprep.subr.bf16.mxu1 %v18740_v6  ;;  %v18931_v6 = vcombine.low %v8235_v10, %v8243_v60  ;;  %v18916_v13 = vcombine.high %v8219_v61, %v8227_v5  ;;  %v19890_v10 = vcombine.high %v9194_v1, %v9202_v59  ;;  %v8635_v25 = vld [vmem:[%s22413_s18 + $0x12b8] sm:$0xff] }
 0xbe3   : > { %v8643_v41 = vld [vmem:[%s22413_s18 + $0x12f8] sm:$0xff] }
 0xbe4   : > { %17292 = vmatpush1.bf16.msra.mxu0 %v19761_v27  ;;  %v8203_v27 = vld [vmem:[%s22413_s18 + $0x538] sm:$0xff] }
 0xbe5   : > { %17333 = vmatpush1.bf16.msra.mxu1 %v18739_v47  ;;  %17293 = vmatprep.subr.bf16.mxu0 %v20002_v49  ;;  %v8211_v47 = vld [vmem:[%s22413_s18 + $0x578] sm:$0xff]  ;;  %v19937_v49 = vcombine.low %v9242_v53, %v9250_v2  ;;  %v19889_v2 = vcombine.low %v9194_v1, %v9202_v59  ;;  %v19332_v59 = vcombine.high %v8635_v25, %v8643_v41 }
 0xbe6   : > { %17334 = vmatprep.subr.bf16.mxu1 %v18980_v44  ;;  %v18915_v44 = vcombine.low %v8219_v61, %v8227_v5  ;;  %v18900_v54 = vcombine.high %v8203_v27, %v8211_v47 }
 0xbe8   : > { %17294 = vmatpush2.bf16.msra.mxu0 %v20001_v33  ;;  %v8187_v33 = vld [vmem:[%s22413_s18 + $0x4b8] sm:$0xff] }
 0xbe9   : > { %17335 = vmatpush2.bf16.msra.mxu1 %v18979_v20  ;;  %17295 = vmatprep.subr.bf16.mxu0 %v19986_v11  ;;  %v8195_v20 = vld [vmem:[%s22413_s18 + $0x4f8] sm:$0xff]  ;;  %v19921_v11 = vcombine.low %v9226_v37, %v9234_v58 }
 0xbea   : > { %17336 = vmatprep.subr.bf16.mxu1 %v18964_v30  ;;  %v18899_v30 = vcombine.low %v8203_v27, %v8211_v47  ;;  %v18884_v24 = vcombine.high %v8187_v33, %v8195_v20  ;;  %v18883_v0 = vcombine.low %v8187_v33, %v8195_v20  ;;  %v8651_v37 = vld [vmem:[%s22413_s18 + $0x1338] sm:$0xff] }
 0xbeb   : > { %v8659_v58 = vld [vmem:[%s22413_s18 + $0x1378] sm:$0xff] }
 0xbec   : > { %17296 = vmatpush2.bf16.msra.mxu0 %v19985_v19  ;;  %v8171_v19 = vld [vmem:[%s22413_s18 + $0x438] sm:$0xff] }
 0xbed   : > { %17337 = vmatpush2.bf16.msra.mxu1 %v18963_v34  ;;  %17297 = vmatprep.subr.bf16.mxu0 %v19970_v29  ;;  %v8179_v34 = vld [vmem:[%s22413_s18 + $0x478] sm:$0xff] }
 0xbee   : > { %17338 = vmatprep.subr.bf16.mxu1 %v18948_v35  ;;  %v24941_v29 = vld [vmem:[%s22425_s19 + $0x8] sm:$0xff]  ;;  %v18867_v61 = vcombine.low %v8171_v19, %v8179_v34 }
 0xbef   : > { %v9363_v35 = vrot.slane %v24941_v29, %v9330_v17  ;;  %v9367_v60 = vrot.slane %v24941_v29, %v9334_v62  ;;  %v8675_v17 = vld [vmem:[%s22413_s18 + $0x13f8] sm:$0xff] }
 0xbf0   : > { %17298 = vmatpush2.bf16.msra.mxu0 %v19969_v50  ;;  %v18868_v50 = vcombine.high %v8171_v19, %v8179_v34  ;;  %v8363_v19 = vld [vmem:[%s22413_s18 + $0xa38] sm:$0xff] }
 0xbf1   : > { %17339 = vmatpush2.bf16.msra.mxu1 %v18947_v56  ;;  %17299 = vmatprep.subr.bf16.mxu0 %v19954_v42  ;;  %v8411_v56 = vld [vmem:[%s22413_s18 + $0xbb8] sm:$0xff]  ;;  %v16943_v53 = vadd.f32 %v24800_v8, %v9363_v35  ;;  %v16945_v62 = vadd.f32 %v24806_v3, %v9367_v60 }
 0xbf2   : > { %17340 = vmatprep.subr.bf16.mxu1 %v18932_v46  ;;  %v8419_v42 = vld [vmem:[%s22413_s18 + $0xbf8] sm:$0xff] }
 0xbf3   : > { %v8667_v46 = vld [vmem:[%s22413_s18 + $0x13b8] sm:$0xff]  ;;  %v19108_v5 = vcombine.high %v8411_v56, %v8419_v42  ;;  %v16986_v8 = vadd.f32 %v24882_v52, %v16945_v62  ;;  %v19107_v27 = vcombine.low %v8411_v56, %v8419_v42  ;;  %v19331_v56 = vcombine.low %v8635_v25, %v8643_v41 }
 0xbf4   : > { %17300 = vmatpush2.bf16.msra.mxu0 %v19953_v48  ;;  %v16984_v48 = vadd.f32 %v24874_v57, %v16943_v53  ;;  %v19363_v47 = vcombine.low %v8667_v46, %v8675_v17  ;;  %v8619_v35 = vld [vmem:[%s22413_s18 + $0x1238] sm:$0xff]  ;;  %v19283_v25 = vcombine.low %v8587_v23, %v8595_v63 }
 0xbf5   : > { %17341 = vmatpush2.bf16.msra.mxu1 %v18931_v6  ;;  %17301 = vmatprep.subr.bf16.mxu0 %v19938_v9  ;;  %v19364_v6 = vcombine.high %v8667_v46, %v8675_v17  ;;  %v8395_v9 = vld [vmem:[%s22413_s18 + $0xb38] sm:$0xff]  ;;  %v17027_v52 = vadd.f32 %v24884_v51, %v16986_v8 }
 0xbf6   : > { %17342 = vmatprep.subr.bf16.mxu1 %v18916_v13  ;;  %v8403_v13 = vld [vmem:[%s22413_s18 + $0xb78] sm:$0xff]  ;;  %v17025_v57 = vadd.f32 %v24879_v45, %v16984_v48 }
 0xbf7   : > { %v19092_v3 = vcombine.high %v8395_v9, %v8403_v13  ;;  %v19091_v45 = vcombine.low %v8395_v9, %v8403_v13  ;;  %v8371_v51 = vld [vmem:[%s22413_s18 + $0xa78] sm:$0xff] }
 0xbf8   : > { %17302 = vmatpush2.bf16.msra.mxu0 %v19937_v49  ;;  %v19348_v49 = vcombine.high %v8651_v37, %v8659_v58  ;;  %v19060_v42 = vcombine.high %v8363_v19, %v8371_v51  ;;  %v8347_v53 = vld [vmem:[%s22413_s18 + $0x9b8] sm:$0xff]  ;;  %v19059_v48 = vcombine.low %v8363_v19, %v8371_v51 }
 0xbf9   : > { %17343 = vmatpush2.bf16.msra.mxu1 %v18915_v44  ;;  %17303 = vmatprep.subr.bf16.mxu0 %v19922_v12  ;;  %v8379_v44 = vld [vmem:[%s22413_s18 + $0xab8] sm:$0xff] }
 0xbfa   : > { %17344 = vmatprep.subr.bf16.mxu1 %v18900_v54  ;;  %v8387_v12 = vld [vmem:[%s22413_s18 + $0xaf8] sm:$0xff] }
 0xbfb   : > { %v19075_v60 = vcombine.low %v8379_v44, %v8387_v12  ;;  %v8339_v8 = vld [vmem:[%s22413_s18 + $0x978] sm:$0xff] }
 0xbfc   : > { %17304 = vmatpush2.bf16.msra.mxu0 %v19921_v11  ;;  %v8547_v19 = vld [vmem:[%s22413_s18 + $0xff8] sm:$0xff] }
 0xbfd   : > { %17345 = vmatpush2.bf16.msra.mxu1 %v18899_v30  ;;  %17305 = vmatprep.subr.bf16.mxu0 %v19906_v7  ;;  %v19347_v30 = vcombine.low %v8651_v37, %v8659_v58  ;;  %v19076_v7 = vcombine.high %v8379_v44, %v8387_v12  ;;  %v8331_v58 = vld [vmem:[%s22413_s18 + $0x938] sm:$0xff] }
 0xbfe   : > { %17346 = vmatprep.subr.bf16.mxu1 %v18884_v24  ;;  %v8571_v44 = vld [vmem:[%s22413_s18 + $0x10b8] sm:$0xff] }
 0xbff   : > { %v8579_v12 = vld [vmem:[%s22413_s18 + $0x10f8] sm:$0xff] }
 0xc00   : > { %17306 = vmatpush2.bf16.msra.mxu0 %v19905_v26  ;;  %v8795_v51 = vld [vmem:[%s22413_s18 + $0x17b8] sm:$0xff] }
 0xc01   : > { %17347 = vmatpush2.bf16.msra.mxu1 %v18883_v0  ;;  %17307 = vmatprep.subr.bf16.mxu0 %v19890_v10 }
 0xc02   : > { %17348 = vmatprep.subr.bf16.mxu1 %v18868_v50 }
 0xc04   : > { %17308 = vmatpush2.bf16.msra.mxu0 %v19889_v2  ;;  %v8603_v2 = vld [vmem:[%s22413_s18 + $0x11b8] sm:$0xff] }
 0xc05   : > { %17349 = vmatpush2.bf16.msra.mxu1 %v18867_v61  ;;  %17359 = vmatprep.subr.bf16.mxu0 %v19108_v5  ;;  %v8611_v61 = vld [vmem:[%s22413_s18 + $0x11f8] sm:$0xff]  ;;  %v17581_v5 = vrot.slane %v17573_v32, %v24180_v31 }
 0xc06   : > { %17400 = vmatprep.subr.bf16.mxu1 %v19364_v6  ;;  %v19300_v37 = vcombine.high %v8603_v2, %v8611_v61 }
 0xc07   : > { %v17065_v54 = vpop.f32.mrf.mxu0  ;;  %17310 = vmatmul.mubr.bf16.vlgmr.msra.gmra.mxu0 %v23769_v28 }
 0xc08   : > { %v17066_v33 = vadd.f32 %v17065_v54, %v17025_v57  ;;  %v17106_v20 = vpop.f32.mrf.mxu1  ;;  %17351 = vmatmul.mubr.bf16.vlgmr.msra.gmra.mxu1 %v23605_v22  ;;  %17360 = vmatpush1.bf16.msra.mxu0 %v19107_v27  ;;  %v8627_v22 = vld [vmem:[%s22413_s18 + $0x1278] sm:$0xff]  ;;  %v19299_v27 = vcombine.low %v8603_v2, %v8611_v61  ;;  %v19027_v54 = vcombine.low %v8331_v58, %v8339_v8 }
 0xc09   : > { %17401 = vmatpush1.bf16.msra.mxu1 %v19363_v47  ;;  %v17067_v11 = vpop.f32.mrf.mxu0  ;;  %17361 = vmatprep.subr.bf16.mxu0 %v19092_v3  ;;  %v19316_v17 = vcombine.high %v8619_v35, %v8627_v22  ;;  %v19315_v6 = vcombine.low %v8619_v35, %v8627_v22  ;;  %v19028_v47 = vcombine.high %v8331_v58, %v8339_v8  ;;  %v8315_v57 = vld [vmem:[%s22413_s18 + $0x8b8] sm:$0xff] }
 0xc0a   : > { %v17068_v24 = vadd.f32 %v17067_v11, %v17027_v52  ;;  %v17108_v1 = vpop.f32.mrf.mxu1  ;;  %17402 = vmatprep.subr.bf16.mxu1 %v19348_v49  ;;  %17391 = vmatprep.mubr.bf16.mxu0 %v23559_v21  ;;  %v17107_v26 = vadd.f32 %v17106_v20, %v17066_v33  ;;  %v19284_v3 = vcombine.high %v8587_v23, %v8595_v63  ;;  %v8323_v49 = vld [vmem:[%s22413_s18 + $0x8f8] sm:$0xff] }
 0xc0b   : > { %v17069_v34 = vpop.f32.mrf.mxu0  ;;  %17432 = vmatprep.mubr.bf16.mxu1 %v23612_v4  ;;  %v8355_v4 = vld [vmem:[%s22413_s18 + $0x9f8] sm:$0xff]  ;;  %v19012_v41 = vcombine.high %v8315_v57, %v8323_v49  ;;  %v19268_v52 = vcombine.high %v8571_v44, %v8579_v12 }
 0xc0c   : > { %v17109_v0 = vadd.f32 %v17108_v1, %v17068_v24  ;;  %v17110_v10 = vpop.f32.mrf.mxu1  ;;  %17362 = vmatpush1.bf16.msra.mxu0 %v19091_v45  ;;  %v19044_v9 = vcombine.high %v8347_v53, %v8355_v4  ;;  %v19043_v32 = vcombine.low %v8347_v53, %v8355_v4  ;;  %v8299_v33 = vld [vmem:[%s22413_s18 + $0x838] sm:$0xff] }
 0xc0d   : > { %17403 = vmatpush1.bf16.msra.mxu1 %v19347_v30  ;;  %v17070_v50 = vpop.f32.mrf.mxu0  ;;  %17363 = vmatprep.subr.bf16.mxu0 %v19076_v7  ;;  %v8307_v20 = vld [vmem:[%s22413_s18 + $0x878] sm:$0xff]  ;;  %v19011_v30 = vcombine.low %v8315_v57, %v8323_v49  ;;  %v19267_v7 = vcombine.low %v8571_v44, %v8579_v12 }
 0xc0e   : > { %v17574_v21 = vcombine.low %v17107_v26, %v17109_v0  ;;  %v17111_v46 = vpop.f32.mrf.mxu1  ;;  %17404 = vmatprep.subr.bf16.mxu1 %v19332_v59  ;;  %v8555_v45 = vld [vmem:[%s22413_s18 + $0x1038] sm:$0xff]  ;;  %v18996_v24 = vcombine.high %v8299_v33, %v8307_v20  ;;  %v18995_v35 = vcombine.low %v8299_v33, %v8307_v20 }
 0xc0f   : > { %v8563_v11 = vld [vmem:[%s22413_s18 + $0x1078] sm:$0xff] }
 0xc10   : > { %v17588_v62 = vrot.slane %v17574_v21, %v24180_v31  ;;  %17364 = vmatpush1.bf16.msra.mxu0 %v19075_v60  ;;  %v19252_v1 = vcombine.high %v8555_v45, %v8563_v11  ;;  %v8539_v59 = vld [vmem:[%s22413_s18 + $0xfb8] sm:$0xff]  ;;  %v19251_v22 = vcombine.low %v8555_v45, %v8563_v11 }
 0xc11   : > { %17405 = vmatpush1.bf16.msra.mxu1 %v19331_v56  ;;  %17365 = vmatprep.subr.bf16.mxu0 %v19060_v42  ;;  %v8803_v34 = vld [vmem:[%s22413_s18 + $0x17f8] sm:$0xff]  ;;  %v19236_v26 = vcombine.high %v8539_v59, %v8547_v19  ;;  %v19235_v42 = vcombine.low %v8539_v59, %v8547_v19 }
 0xc12   : > { %v17589_v13 = vcombine.low %v17581_v5, %v17588_v62  ;;  %17406 = vmatprep.subr.bf16.mxu1 %v19316_v17  ;;  %v19492_v0 = vcombine.high %v8795_v51, %v8803_v34  ;;  %v8523_v10 = vld [vmem:[%s22413_s18 + $0xf38] sm:$0xff]  ;;  %v19491_v21 = vcombine.low %v8795_v51, %v8803_v34 }
 0xc13   : > { %v8531_v60 = vld [vmem:[%s22413_s18 + $0xf78] sm:$0xff] }
 0xc14   : > { %17613 = vst [vmem:[%s22423_s5 + $0x10] sm:$0xff] %v17589_v13  ;;  %17366 = vmatpush1.bf16.msra.mxu0 %v19059_v48  ;;  %v8779_v50 = vld [vmem:[%s22413_s18 + $0x1738] sm:$0xff]  ;;  %v19220_v46 = vcombine.high %v8523_v10, %v8531_v60  ;;  %v19219_v5 = vcombine.low %v8523_v10, %v8531_v60 }
 0xc15   : > { %17407 = vmatpush1.bf16.msra.mxu1 %v19315_v6  ;;  %17367 = vmatprep.subr.bf16.mxu0 %v19044_v9  ;;  %v8787_v56 = vld [vmem:[%s22413_s18 + $0x1778] sm:$0xff] }
 0xc16   : > { %17408 = vmatprep.subr.bf16.mxu1 %v19300_v37  ;;  %v19476_v17 = vcombine.high %v8779_v50, %v8787_v56  ;;  %v8507_v53 = vld [vmem:[%s22413_s18 + $0xeb8] sm:$0xff]  ;;  %v19475_v62 = vcombine.low %v8779_v50, %v8787_v56 }
 0xc17   : > { %v8515_v4 = vld [vmem:[%s22413_s18 + $0xef8] sm:$0xff] }
 0xc18   : > { %17368 = vmatpush1.bf16.msra.mxu0 %v19043_v32  ;;  %v8763_v2 = vld [vmem:[%s22413_s18 + $0x16b8] sm:$0xff]  ;;  %v19204_v48 = vcombine.high %v8507_v53, %v8515_v4  ;;  %v19203_v8 = vcombine.low %v8507_v53, %v8515_v4 }
 0xc19   : > { %17409 = vmatpush1.bf16.msra.mxu1 %v19299_v27  ;;  %17369 = vmatprep.subr.bf16.mxu0 %v19028_v47  ;;  %v8771_v61 = vld [vmem:[%s22413_s18 + $0x16f8] sm:$0xff] }
 0xc1a   : > { %17410 = vmatprep.subr.bf16.mxu1 %v19284_v3  ;;  %v19460_v6 = vcombine.high %v8763_v2, %v8771_v61  ;;  %v8491_v9 = vld [vmem:[%s22413_s18 + $0xe38] sm:$0xff]  ;;  %v19459_v23 = vcombine.low %v8763_v2, %v8771_v61 }
 0xc1b   : > { %v8499_v13 = vld [vmem:[%s22413_s18 + $0xe78] sm:$0xff] }
 0xc1c   : > { %17370 = vmatpush1.bf16.msra.mxu0 %v19027_v54  ;;  %v8747_v37 = vld [vmem:[%s22413_s18 + $0x1638] sm:$0xff]  ;;  %v19188_v63 = vcombine.high %v8491_v9, %v8499_v13  ;;  %v19187_v49 = vcombine.low %v8491_v9, %v8499_v13  ;;  %v9371_v13 = vrot.slane %v24941_v29, %v9338_v38 }
 0xc1d   : > { %17411 = vmatpush1.bf16.msra.mxu1 %v19283_v25  ;;  %17371 = vmatprep.subr.bf16.mxu0 %v19012_v41  ;;  %v8755_v58 = vld [vmem:[%s22413_s18 + $0x1678] sm:$0xff] }
 0xc1e   : > { %17412 = vmatprep.subr.bf16.mxu1 %v19268_v52  ;;  %v19444_v32 = vcombine.high %v8747_v37, %v8755_v58  ;;  %v8475_v27 = vld [vmem:[%s22413_s18 + $0xdb8] sm:$0xff]  ;;  %v19443_v44 = vcombine.low %v8747_v37, %v8755_v58 }
 0xc1f   : > { %v8483_v47 = vld [vmem:[%s22413_s18 + $0xdf8] sm:$0xff] }
 0xc20   : > { %17372 = vmatpush1.bf16.msra.mxu0 %v19011_v30  ;;  %v8731_v3 = vld [vmem:[%s22413_s18 + $0x15b8] sm:$0xff]  ;;  %v19172_v12 = vcombine.high %v8475_v27, %v8483_v47  ;;  %v19171_v20 = vcombine.low %v8475_v27, %v8483_v47 }
 0xc21   : > { %17413 = vmatpush1.bf16.msra.mxu1 %v19267_v7  ;;  %17373 = vmatprep.subr.bf16.mxu0 %v18996_v24  ;;  %v8739_v57 = vld [vmem:[%s22413_s18 + $0x15f8] sm:$0xff] }
 0xc22   : > { %17414 = vmatprep.subr.bf16.mxu1 %v19252_v1  ;;  %v19428_v54 = vcombine.high %v8731_v3, %v8739_v57  ;;  %v8459_v25 = vld [vmem:[%s22413_s18 + $0xd38] sm:$0xff]  ;;  %v19427_v45 = vcombine.low %v8731_v3, %v8739_v57 }
 0xc23   : > { %v8467_v41 = vld [vmem:[%s22413_s18 + $0xd78] sm:$0xff] }
 0xc24   : > { %17374 = vmatpush1.bf16.msra.mxu0 %v18995_v35  ;;  %v8715_v52 = vld [vmem:[%s22413_s18 + $0x1538] sm:$0xff]  ;;  %v19156_v11 = vcombine.high %v8459_v25, %v8467_v41  ;;  %v19155_v19 = vcombine.low %v8459_v25, %v8467_v41 }
 0xc25   : > { %17415 = vmatpush1.bf16.msra.mxu1 %v19251_v22  ;;  %17375 = vmatprep.subr.bf16.mxu0 %v19236_v26  ;;  %v8723_v33 = vld [vmem:[%s22413_s18 + $0x1578] sm:$0xff] }
 0xc26   : > { %17416 = vmatprep.subr.bf16.mxu1 %v19492_v0  ;;  %v19412_v30 = vcombine.high %v8715_v52, %v8723_v33  ;;  %v8443_v7 = vld [vmem:[%s22413_s18 + $0xcb8] sm:$0xff]  ;;  %v19411_v51 = vcombine.low %v8715_v52, %v8723_v33 }
 0xc27   : > { %v8451_v24 = vld [vmem:[%s22413_s18 + $0xcf8] sm:$0xff] }
 0xc28   : > { %17376 = vmatpush2.bf16.msra.mxu0 %v19235_v42  ;;  %v8699_v1 = vld [vmem:[%s22413_s18 + $0x14b8] sm:$0xff]  ;;  %v19140_v34 = vcombine.high %v8443_v7, %v8451_v24  ;;  %v19139_v60 = vcombine.low %v8443_v7, %v8451_v24 }
 0xc29   : > { %17417 = vmatpush2.bf16.msra.mxu1 %v19491_v21  ;;  %17377 = vmatprep.subr.bf16.mxu0 %v19220_v46  ;;  %v8707_v59 = vld [vmem:[%s22413_s18 + $0x14f8] sm:$0xff] }
 0xc2a   : > { %17418 = vmatprep.subr.bf16.mxu1 %v19476_v17  ;;  %v19396_v35 = vcombine.high %v8699_v1, %v8707_v59  ;;  %v8427_v22 = vld [vmem:[%s22413_s18 + $0xc38] sm:$0xff]  ;;  %v19395_v50 = vcombine.low %v8699_v1, %v8707_v59 }
 0xc2b   : > { %v8435_v26 = vld [vmem:[%s22413_s18 + $0xc78] sm:$0xff] }
 0xc2c   : > { %17378 = vmatpush2.bf16.msra.mxu0 %v19219_v5  ;;  %v8683_v0 = vld [vmem:[%s22413_s18 + $0x1438] sm:$0xff]  ;;  %v19124_v56 = vcombine.high %v8427_v22, %v8435_v26  ;;  %v19123_v4 = vcombine.low %v8427_v22, %v8435_v26 }
 0xc2d   : > { %17419 = vmatpush2.bf16.msra.mxu1 %v19475_v62  ;;  %17379 = vmatprep.subr.bf16.mxu0 %v19204_v48  ;;  %v8691_v10 = vld [vmem:[%s22413_s18 + $0x1478] sm:$0xff] }
 0xc2e   : > { %17420 = vmatprep.subr.bf16.mxu1 %v19460_v6  ;;  %v19380_v42 = vcombine.high %v8683_v0, %v8691_v10  ;;  %v8923_v21 = vld [vmem:[%s22413_s18 + $0x1bb8] sm:$0xff]  ;;  %v19379_v2 = vcombine.low %v8683_v0, %v8691_v10 }
 0xc2f   : > { %v8931_v46 = vld [vmem:[%s22413_s18 + $0x1bf8] sm:$0xff] }
 0xc30   : > { %17380 = vmatpush2.bf16.msra.mxu0 %v19203_v8  ;;  %v9179_v17 = vld [vmem:[%s22413_s18 + $0x23b8] sm:$0xff]  ;;  %v19620_v61 = vcombine.high %v8923_v21, %v8931_v46  ;;  %v19619_v37 = vcombine.low %v8923_v21, %v8931_v46 }
 0xc31   : > { %17421 = vmatpush2.bf16.msra.mxu1 %v19459_v23  ;;  %17381 = vmatprep.subr.bf16.mxu0 %v19188_v63  ;;  %v9187_v53 = vld [vmem:[%s22413_s18 + $0x23f8] sm:$0xff]  ;;  %v9375_v23 = vrot.slane %v24941_v29, %v9342_v40 }
 0xc32   : > { %17422 = vmatprep.subr.bf16.mxu1 %v19444_v32  ;;  %v19876_v5 = vcombine.high %v9179_v17, %v9187_v53  ;;  %v8907_v62 = vld [vmem:[%s22413_s18 + $0x1b38] sm:$0xff]  ;;  %v19875_v58 = vcombine.low %v9179_v17, %v9187_v53 }
 0xc33   : > { %v8915_v48 = vld [vmem:[%s22413_s18 + $0x1b78] sm:$0xff] }
 0xc34   : > { %17382 = vmatpush2.bf16.msra.mxu0 %v19187_v49  ;;  %v9163_v6 = vld [vmem:[%s22413_s18 + $0x2338] sm:$0xff]  ;;  %v19604_v8 = vcombine.high %v8907_v62, %v8915_v48 }
 0xc35   : > { %17423 = vmatpush2.bf16.msra.mxu1 %v19443_v44  ;;  %17383 = vmatprep.subr.bf16.mxu0 %v19172_v12  ;;  %v9171_v9 = vld [vmem:[%s22413_s18 + $0x2378] sm:$0xff]  ;;  %v19603_v44 = vcombine.low %v8907_v62, %v8915_v48 }
 0xc36   : > { %17424 = vmatprep.subr.bf16.mxu1 %v19428_v54  ;;  %v19860_v63 = vcombine.high %v9163_v6, %v9171_v9  ;;  %v8891_v32 = vld [vmem:[%s22413_s18 + $0x1ab8] sm:$0xff]  ;;  %v19859_v12 = vcombine.low %v9163_v6, %v9171_v9 }
 0xc37   : > { %v8899_v27 = vld [vmem:[%s22413_s18 + $0x1af8] sm:$0xff] }
 0xc38   : > { %17384 = vmatpush2.bf16.msra.mxu0 %v19171_v20  ;;  %v9147_v3 = vld [vmem:[%s22413_s18 + $0x22b8] sm:$0xff]  ;;  %v19588_v54 = vcombine.high %v8891_v32, %v8899_v27  ;;  %v19587_v24 = vcombine.low %v8891_v32, %v8899_v27 }
 0xc39   : > { %17425 = vmatpush2.bf16.msra.mxu1 %v19427_v45  ;;  %17385 = vmatprep.subr.bf16.mxu0 %v19156_v11  ;;  %v9155_v57 = vld [vmem:[%s22413_s18 + $0x22f8] sm:$0xff] }
 0xc3a   : > { %17426 = vmatprep.subr.bf16.mxu1 %v19412_v30  ;;  %v19844_v52 = vcombine.high %v9147_v3, %v9155_v57  ;;  %v8875_v33 = vld [vmem:[%s22413_s18 + $0x1a38] sm:$0xff]  ;;  %v19843_v59 = vcombine.low %v9147_v3, %v9155_v57 }
 0xc3b   : > { %v8883_v20 = vld [vmem:[%s22413_s18 + $0x1a78] sm:$0xff] }
 0xc3c   : > { %17386 = vmatpush2.bf16.msra.mxu0 %v19155_v19  ;;  %v9131_v45 = vld [vmem:[%s22413_s18 + $0x2238] sm:$0xff]  ;;  %v19572_v19 = vcombine.high %v8875_v33, %v8883_v20  ;;  %v19571_v26 = vcombine.low %v8875_v33, %v8883_v20 }
 0xc3d   : > { %17427 = vmatpush2.bf16.msra.mxu1 %v19411_v51  ;;  %17387 = vmatprep.subr.bf16.mxu0 %v19140_v34  ;;  %v9139_v11 = vld [vmem:[%s22413_s18 + $0x2278] sm:$0xff] }
 0xc3e   : > { %17428 = vmatprep.subr.bf16.mxu1 %v19396_v35  ;;  %v19828_v51 = vcombine.high %v9131_v45, %v9139_v11  ;;  %v8859_v34 = vld [vmem:[%s22413_s18 + $0x19b8] sm:$0xff]  ;;  %v19827_v0 = vcombine.low %v9131_v45, %v9139_v11 }
 0xc3f   : > { %v9115_v35 = vld [vmem:[%s22413_s18 + $0x21b8] sm:$0xff] }
 0xc40   : > { %17388 = vmatpush2.bf16.msra.mxu0 %v19139_v60  ;;  %v9123_v22 = vld [vmem:[%s22413_s18 + $0x21f8] sm:$0xff] }
 0xc41   : > { %17429 = vmatpush2.bf16.msra.mxu1 %v19395_v50  ;;  %17389 = vmatprep.subr.bf16.mxu0 %v19124_v56  ;;  %v19812_v60 = vcombine.high %v9115_v35, %v9123_v22  ;;  %v8843_v50 = vld [vmem:[%s22413_s18 + $0x1938] sm:$0xff]  ;;  %v19811_v17 = vcombine.low %v9115_v35, %v9123_v22 }
 0xc42   : > { %17430 = vmatprep.subr.bf16.mxu1 %v19380_v42  ;;  %v8851_v56 = vld [vmem:[%s22413_s18 + $0x1978] sm:$0xff] }
 0xc43   : > { %v9099_v42 = vld [vmem:[%s22413_s18 + $0x2138] sm:$0xff]  ;;  %v19540_v53 = vcombine.high %v8843_v50, %v8851_v56  ;;  %v19539_v48 = vcombine.low %v8843_v50, %v8851_v56 }
 0xc44   : > { %17390 = vmatpush2.bf16.msra.mxu0 %v19123_v4  ;;  %v9107_v21 = vld [vmem:[%s22413_s18 + $0x2178] sm:$0xff] }
 0xc45   : > { %17431 = vmatpush2.bf16.msra.mxu1 %v19379_v2  ;;  %17441 = vmatprep.subr.bf16.mxu0 %v19620_v61  ;;  %v19796_v4 = vcombine.high %v9099_v42, %v9107_v21  ;;  %v8827_v2 = vld [vmem:[%s22413_s18 + $0x18b8] sm:$0xff]  ;;  %v19795_v6 = vcombine.low %v9099_v42, %v9107_v21 }
 0xc46   : > { %17482 = vmatprep.subr.bf16.mxu1 %v19876_v5  ;;  %v8835_v61 = vld [vmem:[%s22413_s18 + $0x18f8] sm:$0xff] }
 0xc47   : > { %v17147_v47 = vpop.f32.mrf.mxu0  ;;  %17392 = vmatmul.mubr.bf16.vlgmr.msra.gmra.mxu0 %v23616_v14  ;;  %v9083_v5 = vld [vmem:[%s22413_s18 + $0x20b8] sm:$0xff]  ;;  %v19524_v9 = vcombine.high %v8827_v2, %v8835_v61 }
 0xc48   : > { %v17148_v38 = vadd.f32 %v17147_v47, %v9371_v13  ;;  %v17188_v49 = vpop.f32.mrf.mxu1  ;;  %17433 = vmatmul.mubr.bf16.vlgmr.msra.gmra.mxu1 %v23575_v18  ;;  %17442 = vmatpush1.bf16.msra.mxu0 %v19619_v37  ;;  %v9091_v62 = vld [vmem:[%s22413_s18 + $0x20f8] sm:$0xff] }
 0xc49   : > { %17483 = vmatpush1.bf16.msra.mxu1 %v19875_v58  ;;  %v17149_v40 = vpop.f32.mrf.mxu0  ;;  %17443 = vmatprep.subr.bf16.mxu0 %v19604_v8  ;;  %v19780_v13 = vcombine.high %v9083_v5, %v9091_v62  ;;  %v8811_v37 = vld [vmem:[%s22413_s18 + $0x1838] sm:$0xff]  ;;  %v19779_v32 = vcombine.low %v9083_v5, %v9091_v62 }
 0xc4a   : > { %v25049_v25 = vadd.f32 %v17188_v49, %v17148_v38  ;;  %v17150_v14 = vadd.f32 %v17149_v40, %v9375_v23  ;;  %v17190_v41 = vpop.f32.mrf.mxu1  ;;  %17484 = vmatprep.subr.bf16.mxu1 %v19860_v63  ;;  %17473 = vmatprep.mubr.bf16.mxu0 %v23625_v36  ;;  %v8819_v58 = vld [vmem:[%s22413_s18 + $0x1878] sm:$0xff]  ;;  %v19523_v63 = vcombine.low %v8827_v2, %v8835_v61 }
 0xc4b   : > { %v17151_v18 = vpop.f32.mrf.mxu0  ;;  %17514 = vmatprep.mubr.bf16.mxu1 %v23701_v39  ;;  %v8867_v39 = vld [vmem:[%s22413_s18 + $0x19f8] sm:$0xff]  ;;  %v19508_v27 = vcombine.high %v8811_v37, %v8819_v58 }
 0xc4c   : > { %v25057_v30 = vadd.f32 %v17190_v41, %v17150_v14  ;;  %v17192_v7 = vpop.f32.mrf.mxu1  ;;  %17444 = vmatpush1.bf16.msra.mxu0 %v19603_v44  ;;  %v19556_v10 = vcombine.high %v8859_v34, %v8867_v39  ;;  %v19555_v46 = vcombine.low %v8859_v34, %v8867_v39  ;;  %v9067_v8 = vld [vmem:[%s22413_s18 + $0x2038] sm:$0xff]  ;;  %v19507_v44 = vcombine.low %v8811_v37, %v8819_v58 }
 0xc4d   : > { %17485 = vmatpush1.bf16.msra.mxu1 %v19859_v12  ;;  %v17152_v1 = vpop.f32.mrf.mxu0  ;;  %17445 = vmatprep.subr.bf16.mxu0 %v19588_v54  ;;  %v9075_v23 = vld [vmem:[%s22413_s18 + $0x2078] sm:$0xff] }
 0xc4e   : > { %v17193_v36 = vpop.f32.mrf.mxu1  ;;  %17486 = vmatprep.subr.bf16.mxu1 %v19844_v52  ;;  %v19764_v47 = vcombine.high %v9067_v8, %v9075_v23  ;;  %v9051_v3 = vld [vmem:[%s22413_s18 + $0x1fb8] sm:$0xff]  ;;  %v19763_v40 = vcombine.low %v9067_v8, %v9075_v23 }
 0xc4f   : > { %v9059_v57 = vld [vmem:[%s22413_s18 + $0x1ff8] sm:$0xff] }
 0xc50   : > { %17446 = vmatpush1.bf16.msra.mxu0 %v19587_v24  ;;  %v9307_v38 = vld [vmem:[%s22413_s18 + $0x27b8] sm:$0xff]  ;;  %v19748_v12 = vcombine.high %v9051_v3, %v9059_v57  ;;  %v19747_v20 = vcombine.low %v9051_v3, %v9059_v57 }
 0xc51   : > { %17487 = vmatpush1.bf16.msra.mxu1 %v19843_v59  ;;  %17447 = vmatprep.subr.bf16.mxu0 %v19572_v19  ;;  %v9315_v49 = vld [vmem:[%s22413_s18 + $0x27f8] sm:$0xff] }
 0xc52   : > { %17488 = vmatprep.subr.bf16.mxu1 %v19828_v51  ;;  %v20004_v54 = vcombine.high %v9307_v38, %v9315_v49  ;;  %v9035_v14 = vld [vmem:[%s22413_s18 + $0x1f38] sm:$0xff]  ;;  %v20003_v18 = vcombine.low %v9307_v38, %v9315_v49 }
 0xc53   : > { %v9043_v41 = vld [vmem:[%s22413_s18 + $0x1f78] sm:$0xff] }
 0xc54   : > { %17448 = vmatpush1.bf16.msra.mxu0 %v19571_v26  ;;  %v9291_v52 = vld [vmem:[%s22413_s18 + $0x2738] sm:$0xff]  ;;  %v19732_v45 = vcombine.high %v9035_v14, %v9043_v41  ;;  %v19731_v19 = vcombine.low %v9035_v14, %v9043_v41 }
 0xc55   : > { %17489 = vmatpush1.bf16.msra.mxu1 %v19827_v0  ;;  %17449 = vmatprep.subr.bf16.mxu0 %v19556_v10  ;;  %v9299_v33 = vld [vmem:[%s22413_s18 + $0x2778] sm:$0xff] }
 0xc56   : > { %17490 = vmatprep.subr.bf16.mxu1 %v19812_v60  ;;  %v19988_v11 = vcombine.high %v9291_v52, %v9299_v33  ;;  %v9019_v7 = vld [vmem:[%s22413_s18 + $0x1eb8] sm:$0xff]  ;;  %v19987_v36 = vcombine.low %v9291_v52, %v9299_v33 }
 0xc57   : > { %v9027_v24 = vld [vmem:[%s22413_s18 + $0x1ef8] sm:$0xff] }
 0xc58   : > { %17450 = vmatpush1.bf16.msra.mxu0 %v19555_v46  ;;  %v9275_v1 = vld [vmem:[%s22413_s18 + $0x26b8] sm:$0xff]  ;;  %v19716_v51 = vcombine.high %v9019_v7, %v9027_v24  ;;  %v19715_v0 = vcombine.low %v9019_v7, %v9027_v24 }
 0xc59   : > { %17491 = vmatpush1.bf16.msra.mxu1 %v19811_v17  ;;  %17451 = vmatprep.subr.bf16.mxu0 %v19540_v53  ;;  %v9283_v59 = vld [vmem:[%s22413_s18 + $0x26f8] sm:$0xff] }
 0xc5a   : > { %17492 = vmatprep.subr.bf16.mxu1 %v19796_v4  ;;  %v19972_v34 = vcombine.high %v9275_v1, %v9283_v59  ;;  %v9003_v39 = vld [vmem:[%s22413_s18 + $0x1e38] sm:$0xff]  ;;  %v19971_v10 = vcombine.low %v9275_v1, %v9283_v59 }
 0xc5b   : > { %v9011_v35 = vld [vmem:[%s22413_s18 + $0x1e78] sm:$0xff] }
 0xc5c   : > { %17452 = vmatpush1.bf16.msra.mxu0 %v19539_v48  ;;  %v9259_v22 = vld [vmem:[%s22413_s18 + $0x2638] sm:$0xff]  ;;  %v19700_v60 = vcombine.high %v9003_v39, %v9011_v35  ;;  %v19699_v17 = vcombine.low %v9003_v39, %v9011_v35 }
 0xc5d   : > { %17493 = vmatpush1.bf16.msra.mxu1 %v19795_v6  ;;  %17453 = vmatprep.subr.bf16.mxu0 %v19524_v9  ;;  %v9267_v26 = vld [vmem:[%s22413_s18 + $0x2678] sm:$0xff] }
 0xc5e   : > { %17494 = vmatprep.subr.bf16.mxu1 %v19780_v13  ;;  %v19956_v50 = vcombine.high %v9259_v22, %v9267_v26  ;;  %v8987_v56 = vld [vmem:[%s22413_s18 + $0x1db8] sm:$0xff]  ;;  %v19955_v53 = vcombine.low %v9259_v22, %v9267_v26 }
 0xc5f   : > { %v8995_v42 = vld [vmem:[%s22413_s18 + $0x1df8] sm:$0xff] }
 0xc60   : > { %17454 = vmatpush1.bf16.msra.mxu0 %v19523_v63  ;;  %v9243_v21 = vld [vmem:[%s22413_s18 + $0x25b8] sm:$0xff]  ;;  %v19684_v4 = vcombine.high %v8987_v56, %v8995_v42  ;;  %v19683_v6 = vcombine.low %v8987_v56, %v8995_v42 }
 0xc61   : > { %17495 = vmatpush1.bf16.msra.mxu1 %v19779_v32  ;;  %17455 = vmatprep.subr.bf16.mxu0 %v19508_v27  ;;  %v9251_v46 = vld [vmem:[%s22413_s18 + $0x25f8] sm:$0xff] }
 0xc62   : > { %17496 = vmatprep.subr.bf16.mxu1 %v19764_v47  ;;  %v19940_v2 = vcombine.high %v9243_v21, %v9251_v46  ;;  %v8971_v61 = vld [vmem:[%s22413_s18 + $0x1d38] sm:$0xff]  ;;  %v19939_v9 = vcombine.low %v9243_v21, %v9251_v46 }
 0xc63   : > { %v8979_v5 = vld [vmem:[%s22413_s18 + $0x1d78] sm:$0xff] }
 0xc64   : > { %17456 = vmatpush1.bf16.msra.mxu0 %v19507_v44  ;;  %v9227_v62 = vld [vmem:[%s22413_s18 + $0x2538] sm:$0xff]  ;;  %v19668_v13 = vcombine.high %v8971_v61, %v8979_v5  ;;  %v19667_v32 = vcombine.low %v8971_v61, %v8979_v5 }
 0xc65   : > { %17497 = vmatpush1.bf16.msra.mxu1 %v19763_v40  ;;  %17457 = vmatprep.subr.bf16.mxu0 %v19748_v12  ;;  %v9235_v48 = vld [vmem:[%s22413_s18 + $0x2578] sm:$0xff] }
 0xc66   : > { %17498 = vmatprep.subr.bf16.mxu1 %v20004_v54  ;;  %v19924_v37 = vcombine.high %v9227_v62, %v9235_v48  ;;  %v8955_v58 = vld [vmem:[%s22413_s18 + $0x1cb8] sm:$0xff]  ;;  %v19923_v27 = vcombine.low %v9227_v62, %v9235_v48 }
 0xc67   : > { %v8963_v8 = vld [vmem:[%s22413_s18 + $0x1cf8] sm:$0xff] }
 0xc68   : > { %17458 = vmatpush2.bf16.msra.mxu0 %v19747_v20  ;;  %v9211_v23 = vld [vmem:[%s22413_s18 + $0x24b8] sm:$0xff]  ;;  %v19652_v47 = vcombine.high %v8955_v58, %v8963_v8  ;;  %v19651_v40 = vcombine.low %v8955_v58, %v8963_v8 }
 0xc69   : > { %17499 = vmatpush2.bf16.msra.mxu1 %v20003_v18  ;;  %17459 = vmatprep.subr.bf16.mxu0 %v19732_v45  ;;  %v9219_v63 = vld [vmem:[%s22413_s18 + $0x24f8] sm:$0xff] }
 0xc6a   : > { %17500 = vmatprep.subr.bf16.mxu1 %v19988_v11  ;;  %v19908_v3 = vcombine.high %v9211_v23, %v9219_v63  ;;  %v8939_v57 = vld [vmem:[%s22413_s18 + $0x1c38] sm:$0xff]  ;;  %v19907_v12 = vcombine.low %v9211_v23, %v9219_v63 }
 0xc6b   : > { %v8947_v38 = vld [vmem:[%s22413_s18 + $0x1c78] sm:$0xff] }
 0xc6c   : > { %17460 = vmatpush2.bf16.msra.mxu0 %v19731_v19  ;;  %v9195_v49 = vld [vmem:[%s22413_s18 + $0x2438] sm:$0xff]  ;;  %v19636_v54 = vcombine.high %v8939_v57, %v8947_v38  ;;  %v19635_v41 = vcombine.low %v8939_v57, %v8947_v38 }
 0xc6d   : > { %17501 = vmatpush2.bf16.msra.mxu1 %v19987_v36  ;;  %17461 = vmatprep.subr.bf16.mxu0 %v19716_v51  ;;  %v9203_v44 = vld [vmem:[%s22413_s18 + $0x2478] sm:$0xff] }
 0xc6e   : > { %17502 = vmatprep.subr.bf16.mxu1 %v19972_v34  ;;  %v19892_v14 = vcombine.high %v9195_v49, %v9203_v44  ;;  %v19891_v52 = vcombine.low %v9195_v49, %v9203_v44 }
 0xc70   : > { %17462 = vmatpush2.bf16.msra.mxu0 %v19715_v0 }
 0xc71   : > { %17503 = vmatpush2.bf16.msra.mxu1 %v19971_v10  ;;  %17463 = vmatprep.subr.bf16.mxu0 %v19700_v60 }
 0xc72   : > { %17504 = vmatprep.subr.bf16.mxu1 %v19956_v50 }
 0xc74   : > { %17464 = vmatpush2.bf16.msra.mxu0 %v19699_v17 }
 0xc75   : > { %17505 = vmatpush2.bf16.msra.mxu1 %v19955_v53  ;;  %17465 = vmatprep.subr.bf16.mxu0 %v19684_v4  ;;  %v9379_v4 = vrot.slane %v24941_v29, %v9346_v43 }
 0xc76   : > { %17506 = vmatprep.subr.bf16.mxu1 %v19940_v2  ;;  %v9383_v2 = vrot.slane %v24941_v29, %v9350_v55 }
 0xc78   : > { %17466 = vmatpush2.bf16.msra.mxu0 %v19683_v6 }
 0xc79   : > { %17507 = vmatpush2.bf16.msra.mxu1 %v19939_v9  ;;  %17467 = vmatprep.subr.bf16.mxu0 %v19668_v13 }
 0xc7a   : > { %17508 = vmatprep.subr.bf16.mxu1 %v19924_v37 }
 0xc7c   : > { %17468 = vmatpush2.bf16.msra.mxu0 %v19667_v32 }
 0xc7d   : > { %17509 = vmatpush2.bf16.msra.mxu1 %v19923_v27  ;;  %17469 = vmatprep.subr.bf16.mxu0 %v19652_v47 }
 0xc7e   : > { %17510 = vmatprep.subr.bf16.mxu1 %v19908_v3 }
 0xc80   : > { %17470 = vmatpush2.bf16.msra.mxu0 %v19651_v40 }
 0xc81   : > { %17511 = vmatpush2.bf16.msra.mxu1 %v19907_v12  ;;  %17471 = vmatprep.subr.bf16.mxu0 %v19636_v54 }
 0xc82   : > { %17512 = vmatprep.subr.bf16.mxu1 %v19892_v14 }
 0xc84   : > { %17472 = vmatpush2.bf16.msra.mxu0 %v19635_v41 }
 0xc85   : > { %17513 = vmatpush2.bf16.msra.mxu1 %v19891_v52 }
 0xc87   : > { %v17229_v33 = vpop.f32.mrf.mxu0  ;;  %17474 = vmatmul.mubr.bf16.vlgmr.msra.gmra.mxu0 %v23696_v15 }
 0xc88   : > { %v17230_v20 = vadd.f32 %v17229_v33, %v25049_v25  ;;  %v17270_v18 = vpop.f32.mrf.mxu1  ;;  %17515 = vmatmul.mubr.bf16.vlgmr.msra.gmra.mxu1 %v23769_v28 }
 0xc89   : > { %v17231_v45 = vpop.f32.mrf.mxu0 }
 0xc8a   : > { %v17271_v11 = vadd.f32 %v17270_v18, %v17230_v20  ;;  %v17232_v7 = vadd.f32 %v17231_v45, %v25057_v30  ;;  %v17272_v24 = vpop.f32.mrf.mxu1 }
 0xc8b   : > { %v17233_v1 = vpop.f32.mrf.mxu0 }
 0xc8c   : > { %v17273_v59 = vadd.f32 %v17272_v24, %v17232_v7  ;;  %v17274_v19 = vpop.f32.mrf.mxu1 }
 0xc8d   : > { %v17234_v36 = vpop.f32.mrf.mxu0 }
 0xc8e   : > { %v17275_v51 = vpop.f32.mrf.mxu1 }
 0xcc7   : > { %v17311_v34 = vpop.f32.mrf.mxu0 }
 0xcc8   : > { %v17312_v39 = vadd.f32 %v17311_v34, %v17271_v11  ;;  %v17352_v35 = vpop.f32.mrf.mxu1 }
 0xcc9   : > { %v17313_v22 = vpop.f32.mrf.mxu0  ;;  %v17353_v61 = vadd.f32 %v17352_v35, %v9379_v4 }
 0xcca   : > { %v17314_v15 = vadd.f32 %v17313_v22, %v17273_v59  ;;  %v17354_v26 = vpop.f32.mrf.mxu1 }
 0xccb   : > { %v17315_v25 = vpop.f32.mrf.mxu0  ;;  %v17355_v5 = vadd.f32 %v17354_v26, %v9383_v2 }
 0xccc   : > { %v17590_v0 = vcombine.low %v17312_v39, %v17314_v15  ;;  %v17356_v10 = vpop.f32.mrf.mxu1 }
 0xccd   : > { %v17316_v28 = vpop.f32.mrf.mxu0 }
 0xcce   : > { %v17357_v60 = vpop.f32.mrf.mxu1  ;;  %v17598_v29 = vrot.slane %v17590_v0, %v24180_v31 }
 0xd07   : > { %v17393_v50 = vpop.f32.mrf.mxu0 }
 0xd08   : > { %v17434_v56 = vpop.f32.mrf.mxu1  ;;  %v17394_v62 = vadd.f32 %v17393_v50, %v17353_v61 }
 0xd09   : > { %v17395_v30 = vpop.f32.mrf.mxu0 }
 0xd0a   : > { %v17436_v42 = vpop.f32.mrf.mxu1  ;;  %v17396_v48 = vadd.f32 %v17395_v30, %v17355_v5  ;;  %v17435_v6 = vadd.f32 %v17434_v56, %v17394_v62 }
 0xd0b   : > { %v17397_v21 = vpop.f32.mrf.mxu0 }
 0xd0c   : > { %v17438_v46 = vpop.f32.mrf.mxu1  ;;  %v17437_v13 = vadd.f32 %v17436_v42, %v17396_v48 }
 0xd0d   : > { %v17398_v17 = vpop.f32.mrf.mxu0 }
 0xd0e   : > { %v17439_v53 = vpop.f32.mrf.mxu1 }
 0xd47   : > { %v17475_v9 = vpop.f32.mrf.mxu0 }
 0xd48   : > { %v17476_v37 = vadd.f32 %v17475_v9, %v17435_v6  ;;  %v17516_v58 = vpop.f32.mrf.mxu1 }
 0xd49   : > { %v17477_v8 = vpop.f32.mrf.mxu0 }
 0xd4a   : > { %v17478_v23 = vadd.f32 %v17477_v8, %v17437_v13  ;;  %v17518_v63 = vpop.f32.mrf.mxu1  ;;  %v17517_v27 = vadd.f32 %v17516_v58, %v17476_v37 }
 0xd4b   : > { %v17479_v32 = vpop.f32.mrf.mxu0 }
 0xd4c   : > { %v17519_v43 = vadd.f32 %v17518_v63, %v17478_v23  ;;  %v17520_v47 = vpop.f32.mrf.mxu1 }
 0xd4d   : > { %v17480_v16 = vpop.f32.mrf.mxu0 }
 0xd4e   : > { %v17591_v3 = vcombine.low %v17517_v27, %v17519_v43  ;;  %v17521_v55 = vpop.f32.mrf.mxu1 }
 0xd50   : > { %v17605_v57 = vrot.slane %v17591_v3, %v24180_v31 }
 0xd52   : > { %v17606_v38 = vcombine.low %v17598_v29, %v17605_v57 }
 0xd54   : > { %17614 = vst [vmem:[%s22423_s5 + $0x18] sm:$0xff] %v17606_v38 }
 0xd55 PF: > { %s25270_s18 = sld [smem:[#allocation27_spill]]  ;;  %s25276_s30 = smov %s21890_s10 }
 0xd56   : > { %s25271_s21 = sld [smem:[#allocation31_spill]]  ;;  %s25277_s10 = smov %s21894_s11 }
 0xd57   : > { %s25272_s12 = sld [smem:[#allocation24_spill]]  ;;  %s25279_s13 = smov %s21906_s14 }
 0xd58   : > { %s25273_s15 = sld [smem:[#allocation30_spill]]  ;;  %s25282_s16 = smov %s21918_s17 }
 0xd59   : > { %s25274_s2 = sld [smem:[#allocation25_spill]] }
 0xd5a   : > { %s25275_s23 = sld [smem:[#allocation29_spill]] }
 0xd5b   : > { %p27_p3 = scmp.ge.s32.totalorder %s25270_s18, 8  }
 0xd5c   : > { %s25278_s11 = smov %s25271_s21 }
 0xd5d   :  { %29 = sbr.rel (!%p27_p3) target bundleno = 22 (0x16), region = 200 }
 0xd5e   : > { %s25280_s14 = smov %s25273_s15 }
 0xd5f   : > { %s25281_s15 = smov %s25274_s2 }
 0xd60   : > { %s25283_s17 = smov %s25275_s23 }
 0xd62   :  { %17646 = vsyncpa [#allocation6], 1 }
 0xd63   :  { %17648 = vsyncpa [#allocation6 + $0x1], 1 }
 0xd64   :  { %17649 = vsyncpa [#allocation8], 1 }
 0xd65   :  { %17650 = vsyncpa [#allocation11], 1 }
 0xd66   :  { %17652 = vsyncpa [#allocation11 + $0x1], 1 }
 0xd67   :  { %17653 = vsyncpa [#allocation14], 1 }
 0xd68   :  { %17655 = vsyncpa [#allocation14 + $0x1], 1 }
 0xd69   :  { %17656 = vsyncpa [#allocation17], 1 }
 0xd6a   :  { %17658 = vsyncpa [#allocation17 + $0x1], 1 }

</bundles_post_ra>
